<compile_context>
chip_gen: v7x
topology: tpu7x:2x2x1
jax: 0.10.0
libtpu: 0.0.40
codegen_flags: <defaults>
</compile_context>

<pallas_src>
import functools
import math

import jax
import jax.numpy as jnp
from jax import lax
from jax.experimental import pallas as pl
from jax.experimental.pallas import tpu as pltpu

F32 = jnp.float32
BF16 = jnp.bfloat16


# ---------------------------------------------------------------------------
# In-kernel helpers (VMEM-resident values only)
# ---------------------------------------------------------------------------
def _sigmoid(x):
    # EUP exp + EUP approx reciprocal: keeps the serial LSTM chain off the VALU divide.
    return pl.reciprocal(1.0 + jnp.exp(-x), approx=True)


def _layer_norm(x, gamma, beta, eps=1e-5):
    mu = jnp.mean(x, axis=-1, keepdims=True)
    xc = x - mu
    var = jnp.mean(xc * xc, axis=-1, keepdims=True)
    return xc * lax.rsqrt(var + eps) * gamma + beta


def _bdot(a_f32, w_bf16):
    """bf16 x bf16 matmul with f32 accumulation (MXU-friendly)."""
    return jnp.dot(a_f32.astype(BF16), w_bf16, preferred_element_type=F32)


def _head_group_mats(H, nhead, head_dim):
    """G (H, nhead): per-head score reduction; G^T (nhead, H): per-head prob broadcast."""
    r = lax.broadcasted_iota(jnp.int32, (H, nhead), 0)
    c = lax.broadcasted_iota(jnp.int32, (H, nhead), 1) * head_dim
    g = jnp.where(jnp.logical_and(r >= c, r < c + head_dim), 1.0, 0.0).astype(F32)
    rt = lax.broadcasted_iota(jnp.int32, (nhead, H), 1)
    ct = lax.broadcasted_iota(jnp.int32, (nhead, H), 0) * head_dim
    gt = jnp.where(jnp.logical_and(rt >= ct, rt < ct + head_dim), 1.0, 0.0).astype(F32)
    return g, gt


def _mha_quirky(q_in, kv_in, wqkv, b_all, wo, *, B, N, H, g_mat, gt_mat, scale, self_attn):
    """nn.MultiheadAttention with batch_first=False fed (B, N, E) tensors.

    q_in / kv_in are batch-major stacked (B*N, H).  The attention "sequence" axis is the
    batch index (PyTorch quirk), so the softmax runs over the B-element list.  Projections
    are batch-stacked and use the packed (H, 3H) qkv weight; per-head reductions use the
    head-grouping matrices (no transposes / head-dim-8 layouts).
    """
    bqkv = b_all[:, 0:3 * H]
    bo = b_all[:, 3 * H:4 * H]
    if self_attn:
        qkv = _bdot(q_in, wqkv) + bqkv                               # (B*N, 3H)
        q_all = qkv[:, 0:H] * scale
        k_all = qkv[:, H:2 * H]
        v_all = qkv[:, 2 * H:3 * H]
    else:
        q_all = (_bdot(q_in, wqkv[:, 0:H]) + bqkv[:, 0:H]) * scale   # (B*N, H)
        kv = _bdot(kv_in, wqkv[:, H:3 * H]) + bqkv[:, H:3 * H]       # (B*N, 2H)
        k_all = kv[:, 0:H]
        v_all = kv[:, H:2 * H]

    q = [q_all[i * N:(i + 1) * N, :] for i in range(B)]
    k = [k_all[j * N:(j + 1) * N, :] for j in range(B)]
    v = [v_all[j * N:(j + 1) * N, :] for j in range(B)]

    outs = []
    for i in range(B):
        s = [jnp.dot(q[i] * k[j], g_mat, preferred_element_type=F32) for j in range(B)]
        m = s[0]
        for j in range(1, B):
            m = jnp.maximum(m, s[j])
        e = [jnp.exp(s[j] - m) for j in range(B)]
        den = e[0]
        for j in range(1, B):
            den = den + e[j]
        inv = pl.reciprocal(den, approx=True)
        acc = None
        for j in range(B):
            pb = jnp.dot(e[j] * inv, gt_mat, preferred_element_type=F32)  # (N, H) per-head prob
            term = pb * v[j]
            acc = term if acc is None else acc + term
        outs.append(acc)
    attn = jnp.concatenate(outs, axis=0)                             # (B*N, H)
    return _bdot(attn, wo) + bo


# ---------------------------------------------------------------------------
# Fused forward-pass kernel
# ---------------------------------------------------------------------------
def _decoder_lstm_fused_kernel(
        x3_ref, x1_ref, state0_ref, bn_ref, lstm_w_ref,
        attn_wqkv_ref, attn_wo_ref, attn_b_ref,
        enc_w1_ref, enc_b1_ref, enc_w2_ref, enc_vecs_ref,
        mlp_wa_ref, mlp_wb_ref, mlp_b512_ref, tail_ref,
        out_ref,
        *, B, T, S3, H, dim_in, nhead, n_enc):
    head_dim = H // nhead
    scale = 1.0 / math.sqrt(head_dim)
    g_mat, gt_mat = _head_group_mats(H, nhead, head_dim)

    # ---- unpack small slabs ------------------------------------------------------------------
    tail = tail_ref[...]
    fc2_b = tail[0:1, :]
    l20_b = tail[1:2, :]
    w30_row = tail[2:3, :]
    w01_row = tail[3:4, :]
    b30 = tail[4:5, 0:1]
    b01 = tail[4:5, 1:2]

    bn_s = bn_ref[0:B * T, :]            # (B*T, H) pre-broadcast BatchNorm1d(eval) scale
    bn_b = bn_ref[B * T:2 * B * T, :]    # (B*T, H) pre-broadcast shift

    def bn(v):                           # batch-major rows: row b*T+t uses channel t
        return v * bn_s + bn_b

    mha = functools.partial(_mha_quirky, B=B, H=H, g_mat=g_mat, gt_mat=gt_mat, scale=scale)

    fc1_w = mlp_wa_ref[0:dim_in, :]              # (dim_in, 512) bf16
    l10_w = mlp_wa_ref[dim_in:dim_in + H, :]     # (H, 512) bf16
    fc2_w = mlp_wb_ref[:, 0:H]                   # (512, H) bf16
    l20_w = mlp_wb_ref[:, H:2 * H]               # (512, H) bf16
    fc1_b = mlp_b512_ref[0:1, :]
    l10_b = mlp_b512_ref[1:2, :]

    # ---- src = fc_embed2(relu(fc_embed1(x3[:, :, :dim_in]))), batch-stacked ------------------
    h1 = jnp.maximum(_bdot(x3_ref[...], fc1_w) + fc1_b, 0.0)        # (B*S3, 512)
    xe = _bdot(h1, fc2_w) + fc2_b                                   # (B*S3, H) f32

    # ---- transformer encoder: 3 post-norm layers, relu, eval ---------------------------------
    for l in range(n_enc):
        sa = mha(xe, xe, attn_wqkv_ref[l], attn_b_ref[l], attn_wo_ref[l],
                 N=S3, self_attn=True)
        ev = enc_vecs_ref[l]                                        # (5, H): b2, ln1g, ln1b, ln2g, ln2b
        b2 = ev[0:1, :]
        ln1g = ev[1:2, :]
        ln1b = ev[2:3, :]
        ln2g = ev[3:4, :]
        ln2b = ev[4:5, :]
        xe = _layer_norm(xe + sa, ln1g, ln1b)
        hf = jnp.maximum(_bdot(xe, enc_w1_ref[l]) + enc_b1_ref[l], 0.0)   # (B*S3, dff)
        ff = _bdot(hf, enc_w2_ref[l]) + b2
        xe = _layer_norm(xe + ff, ln2g, ln2b)

    # memory = last output_len positions per batch element, batch-major stacked (B*T, H)
    memory = jnp.concatenate(
        [xe[b * S3 + (S3 - T):(b + 1) * S3, :] for b in range(B)], axis=0)

    # ---- single-layer LSTM over x1: one fused (B,H)@(H,4H) matmul per step -------------------
    wih = lstm_w_ref[0:2, :]                                        # (2, 4H)  f32
    whh = lstm_w_ref[2:2 + H, :]                                    # (H, 4H)  f32
    b4 = lstm_w_ref[2 + H:3 + H, :]                                 # (1, 4H)  f32
    gx = jnp.dot(x1_ref[...], wih, preferred_element_type=F32) + b4  # (T*B, 4H), time-major
    h = state0_ref[0:B, :]                                          # (B, H)
    c = state0_ref[B:2 * B, :]
    hs = []
    for t in range(T):
        gates = gx[t * B:(t + 1) * B, :] + jnp.dot(h, whh, preferred_element_type=F32)  # (B, 4H)
        i_t = _sigmoid(gates[:, 0:H])
        f_t = _sigmoid(gates[:, H:2 * H])
        g_t = jnp.tanh(gates[:, 2 * H:3 * H])
        o_t = _sigmoid(gates[:, 3 * H:4 * H])
        c = f_t * c + i_t * g_t
        h = o_t * jnp.tanh(c)
        hs.append(h)
    # batch-major (B*T, H) LSTM output slab (row b*T + t)
    lstm_bt = jnp.concatenate(
        [hs[t][b:b + 1, :] for b in range(B) for t in range(T)], axis=0)

    # ---- decoder attention / BN / MLP tail ----------------------------------------------------
    ww00 = mha(lstm_bt, memory, attn_wqkv_ref[n_enc], attn_b_ref[n_enc],
               attn_wo_ref[n_enc], N=T, self_attn=False)
    ww0 = bn(lstm_bt + ww00)
    sa = mha(ww0, ww0, attn_wqkv_ref[n_enc + 1], attn_b_ref[n_enc + 1],
             attn_wo_ref[n_enc + 1], N=T, self_attn=True)
    ww00 = bn(ww0 + sa)

    hm = jnp.maximum(_bdot(ww00, l10_w) + l10_b, 0.0)               # (B*T, 512)
    ww0p = _bdot(hm, l20_w) + l20_b                                 # (B*T, H)
    zb = bn(ww0p + ww00)

    out01 = jnp.sum(zb * w30_row, axis=-1, keepdims=True) + b30     # (B*T, 1) = L30(bn(...))
    out02 = jnp.sum(lstm_bt * w01_row, axis=-1, keepdims=True) + b01  # (B*T, 1) = L01(lstm out)
    out_ref[:, 0:1] = out01 + out02                                 # module returns out01 + out02
    out_ref[:, 1:2] = out02


# ---------------------------------------------------------------------------
# Host-side wrapper: packs the 16 input slabs and makes one pallas_call
# ---------------------------------------------------------------------------
def decoder_lstm_forward(params, x1, x3, encoder_h, encoder_c, *, dim_in, output_len, nhead=4):
    B, T, _ = x1.shape
    assert T == output_len, "model requires x1 time length == output_len"
    H = params["fc2_w"].shape[1]
    assert H % nhead == 0
    n_enc = params["enc_wq"].shape[0]
    S3 = x3.shape[1]

    # ---- data slabs ----
    x3_flat = x3[:, :, :dim_in].astype(F32).reshape(B * S3, dim_in)
    x1_tm = jnp.transpose(x1.astype(F32), (1, 0, 2)).reshape(T * B, 2)          # time-major
    state0 = jnp.concatenate([encoder_h[0][0], encoder_c[0][0]], axis=0).astype(F32)  # (2B, H)

    # ---- BatchNorm (eval, folded) pre-broadcast to batch-major (B*T, H) ----
    bn_s = jnp.broadcast_to(params["bn_scale"][:, None], (T, H))
    bn_b = jnp.broadcast_to(params["bn_shift"][:, None], (T, H))
    bn_tb = jnp.concatenate([jnp.tile(bn_s, (B, 1)), jnp.tile(bn_b, (B, 1))], axis=0).astype(F32)

    # ---- LSTM slab: [wih (2,4H); whh (H,4H); bias (1,4H)], gate order i,f,g,o ----
    lstm_w = jnp.concatenate(
        [params["lstm_wih"], params["lstm_whh"], params["lstm_b"].reshape(1, 4 * H)],
        axis=0).astype(F32)

    # ---- attention stacks: 3 encoder layers + decoder attn0 + decoder attn3 ----
    wq = jnp.concatenate([params["enc_wq"], params["dec_wq"]], axis=0)
    wk = jnp.concatenate([params["enc_wk"], params["dec_wk"]], axis=0)
    wv = jnp.concatenate([params["enc_wv"], params["dec_wv"]], axis=0)
    wo = jnp.concatenate([params["enc_wo"], params["dec_wo"]], axis=0)
    bq = jnp.concatenate([params["enc_bq"], params["dec_bq"]], axis=0)
    bk = jnp.concatenate([params["enc_bk"], params["dec_bk"]], axis=0)
    bv = jnp.concatenate([params["enc_bv"], params["dec_bv"]], axis=0)
    bo = jnp.concatenate([params["enc_bo"], params["dec_bo"]], axis=0)
    attn_wqkv = jnp.concatenate([wq, wk, wv], axis=2).astype(BF16)               # (5, H, 3H)
    attn_wo = wo.astype(BF16)                                                    # (5, H, H)
    attn_b = jnp.concatenate([bq, bk, bv, bo], axis=1)[:, None, :].astype(F32)   # (5, 1, 4H)

    # ---- encoder FF + LayerNorm slabs ----
    enc_w1 = params["enc_w1"].astype(BF16)                                       # (3, H, dff)
    enc_b1 = params["enc_b1"][:, None, :].astype(F32)                            # (3, 1, dff)
    enc_w2 = params["enc_w2"].astype(BF16)                                       # (3, dff, H)
    enc_vecs = jnp.stack([params["enc_b2"], params["enc_ln1g"], params["enc_ln1b"],
                          params["enc_ln2g"], params["enc_ln2b"]], axis=1).astype(F32)  # (3, 5, H)

    # ---- embedding / output MLP slabs ----
    mlp_wa = jnp.concatenate([params["fc1_w"], params["L10_w"]], axis=0).astype(BF16)   # (dim_in+H, 512)
    mlp_wb = jnp.concatenate([params["fc2_w"], params["L20_w"]], axis=1).astype(BF16)   # (512, 2H)
    mlp_b512 = jnp.stack([params["fc1_b"], params["L10_b"]], axis=0).astype(F32)        # (2, 512)
    last = jnp.zeros((H,), F32).at[0].set(params["L30_b"][0]).at[1].set(params["L01_b"][0])
    tail = jnp.stack([params["fc2_b"], params["L20_b"], params["L30_w"][:, 0],
                      params["L01_w"][:, 0], last], axis=0).astype(F32)                 # (5, H)

    out = pl.pallas_call(
        functools.partial(_decoder_lstm_fused_kernel, B=B, T=T, S3=S3, H=H,
                          dim_in=dim_in, nhead=nhead, n_enc=n_enc),
        out_shape=jax.ShapeDtypeStruct((B * T, 2), F32),
        compiler_params=pltpu.CompilerParams(vmem_limit_bytes=32 * 1024 * 1024),
    )(x3_flat, x1_tm, state0, bn_tb, lstm_w,
      attn_wqkv, attn_wo, attn_b,
      enc_w1, enc_b1, enc_w2, enc_vecs,
      mlp_wa, mlp_wb, mlp_b512, tail)

    out = out.reshape(B, T, 2)
    # torch.squeeze() would also drop B==1; keep the batch dim explicit.
    return out[..., 0], out[..., 1]


# ---------------------------------------------------------------------------
# Deterministic parameter initialization (shapes from DecoderLSTM.__init__)
# ---------------------------------------------------------------------------
def _dense(key, fan_in, fan_out):
    kw, kb = jax.random.split(key)
    w = jax.random.normal(kw, (fan_in, fan_out), F32) * (1.0 / math.sqrt(fan_in))
    b = jax.random.normal(kb, (fan_out,), F32) * 0.01
    return w, b


def _mha_stack(key, n, h):
    ks = jax.random.split(key, n)
    acc = {name: [] for name in ("wq", "bq", "wk", "bk", "wv", "bv", "wo", "bo")}
    for i in range(n):
        k4 = jax.random.split(ks[i], 4)
        for kk, (wn, bn_) in zip(k4, (("wq", "bq"), ("wk", "bk"), ("wv", "bv"), ("wo", "bo"))):
            w, b = _dense(kk, h, h)
            acc[wn].append(w)
            acc[bn_].append(b)
    return {k: jnp.stack(v, axis=0) for k, v in acc.items()}


def init_params(key, *, hidden, dim_in, output_len, nhead=4, n_enc=3, dff=2048):
    H = hidden
    keys = jax.random.split(key, 24)
    p = {}
    p["fc1_w"], p["fc1_b"] = _dense(keys[0], dim_in, 512)
    p["fc2_w"], p["fc2_b"] = _dense(keys[1], 512, H)

    enc_attn = _mha_stack(keys[2], n_enc, H)
    for k in enc_attn:
        p["enc_" + k] = enc_attn[k]

    w1s, b1s, w2s, b2s, g1s, be1s, g2s, be2s = [], [], [], [], [], [], [], []
    for i in range(n_enc):
        k5 = jax.random.split(keys[3 + i], 4)
        a, b = _dense(k5[0], H, dff); w1s.append(a); b1s.append(b)
        a, b = _dense(k5[1], dff, H); w2s.append(a); b2s.append(b)
        g1s.append(1.0 + 0.01 * jax.random.normal(k5[2], (H,), F32))
        be1s.append(0.01 * jax.random.normal(k5[2], (H,), F32))
        g2s.append(1.0 + 0.01 * jax.random.normal(k5[3], (H,), F32))
        be2s.append(0.01 * jax.random.normal(k5[3], (H,), F32))
    p["enc_w1"] = jnp.stack(w1s); p["enc_b1"] = jnp.stack(b1s)
    p["enc_w2"] = jnp.stack(w2s); p["enc_b2"] = jnp.stack(b2s)
    p["enc_ln1g"] = jnp.stack(g1s); p["enc_ln1b"] = jnp.stack(be1s)
    p["enc_ln2g"] = jnp.stack(g2s); p["enc_ln2b"] = jnp.stack(be2s)

    dec_attn = _mha_stack(keys[6], 2, H)                  # [0] = attn0, [1] = attn3
    for k in dec_attn:
        p["dec_" + k] = dec_attn[k]

    p["L10_w"], p["L10_b"] = _dense(keys[7], H, 512)
    p["L20_w"], p["L20_b"] = _dense(keys[8], 512, H)
    p["L30_w"], p["L30_b"] = _dense(keys[9], H, 1)
    p["L01_w"], p["L01_b"] = _dense(keys[10], H, 1)

    # nn.LSTM(2, H, 1): concatenated-gate weights stored pre-transposed for x @ W,
    # gate order (i, f, g, o); b_ih + b_hh folded.
    p["lstm_wih"] = jax.random.normal(keys[11], (2, 4 * H), F32) / math.sqrt(H)
    p["lstm_whh"] = jax.random.normal(keys[12], (H, 4 * H), F32) / math.sqrt(H)
    p["lstm_b"] = jax.random.normal(keys[13], (4 * H,), F32) * 0.01

    # nn.BatchNorm1d(output_len), eval mode: fold running stats into scale/shift.
    gamma = 1.0 + 0.01 * jax.random.normal(keys[14], (output_len,), F32)
    beta = 0.01 * jax.random.normal(keys[15], (output_len,), F32)
    rmean = jnp.zeros((output_len,), F32)
    rvar = jnp.ones((output_len,), F32)
    scale = gamma / jnp.sqrt(rvar + 1e-5)
    p["bn_scale"] = scale
    p["bn_shift"] = beta - rmean * scale
    return p


if __name__ == "__main__":
    # Small config: hidden_dim=32, layer=1, output_len=8, r_shift=2 -> dim_in=4
    B, T, S3 = 2, 8, 12
    H = 32
    dim_in = 4
    output_len = 8
    layer = 1

    key = jax.random.PRNGKey(0)
    kp, k1, k2, k3, k4 = jax.random.split(key, 5)
    params = init_params(kp, hidden=H, dim_in=dim_in, output_len=output_len)

    x1 = jax.random.normal(k1, (B, T, 2), F32)
    x3 = jax.random.normal(k2, (B, S3, dim_in), F32)
    encoder_h = jax.random.normal(k3, (1, layer, B, H), F32)
    encoder_c = jax.random.normal(k4, (1, layer, B, H), F32)

    fwd = jax.jit(functools.partial(decoder_lstm_forward, dim_in=dim_in,
                                    output_len=output_len, nhead=4))
    out01, out02 = fwd(params, x1, x3, encoder_h, encoder_c)
    jax.block_until_ready((out01, out02))
    assert out01.shape == (B, T) and out02.shape == (B, T)
    print("KERNEL_OK")
</pallas_src>

<mosaic_0001>
module attributes {stable_mosaic.version = 11 : i64} {
  func.func @_decoder_lstm_fused_kernel(%arg0: memref<24x4xf32, #tpu.memory_space<vmem>>, %arg1: memref<16x2xf32, #tpu.memory_space<vmem>>, %arg2: memref<4x32xf32, #tpu.memory_space<vmem>>, %arg3: memref<32x32xf32, #tpu.memory_space<vmem>>, %arg4: memref<35x128xf32, #tpu.memory_space<vmem>>, %arg5: memref<5x32x96xbf16, #tpu.memory_space<vmem>>, %arg6: memref<5x32x32xbf16, #tpu.memory_space<vmem>>, %arg7: memref<5x1x128xf32, #tpu.memory_space<vmem>>, %arg8: memref<3x32x2048xbf16, #tpu.memory_space<vmem>>, %arg9: memref<3x1x2048xf32, #tpu.memory_space<vmem>>, %arg10: memref<3x2048x32xbf16, #tpu.memory_space<vmem>>, %arg11: memref<3x5x32xf32, #tpu.memory_space<vmem>>, %arg12: memref<36x512xbf16, #tpu.memory_space<vmem>>, %arg13: memref<512x64xbf16, #tpu.memory_space<vmem>>, %arg14: memref<2x512xf32, #tpu.memory_space<vmem>>, %arg15: memref<5x32xf32, #tpu.memory_space<vmem>>, %arg16: memref<16x2xf32, #tpu.memory_space<vmem>>) attributes {dimension_semantics = [], scalar_prefetch = 0 : i64, scratch_operands = 0 : i64, tpu.core_type = #tpu.core_type<tc>} {
    %0 = tpu.iota {dimensions = array<i32: 0>} : vector<32x4xi32>
    %1 = tpu.iota {dimensions = array<i32: 1>} : vector<32x4xi32>
    %c8_i32 = arith.constant 8 : i32
    %2 = vector.broadcast %c8_i32 : i32 to vector<32x4xi32>
    %3 = arith.muli %1, %2 : vector<32x4xi32>
    %4 = arith.cmpi sge, %0, %3 : vector<32x4xi32>
    %c8_i32_0 = arith.constant 8 : i32
    %5 = vector.broadcast %c8_i32_0 : i32 to vector<32x4xi32>
    %6 = arith.addi %3, %5 : vector<32x4xi32>
    %7 = arith.cmpi slt, %0, %6 : vector<32x4xi32>
    %8 = arith.andi %4, %7 : vector<32x4xi1>
    %cst = arith.constant 1.000000e+00 : f32
    %cst_1 = arith.constant 0.000000e+00 : f32
    %9 = vector.broadcast %cst : f32 to vector<32x4xf32>
    %10 = vector.broadcast %cst_1 : f32 to vector<32x4xf32>
    %11 = arith.select %8, %9, %10 : vector<32x4xi1>, vector<32x4xf32>
    %12 = tpu.iota {dimensions = array<i32: 1>} : vector<4x32xi32>
    %13 = tpu.iota {dimensions = array<i32: 0>} : vector<4x32xi32>
    %c8_i32_2 = arith.constant 8 : i32
    %14 = vector.broadcast %c8_i32_2 : i32 to vector<4x32xi32>
    %15 = arith.muli %13, %14 : vector<4x32xi32>
    %16 = arith.cmpi sge, %12, %15 : vector<4x32xi32>
    %c8_i32_3 = arith.constant 8 : i32
    %17 = vector.broadcast %c8_i32_3 : i32 to vector<4x32xi32>
    %18 = arith.addi %15, %17 : vector<4x32xi32>
    %19 = arith.cmpi slt, %12, %18 : vector<4x32xi32>
    %20 = arith.andi %16, %19 : vector<4x32xi1>
    %cst_4 = arith.constant 1.000000e+00 : f32
    %cst_5 = arith.constant 0.000000e+00 : f32
    %21 = vector.broadcast %cst_4 : f32 to vector<4x32xf32>
    %22 = vector.broadcast %cst_5 : f32 to vector<4x32xf32>
    %23 = arith.select %20, %21, %22 : vector<4x32xi1>, vector<4x32xf32>
    %c0 = arith.constant 0 : index
    %c0_6 = arith.constant 0 : index
    %24 = vector.load %arg15[%c0, %c0_6] : memref<5x32xf32, #tpu.memory_space<vmem>>, vector<5x32xf32>
    %25 = vector.extract_strided_slice %24 {offsets = [0, 0], sizes = [1, 32], strides = [1, 1]} : vector<5x32xf32> to vector<1x32xf32>
    %26 = vector.extract_strided_slice %24 {offsets = [1, 0], sizes = [1, 32], strides = [1, 1]} : vector<5x32xf32> to vector<1x32xf32>
    %27 = vector.extract_strided_slice %24 {offsets = [2, 0], sizes = [1, 32], strides = [1, 1]} : vector<5x32xf32> to vector<1x32xf32>
    %28 = vector.extract_strided_slice %24 {offsets = [3, 0], sizes = [1, 32], strides = [1, 1]} : vector<5x32xf32> to vector<1x32xf32>
    %29 = vector.extract_strided_slice %24 {offsets = [4, 0], sizes = [1, 1], strides = [1, 1]} : vector<5x32xf32> to vector<1x1xf32>
    %30 = vector.extract_strided_slice %24 {offsets = [4, 1], sizes = [1, 1], strides = [1, 1]} : vector<5x32xf32> to vector<1x1xf32>
    %c0_7 = arith.constant 0 : index
    %c0_8 = arith.constant 0 : index
    %31 = vector.load %arg3[%c0_7, %c0_8] : memref<32x32xf32, #tpu.memory_space<vmem>>, vector<16x32xf32>
    %c16 = arith.constant 16 : index
    %c0_9 = arith.constant 0 : index
    %32 = vector.load %arg3[%c16, %c0_9] : memref<32x32xf32, #tpu.memory_space<vmem>>, vector<16x32xf32>
    %c0_10 = arith.constant 0 : index
    %c0_11 = arith.constant 0 : index
    %33 = vector.load %arg12[%c0_10, %c0_11] : memref<36x512xbf16, #tpu.memory_space<vmem>>, vector<4x512xbf16>
    %c4 = arith.constant 4 : index
    %c0_12 = arith.constant 0 : index
    %34 = vector.load %arg12[%c4, %c0_12] : memref<36x512xbf16, #tpu.memory_space<vmem>>, vector<32x512xbf16>
    %c0_13 = arith.constant 0 : index
    %c0_14 = arith.constant 0 : index
    %35 = vector.load %arg13[%c0_13, %c0_14] : memref<512x64xbf16, #tpu.memory_space<vmem>>, vector<512x32xbf16>
    %c0_15 = arith.constant 0 : index
    %c32 = arith.constant 32 : index
    %36 = vector.load %arg13[%c0_15, %c32] : memref<512x64xbf16, #tpu.memory_space<vmem>>, vector<512x32xbf16>
    %c0_16 = arith.constant 0 : index
    %c0_17 = arith.constant 0 : index
    %37 = vector.load %arg14[%c0_16, %c0_17] : memref<2x512xf32, #tpu.memory_space<vmem>>, vector<1x512xf32>
    %c1 = arith.constant 1 : index
    %c0_18 = arith.constant 0 : index
    %38 = vector.load %arg14[%c1, %c0_18] : memref<2x512xf32, #tpu.memory_space<vmem>>, vector<1x512xf32>
    %c0_19 = arith.constant 0 : index
    %c0_20 = arith.constant 0 : index
    %39 = vector.load %arg0[%c0_19, %c0_20] : memref<24x4xf32, #tpu.memory_space<vmem>>, vector<24x4xf32>
    %40 = arith.truncf %39 : vector<24x4xf32> to vector<24x4xbf16>
    %cst_21 = arith.constant dense<0.000000e+00> : vector<24x512xf32>
    %41 = tpu.matmul %40, %33, %cst_21 {dimension_numbers = #tpu.dot_dimension_numbers<[1], [0], [0], [1], [0, 0, 1, 1], [], []>} : vector<24x4xbf16>, vector<4x512xbf16>, vector<24x512xf32> -> vector<24x512xf32>
    %42 = vector.broadcast %37 : vector<1x512xf32> to vector<24x512xf32>
    %43 = arith.addf %41, %42 : vector<24x512xf32>
    %cst_22 = arith.constant 0.000000e+00 : f32
    %44 = vector.broadcast %cst_22 : f32 to vector<24x512xf32>
    %45 = arith.maximumf %43, %44 : vector<24x512xf32>
    %46 = arith.truncf %45 : vector<24x512xf32> to vector<24x512xbf16>
    %cst_23 = arith.constant dense<0.000000e+00> : vector<24x32xf32>
    %47 = tpu.matmul %46, %35, %cst_23 {dimension_numbers = #tpu.dot_dimension_numbers<[1], [0], [0], [1], [0, 0, 1, 1], [], []>} : vector<24x512xbf16>, vector<512x32xbf16>, vector<24x32xf32> -> vector<24x32xf32>
    %48 = vector.broadcast %25 : vector<1x32xf32> to vector<24x32xf32>
    %49 = arith.addf %47, %48 : vector<24x32xf32>
    %c0_24 = arith.constant 0 : index
    %c0_25 = arith.constant 0 : index
    %c0_26 = arith.constant 0 : index
    %50 = vector.load %arg5[%c0_24, %c0_25, %c0_26] : memref<5x32x96xbf16, #tpu.memory_space<vmem>>, vector<1x32x96xbf16>
    %51 = vector.shape_cast %50 : vector<1x32x96xbf16> to vector<32x96xbf16>
    %c0_27 = arith.constant 0 : index
    %c0_28 = arith.constant 0 : index
    %c0_29 = arith.constant 0 : index
    %52 = vector.load %arg7[%c0_27, %c0_28, %c0_29] : memref<5x1x128xf32, #tpu.memory_space<vmem>>, vector<1x1x128xf32>
    %53 = vector.shape_cast %52 : vector<1x1x128xf32> to vector<1x128xf32>
    %c0_30 = arith.constant 0 : index
    %c0_31 = arith.constant 0 : index
    %c0_32 = arith.constant 0 : index
    %54 = vector.load %arg6[%c0_30, %c0_31, %c0_32] : memref<5x32x32xbf16, #tpu.memory_space<vmem>>, vector<1x32x32xbf16>
    %55 = vector.shape_cast %54 : vector<1x32x32xbf16> to vector<32x32xbf16>
    %56 = vector.extract_strided_slice %53 {offsets = [0, 0], sizes = [1, 96], strides = [1, 1]} : vector<1x128xf32> to vector<1x96xf32>
    %57 = vector.extract_strided_slice %53 {offsets = [0, 96], sizes = [1, 32], strides = [1, 1]} : vector<1x128xf32> to vector<1x32xf32>
    %58 = arith.truncf %49 : vector<24x32xf32> to vector<24x32xbf16>
    %cst_33 = arith.constant dense<0.000000e+00> : vector<24x96xf32>
    %59 = tpu.matmul %58, %51, %cst_33 {dimension_numbers = #tpu.dot_dimension_numbers<[1], [0], [0], [1], [0, 0, 1, 1], [], []>} : vector<24x32xbf16>, vector<32x96xbf16>, vector<24x96xf32> -> vector<24x96xf32>
    %60 = vector.broadcast %56 : vector<1x96xf32> to vector<24x96xf32>
    %61 = arith.addf %59, %60 : vector<24x96xf32>
    %62 = vector.extract_strided_slice %61 {offsets = [0, 0], sizes = [24, 32], strides = [1, 1]} : vector<24x96xf32> to vector<24x32xf32>
    %cst_34 = arith.constant 0.353553385 : f32
    %63 = vector.broadcast %cst_34 : f32 to vector<24x32xf32>
    %64 = arith.mulf %62, %63 : vector<24x32xf32>
    %65 = vector.extract_strided_slice %61 {offsets = [0, 32], sizes = [24, 32], strides = [1, 1]} : vector<24x96xf32> to vector<24x32xf32>
    %66 = vector.extract_strided_slice %61 {offsets = [0, 64], sizes = [24, 32], strides = [1, 1]} : vector<24x96xf32> to vector<24x32xf32>
    %67 = vector.extract_strided_slice %64 {offsets = [0, 0], sizes = [12, 32], strides = [1, 1]} : vector<24x32xf32> to vector<12x32xf32>
    %68 = vector.extract_strided_slice %64 {offsets = [12, 0], sizes = [12, 32], strides = [1, 1]} : vector<24x32xf32> to vector<12x32xf32>
    %69 = vector.extract_strided_slice %65 {offsets = [0, 0], sizes = [12, 32], strides = [1, 1]} : vector<24x32xf32> to vector<12x32xf32>
    %70 = vector.extract_strided_slice %65 {offsets = [12, 0], sizes = [12, 32], strides = [1, 1]} : vector<24x32xf32> to vector<12x32xf32>
    %71 = vector.extract_strided_slice %66 {offsets = [0, 0], sizes = [12, 32], strides = [1, 1]} : vector<24x32xf32> to vector<12x32xf32>
    %72 = vector.extract_strided_slice %66 {offsets = [12, 0], sizes = [12, 32], strides = [1, 1]} : vector<24x32xf32> to vector<12x32xf32>
    %73 = arith.mulf %67, %69 : vector<12x32xf32>
    %cst_35 = arith.constant dense<0.000000e+00> : vector<12x4xf32>
    %74 = tpu.matmul %73, %11, %cst_35 {dimension_numbers = #tpu.dot_dimension_numbers<[1], [0], [0], [1], [0, 0, 1, 1], [], []>} : vector<12x32xf32>, vector<32x4xf32>, vector<12x4xf32> -> vector<12x4xf32>
    %75 = arith.mulf %67, %70 : vector<12x32xf32>
    %cst_36 = arith.constant dense<0.000000e+00> : vector<12x4xf32>
    %76 = tpu.matmul %75, %11, %cst_36 {dimension_numbers = #tpu.dot_dimension_numbers<[1], [0], [0], [1], [0, 0, 1, 1], [], []>} : vector<12x32xf32>, vector<32x4xf32>, vector<12x4xf32> -> vector<12x4xf32>
    %77 = arith.maximumf %74, %76 : vector<12x4xf32>
    %78 = arith.subf %74, %77 : vector<12x4xf32>
    %79 = math.exp %78 : vector<12x4xf32>
    %80 = arith.subf %76, %77 : vector<12x4xf32>
    %81 = math.exp %80 : vector<12x4xf32>
    %82 = arith.addf %79, %81 : vector<12x4xf32>
    %83 = tpu.reciprocal %82 {approx = true} : vector<12x4xf32> -> vector<12x4xf32>
    %84 = arith.mulf %79, %83 : vector<12x4xf32>
    %cst_37 = arith.constant dense<0.000000e+00> : vector<12x32xf32>
    %85 = tpu.matmul %84, %23, %cst_37 {dimension_numbers = #tpu.dot_dimension_numbers<[1], [0], [0], [1], [0, 0, 1, 1], [], []>} : vector<12x4xf32>, vector<4x32xf32>, vector<12x32xf32> -> vector<12x32xf32>
    %86 = arith.mulf %85, %71 : vector<12x32xf32>
    %87 = arith.mulf %81, %83 : vector<12x4xf32>
    %cst_38 = arith.constant dense<0.000000e+00> : vector<12x32xf32>
    %88 = tpu.matmul %87, %23, %cst_38 {dimension_numbers = #tpu.dot_dimension_numbers<[1], [0], [0], [1], [0, 0, 1, 1], [], []>} : vector<12x4xf32>, vector<4x32xf32>, vector<12x32xf32> -> vector<12x32xf32>
    %89 = arith.mulf %88, %72 : vector<12x32xf32>
    %90 = arith.addf %86, %89 : vector<12x32xf32>
    %91 = arith.mulf %68, %69 : vector<12x32xf32>
    %cst_39 = arith.constant dense<0.000000e+00> : vector<12x4xf32>
    %92 = tpu.matmul %91, %11, %cst_39 {dimension_numbers = #tpu.dot_dimension_numbers<[1], [0], [0], [1], [0, 0, 1, 1], [], []>} : vector<12x32xf32>, vector<32x4xf32>, vector<12x4xf32> -> vector<12x4xf32>
    %93 = arith.mulf %68, %70 : vector<12x32xf32>
    %cst_40 = arith.constant dense<0.000000e+00> : vector<12x4xf32>
    %94 = tpu.matmul %93, %11, %cst_40 {dimension_numbers = #tpu.dot_dimension_numbers<[1], [0], [0], [1], [0, 0, 1, 1], [], []>} : vector<12x32xf32>, vector<32x4xf32>, vector<12x4xf32> -> vector<12x4xf32>
    %95 = arith.maximumf %92, %94 : vector<12x4xf32>
    %96 = arith.subf %92, %95 : vector<12x4xf32>
    %97 = math.exp %96 : vector<12x4xf32>
    %98 = arith.subf %94, %95 : vector<12x4xf32>
    %99 = math.exp %98 : vector<12x4xf32>
    %100 = arith.addf %97, %99 : vector<12x4xf32>
    %101 = tpu.reciprocal %100 {approx = true} : vector<12x4xf32> -> vector<12x4xf32>
    %102 = arith.mulf %97, %101 : vector<12x4xf32>
    %cst_41 = arith.constant dense<0.000000e+00> : vector<12x32xf32>
    %103 = tpu.matmul %102, %23, %cst_41 {dimension_numbers = #tpu.dot_dimension_numbers<[1], [0], [0], [1], [0, 0, 1, 1], [], []>} : vector<12x4xf32>, vector<4x32xf32>, vector<12x32xf32> -> vector<12x32xf32>
    %104 = arith.mulf %103, %71 : vector<12x32xf32>
    %105 = arith.mulf %99, %101 : vector<12x4xf32>
    %cst_42 = arith.constant dense<0.000000e+00> : vector<12x32xf32>
    %106 = tpu.matmul %105, %23, %cst_42 {dimension_numbers = #tpu.dot_dimension_numbers<[1], [0], [0], [1], [0, 0, 1, 1], [], []>} : vector<12x4xf32>, vector<4x32xf32>, vector<12x32xf32> -> vector<12x32xf32>
    %107 = arith.mulf %106, %72 : vector<12x32xf32>
    %108 = arith.addf %104, %107 : vector<12x32xf32>
    %109 = tpu.concatenate %90, %108 in 0 : vector<12x32xf32>, vector<12x32xf32> -> vector<24x32xf32>
    %110 = arith.truncf %109 : vector<24x32xf32> to vector<24x32xbf16>
    %cst_43 = arith.constant dense<0.000000e+00> : vector<24x32xf32>
    %111 = tpu.matmul %110, %55, %cst_43 {dimension_numbers = #tpu.dot_dimension_numbers<[1], [0], [0], [1], [0, 0, 1, 1], [], []>} : vector<24x32xbf16>, vector<32x32xbf16>, vector<24x32xf32> -> vector<24x32xf32>
    %112 = vector.broadcast %57 : vector<1x32xf32> to vector<24x32xf32>
    %113 = arith.addf %111, %112 : vector<24x32xf32>
    %c0_44 = arith.constant 0 : index
    %c0_45 = arith.constant 0 : index
    %c0_46 = arith.constant 0 : index
    %114 = vector.load %arg11[%c0_44, %c0_45, %c0_46] : memref<3x5x32xf32, #tpu.memory_space<vmem>>, vector<1x5x32xf32>
    %115 = vector.shape_cast %114 : vector<1x5x32xf32> to vector<5x32xf32>
    %116 = vector.extract_strided_slice %115 {offsets = [0, 0], sizes = [1, 32], strides = [1, 1]} : vector<5x32xf32> to vector<1x32xf32>
    %117 = vector.extract_strided_slice %115 {offsets = [1, 0], sizes = [1, 32], strides = [1, 1]} : vector<5x32xf32> to vector<1x32xf32>
    %118 = vector.extract_strided_slice %115 {offsets = [2, 0], sizes = [1, 32], strides = [1, 1]} : vector<5x32xf32> to vector<1x32xf32>
    %119 = vector.extract_strided_slice %115 {offsets = [3, 0], sizes = [1, 32], strides = [1, 1]} : vector<5x32xf32> to vector<1x32xf32>
    %120 = vector.extract_strided_slice %115 {offsets = [4, 0], sizes = [1, 32], strides = [1, 1]} : vector<5x32xf32> to vector<1x32xf32>
    %121 = arith.addf %49, %113 : vector<24x32xf32>
    %cst_47 = arith.constant dense<0.000000e+00> : vector<24xf32>
    %122 = vector.multi_reduction <add>, %121, %cst_47 [1] : vector<24x32xf32> to vector<24xf32>
    %123 = vector.shape_cast %122 : vector<24xf32> to vector<24x1xf32>
    %cst_48 = arith.constant 3.200000e+01 : f32
    %124 = vector.broadcast %cst_48 : f32 to vector<24x1xf32>
    %125 = arith.divf %123, %124 : vector<24x1xf32>
    %126 = vector.broadcast %125 : vector<24x1xf32> to vector<24x32xf32>
    %127 = arith.subf %121, %126 : vector<24x32xf32>
    %128 = arith.mulf %127, %127 : vector<24x32xf32>
    %cst_49 = arith.constant dense<0.000000e+00> : vector<24xf32>
    %129 = vector.multi_reduction <add>, %128, %cst_49 [1] : vector<24x32xf32> to vector<24xf32>
    %130 = vector.shape_cast %129 : vector<24xf32> to vector<24x1xf32>
    %cst_50 = arith.constant 3.200000e+01 : f32
    %131 = vector.broadcast %cst_50 : f32 to vector<24x1xf32>
    %132 = arith.divf %130, %131 : vector<24x1xf32>
    %cst_51 = arith.constant 9.99999974E-6 : f32
    %133 = vector.broadcast %cst_51 : f32 to vector<24x1xf32>
    %134 = arith.addf %132, %133 : vector<24x1xf32>
    %135 = math.rsqrt %134 : vector<24x1xf32>
    %136 = vector.broadcast %135 : vector<24x1xf32> to vector<24x32xf32>
    %137 = arith.mulf %127, %136 : vector<24x32xf32>
    %138 = vector.broadcast %117 : vector<1x32xf32> to vector<24x32xf32>
    %139 = arith.mulf %137, %138 : vector<24x32xf32>
    %140 = vector.broadcast %118 : vector<1x32xf32> to vector<24x32xf32>
    %141 = arith.addf %139, %140 : vector<24x32xf32>
    %c0_52 = arith.constant 0 : index
    %c0_53 = arith.constant 0 : index
    %c0_54 = arith.constant 0 : index
    %142 = vector.load %arg8[%c0_52, %c0_53, %c0_54] : memref<3x32x2048xbf16, #tpu.memory_space<vmem>>, vector<1x32x2048xbf16>
    %143 = vector.shape_cast %142 : vector<1x32x2048xbf16> to vector<32x2048xbf16>
    %144 = arith.truncf %141 : vector<24x32xf32> to vector<24x32xbf16>
    %cst_55 = arith.constant dense<0.000000e+00> : vector<24x2048xf32>
    %145 = tpu.matmul %144, %143, %cst_55 {dimension_numbers = #tpu.dot_dimension_numbers<[1], [0], [0], [1], [0, 0, 1, 1], [], []>} : vector<24x32xbf16>, vector<32x2048xbf16>, vector<24x2048xf32> -> vector<24x2048xf32>
    %c0_56 = arith.constant 0 : index
    %c0_57 = arith.constant 0 : index
    %c0_58 = arith.constant 0 : index
    %146 = vector.load %arg9[%c0_56, %c0_57, %c0_58] : memref<3x1x2048xf32, #tpu.memory_space<vmem>>, vector<1x1x2048xf32>
    %147 = vector.shape_cast %146 : vector<1x1x2048xf32> to vector<1x2048xf32>
    %148 = vector.broadcast %147 : vector<1x2048xf32> to vector<24x2048xf32>
    %149 = arith.addf %145, %148 : vector<24x2048xf32>
    %cst_59 = arith.constant 0.000000e+00 : f32
    %150 = vector.broadcast %cst_59 : f32 to vector<24x2048xf32>
    %151 = arith.maximumf %149, %150 : vector<24x2048xf32>
    %c0_60 = arith.constant 0 : index
    %c0_61 = arith.constant 0 : index
    %c0_62 = arith.constant 0 : index
    %152 = vector.load %arg10[%c0_60, %c0_61, %c0_62] : memref<3x2048x32xbf16, #tpu.memory_space<vmem>>, vector<1x2048x32xbf16>
    %153 = vector.shape_cast %152 : vector<1x2048x32xbf16> to vector<2048x32xbf16>
    %154 = arith.truncf %151 : vector<24x2048xf32> to vector<24x2048xbf16>
    %cst_63 = arith.constant dense<0.000000e+00> : vector<24x32xf32>
    %155 = tpu.matmul %154, %153, %cst_63 {dimension_numbers = #tpu.dot_dimension_numbers<[1], [0], [0], [1], [0, 0, 1, 1], [], []>} : vector<24x2048xbf16>, vector<2048x32xbf16>, vector<24x32xf32> -> vector<24x32xf32>
    %156 = vector.broadcast %116 : vector<1x32xf32> to vector<24x32xf32>
    %157 = arith.addf %155, %156 : vector<24x32xf32>
    %158 = arith.addf %141, %157 : vector<24x32xf32>
    %cst_64 = arith.constant dense<0.000000e+00> : vector<24xf32>
    %159 = vector.multi_reduction <add>, %158, %cst_64 [1] : vector<24x32xf32> to vector<24xf32>
    %160 = vector.shape_cast %159 : vector<24xf32> to vector<24x1xf32>
    %cst_65 = arith.constant 3.200000e+01 : f32
    %161 = vector.broadcast %cst_65 : f32 to vector<24x1xf32>
    %162 = arith.divf %160, %161 : vector<24x1xf32>
    %163 = vector.broadcast %162 : vector<24x1xf32> to vector<24x32xf32>
    %164 = arith.subf %158, %163 : vector<24x32xf32>
    %165 = arith.mulf %164, %164 : vector<24x32xf32>
    %cst_66 = arith.constant dense<0.000000e+00> : vector<24xf32>
    %166 = vector.multi_reduction <add>, %165, %cst_66 [1] : vector<24x32xf32> to vector<24xf32>
    %167 = vector.shape_cast %166 : vector<24xf32> to vector<24x1xf32>
    %cst_67 = arith.constant 3.200000e+01 : f32
    %168 = vector.broadcast %cst_67 : f32 to vector<24x1xf32>
    %169 = arith.divf %167, %168 : vector<24x1xf32>
    %cst_68 = arith.constant 9.99999974E-6 : f32
    %170 = vector.broadcast %cst_68 : f32 to vector<24x1xf32>
    %171 = arith.addf %169, %170 : vector<24x1xf32>
    %172 = math.rsqrt %171 : vector<24x1xf32>
    %173 = vector.broadcast %172 : vector<24x1xf32> to vector<24x32xf32>
    %174 = arith.mulf %164, %173 : vector<24x32xf32>
    %175 = vector.broadcast %119 : vector<1x32xf32> to vector<24x32xf32>
    %176 = arith.mulf %174, %175 : vector<24x32xf32>
    %177 = vector.broadcast %120 : vector<1x32xf32> to vector<24x32xf32>
    %178 = arith.addf %176, %177 : vector<24x32xf32>
    %c1_69 = arith.constant 1 : index
    %c0_70 = arith.constant 0 : index
    %c0_71 = arith.constant 0 : index
    %179 = vector.load %arg5[%c1_69, %c0_70, %c0_71] : memref<5x32x96xbf16, #tpu.memory_space<vmem>>, vector<1x32x96xbf16>
    %180 = vector.shape_cast %179 : vector<1x32x96xbf16> to vector<32x96xbf16>
    %c1_72 = arith.constant 1 : index
    %c0_73 = arith.constant 0 : index
    %c0_74 = arith.constant 0 : index
    %181 = vector.load %arg7[%c1_72, %c0_73, %c0_74] : memref<5x1x128xf32, #tpu.memory_space<vmem>>, vector<1x1x128xf32>
    %182 = vector.shape_cast %181 : vector<1x1x128xf32> to vector<1x128xf32>
    %c1_75 = arith.constant 1 : index
    %c0_76 = arith.constant 0 : index
    %c0_77 = arith.constant 0 : index
    %183 = vector.load %arg6[%c1_75, %c0_76, %c0_77] : memref<5x32x32xbf16, #tpu.memory_space<vmem>>, vector<1x32x32xbf16>
    %184 = vector.shape_cast %183 : vector<1x32x32xbf16> to vector<32x32xbf16>
    %185 = vector.extract_strided_slice %182 {offsets = [0, 0], sizes = [1, 96], strides = [1, 1]} : vector<1x128xf32> to vector<1x96xf32>
    %186 = vector.extract_strided_slice %182 {offsets = [0, 96], sizes = [1, 32], strides = [1, 1]} : vector<1x128xf32> to vector<1x32xf32>
    %187 = arith.truncf %178 : vector<24x32xf32> to vector<24x32xbf16>
    %cst_78 = arith.constant dense<0.000000e+00> : vector<24x96xf32>
    %188 = tpu.matmul %187, %180, %cst_78 {dimension_numbers = #tpu.dot_dimension_numbers<[1], [0], [0], [1], [0, 0, 1, 1], [], []>} : vector<24x32xbf16>, vector<32x96xbf16>, vector<24x96xf32> -> vector<24x96xf32>
    %189 = vector.broadcast %185 : vector<1x96xf32> to vector<24x96xf32>
    %190 = arith.addf %188, %189 : vector<24x96xf32>
    %191 = vector.extract_strided_slice %190 {offsets = [0, 0], sizes = [24, 32], strides = [1, 1]} : vector<24x96xf32> to vector<24x32xf32>
    %cst_79 = arith.constant 0.353553385 : f32
    %192 = vector.broadcast %cst_79 : f32 to vector<24x32xf32>
    %193 = arith.mulf %191, %192 : vector<24x32xf32>
    %194 = vector.extract_strided_slice %190 {offsets = [0, 32], sizes = [24, 32], strides = [1, 1]} : vector<24x96xf32> to vector<24x32xf32>
    %195 = vector.extract_strided_slice %190 {offsets = [0, 64], sizes = [24, 32], strides = [1, 1]} : vector<24x96xf32> to vector<24x32xf32>
    %196 = vector.extract_strided_slice %193 {offsets = [0, 0], sizes = [12, 32], strides = [1, 1]} : vector<24x32xf32> to vector<12x32xf32>
    %197 = vector.extract_strided_slice %193 {offsets = [12, 0], sizes = [12, 32], strides = [1, 1]} : vector<24x32xf32> to vector<12x32xf32>
    %198 = vector.extract_strided_slice %194 {offsets = [0, 0], sizes = [12, 32], strides = [1, 1]} : vector<24x32xf32> to vector<12x32xf32>
    %199 = vector.extract_strided_slice %194 {offsets = [12, 0], sizes = [12, 32], strides = [1, 1]} : vector<24x32xf32> to vector<12x32xf32>
    %200 = vector.extract_strided_slice %195 {offsets = [0, 0], sizes = [12, 32], strides = [1, 1]} : vector<24x32xf32> to vector<12x32xf32>
    %201 = vector.extract_strided_slice %195 {offsets = [12, 0], sizes = [12, 32], strides = [1, 1]} : vector<24x32xf32> to vector<12x32xf32>
    %202 = arith.mulf %196, %198 : vector<12x32xf32>
    %cst_80 = arith.constant dense<0.000000e+00> : vector<12x4xf32>
    %203 = tpu.matmul %202, %11, %cst_80 {dimension_numbers = #tpu.dot_dimension_numbers<[1], [0], [0], [1], [0, 0, 1, 1], [], []>} : vector<12x32xf32>, vector<32x4xf32>, vector<12x4xf32> -> vector<12x4xf32>
    %204 = arith.mulf %196, %199 : vector<12x32xf32>
    %cst_81 = arith.constant dense<0.000000e+00> : vector<12x4xf32>
    %205 = tpu.matmul %204, %11, %cst_81 {dimension_numbers = #tpu.dot_dimension_numbers<[1], [0], [0], [1], [0, 0, 1, 1], [], []>} : vector<12x32xf32>, vector<32x4xf32>, vector<12x4xf32> -> vector<12x4xf32>
    %206 = arith.maximumf %203, %205 : vector<12x4xf32>
    %207 = arith.subf %203, %206 : vector<12x4xf32>
    %208 = math.exp %207 : vector<12x4xf32>
    %209 = arith.subf %205, %206 : vector<12x4xf32>
    %210 = math.exp %209 : vector<12x4xf32>
    %211 = arith.addf %208, %210 : vector<12x4xf32>
    %212 = tpu.reciprocal %211 {approx = true} : vector<12x4xf32> -> vector<12x4xf32>
    %213 = arith.mulf %208, %212 : vector<12x4xf32>
    %cst_82 = arith.constant dense<0.000000e+00> : vector<12x32xf32>
    %214 = tpu.matmul %213, %23, %cst_82 {dimension_numbers = #tpu.dot_dimension_numbers<[1], [0], [0], [1], [0, 0, 1, 1], [], []>} : vector<12x4xf32>, vector<4x32xf32>, vector<12x32xf32> -> vector<12x32xf32>
    %215 = arith.mulf %214, %200 : vector<12x32xf32>
    %216 = arith.mulf %210, %212 : vector<12x4xf32>
    %cst_83 = arith.constant dense<0.000000e+00> : vector<12x32xf32>
    %217 = tpu.matmul %216, %23, %cst_83 {dimension_numbers = #tpu.dot_dimension_numbers<[1], [0], [0], [1], [0, 0, 1, 1], [], []>} : vector<12x4xf32>, vector<4x32xf32>, vector<12x32xf32> -> vector<12x32xf32>
    %218 = arith.mulf %217, %201 : vector<12x32xf32>
    %219 = arith.addf %215, %218 : vector<12x32xf32>
    %220 = arith.mulf %197, %198 : vector<12x32xf32>
    %cst_84 = arith.constant dense<0.000000e+00> : vector<12x4xf32>
    %221 = tpu.matmul %220, %11, %cst_84 {dimension_numbers = #tpu.dot_dimension_numbers<[1], [0], [0], [1], [0, 0, 1, 1], [], []>} : vector<12x32xf32>, vector<32x4xf32>, vector<12x4xf32> -> vector<12x4xf32>
    %222 = arith.mulf %197, %199 : vector<12x32xf32>
    %cst_85 = arith.constant dense<0.000000e+00> : vector<12x4xf32>
    %223 = tpu.matmul %222, %11, %cst_85 {dimension_numbers = #tpu.dot_dimension_numbers<[1], [0], [0], [1], [0, 0, 1, 1], [], []>} : vector<12x32xf32>, vector<32x4xf32>, vector<12x4xf32> -> vector<12x4xf32>
    %224 = arith.maximumf %221, %223 : vector<12x4xf32>
    %225 = arith.subf %221, %224 : vector<12x4xf32>
    %226 = math.exp %225 : vector<12x4xf32>
    %227 = arith.subf %223, %224 : vector<12x4xf32>
    %228 = math.exp %227 : vector<12x4xf32>
    %229 = arith.addf %226, %228 : vector<12x4xf32>
    %230 = tpu.reciprocal %229 {approx = true} : vector<12x4xf32> -> vector<12x4xf32>
    %231 = arith.mulf %226, %230 : vector<12x4xf32>
    %cst_86 = arith.constant dense<0.000000e+00> : vector<12x32xf32>
    %232 = tpu.matmul %231, %23, %cst_86 {dimension_numbers = #tpu.dot_dimension_numbers<[1], [0], [0], [1], [0, 0, 1, 1], [], []>} : vector<12x4xf32>, vector<4x32xf32>, vector<12x32xf32> -> vector<12x32xf32>
    %233 = arith.mulf %232, %200 : vector<12x32xf32>
    %234 = arith.mulf %228, %230 : vector<12x4xf32>
    %cst_87 = arith.constant dense<0.000000e+00> : vector<12x32xf32>
    %235 = tpu.matmul %234, %23, %cst_87 {dimension_numbers = #tpu.dot_dimension_numbers<[1], [0], [0], [1], [0, 0, 1, 1], [], []>} : vector<12x4xf32>, vector<4x32xf32>, vector<12x32xf32> -> vector<12x32xf32>
    %236 = arith.mulf %235, %201 : vector<12x32xf32>
    %237 = arith.addf %233, %236 : vector<12x32xf32>
    %238 = tpu.concatenate %219, %237 in 0 : vector<12x32xf32>, vector<12x32xf32> -> vector<24x32xf32>
    %239 = arith.truncf %238 : vector<24x32xf32> to vector<24x32xbf16>
    %cst_88 = arith.constant dense<0.000000e+00> : vector<24x32xf32>
    %240 = tpu.matmul %239, %184, %cst_88 {dimension_numbers = #tpu.dot_dimension_numbers<[1], [0], [0], [1], [0, 0, 1, 1], [], []>} : vector<24x32xbf16>, vector<32x32xbf16>, vector<24x32xf32> -> vector<24x32xf32>
    %241 = vector.broadcast %186 : vector<1x32xf32> to vector<24x32xf32>
    %242 = arith.addf %240, %241 : vector<24x32xf32>
    %c1_89 = arith.constant 1 : index
    %c0_90 = arith.constant 0 : index
    %c0_91 = arith.constant 0 : index
    %243 = vector.load %arg11[%c1_89, %c0_90, %c0_91] : memref<3x5x32xf32, #tpu.memory_space<vmem>>, vector<1x5x32xf32>
    %244 = vector.shape_cast %243 : vector<1x5x32xf32> to vector<5x32xf32>
    %245 = vector.extract_strided_slice %244 {offsets = [0, 0], sizes = [1, 32], strides = [1, 1]} : vector<5x32xf32> to vector<1x32xf32>
    %246 = vector.extract_strided_slice %244 {offsets = [1, 0], sizes = [1, 32], strides = [1, 1]} : vector<5x32xf32> to vector<1x32xf32>
    %247 = vector.extract_strided_slice %244 {offsets = [2, 0], sizes = [1, 32], strides = [1, 1]} : vector<5x32xf32> to vector<1x32xf32>
    %248 = vector.extract_strided_slice %244 {offsets = [3, 0], sizes = [1, 32], strides = [1, 1]} : vector<5x32xf32> to vector<1x32xf32>
    %249 = vector.extract_strided_slice %244 {offsets = [4, 0], sizes = [1, 32], strides = [1, 1]} : vector<5x32xf32> to vector<1x32xf32>
    %250 = arith.addf %178, %242 : vector<24x32xf32>
    %cst_92 = arith.constant dense<0.000000e+00> : vector<24xf32>
    %251 = vector.multi_reduction <add>, %250, %cst_92 [1] : vector<24x32xf32> to vector<24xf32>
    %252 = vector.shape_cast %251 : vector<24xf32> to vector<24x1xf32>
    %cst_93 = arith.constant 3.200000e+01 : f32
    %253 = vector.broadcast %cst_93 : f32 to vector<24x1xf32>
    %254 = arith.divf %252, %253 : vector<24x1xf32>
    %255 = vector.broadcast %254 : vector<24x1xf32> to vector<24x32xf32>
    %256 = arith.subf %250, %255 : vector<24x32xf32>
    %257 = arith.mulf %256, %256 : vector<24x32xf32>
    %cst_94 = arith.constant dense<0.000000e+00> : vector<24xf32>
    %258 = vector.multi_reduction <add>, %257, %cst_94 [1] : vector<24x32xf32> to vector<24xf32>
    %259 = vector.shape_cast %258 : vector<24xf32> to vector<24x1xf32>
    %cst_95 = arith.constant 3.200000e+01 : f32
    %260 = vector.broadcast %cst_95 : f32 to vector<24x1xf32>
    %261 = arith.divf %259, %260 : vector<24x1xf32>
    %cst_96 = arith.constant 9.99999974E-6 : f32
    %262 = vector.broadcast %cst_96 : f32 to vector<24x1xf32>
    %263 = arith.addf %261, %262 : vector<24x1xf32>
    %264 = math.rsqrt %263 : vector<24x1xf32>
    %265 = vector.broadcast %264 : vector<24x1xf32> to vector<24x32xf32>
    %266 = arith.mulf %256, %265 : vector<24x32xf32>
    %267 = vector.broadcast %246 : vector<1x32xf32> to vector<24x32xf32>
    %268 = arith.mulf %266, %267 : vector<24x32xf32>
    %269 = vector.broadcast %247 : vector<1x32xf32> to vector<24x32xf32>
    %270 = arith.addf %268, %269 : vector<24x32xf32>
    %c1_97 = arith.constant 1 : index
    %c0_98 = arith.constant 0 : index
    %c0_99 = arith.constant 0 : index
    %271 = vector.load %arg8[%c1_97, %c0_98, %c0_99] : memref<3x32x2048xbf16, #tpu.memory_space<vmem>>, vector<1x32x2048xbf16>
    %272 = vector.shape_cast %271 : vector<1x32x2048xbf16> to vector<32x2048xbf16>
    %273 = arith.truncf %270 : vector<24x32xf32> to vector<24x32xbf16>
    %cst_100 = arith.constant dense<0.000000e+00> : vector<24x2048xf32>
    %274 = tpu.matmul %273, %272, %cst_100 {dimension_numbers = #tpu.dot_dimension_numbers<[1], [0], [0], [1], [0, 0, 1, 1], [], []>} : vector<24x32xbf16>, vector<32x2048xbf16>, vector<24x2048xf32> -> vector<24x2048xf32>
    %c1_101 = arith.constant 1 : index
    %c0_102 = arith.constant 0 : index
    %c0_103 = arith.constant 0 : index
    %275 = vector.load %arg9[%c1_101, %c0_102, %c0_103] : memref<3x1x2048xf32, #tpu.memory_space<vmem>>, vector<1x1x2048xf32>
    %276 = vector.shape_cast %275 : vector<1x1x2048xf32> to vector<1x2048xf32>
    %277 = vector.broadcast %276 : vector<1x2048xf32> to vector<24x2048xf32>
    %278 = arith.addf %274, %277 : vector<24x2048xf32>
    %cst_104 = arith.constant 0.000000e+00 : f32
    %279 = vector.broadcast %cst_104 : f32 to vector<24x2048xf32>
    %280 = arith.maximumf %278, %279 : vector<24x2048xf32>
    %c1_105 = arith.constant 1 : index
    %c0_106 = arith.constant 0 : index
    %c0_107 = arith.constant 0 : index
    %281 = vector.load %arg10[%c1_105, %c0_106, %c0_107] : memref<3x2048x32xbf16, #tpu.memory_space<vmem>>, vector<1x2048x32xbf16>
    %282 = vector.shape_cast %281 : vector<1x2048x32xbf16> to vector<2048x32xbf16>
    %283 = arith.truncf %280 : vector<24x2048xf32> to vector<24x2048xbf16>
    %cst_108 = arith.constant dense<0.000000e+00> : vector<24x32xf32>
    %284 = tpu.matmul %283, %282, %cst_108 {dimension_numbers = #tpu.dot_dimension_numbers<[1], [0], [0], [1], [0, 0, 1, 1], [], []>} : vector<24x2048xbf16>, vector<2048x32xbf16>, vector<24x32xf32> -> vector<24x32xf32>
    %285 = vector.broadcast %245 : vector<1x32xf32> to vector<24x32xf32>
    %286 = arith.addf %284, %285 : vector<24x32xf32>
    %287 = arith.addf %270, %286 : vector<24x32xf32>
    %cst_109 = arith.constant dense<0.000000e+00> : vector<24xf32>
    %288 = vector.multi_reduction <add>, %287, %cst_109 [1] : vector<24x32xf32> to vector<24xf32>
    %289 = vector.shape_cast %288 : vector<24xf32> to vector<24x1xf32>
    %cst_110 = arith.constant 3.200000e+01 : f32
    %290 = vector.broadcast %cst_110 : f32 to vector<24x1xf32>
    %291 = arith.divf %289, %290 : vector<24x1xf32>
    %292 = vector.broadcast %291 : vector<24x1xf32> to vector<24x32xf32>
    %293 = arith.subf %287, %292 : vector<24x32xf32>
    %294 = arith.mulf %293, %293 : vector<24x32xf32>
    %cst_111 = arith.constant dense<0.000000e+00> : vector<24xf32>
    %295 = vector.multi_reduction <add>, %294, %cst_111 [1] : vector<24x32xf32> to vector<24xf32>
    %296 = vector.shape_cast %295 : vector<24xf32> to vector<24x1xf32>
    %cst_112 = arith.constant 3.200000e+01 : f32
    %297 = vector.broadcast %cst_112 : f32 to vector<24x1xf32>
    %298 = arith.divf %296, %297 : vector<24x1xf32>
    %cst_113 = arith.constant 9.99999974E-6 : f32
    %299 = vector.broadcast %cst_113 : f32 to vector<24x1xf32>
    %300 = arith.addf %298, %299 : vector<24x1xf32>
    %301 = math.rsqrt %300 : vector<24x1xf32>
    %302 = vector.broadcast %301 : vector<24x1xf32> to vector<24x32xf32>
    %303 = arith.mulf %293, %302 : vector<24x32xf32>
    %304 = vector.broadcast %248 : vector<1x32xf32> to vector<24x32xf32>
    %305 = arith.mulf %303, %304 : vector<24x32xf32>
    %306 = vector.broadcast %249 : vector<1x32xf32> to vector<24x32xf32>
    %307 = arith.addf %305, %306 : vector<24x32xf32>
    %c2 = arith.constant 2 : index
    %c0_114 = arith.constant 0 : index
    %c0_115 = arith.constant 0 : index
    %308 = vector.load %arg5[%c2, %c0_114, %c0_115] : memref<5x32x96xbf16, #tpu.memory_space<vmem>>, vector<1x32x96xbf16>
    %309 = vector.shape_cast %308 : vector<1x32x96xbf16> to vector<32x96xbf16>
    %c2_116 = arith.constant 2 : index
    %c0_117 = arith.constant 0 : index
    %c0_118 = arith.constant 0 : index
    %310 = vector.load %arg7[%c2_116, %c0_117, %c0_118] : memref<5x1x128xf32, #tpu.memory_space<vmem>>, vector<1x1x128xf32>
    %311 = vector.shape_cast %310 : vector<1x1x128xf32> to vector<1x128xf32>
    %c2_119 = arith.constant 2 : index
    %c0_120 = arith.constant 0 : index
    %c0_121 = arith.constant 0 : index
    %312 = vector.load %arg6[%c2_119, %c0_120, %c0_121] : memref<5x32x32xbf16, #tpu.memory_space<vmem>>, vector<1x32x32xbf16>
    %313 = vector.shape_cast %312 : vector<1x32x32xbf16> to vector<32x32xbf16>
    %314 = vector.extract_strided_slice %311 {offsets = [0, 0], sizes = [1, 96], strides = [1, 1]} : vector<1x128xf32> to vector<1x96xf32>
    %315 = vector.extract_strided_slice %311 {offsets = [0, 96], sizes = [1, 32], strides = [1, 1]} : vector<1x128xf32> to vector<1x32xf32>
    %316 = arith.truncf %307 : vector<24x32xf32> to vector<24x32xbf16>
    %cst_122 = arith.constant dense<0.000000e+00> : vector<24x96xf32>
    %317 = tpu.matmul %316, %309, %cst_122 {dimension_numbers = #tpu.dot_dimension_numbers<[1], [0], [0], [1], [0, 0, 1, 1], [], []>} : vector<24x32xbf16>, vector<32x96xbf16>, vector<24x96xf32> -> vector<24x96xf32>
    %318 = vector.broadcast %314 : vector<1x96xf32> to vector<24x96xf32>
    %319 = arith.addf %317, %318 : vector<24x96xf32>
    %320 = vector.extract_strided_slice %319 {offsets = [0, 0], sizes = [24, 32], strides = [1, 1]} : vector<24x96xf32> to vector<24x32xf32>
    %cst_123 = arith.constant 0.353553385 : f32
    %321 = vector.broadcast %cst_123 : f32 to vector<24x32xf32>
    %322 = arith.mulf %320, %321 : vector<24x32xf32>
    %323 = vector.extract_strided_slice %319 {offsets = [0, 32], sizes = [24, 32], strides = [1, 1]} : vector<24x96xf32> to vector<24x32xf32>
    %324 = vector.extract_strided_slice %319 {offsets = [0, 64], sizes = [24, 32], strides = [1, 1]} : vector<24x96xf32> to vector<24x32xf32>
    %325 = vector.extract_strided_slice %322 {offsets = [0, 0], sizes = [12, 32], strides = [1, 1]} : vector<24x32xf32> to vector<12x32xf32>
    %326 = vector.extract_strided_slice %322 {offsets = [12, 0], sizes = [12, 32], strides = [1, 1]} : vector<24x32xf32> to vector<12x32xf32>
    %327 = vector.extract_strided_slice %323 {offsets = [0, 0], sizes = [12, 32], strides = [1, 1]} : vector<24x32xf32> to vector<12x32xf32>
    %328 = vector.extract_strided_slice %323 {offsets = [12, 0], sizes = [12, 32], strides = [1, 1]} : vector<24x32xf32> to vector<12x32xf32>
    %329 = vector.extract_strided_slice %324 {offsets = [0, 0], sizes = [12, 32], strides = [1, 1]} : vector<24x32xf32> to vector<12x32xf32>
    %330 = vector.extract_strided_slice %324 {offsets = [12, 0], sizes = [12, 32], strides = [1, 1]} : vector<24x32xf32> to vector<12x32xf32>
    %331 = arith.mulf %325, %327 : vector<12x32xf32>
    %cst_124 = arith.constant dense<0.000000e+00> : vector<12x4xf32>
    %332 = tpu.matmul %331, %11, %cst_124 {dimension_numbers = #tpu.dot_dimension_numbers<[1], [0], [0], [1], [0, 0, 1, 1], [], []>} : vector<12x32xf32>, vector<32x4xf32>, vector<12x4xf32> -> vector<12x4xf32>
    %333 = arith.mulf %325, %328 : vector<12x32xf32>
    %cst_125 = arith.constant dense<0.000000e+00> : vector<12x4xf32>
    %334 = tpu.matmul %333, %11, %cst_125 {dimension_numbers = #tpu.dot_dimension_numbers<[1], [0], [0], [1], [0, 0, 1, 1], [], []>} : vector<12x32xf32>, vector<32x4xf32>, vector<12x4xf32> -> vector<12x4xf32>
    %335 = arith.maximumf %332, %334 : vector<12x4xf32>
    %336 = arith.subf %332, %335 : vector<12x4xf32>
    %337 = math.exp %336 : vector<12x4xf32>
    %338 = arith.subf %334, %335 : vector<12x4xf32>
    %339 = math.exp %338 : vector<12x4xf32>
    %340 = arith.addf %337, %339 : vector<12x4xf32>
    %341 = tpu.reciprocal %340 {approx = true} : vector<12x4xf32> -> vector<12x4xf32>
    %342 = arith.mulf %337, %341 : vector<12x4xf32>
    %cst_126 = arith.constant dense<0.000000e+00> : vector<12x32xf32>
    %343 = tpu.matmul %342, %23, %cst_126 {dimension_numbers = #tpu.dot_dimension_numbers<[1], [0], [0], [1], [0, 0, 1, 1], [], []>} : vector<12x4xf32>, vector<4x32xf32>, vector<12x32xf32> -> vector<12x32xf32>
    %344 = arith.mulf %343, %329 : vector<12x32xf32>
    %345 = arith.mulf %339, %341 : vector<12x4xf32>
    %cst_127 = arith.constant dense<0.000000e+00> : vector<12x32xf32>
    %346 = tpu.matmul %345, %23, %cst_127 {dimension_numbers = #tpu.dot_dimension_numbers<[1], [0], [0], [1], [0, 0, 1, 1], [], []>} : vector<12x4xf32>, vector<4x32xf32>, vector<12x32xf32> -> vector<12x32xf32>
    %347 = arith.mulf %346, %330 : vector<12x32xf32>
    %348 = arith.addf %344, %347 : vector<12x32xf32>
    %349 = arith.mulf %326, %327 : vector<12x32xf32>
    %cst_128 = arith.constant dense<0.000000e+00> : vector<12x4xf32>
    %350 = tpu.matmul %349, %11, %cst_128 {dimension_numbers = #tpu.dot_dimension_numbers<[1], [0], [0], [1], [0, 0, 1, 1], [], []>} : vector<12x32xf32>, vector<32x4xf32>, vector<12x4xf32> -> vector<12x4xf32>
    %351 = arith.mulf %326, %328 : vector<12x32xf32>
    %cst_129 = arith.constant dense<0.000000e+00> : vector<12x4xf32>
    %352 = tpu.matmul %351, %11, %cst_129 {dimension_numbers = #tpu.dot_dimension_numbers<[1], [0], [0], [1], [0, 0, 1, 1], [], []>} : vector<12x32xf32>, vector<32x4xf32>, vector<12x4xf32> -> vector<12x4xf32>
    %353 = arith.maximumf %350, %352 : vector<12x4xf32>
    %354 = arith.subf %350, %353 : vector<12x4xf32>
    %355 = math.exp %354 : vector<12x4xf32>
    %356 = arith.subf %352, %353 : vector<12x4xf32>
    %357 = math.exp %356 : vector<12x4xf32>
    %358 = arith.addf %355, %357 : vector<12x4xf32>
    %359 = tpu.reciprocal %358 {approx = true} : vector<12x4xf32> -> vector<12x4xf32>
    %360 = arith.mulf %355, %359 : vector<12x4xf32>
    %cst_130 = arith.constant dense<0.000000e+00> : vector<12x32xf32>
    %361 = tpu.matmul %360, %23, %cst_130 {dimension_numbers = #tpu.dot_dimension_numbers<[1], [0], [0], [1], [0, 0, 1, 1], [], []>} : vector<12x4xf32>, vector<4x32xf32>, vector<12x32xf32> -> vector<12x32xf32>
    %362 = arith.mulf %361, %329 : vector<12x32xf32>
    %363 = arith.mulf %357, %359 : vector<12x4xf32>
    %cst_131 = arith.constant dense<0.000000e+00> : vector<12x32xf32>
    %364 = tpu.matmul %363, %23, %cst_131 {dimension_numbers = #tpu.dot_dimension_numbers<[1], [0], [0], [1], [0, 0, 1, 1], [], []>} : vector<12x4xf32>, vector<4x32xf32>, vector<12x32xf32> -> vector<12x32xf32>
    %365 = arith.mulf %364, %330 : vector<12x32xf32>
    %366 = arith.addf %362, %365 : vector<12x32xf32>
    %367 = tpu.concatenate %348, %366 in 0 : vector<12x32xf32>, vector<12x32xf32> -> vector<24x32xf32>
    %368 = arith.truncf %367 : vector<24x32xf32> to vector<24x32xbf16>
    %cst_132 = arith.constant dense<0.000000e+00> : vector<24x32xf32>
    %369 = tpu.matmul %368, %313, %cst_132 {dimension_numbers = #tpu.dot_dimension_numbers<[1], [0], [0], [1], [0, 0, 1, 1], [], []>} : vector<24x32xbf16>, vector<32x32xbf16>, vector<24x32xf32> -> vector<24x32xf32>
    %370 = vector.broadcast %315 : vector<1x32xf32> to vector<24x32xf32>
    %371 = arith.addf %369, %370 : vector<24x32xf32>
    %c2_133 = arith.constant 2 : index
    %c0_134 = arith.constant 0 : index
    %c0_135 = arith.constant 0 : index
    %372 = vector.load %arg11[%c2_133, %c0_134, %c0_135] : memref<3x5x32xf32, #tpu.memory_space<vmem>>, vector<1x5x32xf32>
    %373 = vector.shape_cast %372 : vector<1x5x32xf32> to vector<5x32xf32>
    %374 = vector.extract_strided_slice %373 {offsets = [0, 0], sizes = [1, 32], strides = [1, 1]} : vector<5x32xf32> to vector<1x32xf32>
    %375 = vector.extract_strided_slice %373 {offsets = [1, 0], sizes = [1, 32], strides = [1, 1]} : vector<5x32xf32> to vector<1x32xf32>
    %376 = vector.extract_strided_slice %373 {offsets = [2, 0], sizes = [1, 32], strides = [1, 1]} : vector<5x32xf32> to vector<1x32xf32>
    %377 = vector.extract_strided_slice %373 {offsets = [3, 0], sizes = [1, 32], strides = [1, 1]} : vector<5x32xf32> to vector<1x32xf32>
    %378 = vector.extract_strided_slice %373 {offsets = [4, 0], sizes = [1, 32], strides = [1, 1]} : vector<5x32xf32> to vector<1x32xf32>
    %379 = arith.addf %307, %371 : vector<24x32xf32>
    %cst_136 = arith.constant dense<0.000000e+00> : vector<24xf32>
    %380 = vector.multi_reduction <add>, %379, %cst_136 [1] : vector<24x32xf32> to vector<24xf32>
    %381 = vector.shape_cast %380 : vector<24xf32> to vector<24x1xf32>
    %cst_137 = arith.constant 3.200000e+01 : f32
    %382 = vector.broadcast %cst_137 : f32 to vector<24x1xf32>
    %383 = arith.divf %381, %382 : vector<24x1xf32>
    %384 = vector.broadcast %383 : vector<24x1xf32> to vector<24x32xf32>
    %385 = arith.subf %379, %384 : vector<24x32xf32>
    %386 = arith.mulf %385, %385 : vector<24x32xf32>
    %cst_138 = arith.constant dense<0.000000e+00> : vector<24xf32>
    %387 = vector.multi_reduction <add>, %386, %cst_138 [1] : vector<24x32xf32> to vector<24xf32>
    %388 = vector.shape_cast %387 : vector<24xf32> to vector<24x1xf32>
    %cst_139 = arith.constant 3.200000e+01 : f32
    %389 = vector.broadcast %cst_139 : f32 to vector<24x1xf32>
    %390 = arith.divf %388, %389 : vector<24x1xf32>
    %cst_140 = arith.constant 9.99999974E-6 : f32
    %391 = vector.broadcast %cst_140 : f32 to vector<24x1xf32>
    %392 = arith.addf %390, %391 : vector<24x1xf32>
    %393 = math.rsqrt %392 : vector<24x1xf32>
    %394 = vector.broadcast %393 : vector<24x1xf32> to vector<24x32xf32>
    %395 = arith.mulf %385, %394 : vector<24x32xf32>
    %396 = vector.broadcast %375 : vector<1x32xf32> to vector<24x32xf32>
    %397 = arith.mulf %395, %396 : vector<24x32xf32>
    %398 = vector.broadcast %376 : vector<1x32xf32> to vector<24x32xf32>
    %399 = arith.addf %397, %398 : vector<24x32xf32>
    %c2_141 = arith.constant 2 : index
    %c0_142 = arith.constant 0 : index
    %c0_143 = arith.constant 0 : index
    %400 = vector.load %arg8[%c2_141, %c0_142, %c0_143] : memref<3x32x2048xbf16, #tpu.memory_space<vmem>>, vector<1x32x2048xbf16>
    %401 = vector.shape_cast %400 : vector<1x32x2048xbf16> to vector<32x2048xbf16>
    %402 = arith.truncf %399 : vector<24x32xf32> to vector<24x32xbf16>
    %cst_144 = arith.constant dense<0.000000e+00> : vector<24x2048xf32>
    %403 = tpu.matmul %402, %401, %cst_144 {dimension_numbers = #tpu.dot_dimension_numbers<[1], [0], [0], [1], [0, 0, 1, 1], [], []>} : vector<24x32xbf16>, vector<32x2048xbf16>, vector<24x2048xf32> -> vector<24x2048xf32>
    %c2_145 = arith.constant 2 : index
    %c0_146 = arith.constant 0 : index
    %c0_147 = arith.constant 0 : index
    %404 = vector.load %arg9[%c2_145, %c0_146, %c0_147] : memref<3x1x2048xf32, #tpu.memory_space<vmem>>, vector<1x1x2048xf32>
    %405 = vector.shape_cast %404 : vector<1x1x2048xf32> to vector<1x2048xf32>
    %406 = vector.broadcast %405 : vector<1x2048xf32> to vector<24x2048xf32>
    %407 = arith.addf %403, %406 : vector<24x2048xf32>
    %cst_148 = arith.constant 0.000000e+00 : f32
    %408 = vector.broadcast %cst_148 : f32 to vector<24x2048xf32>
    %409 = arith.maximumf %407, %408 : vector<24x2048xf32>
    %c2_149 = arith.constant 2 : index
    %c0_150 = arith.constant 0 : index
    %c0_151 = arith.constant 0 : index
    %410 = vector.load %arg10[%c2_149, %c0_150, %c0_151] : memref<3x2048x32xbf16, #tpu.memory_space<vmem>>, vector<1x2048x32xbf16>
    %411 = vector.shape_cast %410 : vector<1x2048x32xbf16> to vector<2048x32xbf16>
    %412 = arith.truncf %409 : vector<24x2048xf32> to vector<24x2048xbf16>
    %cst_152 = arith.constant dense<0.000000e+00> : vector<24x32xf32>
    %413 = tpu.matmul %412, %411, %cst_152 {dimension_numbers = #tpu.dot_dimension_numbers<[1], [0], [0], [1], [0, 0, 1, 1], [], []>} : vector<24x2048xbf16>, vector<2048x32xbf16>, vector<24x32xf32> -> vector<24x32xf32>
    %414 = vector.broadcast %374 : vector<1x32xf32> to vector<24x32xf32>
    %415 = arith.addf %413, %414 : vector<24x32xf32>
    %416 = arith.addf %399, %415 : vector<24x32xf32>
    %cst_153 = arith.constant dense<0.000000e+00> : vector<24xf32>
    %417 = vector.multi_reduction <add>, %416, %cst_153 [1] : vector<24x32xf32> to vector<24xf32>
    %418 = vector.shape_cast %417 : vector<24xf32> to vector<24x1xf32>
    %cst_154 = arith.constant 3.200000e+01 : f32
    %419 = vector.broadcast %cst_154 : f32 to vector<24x1xf32>
    %420 = arith.divf %418, %419 : vector<24x1xf32>
    %421 = vector.broadcast %420 : vector<24x1xf32> to vector<24x32xf32>
    %422 = arith.subf %416, %421 : vector<24x32xf32>
    %423 = arith.mulf %422, %422 : vector<24x32xf32>
    %cst_155 = arith.constant dense<0.000000e+00> : vector<24xf32>
    %424 = vector.multi_reduction <add>, %423, %cst_155 [1] : vector<24x32xf32> to vector<24xf32>
    %425 = vector.shape_cast %424 : vector<24xf32> to vector<24x1xf32>
    %cst_156 = arith.constant 3.200000e+01 : f32
    %426 = vector.broadcast %cst_156 : f32 to vector<24x1xf32>
    %427 = arith.divf %425, %426 : vector<24x1xf32>
    %cst_157 = arith.constant 9.99999974E-6 : f32
    %428 = vector.broadcast %cst_157 : f32 to vector<24x1xf32>
    %429 = arith.addf %427, %428 : vector<24x1xf32>
    %430 = math.rsqrt %429 : vector<24x1xf32>
    %431 = vector.broadcast %430 : vector<24x1xf32> to vector<24x32xf32>
    %432 = arith.mulf %422, %431 : vector<24x32xf32>
    %433 = vector.broadcast %377 : vector<1x32xf32> to vector<24x32xf32>
    %434 = arith.mulf %432, %433 : vector<24x32xf32>
    %435 = vector.broadcast %378 : vector<1x32xf32> to vector<24x32xf32>
    %436 = arith.addf %434, %435 : vector<24x32xf32>
    %437 = vector.extract_strided_slice %436 {offsets = [4, 0], sizes = [8, 32], strides = [1, 1]} : vector<24x32xf32> to vector<8x32xf32>
    %438 = vector.extract_strided_slice %436 {offsets = [16, 0], sizes = [8, 32], strides = [1, 1]} : vector<24x32xf32> to vector<8x32xf32>
    %439 = tpu.concatenate %437, %438 in 0 : vector<8x32xf32>, vector<8x32xf32> -> vector<16x32xf32>
    %c0_158 = arith.constant 0 : index
    %c0_159 = arith.constant 0 : index
    %440 = vector.load %arg4[%c0_158, %c0_159] : memref<35x128xf32, #tpu.memory_space<vmem>>, vector<2x128xf32>
    %c2_160 = arith.constant 2 : index
    %c0_161 = arith.constant 0 : index
    %441 = vector.load %arg4[%c2_160, %c0_161] : memref<35x128xf32, #tpu.memory_space<vmem>>, vector<32x128xf32>
    %c34 = arith.constant 34 : index
    %c0_162 = arith.constant 0 : index
    %442 = vector.load %arg4[%c34, %c0_162] : memref<35x128xf32, #tpu.memory_space<vmem>>, vector<1x128xf32>
    %c0_163 = arith.constant 0 : index
    %c0_164 = arith.constant 0 : index
    %443 = vector.load %arg1[%c0_163, %c0_164] : memref<16x2xf32, #tpu.memory_space<vmem>>, vector<16x2xf32>
    %cst_165 = arith.constant dense<0.000000e+00> : vector<16x128xf32>
    %444 = tpu.matmul %443, %440, %cst_165 {dimension_numbers = #tpu.dot_dimension_numbers<[1], [0], [0], [1], [0, 0, 1, 1], [], []>} : vector<16x2xf32>, vector<2x128xf32>, vector<16x128xf32> -> vector<16x128xf32>
    %445 = vector.broadcast %442 : vector<1x128xf32> to vector<16x128xf32>
    %446 = arith.addf %444, %445 : vector<16x128xf32>
    %c0_166 = arith.constant 0 : index
    %c0_167 = arith.constant 0 : index
    %447 = vector.load %arg2[%c0_166, %c0_167] : memref<4x32xf32, #tpu.memory_space<vmem>>, vector<2x32xf32>
    %c2_168 = arith.constant 2 : index
    %c0_169 = arith.constant 0 : index
    %448 = vector.load %arg2[%c2_168, %c0_169] : memref<4x32xf32, #tpu.memory_space<vmem>>, vector<2x32xf32>
    %449 = vector.extract_strided_slice %446 {offsets = [0, 0], sizes = [2, 128], strides = [1, 1]} : vector<16x128xf32> to vector<2x128xf32>
    %cst_170 = arith.constant dense<0.000000e+00> : vector<2x128xf32>
    %450 = tpu.matmul %447, %441, %cst_170 {dimension_numbers = #tpu.dot_dimension_numbers<[1], [0], [0], [1], [0, 0, 1, 1], [], []>} : vector<2x32xf32>, vector<32x128xf32>, vector<2x128xf32> -> vector<2x128xf32>
    %451 = arith.addf %449, %450 : vector<2x128xf32>
    %452 = vector.extract_strided_slice %451 {offsets = [0, 0], sizes = [2, 32], strides = [1, 1]} : vector<2x128xf32> to vector<2x32xf32>
    %cst_171 = arith.constant 0.000000e+00 : f32
    %453 = vector.broadcast %cst_171 : f32 to vector<2x32xf32>
    %454 = arith.subf %453, %452 : vector<2x32xf32>
    %455 = math.exp %454 : vector<2x32xf32>
    %cst_172 = arith.constant 1.000000e+00 : f32
    %456 = vector.broadcast %cst_172 : f32 to vector<2x32xf32>
    %457 = arith.addf %456, %455 : vector<2x32xf32>
    %458 = tpu.reciprocal %457 {approx = true} : vector<2x32xf32> -> vector<2x32xf32>
    %459 = vector.extract_strided_slice %451 {offsets = [0, 32], sizes = [2, 32], strides = [1, 1]} : vector<2x128xf32> to vector<2x32xf32>
    %cst_173 = arith.constant 0.000000e+00 : f32
    %460 = vector.broadcast %cst_173 : f32 to vector<2x32xf32>
    %461 = arith.subf %460, %459 : vector<2x32xf32>
    %462 = math.exp %461 : vector<2x32xf32>
    %cst_174 = arith.constant 1.000000e+00 : f32
    %463 = vector.broadcast %cst_174 : f32 to vector<2x32xf32>
    %464 = arith.addf %463, %462 : vector<2x32xf32>
    %465 = tpu.reciprocal %464 {approx = true} : vector<2x32xf32> -> vector<2x32xf32>
    %466 = vector.extract_strided_slice %451 {offsets = [0, 64], sizes = [2, 32], strides = [1, 1]} : vector<2x128xf32> to vector<2x32xf32>
    %467 = math.tanh %466 : vector<2x32xf32>
    %468 = vector.extract_strided_slice %451 {offsets = [0, 96], sizes = [2, 32], strides = [1, 1]} : vector<2x128xf32> to vector<2x32xf32>
    %cst_175 = arith.constant 0.000000e+00 : f32
    %469 = vector.broadcast %cst_175 : f32 to vector<2x32xf32>
    %470 = arith.subf %469, %468 : vector<2x32xf32>
    %471 = math.exp %470 : vector<2x32xf32>
    %cst_176 = arith.constant 1.000000e+00 : f32
    %472 = vector.broadcast %cst_176 : f32 to vector<2x32xf32>
    %473 = arith.addf %472, %471 : vector<2x32xf32>
    %474 = tpu.reciprocal %473 {approx = true} : vector<2x32xf32> -> vector<2x32xf32>
    %475 = arith.mulf %465, %448 : vector<2x32xf32>
    %476 = arith.mulf %458, %467 : vector<2x32xf32>
    %477 = arith.addf %475, %476 : vector<2x32xf32>
    %478 = math.tanh %477 : vector<2x32xf32>
    %479 = arith.mulf %474, %478 : vector<2x32xf32>
    %480 = vector.extract_strided_slice %446 {offsets = [2, 0], sizes = [2, 128], strides = [1, 1]} : vector<16x128xf32> to vector<2x128xf32>
    %cst_177 = arith.constant dense<0.000000e+00> : vector<2x128xf32>
    %481 = tpu.matmul %479, %441, %cst_177 {dimension_numbers = #tpu.dot_dimension_numbers<[1], [0], [0], [1], [0, 0, 1, 1], [], []>} : vector<2x32xf32>, vector<32x128xf32>, vector<2x128xf32> -> vector<2x128xf32>
    %482 = arith.addf %480, %481 : vector<2x128xf32>
    %483 = vector.extract_strided_slice %482 {offsets = [0, 0], sizes = [2, 32], strides = [1, 1]} : vector<2x128xf32> to vector<2x32xf32>
    %cst_178 = arith.constant 0.000000e+00 : f32
    %484 = vector.broadcast %cst_178 : f32 to vector<2x32xf32>
    %485 = arith.subf %484, %483 : vector<2x32xf32>
    %486 = math.exp %485 : vector<2x32xf32>
    %cst_179 = arith.constant 1.000000e+00 : f32
    %487 = vector.broadcast %cst_179 : f32 to vector<2x32xf32>
    %488 = arith.addf %487, %486 : vector<2x32xf32>
    %489 = tpu.reciprocal %488 {approx = true} : vector<2x32xf32> -> vector<2x32xf32>
    %490 = vector.extract_strided_slice %482 {offsets = [0, 32], sizes = [2, 32], strides = [1, 1]} : vector<2x128xf32> to vector<2x32xf32>
    %cst_180 = arith.constant 0.000000e+00 : f32
    %491 = vector.broadcast %cst_180 : f32 to vector<2x32xf32>
    %492 = arith.subf %491, %490 : vector<2x32xf32>
    %493 = math.exp %492 : vector<2x32xf32>
    %cst_181 = arith.constant 1.000000e+00 : f32
    %494 = vector.broadcast %cst_181 : f32 to vector<2x32xf32>
    %495 = arith.addf %494, %493 : vector<2x32xf32>
    %496 = tpu.reciprocal %495 {approx = true} : vector<2x32xf32> -> vector<2x32xf32>
    %497 = vector.extract_strided_slice %482 {offsets = [0, 64], sizes = [2, 32], strides = [1, 1]} : vector<2x128xf32> to vector<2x32xf32>
    %498 = math.tanh %497 : vector<2x32xf32>
    %499 = vector.extract_strided_slice %482 {offsets = [0, 96], sizes = [2, 32], strides = [1, 1]} : vector<2x128xf32> to vector<2x32xf32>
    %cst_182 = arith.constant 0.000000e+00 : f32
    %500 = vector.broadcast %cst_182 : f32 to vector<2x32xf32>
    %501 = arith.subf %500, %499 : vector<2x32xf32>
    %502 = math.exp %501 : vector<2x32xf32>
    %cst_183 = arith.constant 1.000000e+00 : f32
    %503 = vector.broadcast %cst_183 : f32 to vector<2x32xf32>
    %504 = arith.addf %503, %502 : vector<2x32xf32>
    %505 = tpu.reciprocal %504 {approx = true} : vector<2x32xf32> -> vector<2x32xf32>
    %506 = arith.mulf %496, %477 : vector<2x32xf32>
    %507 = arith.mulf %489, %498 : vector<2x32xf32>
    %508 = arith.addf %506, %507 : vector<2x32xf32>
    %509 = math.tanh %508 : vector<2x32xf32>
    %510 = arith.mulf %505, %509 : vector<2x32xf32>
    %511 = vector.extract_strided_slice %446 {offsets = [4, 0], sizes = [2, 128], strides = [1, 1]} : vector<16x128xf32> to vector<2x128xf32>
    %cst_184 = arith.constant dense<0.000000e+00> : vector<2x128xf32>
    %512 = tpu.matmul %510, %441, %cst_184 {dimension_numbers = #tpu.dot_dimension_numbers<[1], [0], [0], [1], [0, 0, 1, 1], [], []>} : vector<2x32xf32>, vector<32x128xf32>, vector<2x128xf32> -> vector<2x128xf32>
    %513 = arith.addf %511, %512 : vector<2x128xf32>
    %514 = vector.extract_strided_slice %513 {offsets = [0, 0], sizes = [2, 32], strides = [1, 1]} : vector<2x128xf32> to vector<2x32xf32>
    %cst_185 = arith.constant 0.000000e+00 : f32
    %515 = vector.broadcast %cst_185 : f32 to vector<2x32xf32>
    %516 = arith.subf %515, %514 : vector<2x32xf32>
    %517 = math.exp %516 : vector<2x32xf32>
    %cst_186 = arith.constant 1.000000e+00 : f32
    %518 = vector.broadcast %cst_186 : f32 to vector<2x32xf32>
    %519 = arith.addf %518, %517 : vector<2x32xf32>
    %520 = tpu.reciprocal %519 {approx = true} : vector<2x32xf32> -> vector<2x32xf32>
    %521 = vector.extract_strided_slice %513 {offsets = [0, 32], sizes = [2, 32], strides = [1, 1]} : vector<2x128xf32> to vector<2x32xf32>
    %cst_187 = arith.constant 0.000000e+00 : f32
    %522 = vector.broadcast %cst_187 : f32 to vector<2x32xf32>
    %523 = arith.subf %522, %521 : vector<2x32xf32>
    %524 = math.exp %523 : vector<2x32xf32>
    %cst_188 = arith.constant 1.000000e+00 : f32
    %525 = vector.broadcast %cst_188 : f32 to vector<2x32xf32>
    %526 = arith.addf %525, %524 : vector<2x32xf32>
    %527 = tpu.reciprocal %526 {approx = true} : vector<2x32xf32> -> vector<2x32xf32>
    %528 = vector.extract_strided_slice %513 {offsets = [0, 64], sizes = [2, 32], strides = [1, 1]} : vector<2x128xf32> to vector<2x32xf32>
    %529 = math.tanh %528 : vector<2x32xf32>
    %530 = vector.extract_strided_slice %513 {offsets = [0, 96], sizes = [2, 32], strides = [1, 1]} : vector<2x128xf32> to vector<2x32xf32>
    %cst_189 = arith.constant 0.000000e+00 : f32
    %531 = vector.broadcast %cst_189 : f32 to vector<2x32xf32>
    %532 = arith.subf %531, %530 : vector<2x32xf32>
    %533 = math.exp %532 : vector<2x32xf32>
    %cst_190 = arith.constant 1.000000e+00 : f32
    %534 = vector.broadcast %cst_190 : f32 to vector<2x32xf32>
    %535 = arith.addf %534, %533 : vector<2x32xf32>
    %536 = tpu.reciprocal %535 {approx = true} : vector<2x32xf32> -> vector<2x32xf32>
    %537 = arith.mulf %527, %508 : vector<2x32xf32>
    %538 = arith.mulf %520, %529 : vector<2x32xf32>
    %539 = arith.addf %537, %538 : vector<2x32xf32>
    %540 = math.tanh %539 : vector<2x32xf32>
    %541 = arith.mulf %536, %540 : vector<2x32xf32>
    %542 = vector.extract_strided_slice %446 {offsets = [6, 0], sizes = [2, 128], strides = [1, 1]} : vector<16x128xf32> to vector<2x128xf32>
    %cst_191 = arith.constant dense<0.000000e+00> : vector<2x128xf32>
    %543 = tpu.matmul %541, %441, %cst_191 {dimension_numbers = #tpu.dot_dimension_numbers<[1], [0], [0], [1], [0, 0, 1, 1], [], []>} : vector<2x32xf32>, vector<32x128xf32>, vector<2x128xf32> -> vector<2x128xf32>
    %544 = arith.addf %542, %543 : vector<2x128xf32>
    %545 = vector.extract_strided_slice %544 {offsets = [0, 0], sizes = [2, 32], strides = [1, 1]} : vector<2x128xf32> to vector<2x32xf32>
    %cst_192 = arith.constant 0.000000e+00 : f32
    %546 = vector.broadcast %cst_192 : f32 to vector<2x32xf32>
    %547 = arith.subf %546, %545 : vector<2x32xf32>
    %548 = math.exp %547 : vector<2x32xf32>
    %cst_193 = arith.constant 1.000000e+00 : f32
    %549 = vector.broadcast %cst_193 : f32 to vector<2x32xf32>
    %550 = arith.addf %549, %548 : vector<2x32xf32>
    %551 = tpu.reciprocal %550 {approx = true} : vector<2x32xf32> -> vector<2x32xf32>
    %552 = vector.extract_strided_slice %544 {offsets = [0, 32], sizes = [2, 32], strides = [1, 1]} : vector<2x128xf32> to vector<2x32xf32>
    %cst_194 = arith.constant 0.000000e+00 : f32
    %553 = vector.broadcast %cst_194 : f32 to vector<2x32xf32>
    %554 = arith.subf %553, %552 : vector<2x32xf32>
    %555 = math.exp %554 : vector<2x32xf32>
    %cst_195 = arith.constant 1.000000e+00 : f32
    %556 = vector.broadcast %cst_195 : f32 to vector<2x32xf32>
    %557 = arith.addf %556, %555 : vector<2x32xf32>
    %558 = tpu.reciprocal %557 {approx = true} : vector<2x32xf32> -> vector<2x32xf32>
    %559 = vector.extract_strided_slice %544 {offsets = [0, 64], sizes = [2, 32], strides = [1, 1]} : vector<2x128xf32> to vector<2x32xf32>
    %560 = math.tanh %559 : vector<2x32xf32>
    %561 = vector.extract_strided_slice %544 {offsets = [0, 96], sizes = [2, 32], strides = [1, 1]} : vector<2x128xf32> to vector<2x32xf32>
    %cst_196 = arith.constant 0.000000e+00 : f32
    %562 = vector.broadcast %cst_196 : f32 to vector<2x32xf32>
    %563 = arith.subf %562, %561 : vector<2x32xf32>
    %564 = math.exp %563 : vector<2x32xf32>
    %cst_197 = arith.constant 1.000000e+00 : f32
    %565 = vector.broadcast %cst_197 : f32 to vector<2x32xf32>
    %566 = arith.addf %565, %564 : vector<2x32xf32>
    %567 = tpu.reciprocal %566 {approx = true} : vector<2x32xf32> -> vector<2x32xf32>
    %568 = arith.mulf %558, %539 : vector<2x32xf32>
    %569 = arith.mulf %551, %560 : vector<2x32xf32>
    %570 = arith.addf %568, %569 : vector<2x32xf32>
    %571 = math.tanh %570 : vector<2x32xf32>
    %572 = arith.mulf %567, %571 : vector<2x32xf32>
    %573 = vector.extract_strided_slice %446 {offsets = [8, 0], sizes = [2, 128], strides = [1, 1]} : vector<16x128xf32> to vector<2x128xf32>
    %cst_198 = arith.constant dense<0.000000e+00> : vector<2x128xf32>
    %574 = tpu.matmul %572, %441, %cst_198 {dimension_numbers = #tpu.dot_dimension_numbers<[1], [0], [0], [1], [0, 0, 1, 1], [], []>} : vector<2x32xf32>, vector<32x128xf32>, vector<2x128xf32> -> vector<2x128xf32>
    %575 = arith.addf %573, %574 : vector<2x128xf32>
    %576 = vector.extract_strided_slice %575 {offsets = [0, 0], sizes = [2, 32], strides = [1, 1]} : vector<2x128xf32> to vector<2x32xf32>
    %cst_199 = arith.constant 0.000000e+00 : f32
    %577 = vector.broadcast %cst_199 : f32 to vector<2x32xf32>
    %578 = arith.subf %577, %576 : vector<2x32xf32>
    %579 = math.exp %578 : vector<2x32xf32>
    %cst_200 = arith.constant 1.000000e+00 : f32
    %580 = vector.broadcast %cst_200 : f32 to vector<2x32xf32>
    %581 = arith.addf %580, %579 : vector<2x32xf32>
    %582 = tpu.reciprocal %581 {approx = true} : vector<2x32xf32> -> vector<2x32xf32>
    %583 = vector.extract_strided_slice %575 {offsets = [0, 32], sizes = [2, 32], strides = [1, 1]} : vector<2x128xf32> to vector<2x32xf32>
    %cst_201 = arith.constant 0.000000e+00 : f32
    %584 = vector.broadcast %cst_201 : f32 to vector<2x32xf32>
    %585 = arith.subf %584, %583 : vector<2x32xf32>
    %586 = math.exp %585 : vector<2x32xf32>
    %cst_202 = arith.constant 1.000000e+00 : f32
    %587 = vector.broadcast %cst_202 : f32 to vector<2x32xf32>
    %588 = arith.addf %587, %586 : vector<2x32xf32>
    %589 = tpu.reciprocal %588 {approx = true} : vector<2x32xf32> -> vector<2x32xf32>
    %590 = vector.extract_strided_slice %575 {offsets = [0, 64], sizes = [2, 32], strides = [1, 1]} : vector<2x128xf32> to vector<2x32xf32>
    %591 = math.tanh %590 : vector<2x32xf32>
    %592 = vector.extract_strided_slice %575 {offsets = [0, 96], sizes = [2, 32], strides = [1, 1]} : vector<2x128xf32> to vector<2x32xf32>
    %cst_203 = arith.constant 0.000000e+00 : f32
    %593 = vector.broadcast %cst_203 : f32 to vector<2x32xf32>
    %594 = arith.subf %593, %592 : vector<2x32xf32>
    %595 = math.exp %594 : vector<2x32xf32>
    %cst_204 = arith.constant 1.000000e+00 : f32
    %596 = vector.broadcast %cst_204 : f32 to vector<2x32xf32>
    %597 = arith.addf %596, %595 : vector<2x32xf32>
    %598 = tpu.reciprocal %597 {approx = true} : vector<2x32xf32> -> vector<2x32xf32>
    %599 = arith.mulf %589, %570 : vector<2x32xf32>
    %600 = arith.mulf %582, %591 : vector<2x32xf32>
    %601 = arith.addf %599, %600 : vector<2x32xf32>
    %602 = math.tanh %601 : vector<2x32xf32>
    %603 = arith.mulf %598, %602 : vector<2x32xf32>
    %604 = vector.extract_strided_slice %446 {offsets = [10, 0], sizes = [2, 128], strides = [1, 1]} : vector<16x128xf32> to vector<2x128xf32>
    %cst_205 = arith.constant dense<0.000000e+00> : vector<2x128xf32>
    %605 = tpu.matmul %603, %441, %cst_205 {dimension_numbers = #tpu.dot_dimension_numbers<[1], [0], [0], [1], [0, 0, 1, 1], [], []>} : vector<2x32xf32>, vector<32x128xf32>, vector<2x128xf32> -> vector<2x128xf32>
    %606 = arith.addf %604, %605 : vector<2x128xf32>
    %607 = vector.extract_strided_slice %606 {offsets = [0, 0], sizes = [2, 32], strides = [1, 1]} : vector<2x128xf32> to vector<2x32xf32>
    %cst_206 = arith.constant 0.000000e+00 : f32
    %608 = vector.broadcast %cst_206 : f32 to vector<2x32xf32>
    %609 = arith.subf %608, %607 : vector<2x32xf32>
    %610 = math.exp %609 : vector<2x32xf32>
    %cst_207 = arith.constant 1.000000e+00 : f32
    %611 = vector.broadcast %cst_207 : f32 to vector<2x32xf32>
    %612 = arith.addf %611, %610 : vector<2x32xf32>
    %613 = tpu.reciprocal %612 {approx = true} : vector<2x32xf32> -> vector<2x32xf32>
    %614 = vector.extract_strided_slice %606 {offsets = [0, 32], sizes = [2, 32], strides = [1, 1]} : vector<2x128xf32> to vector<2x32xf32>
    %cst_208 = arith.constant 0.000000e+00 : f32
    %615 = vector.broadcast %cst_208 : f32 to vector<2x32xf32>
    %616 = arith.subf %615, %614 : vector<2x32xf32>
    %617 = math.exp %616 : vector<2x32xf32>
    %cst_209 = arith.constant 1.000000e+00 : f32
    %618 = vector.broadcast %cst_209 : f32 to vector<2x32xf32>
    %619 = arith.addf %618, %617 : vector<2x32xf32>
    %620 = tpu.reciprocal %619 {approx = true} : vector<2x32xf32> -> vector<2x32xf32>
    %621 = vector.extract_strided_slice %606 {offsets = [0, 64], sizes = [2, 32], strides = [1, 1]} : vector<2x128xf32> to vector<2x32xf32>
    %622 = math.tanh %621 : vector<2x32xf32>
    %623 = vector.extract_strided_slice %606 {offsets = [0, 96], sizes = [2, 32], strides = [1, 1]} : vector<2x128xf32> to vector<2x32xf32>
    %cst_210 = arith.constant 0.000000e+00 : f32
    %624 = vector.broadcast %cst_210 : f32 to vector<2x32xf32>
    %625 = arith.subf %624, %623 : vector<2x32xf32>
    %626 = math.exp %625 : vector<2x32xf32>
    %cst_211 = arith.constant 1.000000e+00 : f32
    %627 = vector.broadcast %cst_211 : f32 to vector<2x32xf32>
    %628 = arith.addf %627, %626 : vector<2x32xf32>
    %629 = tpu.reciprocal %628 {approx = true} : vector<2x32xf32> -> vector<2x32xf32>
    %630 = arith.mulf %620, %601 : vector<2x32xf32>
    %631 = arith.mulf %613, %622 : vector<2x32xf32>
    %632 = arith.addf %630, %631 : vector<2x32xf32>
    %633 = math.tanh %632 : vector<2x32xf32>
    %634 = arith.mulf %629, %633 : vector<2x32xf32>
    %635 = vector.extract_strided_slice %446 {offsets = [12, 0], sizes = [2, 128], strides = [1, 1]} : vector<16x128xf32> to vector<2x128xf32>
    %cst_212 = arith.constant dense<0.000000e+00> : vector<2x128xf32>
    %636 = tpu.matmul %634, %441, %cst_212 {dimension_numbers = #tpu.dot_dimension_numbers<[1], [0], [0], [1], [0, 0, 1, 1], [], []>} : vector<2x32xf32>, vector<32x128xf32>, vector<2x128xf32> -> vector<2x128xf32>
    %637 = arith.addf %635, %636 : vector<2x128xf32>
    %638 = vector.extract_strided_slice %637 {offsets = [0, 0], sizes = [2, 32], strides = [1, 1]} : vector<2x128xf32> to vector<2x32xf32>
    %cst_213 = arith.constant 0.000000e+00 : f32
    %639 = vector.broadcast %cst_213 : f32 to vector<2x32xf32>
    %640 = arith.subf %639, %638 : vector<2x32xf32>
    %641 = math.exp %640 : vector<2x32xf32>
    %cst_214 = arith.constant 1.000000e+00 : f32
    %642 = vector.broadcast %cst_214 : f32 to vector<2x32xf32>
    %643 = arith.addf %642, %641 : vector<2x32xf32>
    %644 = tpu.reciprocal %643 {approx = true} : vector<2x32xf32> -> vector<2x32xf32>
    %645 = vector.extract_strided_slice %637 {offsets = [0, 32], sizes = [2, 32], strides = [1, 1]} : vector<2x128xf32> to vector<2x32xf32>
    %cst_215 = arith.constant 0.000000e+00 : f32
    %646 = vector.broadcast %cst_215 : f32 to vector<2x32xf32>
    %647 = arith.subf %646, %645 : vector<2x32xf32>
    %648 = math.exp %647 : vector<2x32xf32>
    %cst_216 = arith.constant 1.000000e+00 : f32
    %649 = vector.broadcast %cst_216 : f32 to vector<2x32xf32>
    %650 = arith.addf %649, %648 : vector<2x32xf32>
    %651 = tpu.reciprocal %650 {approx = true} : vector<2x32xf32> -> vector<2x32xf32>
    %652 = vector.extract_strided_slice %637 {offsets = [0, 64], sizes = [2, 32], strides = [1, 1]} : vector<2x128xf32> to vector<2x32xf32>
    %653 = math.tanh %652 : vector<2x32xf32>
    %654 = vector.extract_strided_slice %637 {offsets = [0, 96], sizes = [2, 32], strides = [1, 1]} : vector<2x128xf32> to vector<2x32xf32>
    %cst_217 = arith.constant 0.000000e+00 : f32
    %655 = vector.broadcast %cst_217 : f32 to vector<2x32xf32>
    %656 = arith.subf %655, %654 : vector<2x32xf32>
    %657 = math.exp %656 : vector<2x32xf32>
    %cst_218 = arith.constant 1.000000e+00 : f32
    %658 = vector.broadcast %cst_218 : f32 to vector<2x32xf32>
    %659 = arith.addf %658, %657 : vector<2x32xf32>
    %660 = tpu.reciprocal %659 {approx = true} : vector<2x32xf32> -> vector<2x32xf32>
    %661 = arith.mulf %651, %632 : vector<2x32xf32>
    %662 = arith.mulf %644, %653 : vector<2x32xf32>
    %663 = arith.addf %661, %662 : vector<2x32xf32>
    %664 = math.tanh %663 : vector<2x32xf32>
    %665 = arith.mulf %660, %664 : vector<2x32xf32>
    %666 = vector.extract_strided_slice %446 {offsets = [14, 0], sizes = [2, 128], strides = [1, 1]} : vector<16x128xf32> to vector<2x128xf32>
    %cst_219 = arith.constant dense<0.000000e+00> : vector<2x128xf32>
    %667 = tpu.matmul %665, %441, %cst_219 {dimension_numbers = #tpu.dot_dimension_numbers<[1], [0], [0], [1], [0, 0, 1, 1], [], []>} : vector<2x32xf32>, vector<32x128xf32>, vector<2x128xf32> -> vector<2x128xf32>
    %668 = arith.addf %666, %667 : vector<2x128xf32>
    %669 = vector.extract_strided_slice %668 {offsets = [0, 0], sizes = [2, 32], strides = [1, 1]} : vector<2x128xf32> to vector<2x32xf32>
    %cst_220 = arith.constant 0.000000e+00 : f32
    %670 = vector.broadcast %cst_220 : f32 to vector<2x32xf32>
    %671 = arith.subf %670, %669 : vector<2x32xf32>
    %672 = math.exp %671 : vector<2x32xf32>
    %cst_221 = arith.constant 1.000000e+00 : f32
    %673 = vector.broadcast %cst_221 : f32 to vector<2x32xf32>
    %674 = arith.addf %673, %672 : vector<2x32xf32>
    %675 = tpu.reciprocal %674 {approx = true} : vector<2x32xf32> -> vector<2x32xf32>
    %676 = vector.extract_strided_slice %668 {offsets = [0, 32], sizes = [2, 32], strides = [1, 1]} : vector<2x128xf32> to vector<2x32xf32>
    %cst_222 = arith.constant 0.000000e+00 : f32
    %677 = vector.broadcast %cst_222 : f32 to vector<2x32xf32>
    %678 = arith.subf %677, %676 : vector<2x32xf32>
    %679 = math.exp %678 : vector<2x32xf32>
    %cst_223 = arith.constant 1.000000e+00 : f32
    %680 = vector.broadcast %cst_223 : f32 to vector<2x32xf32>
    %681 = arith.addf %680, %679 : vector<2x32xf32>
    %682 = tpu.reciprocal %681 {approx = true} : vector<2x32xf32> -> vector<2x32xf32>
    %683 = vector.extract_strided_slice %668 {offsets = [0, 64], sizes = [2, 32], strides = [1, 1]} : vector<2x128xf32> to vector<2x32xf32>
    %684 = math.tanh %683 : vector<2x32xf32>
    %685 = vector.extract_strided_slice %668 {offsets = [0, 96], sizes = [2, 32], strides = [1, 1]} : vector<2x128xf32> to vector<2x32xf32>
    %cst_224 = arith.constant 0.000000e+00 : f32
    %686 = vector.broadcast %cst_224 : f32 to vector<2x32xf32>
    %687 = arith.subf %686, %685 : vector<2x32xf32>
    %688 = math.exp %687 : vector<2x32xf32>
    %cst_225 = arith.constant 1.000000e+00 : f32
    %689 = vector.broadcast %cst_225 : f32 to vector<2x32xf32>
    %690 = arith.addf %689, %688 : vector<2x32xf32>
    %691 = tpu.reciprocal %690 {approx = true} : vector<2x32xf32> -> vector<2x32xf32>
    %692 = arith.mulf %682, %663 : vector<2x32xf32>
    %693 = arith.mulf %675, %684 : vector<2x32xf32>
    %694 = arith.addf %692, %693 : vector<2x32xf32>
    %695 = math.tanh %694 : vector<2x32xf32>
    %696 = arith.mulf %691, %695 : vector<2x32xf32>
    %697 = vector.extract_strided_slice %479 {offsets = [0, 0], sizes = [1, 32], strides = [1, 1]} : vector<2x32xf32> to vector<1x32xf32>
    %698 = vector.extract_strided_slice %510 {offsets = [0, 0], sizes = [1, 32], strides = [1, 1]} : vector<2x32xf32> to vector<1x32xf32>
    %699 = vector.extract_strided_slice %541 {offsets = [0, 0], sizes = [1, 32], strides = [1, 1]} : vector<2x32xf32> to vector<1x32xf32>
    %700 = vector.extract_strided_slice %572 {offsets = [0, 0], sizes = [1, 32], strides = [1, 1]} : vector<2x32xf32> to vector<1x32xf32>
    %701 = vector.extract_strided_slice %603 {offsets = [0, 0], sizes = [1, 32], strides = [1, 1]} : vector<2x32xf32> to vector<1x32xf32>
    %702 = vector.extract_strided_slice %634 {offsets = [0, 0], sizes = [1, 32], strides = [1, 1]} : vector<2x32xf32> to vector<1x32xf32>
    %703 = vector.extract_strided_slice %665 {offsets = [0, 0], sizes = [1, 32], strides = [1, 1]} : vector<2x32xf32> to vector<1x32xf32>
    %704 = vector.extract_strided_slice %696 {offsets = [0, 0], sizes = [1, 32], strides = [1, 1]} : vector<2x32xf32> to vector<1x32xf32>
    %705 = vector.extract_strided_slice %479 {offsets = [1, 0], sizes = [1, 32], strides = [1, 1]} : vector<2x32xf32> to vector<1x32xf32>
    %706 = vector.extract_strided_slice %510 {offsets = [1, 0], sizes = [1, 32], strides = [1, 1]} : vector<2x32xf32> to vector<1x32xf32>
    %707 = vector.extract_strided_slice %541 {offsets = [1, 0], sizes = [1, 32], strides = [1, 1]} : vector<2x32xf32> to vector<1x32xf32>
    %708 = vector.extract_strided_slice %572 {offsets = [1, 0], sizes = [1, 32], strides = [1, 1]} : vector<2x32xf32> to vector<1x32xf32>
    %709 = vector.extract_strided_slice %603 {offsets = [1, 0], sizes = [1, 32], strides = [1, 1]} : vector<2x32xf32> to vector<1x32xf32>
    %710 = vector.extract_strided_slice %634 {offsets = [1, 0], sizes = [1, 32], strides = [1, 1]} : vector<2x32xf32> to vector<1x32xf32>
    %711 = vector.extract_strided_slice %665 {offsets = [1, 0], sizes = [1, 32], strides = [1, 1]} : vector<2x32xf32> to vector<1x32xf32>
    %712 = vector.extract_strided_slice %696 {offsets = [1, 0], sizes = [1, 32], strides = [1, 1]} : vector<2x32xf32> to vector<1x32xf32>
    %713 = tpu.concatenate %697, %698, %699, %700, %701, %702, %703, %704, %705, %706, %707, %708, %709, %710, %711, %712 in 0 : vector<1x32xf32>, vector<1x32xf32>, vector<1x32xf32>, vector<1x32xf32>, vector<1x32xf32>, vector<1x32xf32>, vector<1x32xf32>, vector<1x32xf32>, vector<1x32xf32>, vector<1x32xf32>, vector<1x32xf32>, vector<1x32xf32>, vector<1x32xf32>, vector<1x32xf32>, vector<1x32xf32>, vector<1x32xf32> -> vector<16x32xf32>
    %c3 = arith.constant 3 : index
    %c0_226 = arith.constant 0 : index
    %c0_227 = arith.constant 0 : index
    %714 = vector.load %arg5[%c3, %c0_226, %c0_227] : memref<5x32x96xbf16, #tpu.memory_space<vmem>>, vector<1x32x96xbf16>
    %715 = vector.shape_cast %714 : vector<1x32x96xbf16> to vector<32x96xbf16>
    %c3_228 = arith.constant 3 : index
    %c0_229 = arith.constant 0 : index
    %c0_230 = arith.constant 0 : index
    %716 = vector.load %arg7[%c3_228, %c0_229, %c0_230] : memref<5x1x128xf32, #tpu.memory_space<vmem>>, vector<1x1x128xf32>
    %717 = vector.shape_cast %716 : vector<1x1x128xf32> to vector<1x128xf32>
    %c3_231 = arith.constant 3 : index
    %c0_232 = arith.constant 0 : index
    %c0_233 = arith.constant 0 : index
    %718 = vector.load %arg6[%c3_231, %c0_232, %c0_233] : memref<5x32x32xbf16, #tpu.memory_space<vmem>>, vector<1x32x32xbf16>
    %719 = vector.shape_cast %718 : vector<1x32x32xbf16> to vector<32x32xbf16>
    %720 = vector.extract_strided_slice %717 {offsets = [0, 0], sizes = [1, 96], strides = [1, 1]} : vector<1x128xf32> to vector<1x96xf32>
    %721 = vector.extract_strided_slice %717 {offsets = [0, 96], sizes = [1, 32], strides = [1, 1]} : vector<1x128xf32> to vector<1x32xf32>
    %722 = vector.extract_strided_slice %715 {offsets = [0, 0], sizes = [32, 32], strides = [1, 1]} : vector<32x96xbf16> to vector<32x32xbf16>
    %723 = arith.truncf %713 : vector<16x32xf32> to vector<16x32xbf16>
    %cst_234 = arith.constant dense<0.000000e+00> : vector<16x32xf32>
    %724 = tpu.matmul %723, %722, %cst_234 {dimension_numbers = #tpu.dot_dimension_numbers<[1], [0], [0], [1], [0, 0, 1, 1], [], []>} : vector<16x32xbf16>, vector<32x32xbf16>, vector<16x32xf32> -> vector<16x32xf32>
    %725 = vector.extract_strided_slice %720 {offsets = [0, 0], sizes = [1, 32], strides = [1, 1]} : vector<1x96xf32> to vector<1x32xf32>
    %726 = vector.broadcast %725 : vector<1x32xf32> to vector<16x32xf32>
    %727 = arith.addf %724, %726 : vector<16x32xf32>
    %cst_235 = arith.constant 0.353553385 : f32
    %728 = vector.broadcast %cst_235 : f32 to vector<16x32xf32>
    %729 = arith.mulf %727, %728 : vector<16x32xf32>
    %730 = vector.extract_strided_slice %715 {offsets = [0, 32], sizes = [32, 64], strides = [1, 1]} : vector<32x96xbf16> to vector<32x64xbf16>
    %731 = arith.truncf %439 : vector<16x32xf32> to vector<16x32xbf16>
    %cst_236 = arith.constant dense<0.000000e+00> : vector<16x64xf32>
    %732 = tpu.matmul %731, %730, %cst_236 {dimension_numbers = #tpu.dot_dimension_numbers<[1], [0], [0], [1], [0, 0, 1, 1], [], []>} : vector<16x32xbf16>, vector<32x64xbf16>, vector<16x64xf32> -> vector<16x64xf32>
    %733 = vector.extract_strided_slice %720 {offsets = [0, 32], sizes = [1, 64], strides = [1, 1]} : vector<1x96xf32> to vector<1x64xf32>
    %734 = vector.broadcast %733 : vector<1x64xf32> to vector<16x64xf32>
    %735 = arith.addf %732, %734 : vector<16x64xf32>
    %736 = vector.extract_strided_slice %735 {offsets = [0, 0], sizes = [16, 32], strides = [1, 1]} : vector<16x64xf32> to vector<16x32xf32>
    %737 = vector.extract_strided_slice %735 {offsets = [0, 32], sizes = [16, 32], strides = [1, 1]} : vector<16x64xf32> to vector<16x32xf32>
    %738 = vector.extract_strided_slice %729 {offsets = [0, 0], sizes = [8, 32], strides = [1, 1]} : vector<16x32xf32> to vector<8x32xf32>
    %739 = vector.extract_strided_slice %729 {offsets = [8, 0], sizes = [8, 32], strides = [1, 1]} : vector<16x32xf32> to vector<8x32xf32>
    %740 = vector.extract_strided_slice %736 {offsets = [0, 0], sizes = [8, 32], strides = [1, 1]} : vector<16x32xf32> to vector<8x32xf32>
    %741 = vector.extract_strided_slice %736 {offsets = [8, 0], sizes = [8, 32], strides = [1, 1]} : vector<16x32xf32> to vector<8x32xf32>
    %742 = vector.extract_strided_slice %737 {offsets = [0, 0], sizes = [8, 32], strides = [1, 1]} : vector<16x32xf32> to vector<8x32xf32>
    %743 = vector.extract_strided_slice %737 {offsets = [8, 0], sizes = [8, 32], strides = [1, 1]} : vector<16x32xf32> to vector<8x32xf32>
    %744 = arith.mulf %738, %740 : vector<8x32xf32>
    %cst_237 = arith.constant dense<0.000000e+00> : vector<8x4xf32>
    %745 = tpu.matmul %744, %11, %cst_237 {dimension_numbers = #tpu.dot_dimension_numbers<[1], [0], [0], [1], [0, 0, 1, 1], [], []>} : vector<8x32xf32>, vector<32x4xf32>, vector<8x4xf32> -> vector<8x4xf32>
    %746 = arith.mulf %738, %741 : vector<8x32xf32>
    %cst_238 = arith.constant dense<0.000000e+00> : vector<8x4xf32>
    %747 = tpu.matmul %746, %11, %cst_238 {dimension_numbers = #tpu.dot_dimension_numbers<[1], [0], [0], [1], [0, 0, 1, 1], [], []>} : vector<8x32xf32>, vector<32x4xf32>, vector<8x4xf32> -> vector<8x4xf32>
    %748 = arith.maximumf %745, %747 : vector<8x4xf32>
    %749 = arith.subf %745, %748 : vector<8x4xf32>
    %750 = math.exp %749 : vector<8x4xf32>
    %751 = arith.subf %747, %748 : vector<8x4xf32>
    %752 = math.exp %751 : vector<8x4xf32>
    %753 = arith.addf %750, %752 : vector<8x4xf32>
    %754 = tpu.reciprocal %753 {approx = true} : vector<8x4xf32> -> vector<8x4xf32>
    %755 = arith.mulf %750, %754 : vector<8x4xf32>
    %cst_239 = arith.constant dense<0.000000e+00> : vector<8x32xf32>
    %756 = tpu.matmul %755, %23, %cst_239 {dimension_numbers = #tpu.dot_dimension_numbers<[1], [0], [0], [1], [0, 0, 1, 1], [], []>} : vector<8x4xf32>, vector<4x32xf32>, vector<8x32xf32> -> vector<8x32xf32>
    %757 = arith.mulf %756, %742 : vector<8x32xf32>
    %758 = arith.mulf %752, %754 : vector<8x4xf32>
    %cst_240 = arith.constant dense<0.000000e+00> : vector<8x32xf32>
    %759 = tpu.matmul %758, %23, %cst_240 {dimension_numbers = #tpu.dot_dimension_numbers<[1], [0], [0], [1], [0, 0, 1, 1], [], []>} : vector<8x4xf32>, vector<4x32xf32>, vector<8x32xf32> -> vector<8x32xf32>
    %760 = arith.mulf %759, %743 : vector<8x32xf32>
    %761 = arith.addf %757, %760 : vector<8x32xf32>
    %762 = arith.mulf %739, %740 : vector<8x32xf32>
    %cst_241 = arith.constant dense<0.000000e+00> : vector<8x4xf32>
    %763 = tpu.matmul %762, %11, %cst_241 {dimension_numbers = #tpu.dot_dimension_numbers<[1], [0], [0], [1], [0, 0, 1, 1], [], []>} : vector<8x32xf32>, vector<32x4xf32>, vector<8x4xf32> -> vector<8x4xf32>
    %764 = arith.mulf %739, %741 : vector<8x32xf32>
    %cst_242 = arith.constant dense<0.000000e+00> : vector<8x4xf32>
    %765 = tpu.matmul %764, %11, %cst_242 {dimension_numbers = #tpu.dot_dimension_numbers<[1], [0], [0], [1], [0, 0, 1, 1], [], []>} : vector<8x32xf32>, vector<32x4xf32>, vector<8x4xf32> -> vector<8x4xf32>
    %766 = arith.maximumf %763, %765 : vector<8x4xf32>
    %767 = arith.subf %763, %766 : vector<8x4xf32>
    %768 = math.exp %767 : vector<8x4xf32>
    %769 = arith.subf %765, %766 : vector<8x4xf32>
    %770 = math.exp %769 : vector<8x4xf32>
    %771 = arith.addf %768, %770 : vector<8x4xf32>
    %772 = tpu.reciprocal %771 {approx = true} : vector<8x4xf32> -> vector<8x4xf32>
    %773 = arith.mulf %768, %772 : vector<8x4xf32>
    %cst_243 = arith.constant dense<0.000000e+00> : vector<8x32xf32>
    %774 = tpu.matmul %773, %23, %cst_243 {dimension_numbers = #tpu.dot_dimension_numbers<[1], [0], [0], [1], [0, 0, 1, 1], [], []>} : vector<8x4xf32>, vector<4x32xf32>, vector<8x32xf32> -> vector<8x32xf32>
    %775 = arith.mulf %774, %742 : vector<8x32xf32>
    %776 = arith.mulf %770, %772 : vector<8x4xf32>
    %cst_244 = arith.constant dense<0.000000e+00> : vector<8x32xf32>
    %777 = tpu.matmul %776, %23, %cst_244 {dimension_numbers = #tpu.dot_dimension_numbers<[1], [0], [0], [1], [0, 0, 1, 1], [], []>} : vector<8x4xf32>, vector<4x32xf32>, vector<8x32xf32> -> vector<8x32xf32>
    %778 = arith.mulf %777, %743 : vector<8x32xf32>
    %779 = arith.addf %775, %778 : vector<8x32xf32>
    %780 = tpu.concatenate %761, %779 in 0 : vector<8x32xf32>, vector<8x32xf32> -> vector<16x32xf32>
    %781 = arith.truncf %780 : vector<16x32xf32> to vector<16x32xbf16>
    %cst_245 = arith.constant dense<0.000000e+00> : vector<16x32xf32>
    %782 = tpu.matmul %781, %719, %cst_245 {dimension_numbers = #tpu.dot_dimension_numbers<[1], [0], [0], [1], [0, 0, 1, 1], [], []>} : vector<16x32xbf16>, vector<32x32xbf16>, vector<16x32xf32> -> vector<16x32xf32>
    %783 = vector.broadcast %721 : vector<1x32xf32> to vector<16x32xf32>
    %784 = arith.addf %782, %783 : vector<16x32xf32>
    %785 = arith.addf %713, %784 : vector<16x32xf32>
    %786 = arith.mulf %785, %31 : vector<16x32xf32>
    %787 = arith.addf %786, %32 : vector<16x32xf32>
    %c4_246 = arith.constant 4 : index
    %c0_247 = arith.constant 0 : index
    %c0_248 = arith.constant 0 : index
    %788 = vector.load %arg5[%c4_246, %c0_247, %c0_248] : memref<5x32x96xbf16, #tpu.memory_space<vmem>>, vector<1x32x96xbf16>
    %789 = vector.shape_cast %788 : vector<1x32x96xbf16> to vector<32x96xbf16>
    %c4_249 = arith.constant 4 : index
    %c0_250 = arith.constant 0 : index
    %c0_251 = arith.constant 0 : index
    %790 = vector.load %arg7[%c4_249, %c0_250, %c0_251] : memref<5x1x128xf32, #tpu.memory_space<vmem>>, vector<1x1x128xf32>
    %791 = vector.shape_cast %790 : vector<1x1x128xf32> to vector<1x128xf32>
    %c4_252 = arith.constant 4 : index
    %c0_253 = arith.constant 0 : index
    %c0_254 = arith.constant 0 : index
    %792 = vector.load %arg6[%c4_252, %c0_253, %c0_254] : memref<5x32x32xbf16, #tpu.memory_space<vmem>>, vector<1x32x32xbf16>
    %793 = vector.shape_cast %792 : vector<1x32x32xbf16> to vector<32x32xbf16>
    %794 = vector.extract_strided_slice %791 {offsets = [0, 0], sizes = [1, 96], strides = [1, 1]} : vector<1x128xf32> to vector<1x96xf32>
    %795 = vector.extract_strided_slice %791 {offsets = [0, 96], sizes = [1, 32], strides = [1, 1]} : vector<1x128xf32> to vector<1x32xf32>
    %796 = arith.truncf %787 : vector<16x32xf32> to vector<16x32xbf16>
    %cst_255 = arith.constant dense<0.000000e+00> : vector<16x96xf32>
    %797 = tpu.matmul %796, %789, %cst_255 {dimension_numbers = #tpu.dot_dimension_numbers<[1], [0], [0], [1], [0, 0, 1, 1], [], []>} : vector<16x32xbf16>, vector<32x96xbf16>, vector<16x96xf32> -> vector<16x96xf32>
    %798 = vector.broadcast %794 : vector<1x96xf32> to vector<16x96xf32>
    %799 = arith.addf %797, %798 : vector<16x96xf32>
    %800 = vector.extract_strided_slice %799 {offsets = [0, 0], sizes = [16, 32], strides = [1, 1]} : vector<16x96xf32> to vector<16x32xf32>
    %cst_256 = arith.constant 0.353553385 : f32
    %801 = vector.broadcast %cst_256 : f32 to vector<16x32xf32>
    %802 = arith.mulf %800, %801 : vector<16x32xf32>
    %803 = vector.extract_strided_slice %799 {offsets = [0, 32], sizes = [16, 32], strides = [1, 1]} : vector<16x96xf32> to vector<16x32xf32>
    %804 = vector.extract_strided_slice %799 {offsets = [0, 64], sizes = [16, 32], strides = [1, 1]} : vector<16x96xf32> to vector<16x32xf32>
    %805 = vector.extract_strided_slice %802 {offsets = [0, 0], sizes = [8, 32], strides = [1, 1]} : vector<16x32xf32> to vector<8x32xf32>
    %806 = vector.extract_strided_slice %802 {offsets = [8, 0], sizes = [8, 32], strides = [1, 1]} : vector<16x32xf32> to vector<8x32xf32>
    %807 = vector.extract_strided_slice %803 {offsets = [0, 0], sizes = [8, 32], strides = [1, 1]} : vector<16x32xf32> to vector<8x32xf32>
    %808 = vector.extract_strided_slice %803 {offsets = [8, 0], sizes = [8, 32], strides = [1, 1]} : vector<16x32xf32> to vector<8x32xf32>
    %809 = vector.extract_strided_slice %804 {offsets = [0, 0], sizes = [8, 32], strides = [1, 1]} : vector<16x32xf32> to vector<8x32xf32>
    %810 = vector.extract_strided_slice %804 {offsets = [8, 0], sizes = [8, 32], strides = [1, 1]} : vector<16x32xf32> to vector<8x32xf32>
    %811 = arith.mulf %805, %807 : vector<8x32xf32>
    %cst_257 = arith.constant dense<0.000000e+00> : vector<8x4xf32>
    %812 = tpu.matmul %811, %11, %cst_257 {dimension_numbers = #tpu.dot_dimension_numbers<[1], [0], [0], [1], [0, 0, 1, 1], [], []>} : vector<8x32xf32>, vector<32x4xf32>, vector<8x4xf32> -> vector<8x4xf32>
    %813 = arith.mulf %805, %808 : vector<8x32xf32>
    %cst_258 = arith.constant dense<0.000000e+00> : vector<8x4xf32>
    %814 = tpu.matmul %813, %11, %cst_258 {dimension_numbers = #tpu.dot_dimension_numbers<[1], [0], [0], [1], [0, 0, 1, 1], [], []>} : vector<8x32xf32>, vector<32x4xf32>, vector<8x4xf32> -> vector<8x4xf32>
    %815 = arith.maximumf %812, %814 : vector<8x4xf32>
    %816 = arith.subf %812, %815 : vector<8x4xf32>
    %817 = math.exp %816 : vector<8x4xf32>
    %818 = arith.subf %814, %815 : vector<8x4xf32>
    %819 = math.exp %818 : vector<8x4xf32>
    %820 = arith.addf %817, %819 : vector<8x4xf32>
    %821 = tpu.reciprocal %820 {approx = true} : vector<8x4xf32> -> vector<8x4xf32>
    %822 = arith.mulf %817, %821 : vector<8x4xf32>
    %cst_259 = arith.constant dense<0.000000e+00> : vector<8x32xf32>
    %823 = tpu.matmul %822, %23, %cst_259 {dimension_numbers = #tpu.dot_dimension_numbers<[1], [0], [0], [1], [0, 0, 1, 1], [], []>} : vector<8x4xf32>, vector<4x32xf32>, vector<8x32xf32> -> vector<8x32xf32>
    %824 = arith.mulf %823, %809 : vector<8x32xf32>
    %825 = arith.mulf %819, %821 : vector<8x4xf32>
    %cst_260 = arith.constant dense<0.000000e+00> : vector<8x32xf32>
    %826 = tpu.matmul %825, %23, %cst_260 {dimension_numbers = #tpu.dot_dimension_numbers<[1], [0], [0], [1], [0, 0, 1, 1], [], []>} : vector<8x4xf32>, vector<4x32xf32>, vector<8x32xf32> -> vector<8x32xf32>
    %827 = arith.mulf %826, %810 : vector<8x32xf32>
    %828 = arith.addf %824, %827 : vector<8x32xf32>
    %829 = arith.mulf %806, %807 : vector<8x32xf32>
    %cst_261 = arith.constant dense<0.000000e+00> : vector<8x4xf32>
    %830 = tpu.matmul %829, %11, %cst_261 {dimension_numbers = #tpu.dot_dimension_numbers<[1], [0], [0], [1], [0, 0, 1, 1], [], []>} : vector<8x32xf32>, vector<32x4xf32>, vector<8x4xf32> -> vector<8x4xf32>
    %831 = arith.mulf %806, %808 : vector<8x32xf32>
    %cst_262 = arith.constant dense<0.000000e+00> : vector<8x4xf32>
    %832 = tpu.matmul %831, %11, %cst_262 {dimension_numbers = #tpu.dot_dimension_numbers<[1], [0], [0], [1], [0, 0, 1, 1], [], []>} : vector<8x32xf32>, vector<32x4xf32>, vector<8x4xf32> -> vector<8x4xf32>
    %833 = arith.maximumf %830, %832 : vector<8x4xf32>
    %834 = arith.subf %830, %833 : vector<8x4xf32>
    %835 = math.exp %834 : vector<8x4xf32>
    %836 = arith.subf %832, %833 : vector<8x4xf32>
    %837 = math.exp %836 : vector<8x4xf32>
    %838 = arith.addf %835, %837 : vector<8x4xf32>
    %839 = tpu.reciprocal %838 {approx = true} : vector<8x4xf32> -> vector<8x4xf32>
    %840 = arith.mulf %835, %839 : vector<8x4xf32>
    %cst_263 = arith.constant dense<0.000000e+00> : vector<8x32xf32>
    %841 = tpu.matmul %840, %23, %cst_263 {dimension_numbers = #tpu.dot_dimension_numbers<[1], [0], [0], [1], [0, 0, 1, 1], [], []>} : vector<8x4xf32>, vector<4x32xf32>, vector<8x32xf32> -> vector<8x32xf32>
    %842 = arith.mulf %841, %809 : vector<8x32xf32>
    %843 = arith.mulf %837, %839 : vector<8x4xf32>
    %cst_264 = arith.constant dense<0.000000e+00> : vector<8x32xf32>
    %844 = tpu.matmul %843, %23, %cst_264 {dimension_numbers = #tpu.dot_dimension_numbers<[1], [0], [0], [1], [0, 0, 1, 1], [], []>} : vector<8x4xf32>, vector<4x32xf32>, vector<8x32xf32> -> vector<8x32xf32>
    %845 = arith.mulf %844, %810 : vector<8x32xf32>
    %846 = arith.addf %842, %845 : vector<8x32xf32>
    %847 = tpu.concatenate %828, %846 in 0 : vector<8x32xf32>, vector<8x32xf32> -> vector<16x32xf32>
    %848 = arith.truncf %847 : vector<16x32xf32> to vector<16x32xbf16>
    %cst_265 = arith.constant dense<0.000000e+00> : vector<16x32xf32>
    %849 = tpu.matmul %848, %793, %cst_265 {dimension_numbers = #tpu.dot_dimension_numbers<[1], [0], [0], [1], [0, 0, 1, 1], [], []>} : vector<16x32xbf16>, vector<32x32xbf16>, vector<16x32xf32> -> vector<16x32xf32>
    %850 = vector.broadcast %795 : vector<1x32xf32> to vector<16x32xf32>
    %851 = arith.addf %849, %850 : vector<16x32xf32>
    %852 = arith.addf %787, %851 : vector<16x32xf32>
    %853 = arith.mulf %852, %31 : vector<16x32xf32>
    %854 = arith.addf %853, %32 : vector<16x32xf32>
    %855 = arith.truncf %854 : vector<16x32xf32> to vector<16x32xbf16>
    %cst_266 = arith.constant dense<0.000000e+00> : vector<16x512xf32>
    %856 = tpu.matmul %855, %34, %cst_266 {dimension_numbers = #tpu.dot_dimension_numbers<[1], [0], [0], [1], [0, 0, 1, 1], [], []>} : vector<16x32xbf16>, vector<32x512xbf16>, vector<16x512xf32> -> vector<16x512xf32>
    %857 = vector.broadcast %38 : vector<1x512xf32> to vector<16x512xf32>
    %858 = arith.addf %856, %857 : vector<16x512xf32>
    %cst_267 = arith.constant 0.000000e+00 : f32
    %859 = vector.broadcast %cst_267 : f32 to vector<16x512xf32>
    %860 = arith.maximumf %858, %859 : vector<16x512xf32>
    %861 = arith.truncf %860 : vector<16x512xf32> to vector<16x512xbf16>
    %cst_268 = arith.constant dense<0.000000e+00> : vector<16x32xf32>
    %862 = tpu.matmul %861, %36, %cst_268 {dimension_numbers = #tpu.dot_dimension_numbers<[1], [0], [0], [1], [0, 0, 1, 1], [], []>} : vector<16x512xbf16>, vector<512x32xbf16>, vector<16x32xf32> -> vector<16x32xf32>
    %863 = vector.broadcast %26 : vector<1x32xf32> to vector<16x32xf32>
    %864 = arith.addf %862, %863 : vector<16x32xf32>
    %865 = arith.addf %864, %854 : vector<16x32xf32>
    %866 = arith.mulf %865, %31 : vector<16x32xf32>
    %867 = arith.addf %866, %32 : vector<16x32xf32>
    %868 = vector.broadcast %27 : vector<1x32xf32> to vector<16x32xf32>
    %869 = arith.mulf %867, %868 : vector<16x32xf32>
    %cst_269 = arith.constant dense<0.000000e+00> : vector<16xf32>
    %870 = vector.multi_reduction <add>, %869, %cst_269 [1] : vector<16x32xf32> to vector<16xf32>
    %871 = vector.shape_cast %870 : vector<16xf32> to vector<16x1xf32>
    %872 = vector.broadcast %29 : vector<1x1xf32> to vector<16x1xf32>
    %873 = arith.addf %871, %872 : vector<16x1xf32>
    %874 = vector.broadcast %28 : vector<1x32xf32> to vector<16x32xf32>
    %875 = arith.mulf %713, %874 : vector<16x32xf32>
    %cst_270 = arith.constant dense<0.000000e+00> : vector<16xf32>
    %876 = vector.multi_reduction <add>, %875, %cst_270 [1] : vector<16x32xf32> to vector<16xf32>
    %877 = vector.shape_cast %876 : vector<16xf32> to vector<16x1xf32>
    %878 = vector.broadcast %30 : vector<1x1xf32> to vector<16x1xf32>
    %879 = arith.addf %877, %878 : vector<16x1xf32>
    %880 = arith.addf %873, %879 : vector<16x1xf32>
    %c0_271 = arith.constant 0 : index
    %c0_272 = arith.constant 0 : index
    %881 = vector.load %arg16[%c0_271, %c0_272] : memref<16x2xf32, #tpu.memory_space<vmem>>, vector<16x1xf32>
    tpu.vector_store %arg16[%c0_271, %c0_272], %880 {strides = array<i32>} : memref<16x2xf32, #tpu.memory_space<vmem>>, vector<16x1xf32>,
    %c0_273 = arith.constant 0 : index
    %c1_274 = arith.constant 1 : index
    %882 = vector.load %arg16[%c0_273, %c1_274] : memref<16x2xf32, #tpu.memory_space<vmem>>, vector<16x1xf32>
    tpu.vector_store %arg16[%c0_273, %c1_274], %879 {strides = array<i32>} : memref<16x2xf32, #tpu.memory_space<vmem>>, vector<16x1xf32>,
    return
  }
}

</mosaic_0001>

<bundles_post_ra>
// kernel: decoder_lstm_forward.1
= control target key start
LH: loop header
LB: loop body
LE: loop exit
PB: predicated region body
PF: predicated region fallthrough
CT: control target
= control target key end

     0   :  { %vm20843_vm0 = vcmask 1041408   ;;  %v17224_v2 = vmov 0   ;;  %vm20844_vm1 = vcmask 31744   ;;  %v54_v46 = vlaneseq  ;;  %s17228_s17 = smov 64   ;;  %s17229_s22 = smov 32   ;;  %s20825_s12 = inlined_call_operand.vmem [shape: bf16[36,512], index: 12, kind: input, shape index: {}]   ;;  %s20826_s0 = inlined_call_operand.vmem [shape: f32[24,4], index: 0, kind: input, shape index: {}]   ;;  %s20827_s13 = inlined_call_operand.vmem [shape: bf16[512,64], index: 13, kind: input, shape index: {}]   ;;  %s20828_s14 = inlined_call_operand.vmem [shape: f32[2,512], index: 14, kind: input, shape index: {}]   ;;  %s20829_s5 = inlined_call_operand.vmem [shape: bf16[5,32,96], index: 5, kind: input, shape index: {}]   ;;  %s20830_s15 = inlined_call_operand.vmem [shape: f32[5,32], index: 15, kind: input, shape index: {}]   ;;  %s20831_s7 = inlined_call_operand.vmem [shape: f32[5,1,128], index: 7, kind: input, shape index: {}]   ;;  %s20832_s6 = inlined_call_operand.vmem [shape: bf16[5,32,32], index: 6, kind: input, shape index: {}]   ;;  %s20833_s8 = inlined_call_operand.vmem [shape: bf16[3,32,2048], index: 8, kind: input, shape index: {}]   ;;  %s20834_s10 = inlined_call_operand.vmem [shape: bf16[3,2048,32], index: 10, kind: input, shape index: {}]   ;;  %s20835_s11 = inlined_call_operand.vmem [shape: f32[3,5,32], index: 11, kind: input, shape index: {}]   ;;  %s20836_s9 = inlined_call_operand.vmem [shape: f32[3,1,2048], index: 9, kind: input, shape index: {}]   ;;  %s20837_s4 = inlined_call_operand.vmem [shape: f32[35,128], index: 4, kind: input, shape index: {}]   ;;  %s20838_s2 = inlined_call_operand.vmem [shape: f32[4,32], index: 2, kind: input, shape index: {}]   ;;  %s20839_s1 = inlined_call_operand.vmem [shape: f32[16,2], index: 1, kind: input, shape index: {}]   ;;  %s20840_s3 = inlined_call_operand.vmem [shape: f32[32,32], index: 3, kind: input, shape index: {}]   ;;  %s20841_s16 = inlined_call_operand.vmem [shape: f32[16,2], index: 16, kind: output, shape index: {}]  }
   0x1   :  { %20846 = sst [smem:[#allocation2_spill]] %s20825_s12  ;;  %257 = vmatprep.mubr.bf16.mxu0 %v17224_v2  ;;  %308 = vmatprep.mubr.bf16.mxu1 %v17224_v2  ;;  %v169_v3 = vld [vmem:[%s20826_s0] sm:$0xff]  ;;  %v170_v8 = vld [vmem:[%s20826_s0 + $0x8] sm:$0xff]  ;;  %v171_v16 = vld [vmem:[%s20826_s0 + $0x10] sm:$0xff]  ;;  %vm20845_vm2 = vcmask 261120   ;;  %s17227_s0 = smov 96  }
   0x2   :  { %s20847_s23 = sld [smem:[#allocation2_spill]]  ;;  %v16540_v9 = vld [vmem:[%s20827_s13 + $0x40] sm:$0xff]   ;;  %v172_v12 = vpack.c.bf16 %v170_v8, %v169_v3  ;;  %v16544_v17 = vld [vmem:[%s20827_s13 + $0x48] sm:$0xff]   ;;  %v16548_v21 = vld [vmem:[%s20827_s13 + $0x50] sm:$0xff]   ;;  %v173_v22 = vpack.c.bf16 %v171_v16, %v171_v16  ;;  %v17442_v47 = vshrl.u32 %v54_v46, 7 }
   0x3   :  { %v16541_v13 = vld [vmem:[%s20827_s13 + $0xc0] sm:$0xff]   ;;  %v16545_v18 = vld [vmem:[%s20827_s13 + $0xc8] sm:$0xff]   ;;  %v16549_v23 = vld [vmem:[%s20827_s13 + $0xd0] sm:$0xff]  }
   0x4   :  { %v16542_v14 = vld [vmem:[%s20827_s13] sm:$0xff]   ;;  %v16546_v19 = vld [vmem:[%s20827_s13 + $0x8] sm:$0xff]   ;;  %v16550_v24 = vld [vmem:[%s20827_s13 + $0x10] sm:$0xff]   ;;  %v17445_v48 = vsub.s32 0, %v17442_v47  ;;  %v17448_v49 = vsub.s32 2, %v17442_v47  ;;  %v17454_v51 = vsub.s32 1, %v17442_v47 }
   0x5   :  { %v16543_v15 = vld [vmem:[%s20827_s13 + $0x80] sm:$0xff]   ;;  %v16547_v20 = vld [vmem:[%s20827_s13 + $0x88] sm:$0xff]   ;;  %v16551_v25 = vld [vmem:[%s20827_s13 + $0x90] sm:$0xff]   ;;  %v17457_v52 = vsub.s32 3, %v17442_v47 }
   0x6   :  { %v16552_v26 = vld [vmem:[%s20827_s13 + $0x58] sm:$0xff]   ;;  %v16556_v30 = vld [vmem:[%s20827_s13 + $0x60] sm:$0xff]   ;;  %v16560_v34 = vld [vmem:[%s20827_s13 + $0x68] sm:$0xff]  }
   0x7   :  { %v16553_v27 = vld [vmem:[%s20827_s13 + $0xd8] sm:$0xff]   ;;  %v16557_v31 = vld [vmem:[%s20827_s13 + $0xe0] sm:$0xff]   ;;  %v16561_v35 = vld [vmem:[%s20827_s13 + $0xe8] sm:$0xff]  }
   0x8   :  { %v90_v0 = vld [vmem:[%s20847_s23] sm:$0x33]  ;;  %v91_v1 = vld [vmem:[%s20847_s23 + $0x8] sm:$0x33]  ;;  %v16554_v28 = vld [vmem:[%s20827_s13 + $0x18] sm:$0xff]  }
   0x9   :  { %v13397_v4 = vcombine.high %v90_v0, %v90_v0  ;;  %v13399_v5 = vcombine.high %v91_v1, %v91_v1  ;;  %v13396_v6 = vcombine.low %v90_v0, %v90_v0  ;;  %v13398_v7 = vcombine.low %v91_v1, %v91_v1  ;;  %v16555_v29 = vld [vmem:[%s20827_s13 + $0x98] sm:$0xff]   ;;  %v16558_v32 = vld [vmem:[%s20827_s13 + $0x20] sm:$0xff]   ;;  %v16562_v36 = vld [vmem:[%s20827_s13 + $0x28] sm:$0xff]  }
   0xa   :  { %v16559_v33 = vld [vmem:[%s20827_s13 + $0xa0] sm:$0xff]   ;;  %v16563_v37 = vld [vmem:[%s20827_s13 + $0xa8] sm:$0xff]   ;;  %v16564_v38 = vld [vmem:[%s20827_s13 + $0x70] sm:$0xff]  }
   0xb   :  { %13400 = vmatprep.subr.msk.bf16.mxu0 %vm20843_vm0, %v13397_v4  ;;  %13403 = vmatprep.subr.msk.bf16.mxu1 %vm20843_vm0, %v13399_v5  ;;  %v214_v10 = vsel %vm20843_vm0, %v13396_v6, 0  ;;  %v220_v11 = vsel %vm20843_vm0, %v13398_v7, 0  ;;  %v16565_v39 = vld [vmem:[%s20827_s13 + $0xf0] sm:$0xff]   ;;  %v16568_v42 = vld [vmem:[%s20827_s13 + $0x78] sm:$0xff]  }
   0xc   :  { %226 = vmatpush1.bf16.msra.mxu0 %v214_v10  ;;  %277 = vmatpush1.bf16.msra.mxu1 %v220_v11  ;;  %v16566_v40 = vld [vmem:[%s20827_s13 + $0x30] sm:$0xff]   ;;  %v16569_v43 = vld [vmem:[%s20827_s13 + $0xf8] sm:$0xff]   ;;  %v166_v50 = vld [vmem:[%s20828_s14] ss:$2 sm:$0xf] }
   0xd   :  { %14816 = vmatprep.subr.bf16.mxu0 %v16540_v9  ;;  %14844 = vmatprep.subr.bf16.mxu1 %v16541_v13  ;;  %v16567_v41 = vld [vmem:[%s20827_s13 + $0xb0] sm:$0xff]   ;;  %v16570_v44 = vld [vmem:[%s20827_s13 + $0x38] sm:$0xff]   ;;  %v178_v53 = vrot.slane %v166_v50, %v17445_v48  ;;  %v186_v54 = vrot.slane %v166_v50, %v17448_v49  ;;  %v182_v55 = vrot.slane %v166_v50, %v17454_v51 }
   0xe   :  { %v16571_v45 = vld [vmem:[%s20827_s13 + $0xb8] sm:$0xff]   ;;  %v190_v56 = vrot.slane %v166_v50, %v17457_v52 }
   0xf   :  { %13401 = vmatmul.mubr.msk.bf16.vlgmr.msra.gmra.mrb[0].mxu0 %vm20844_vm1, %v172_v12  ;;  %13404 = vmatmul.mubr.msk.bf16.vlgmr.msra.gmra.mrb[0].mxu1 %vm20844_vm1, %v172_v12 }
  0x10   :  { %267 = vmatprep.mubr.bf16.mxu0 %v17224_v2  ;;  %318 = vmatprep.mubr.bf16.mxu1 %v17224_v2 }
  0x11   :  { %14817 = vmatpush3.bf16.msra.mxu0 %v16542_v14  ;;  %14845 = vmatpush3.bf16.msra.mxu1 %v16543_v15 }
  0x12   :  { %14818 = vmatprep.subr.bf16.mxu0 %v16544_v17  ;;  %14846 = vmatprep.subr.bf16.mxu1 %v16545_v18 }
  0x15   :  { %14819 = vmatpush3.bf16.msra.mxu0 %v16546_v19  ;;  %14847 = vmatpush3.bf16.msra.mxu1 %v16547_v20 }
  0x16   :  { %14820 = vmatprep.subr.bf16.mxu0 %v16548_v21  ;;  %14848 = vmatprep.subr.bf16.mxu1 %v16549_v23 }
  0x17   :  { %13402 = vmatmul.mubr.msk.bf16.gmra.mrb[4].mxu0 %vm20844_vm1, %v173_v22  ;;  %13405 = vmatmul.mubr.msk.bf16.gmra.mrb[4].mxu1 %vm20844_vm1, %v173_v22 }
  0x19   :  { %14821 = vmatpush3.bf16.msra.mxu0 %v16550_v24  ;;  %14849 = vmatpush3.bf16.msra.mxu1 %v16551_v25 }
  0x1a   :  { %14822 = vmatprep.subr.bf16.mxu0 %v16552_v26  ;;  %14850 = vmatprep.subr.bf16.mxu1 %v16553_v27 }
  0x1d   :  { %14823 = vmatpush3.bf16.msra.mxu0 %v16554_v28  ;;  %14851 = vmatpush3.bf16.msra.mxu1 %v16555_v29 }
  0x1e   :  { %14824 = vmatprep.subr.bf16.mxu0 %v16556_v30  ;;  %14852 = vmatprep.subr.bf16.mxu1 %v16557_v31 }
  0x21   :  { %14825 = vmatpush3.bf16.msra.mxu0 %v16558_v32  ;;  %14853 = vmatpush3.bf16.msra.mxu1 %v16559_v33 }
  0x22   :  { %14826 = vmatprep.subr.bf16.mxu0 %v16560_v34  ;;  %14854 = vmatprep.subr.bf16.mxu1 %v16561_v35 }
  0x25   :  { %14827 = vmatpush3.bf16.msra.mxu0 %v16562_v36  ;;  %14855 = vmatpush3.bf16.msra.mxu1 %v16563_v37 }
  0x26   :  { %14828 = vmatprep.subr.bf16.mxu0 %v16564_v38  ;;  %14856 = vmatprep.subr.bf16.mxu1 %v16565_v39 }
  0x29   :  { %14829 = vmatpush3.bf16.msra.mxu0 %v16566_v40  ;;  %14857 = vmatpush3.bf16.msra.mxu1 %v16567_v41 }
  0x2a   :  { %14830 = vmatprep.subr.bf16.mxu0 %v16568_v42  ;;  %14858 = vmatprep.subr.bf16.mxu1 %v16569_v43  ;;  %v16572_v42 = vld [vmem:[%s20829_s5] sm:$0xff]   ;;  %v16573_v43 = vld [vmem:[%s20829_s5 + $0x8] sm:$0xff]  }
  0x2d   :  { %14831 = vmatpush3.bf16.msra.mxu0 %v16570_v44  ;;  %14859 = vmatpush3.bf16.msra.mxu1 %v16571_v45  ;;  %v85_v44 = vld [vmem:[%s20830_s15] sm:$0x1f] }
  0x2e   :  { %15834 = vmatprep.subr.bf16.mxu0 %v16572_v42 }
  0xe2   :  { %v259_v57 = vpop.f32.mrb[0].mxu0  ;;  %v310_v58 = vpop.f32.mrb[0].mxu1 }
  0xe3   :  { %v260_v59 = vadd.f32 %v259_v57, %v178_v53  ;;  %v311_v60 = vadd.f32 %v310_v58, %v186_v54  ;;  %v261_v61 = vpop.f32.mrb[1].mxu0  ;;  %v312_v62 = vpop.f32.mrb[1].mxu1 }
  0xe4   :  { %v262_v63 = vadd.f32 %v261_v61, %v182_v55  ;;  %v313_v0 = vadd.f32 %v312_v62, %v190_v56  ;;  %v263_v1 = vpop.f32.mrb[2].mxu0  ;;  %v314_v3 = vpop.f32.mrb[2].mxu1 }
  0xe5   :  { %v329_v4 = vmax.f32 %v311_v60, 0.0  ;;  %v264_v5 = vadd.f32 %v263_v1, %v178_v53  ;;  %v315_v6 = vadd.f32 %v314_v3, %v186_v54  ;;  %v265_v7 = vpop.f32.mrb[3].mxu0  ;;  %v316_v8 = vpop.f32.mrb[3].mxu1  ;;  %v327_v12 = vmax.f32 %v260_v59, 0.0 }
  0xe6   :  { %v330_v9 = vmax.f32 %v313_v0, 0.0  ;;  %v266_v10 = vadd.f32 %v265_v7, %v182_v55  ;;  %v317_v11 = vadd.f32 %v316_v8, %v190_v56  ;;  %v328_v15 = vmax.f32 %v262_v63, 0.0 }
  0xe7   :  { %v331_v13 = vmax.f32 %v264_v5, 0.0  ;;  %v333_v14 = vmax.f32 %v315_v6, 0.0 }
  0xe8   :  { %v332_v16 = vmax.f32 %v266_v10, 0.0  ;;  %v334_v17 = vmax.f32 %v317_v11, 0.0 }
  0xe9   :  { %v339_v18 = vpack.c.bf16 %v331_v13, %v327_v12  ;;  %v341_v19 = vpack.c.bf16 %v333_v14, %v329_v4 }
  0xea   :  { %v269_v20 = vpop.f32.mrb[4].mxu0  ;;  %v320_v21 = vpop.f32.mrb[4].mxu1  ;;  %v340_v22 = vpack.c.bf16 %v332_v16, %v328_v15  ;;  %v342_v23 = vpack.c.bf16 %v334_v17, %v330_v9 }
  0xeb   :  { %v270_v24 = vadd.f32 %v269_v20, %v178_v53  ;;  %v271_v25 = vpop.f32.mrb[5].mxu0  ;;  %v321_v26 = vadd.f32 %v320_v21, %v186_v54  ;;  %v322_v27 = vpop.f32.mrb[5].mxu1  ;;  %v350_v53 = vrot.slane %v85_v44, %v17445_v48 }
  0xec   :  { %v272_v28 = vadd.f32 %v271_v25, %v182_v55  ;;  %v273_v29 = vpop.f32.mrb[6].mxu0  ;;  %v323_v30 = vadd.f32 %v322_v27, %v190_v56  ;;  %575 = vmatprep.mubr.bf16.mxu0 %v340_v22  ;;  %623 = vmatprep.mubr.bf16.mxu1 %v342_v23  ;;  %v324_v31 = vpop.f32.mrb[6].mxu1  ;;  %v56_v22 = vadd.s32 8, %v17442_v47  ;;  %v57_v23 = vadd.s32 16, %v17442_v47 }
  0xed   :  { %v337_v32 = vmax.f32 %v321_v26, 0.0  ;;  %v274_v33 = vpop.f32.mrb[7].mxu0  ;;  %576 = vmatmul.mubr.bf16.vlgmr.msra.gmra.mrb[8].mxu0 %v339_v18  ;;  %624 = vmatmul.mubr.bf16.vlgmr.msra.gmra.mrb[8].mxu1 %v341_v19  ;;  %v325_v34 = vpop.f32.mrb[7].mxu1  ;;  %v335_v37 = vmax.f32 %v270_v24, 0.0  ;;  %v60_v19 = vand.u32 127, %v54_v46  ;;  %v58_v24 = vadd.s32 24, %v17442_v47 }
  0xee   :  { %v336_v35 = vmax.f32 %v272_v28, 0.0  ;;  %v338_v36 = vmax.f32 %v323_v30, 0.0  ;;  %15835 = vmatpush3.bf16.msra.mxu0 %v16572_v42  ;;  %v79_v25 = vmul.u32 8, %v17442_v47  ;;  %v17225_v28 = vmov 1.0|1.0  }
  0xef   :  { %v345_v40 = vpack.c.bf16 %v337_v32, %v337_v32  ;;  %v343_v41 = vpack.c.bf16 %v335_v37, %v335_v37  ;;  %15836 = vmatprep.subr.bf16.mxu0 %v16573_v43  ;;  %v61_v20 = vmul.u32 8, %v60_v19  ;;  %v17226_v29 = vmov 0.0   ;;  %v17535_v31 = vld [vmem:[%s20831_s7] ss:$0 sm:$0xff] }
  0xf0   :  { %v344_v38 = vpack.c.bf16 %v336_v35, %v336_v35  ;;  %v346_v39 = vpack.c.bf16 %v338_v36, %v338_v36  ;;  %v81_v46 = vadd.s32 8, %v79_v25  ;;  %vm80_vm15 = vcmp.ge.s32.totalorder %v60_v19, %v79_v25 }
  0xf1   :  { %v66_v21 = vadd.s32 8, %v61_v20  ;;  %vm62_vm3 = vcmp.ge.s32.totalorder %v17442_v47, %v61_v20  ;;  %vm63_vm5 = vcmp.ge.s32.totalorder %v56_v22, %v61_v20  ;;  %vm64_vm7 = vcmp.ge.s32.totalorder %v57_v23, %v61_v20 }
  0xf2   :  { %583 = vmatprep.mubr.bf16.mxu0 %v344_v38  ;;  %631 = vmatprep.mubr.bf16.mxu1 %v346_v39  ;;  %vm65_vm9 = vcmp.ge.s32.totalorder %v58_v24, %v61_v20  ;;  %vm82_vm0 = vcmp.lt.s32.totalorder %v60_v19, %v81_v46 }
  0xf3   :  { %15837 = vmatpush3.bf16.msra.mxu0 %v16573_v43  ;;  %vm67_vm4 = vcmp.lt.s32.totalorder %v17442_v47, %v66_v21  ;;  %vm68_vm6 = vcmp.lt.s32.totalorder %v56_v22, %v66_v21  ;;  %vm69_vm8 = vcmp.lt.s32.totalorder %v57_v23, %v66_v21  ;;  %vm70_vm10 = vcmp.lt.s32.totalorder %v58_v24, %v66_v21 }
  0xf4   :  { %vm71_vm11 = vmand %vm62_vm3, %vm67_vm4  ;;  %vm20852_vm4 = vcmask 261120  }
  0xf5   :  { %584 = vmatmul.mubr.bf16.gmra.mrb[12].mxu0 %v343_v41  ;;  %632 = vmatmul.mubr.bf16.gmra.mrb[12].mxu1 %v345_v40  ;;  %vm72_vm12 = vmand %vm63_vm5, %vm68_vm6 }
  0xf6   :  { %vm73_vm13 = vmand %vm64_vm7, %vm69_vm8 }
  0xf7   :  { %vm74_vm14 = vmand %vm65_vm9, %vm70_vm10  ;;  %vm20858_vm10 = vcmask 31744  }
  0xf8   :  { %vm17492_vm1 = vmpackc.low %vm72_vm12, %vm71_vm11 }
  0xf9   :  { %vm83_vm3 = vmand %vm80_vm15, %vm82_vm0  ;;  %16336 = vmatprep.subr.msk.bf16.mxu1 %vm17492_vm1, %v17225_v28  ;;  %16344 = vmatprep.subr.msk.bf16.mxu0 %vm17492_vm1, %v17225_v28  ;;  %vm818_vm0 = vcmask 1043456  }
  0xfa   :  { %16338 = vmatpush3.bf16.msk.msra.mxu1 %vm17492_vm1, %v17225_v28  ;;  %v17519_v30 = vsel %vm83_vm3, 1.0, %v17226_v29  ;;  %vm20853_vm5 = vmmov %vm20852_vm4 }
  0xfb   :  { %vm20854_vm6 = vmmov %vm20852_vm4 }
  0xfc   :  { %vm20855_vm7 = vmmov %vm20852_vm4 }
  0xfd   :  { %vm20856_vm8 = vmmov %vm20852_vm4 }
  0xfe   :  { %vm20857_vm9 = vmmov %vm20852_vm4 }
  0xff   :  { %vm20859_vm11 = vmmov %vm20858_vm10 }
 0x100   :  { %vm20860_vm12 = vmmov %vm20858_vm10 }
 0x101   :  { %vm20863_vm15 = vmmov %vm20852_vm4 }
 0x102   :  { %vm20864_vm3 = vmmov %vm20858_vm10 }
 0x1c0   :  { %v14832_v45 = vpop.f32.mrb[8].mxu0  ;;  %v14860_v50 = vpop.f32.mrb[8].mxu1 }
 0x1c1   :  { %v14833_v54 = vpop.f32.mrb[9].mxu0  ;;  %v14861_v55 = vpop.f32.mrb[9].mxu1 }
 0x1c2   :  { %v14834_v56 = vadd.f32 %v14833_v54, %v14832_v45  ;;  %v14862_v57 = vadd.f32 %v14861_v55, %v14860_v50  ;;  %v14835_v58 = vpop.f32.mrb[10].mxu0  ;;  %v14863_v59 = vpop.f32.mrb[10].mxu1 }
 0x1c3   :  { %v14836_v60 = vpop.f32.mrb[11].mxu0  ;;  %v14864_v61 = vpop.f32.mrb[11].mxu1 }
 0x1c4   :  { %v578_v62 = vadd.f32 %v14834_v56, %v350_v53  ;;  %v14837_v63 = vadd.f32 %v14836_v60, %v14835_v58  ;;  %v14865_v0 = vadd.f32 %v14864_v61, %v14863_v59 }
 0x1c6   :  { %v17473_v1 = vadd.f32 %v14862_v57, %v578_v62  ;;  %v581_v3 = vadd.f32 %v14837_v63, %v350_v53 }
 0x1c8   :  { %v17475_v4 = vadd.f32 %v14865_v0, %v581_v3  ;;  %v14838_v5 = vpop.f32.mrb[12].mxu0  ;;  %v14866_v6 = vpop.f32.mrb[12].mxu1 }
 0x1c9   :  { %v14839_v7 = vpop.f32.mrb[13].mxu0  ;;  %v14867_v8 = vpop.f32.mrb[13].mxu1 }
 0x1ca   :  { %v14840_v9 = vadd.f32 %v14839_v7, %v14838_v5  ;;  %v14868_v10 = vadd.f32 %v14867_v8, %v14866_v6  ;;  %v14841_v11 = vpop.f32.mrb[14].mxu0  ;;  %v14869_v12 = vpop.f32.mrb[14].mxu1  ;;  %v648_v13 = vpack.c.bf16 %v17475_v4, %v17473_v1 }
 0x1cb   :  { %v14842_v14 = vpop.f32.mrb[15].mxu0  ;;  %v14870_v15 = vpop.f32.mrb[15].mxu1 }
 0x1cc   :  { %v586_v16 = vadd.f32 %v14840_v9, %v350_v53  ;;  %15838 = vmatprep.mubr.msk.bf16.mxu0 %vm20845_vm2, %v648_v13 }
 0x1ce   :  { %v17480_v17 = vadd.f32 %v14868_v10, %v586_v16 }
 0x1d0   :  { %v649_v18 = vpack.c.bf16 %v17480_v17, %v17480_v17 }
 0x1d2   :  { %15839 = vmatmul.mubr.msk.bf16.vlgmr.msra.gmra.mrb[16].mxu0 %vm20845_vm2, %v649_v18  ;;  %vm17496_vm2 = vmpackc.low %vm74_vm14, %vm73_vm13 }
 0x1d3   :  { %16346 = vmatpush3.bf16.msk.msra.mxu0 %vm17492_vm1, %v17225_v28  ;;  %16340 = vmatprep.subr.msk.bf16.mxu1 %vm17496_vm2, %v17225_v28  ;;  %vm20861_vm13 = vmmov %vm20858_vm10 }
 0x1d4   :  { %16348 = vmatprep.subr.msk.bf16.mxu0 %vm17496_vm2, %v17225_v28  ;;  %16342 = vmatpush3.bf16.msk.msra.mxu1 %vm17496_vm2, %v17225_v28  ;;  %vm20862_vm14 = vmmov %vm20852_vm4 }
 0x1d5   :  { %15864 = vmatprep.subr.msk.mxu1 %vm818_vm0, %v17519_v30 }
 0x1d7   :  { %16350 = vmatpush3.bf16.msk.msra.mxu0 %vm17496_vm2, %v17225_v28 }
 0x1d8   :  { %16352 = vmatprep.subr.msk.bf16.mxu0 %vm17492_vm1, %v17225_v28 }
 0x2a5   :  { %v15840_v32 = vpop.f32.mrb[16].mxu0 }
 0x2a6   :  { %v709_v33 = vpop.f32.mrb[17].mxu0  ;;  %v718_v34 = vadd.f32 %v15840_v32, %v17535_v31 }
 0x2a7   :  { %v710_v35 = vadd.f32 %v17535_v31, %v709_v33  ;;  %v15841_v36 = vpop.f32.mrb[18].mxu0 }
 0x2a8   :  { %v712_v37 = vpop.f32.mrb[19].mxu0  ;;  %v820_v40 = vrot.slane %v718_v34, 4  ;;  %v725_v61 = vmul.f32 0.35355338, %v718_v34 }
 0x2a9   :  { %v713_v38 = vadd.f32 %v17535_v31, %v712_v37  ;;  %728 = vrot.lane.b32.xlu0 %v710_v35, %s17227_s0  ;;  %v1116_v41 = vrot.slane %v710_v35, 4  ;;  %v723_v44 = vmul.f32 0.35355338, %v710_v35 }
 0x2ab   :  { %730 = vrot.lane.b32.xlu1 %v713_v38, %s17227_s0  ;;  %v819_v39 = vrot.slane %v713_v38, 4  ;;  %v724_v53 = vmul.f32 0.35355338, %v713_v38 }
 0x2ad   :  { %v821_v42 = vsel %vm818_vm0, %v819_v39, %v820_v40  ;;  %v1117_v43 = vsel %vm818_vm0, %v1116_v41, %v819_v39 }
 0x2ae   :  { %822 = vrot.lane.b32.xlu0 %v821_v42, %s17227_s0 }
 0x2af   :  { %824 = vrot.lane.b32.xlu1 %v820_v40, %s17227_s0 }
 0x2b2   :  { %1118 = vrot.lane.b32.xlu0 %v1116_v41, %s17227_s0 }
 0x2b3   :  { %1120 = vrot.lane.b32.xlu1 %v1117_v43, %s17227_s0 }
 0x2b6   :  { %1210 = vrot.lane.b32.xlu0 %v718_v34, %s17227_s0 }
 0x2b7   :  { %1015 = vrot.lane.b32.xlu1 %v710_v35, %s17228_s17 }
 0x2ba   :  { %1106 = vrot.lane.b32.xlu0 %v821_v42, %s17228_s17 }
 0x2bb   :  { %1017 = vrot.lane.b32.xlu1 %v713_v38, %s17228_s17 }
 0x2be   :  { %1108 = vrot.lane.b32.xlu0 %v820_v40, %s17228_s17 }
 0x2bf   :  { %1509 = vrot.lane.b32.xlu1 %v17535_v31, %s17229_s22 }
 0x31b   :  { %v729_v45 = vpop.permute.xlu0 %728 }
 0x31c   :  { %v734_v50 = vmul.f32 %v729_v45, %v723_v44 }
 0x31d   :  { %v731_v54 = vpop.permute.xlu1 %730 }
 0x31e   :  { %v735_v55 = vmul.f32 %v731_v54, %v724_v53  ;;  %15850 = vmatprep.mubr.msk.f32.mxu1 %vm20852_vm4, %v734_v50  ;;  %vm20865_vm4 = vmmov %vm20864_vm3 }
 0x320   :  { %v823_v56 = vpop.permute.xlu0 %822  ;;  %15851 = vmatmul.mubr.msk.f32.vlgmr.msra.gmra.mrb[16].mxu1 %vm20853_vm5, %v735_v55  ;;  %v1215_v9 = vrot.slane %v735_v55, 4  ;;  %vm20866_vm5 = vmmov %vm20864_vm3 }
 0x321   :  { %v828_v57 = vmul.f32 %v823_v56, %v723_v44  ;;  %v825_v58 = vpop.permute.xlu1 %824  ;;  %15865 = vmatpush3.msk.msra.mxu1 %vm818_vm0, %v17519_v30 }
 0x322   :  { %v829_v59 = vmul.f32 %v825_v58, %v724_v53  ;;  %15869 = vmatprep.subr.msk.mxu1 %vm818_vm0, %v17519_v30 }
 0x323   :  { %15861 = vmatprep.mubr.msk.f32.mxu0 %vm20854_vm6, %v828_v57  ;;  %vm20867_vm6 = vmmov %vm20864_vm3 }
 0x324   :  { %v1119_v60 = vpop.permute.xlu0 %1118  ;;  %15862 = vmatmul.mubr.msk.f32.vlgmr.msra.gmra.mrb[20].mxu0 %vm20855_vm7, %v829_v59 }
 0x325   :  { %v1124_v62 = vmul.f32 %v1119_v60, %v724_v53  ;;  %v1121_v63 = vpop.permute.xlu1 %1120  ;;  %16354 = vmatpush3.bf16.msk.msra.mxu0 %vm17492_vm1, %v17225_v28 }
 0x326   :  { %v1125_v0 = vmul.f32 %v1121_v63, %v725_v61  ;;  %16356 = vmatprep.subr.msk.bf16.mxu0 %vm17496_vm2, %v17225_v28 }
 0x327   :  { %v1128_v3 = vrot.slane %v1124_v62, 4 }
 0x328   :  { %v1129_v5 = vrot.slane %v1125_v0, 4  ;;  %v1211_v6 = vpop.permute.xlu0 %1210 }
 0x329   :  { %v1213_v7 = vmul.f32 %v1211_v6, %v725_v61  ;;  %16358 = vmatpush3.bf16.msk.msra.mxu0 %vm17496_vm2, %v17225_v28  ;;  %v17600_v50 = vpop.permute.xlu1 %1015 }
 0x32a   :  { %v1130_v8 = vsel %vm818_vm0, %v1128_v3, %v1129_v5 }
 0x32b   :  { %v1216_v10 = vrot.slane %v1213_v7, 4  ;;  %15882 = vmatprep.mubr.msk.f32.mxu0 %vm20856_vm8, %v1130_v8  ;;  %vm20868_vm8 = vmmov %vm20855_vm7 }
 0x32c   :  { %15883 = vmatmul.mubr.msk.f32.vlgmr.msra.gmra.mrb[22].mxu0 %vm20857_vm9, %v1129_v5  ;;  %v17602_v53 = vpop.permute.xlu0 %1106  ;;  %vm20869_vm9 = vmmov %vm20855_vm7 }
 0x32d   :  { %v1217_v11 = vsel %vm818_vm0, %v1215_v9, %v1216_v10  ;;  %v1018_v56 = vpop.permute.xlu1 %1017 }
 0x330   :  { %v1109_v57 = vpop.permute.xlu0 %1108 }
 0x3f3   :  { %v15852_v12 = vpop.f32.mrb[16].mxu1 }
 0x3f4   :  { %v808_v13 = vpop.f32.mrb[17].mxu1 }
 0x3f7   :  { %v15863_v14 = vpop.f32.mrb[20].mxu0 }
 0x3f8   :  { %v912_v15 = vmax.f32 %v15852_v12, %v15863_v14  ;;  %v902_v16 = vpop.f32.mrb[21].mxu0 }
 0x3f9   :  { %v911_v18 = vmax.f32 %v808_v13, %v902_v16 }
 0x3fa   :  { %v914_v19 = vsub.f32 %v15852_v12, %v912_v15  ;;  %v920_v20 = vsub.f32 %v15863_v14, %v912_v15 }
 0x3fb   :  { %v913_v21 = vsub.f32 %v808_v13, %v911_v18  ;;  %v919_v22 = vsub.f32 %v902_v16, %v911_v18 }
 0x3fc   :  { %v917_v23 = vmul.f32 1.442695, %v914_v19  ;;  %v923_v24 = vmul.f32 1.442695, %v920_v20 }
 0x3fd   :  { %v915_v25 = vmul.f32 1.442695, %v913_v21  ;;  %v921_v46 = vmul.f32 1.442695, %v919_v22 }
 0x3fe   :  { %16992 = vpow2.f32 %v917_v23 }
 0x3ff   :  { %16994 = vpow2.f32 %v923_v24  ;;  %v15884_v32 = vpop.f32.mrb[22].mxu0 }
 0x400   :  { %16996 = vpow2.f32 %v915_v25  ;;  %v1201_v33 = vpop.f32.mrb[23].mxu0 }
 0x401   :  { %16998 = vpow2.f32 %v921_v46 }
 0x408   :  { %v16993_v34 = vpop.eup %16992 }
 0x409   :  { %v16995_v35 = vpop.eup %16994 }
 0x40a   :  { %v16997_v36 = vpop.eup %16996  ;;  %v926_v37 = vadd.f32 %v16995_v35, %v16993_v34 }
 0x40b   :  { %v16999_v38 = vpop.eup %16998 }
 0x40c   :  { %17000 = vrcp.f32 %v926_v37  ;;  %v925_v39 = vadd.f32 %v16999_v38, %v16997_v36 }
 0x40e   :  { %17002 = vrcp.f32 %v925_v39 }
 0x416   :  { %v17001_v40 = vpop.eup %17000 }
 0x417   :  { %v930_v41 = vmul.f32 %v17001_v40, %v16993_v34  ;;  %v1024_v42 = vmul.f32 %v17001_v40, %v16995_v35  ;;  %v16574_v35 = vld [vmem:[%s20832_s6] sm:$0xff]  }
 0x418   :  { %v17003_v43 = vpop.eup %17002  ;;  %15906 = vmatprep.subr.bf16.mxu0 %v16574_v35 }
 0x419   :  { %v929_v44 = vmul.f32 %v17003_v43, %v16997_v36  ;;  %v1023_v45 = vmul.f32 %v17003_v43, %v16999_v38  ;;  %15907 = vmatpush3.bf16.msra.mxu0 %v16574_v35  ;;  %v16575_v36 = vld [vmem:[%s20832_s6 + $0x8] sm:$0xff]  }
 0x41a   :  { %15908 = vmatprep.subr.bf16.mxu0 %v16575_v36 }
 0x41b   :  { %15866 = vmatprep.mubr.msk.f32.mxu1 %vm20858_vm10, %v929_v44  ;;  %vm20870_vm10 = vmmov %vm20855_vm7 }
 0x41c   :  { %15867 = vmatmul.mubr.msk.f32.vlgmr.msra.gmra.mrb[18].mxu1 %vm20859_vm11, %v930_v41  ;;  %vm20871_vm11 = vmmov %vm20855_vm7 }
 0x41d   :  { %15870 = vmatpush3.msk.msra.mxu1 %vm818_vm0, %v17519_v30  ;;  %15871 = vmatprep.mubr.msk.f32.mxu1 %vm20860_vm12, %v1023_v45  ;;  %vm20872_vm12 = vmmov %vm20855_vm7 }
 0x41e   :  { %16360 = vmatprep.subr.msk.bf16.mxu1 %vm17492_vm1, %v17225_v28  ;;  %15909 = vmatpush3.bf16.msra.mxu0 %v16575_v36 }
 0x420   :  { %15872 = vmatmul.mubr.msk.f32.vlgmr.msra.gmra.mrb[20].mxu1 %vm20861_vm13, %v1024_v42  ;;  %vm20873_vm13 = vmmov %vm20855_vm7 }
 0x421   :  { %16362 = vmatpush3.bf16.msk.msra.mxu1 %vm17492_vm1, %v17225_v28  ;;  %15893 = vmatprep.mubr.msk.f32.mxu1 %vm20862_vm14, %v1217_v11  ;;  %vm20874_vm14 = vmmov %vm20855_vm7 }
 0x422   :  { %16364 = vmatprep.subr.msk.bf16.mxu1 %vm17496_vm2, %v17225_v28 }
 0x425   :  { %16366 = vmatpush3.bf16.msk.msra.mxu1 %vm17496_vm2, %v17225_v28 }
 0x426   :  { %15896 = vmatprep.subr.msk.mxu1 %vm818_vm0, %v17519_v30 }
 0x428   :  { %15894 = vmatmul.mubr.msk.f32.vlgmr.msra.gmra.mrb[22].mxu1 %vm20863_vm15, %v1216_v10  ;;  %vm20875_vm15 = vmmov %vm20855_vm7 }
 0x429   :  { %15897 = vmatpush3.msk.msra.mxu1 %vm818_vm0, %v17519_v30 }
 0x42a   :  { %15901 = vmatprep.subr.msk.mxu1 %vm818_vm0, %v17519_v30 }
 0x4ef   :  { %v15868_v54 = vpop.f32.mrb[18].mxu1 }
 0x4f0   :  { %v1006_v55 = vpop.f32.mrb[19].mxu1  ;;  %v1022_v59 = vmul.f32 %v15868_v54, %v1018_v56 }
 0x4f1   :  { %v1021_v62 = vmul.f32 %v17600_v50, %v1006_v55 }
 0x4f3   :  { %v15873_v58 = vpop.f32.mrb[20].mxu1 }
 0x4f4   :  { %v1113_v60 = vmul.f32 %v15873_v58, %v1109_v57  ;;  %v1097_v61 = vpop.f32.mrb[21].mxu1 }
 0x4f5   :  { %v1112_v63 = vmul.f32 %v17602_v53, %v1097_v61 }
 0x4f6   :  { %v1115_v0 = vadd.f32 %v1113_v60, %v1022_v59 }
 0x4f7   :  { %v17606_v3 = vadd.f32 %v1112_v63, %v1021_v62 }
 0x4fb   :  { %v15895_v5 = vpop.f32.mrb[22].mxu1 }
 0x4fc   :  { %v1298_v6 = vmax.f32 %v15884_v32, %v15895_v5  ;;  %v1288_v7 = vpop.f32.mrb[23].mxu1 }
 0x4fd   :  { %v1297_v8 = vmax.f32 %v1201_v33, %v1288_v7 }
 0x4fe   :  { %v1300_v9 = vsub.f32 %v15884_v32, %v1298_v6  ;;  %v1306_v10 = vsub.f32 %v15895_v5, %v1298_v6 }
 0x4ff   :  { %v1299_v11 = vsub.f32 %v1201_v33, %v1297_v8  ;;  %v1305_v12 = vsub.f32 %v1288_v7, %v1297_v8 }
 0x500   :  { %v1303_v13 = vmul.f32 1.442695, %v1300_v9  ;;  %v1309_v14 = vmul.f32 1.442695, %v1306_v10 }
 0x501   :  { %v1301_v15 = vmul.f32 1.442695, %v1299_v11  ;;  %v1307_v16 = vmul.f32 1.442695, %v1305_v12 }
 0x502   :  { %17004 = vpow2.f32 %v1303_v13 }
 0x503   :  { %17006 = vpow2.f32 %v1309_v14 }
 0x504   :  { %17008 = vpow2.f32 %v1301_v15 }
 0x505   :  { %17010 = vpow2.f32 %v1307_v16 }
 0x50c   :  { %v17005_v18 = vpop.eup %17004 }
 0x50d   :  { %v17007_v19 = vpop.eup %17006 }
 0x50e   :  { %v17009_v20 = vpop.eup %17008  ;;  %v1312_v21 = vadd.f32 %v17007_v19, %v17005_v18 }
 0x50f   :  { %v17011_v22 = vpop.eup %17010 }
 0x510   :  { %17012 = vrcp.f32 %v1312_v21  ;;  %v1311_v23 = vadd.f32 %v17011_v22, %v17009_v20 }
 0x512   :  { %17014 = vrcp.f32 %v1311_v23 }
 0x51a   :  { %v17013_v24 = vpop.eup %17012 }
 0x51b   :  { %v1316_v25 = vmul.f32 %v17013_v24, %v17005_v18  ;;  %v1401_v46 = vmul.f32 %v17013_v24, %v17007_v19  ;;  %v1624_v24 = vld [vmem:[%s20833_s8] sm:$0xff] }
 0x51c   :  { %v17015_v32 = vpop.eup %17014 }
 0x51d   :  { %v1315_v33 = vmul.f32 %v17015_v32, %v17009_v20  ;;  %v1400_v34 = vmul.f32 %v17015_v32, %v17011_v22 }
 0x51f   :  { %15898 = vmatprep.mubr.msk.f32.mxu1 %vm20864_vm3, %v1315_v33  ;;  %v1633_v33 = vld [vmem:[%s20833_s8 + $0x48] sm:$0xff]  ;;  %vm20876_vm3 = vmmov %vm20855_vm7 }
 0x520   :  { %15899 = vmatmul.mubr.msk.f32.vlgmr.msra.gmra.mrb[24].mxu1 %vm20865_vm4, %v1316_v25  ;;  %v1632_v25 = vld [vmem:[%s20833_s8 + $0x40] sm:$0xff]  ;;  %vm20877_vm4 = vmmov %vm20876_vm3 }
 0x521   :  { %15902 = vmatpush3.msk.msra.mxu1 %vm818_vm0, %v17519_v30  ;;  %15903 = vmatprep.mubr.msk.f32.mxu1 %vm20866_vm5, %v1400_v34  ;;  %v13484_v32 = vcombine.high %v1624_v24, %v1632_v25  ;;  %v13483_v34 = vcombine.low %v1624_v24, %v1632_v25  ;;  %v1636_v24 = vld [vmem:[%s20833_s8 + $0x60] sm:$0xff]  ;;  %v1629_v25 = vld [vmem:[%s20833_s8 + $0x28] sm:$0xff]  ;;  %vm20878_vm5 = vmmov %vm20876_vm3 }
 0x523   :  { %1908 = vmatprep.subr.bf16.mxu1 %v13484_v32 }
 0x524   :  { %15904 = vmatmul.mubr.msk.f32.vlgmr.msra.gmra.mrb[26].mxu1 %vm20867_vm6, %v1401_v46  ;;  %v1625_v46 = vld [vmem:[%s20833_s8 + $0x8] sm:$0xff]  ;;  %vm20879_vm6 = vmmov %vm20876_vm3 }
 0x525   :  { %1940 = vmatprep.mubr.bf16.mxu1 %v17224_v2  ;;  %v13485_v35 = vcombine.low %v1625_v46, %v1633_v33  ;;  %v13486_v36 = vcombine.high %v1625_v46, %v1633_v33  ;;  %1909 = vmatpush1.bf16.msra.mxu1 %v13483_v34  ;;  %v1637_v46 = vld [vmem:[%s20833_s8 + $0x68] sm:$0xff] }
 0x527   :  { %1959 = vmatprep.subr.bf16.mxu0 %v13486_v36 }
 0x5f3   :  { %v15900_v37 = vpop.f32.mrb[24].mxu1 }
 0x5f4   :  { %v1389_v38 = vpop.f32.mrb[25].mxu1  ;;  %v1399_v40 = vmul.f32 %v15900_v37, %v1018_v56  ;;  %v1640_v37 = vld [vmem:[%s20833_s8 + $0x80] sm:$0xff] }
 0x5f5   :  { %v1398_v43 = vmul.f32 %v1389_v38, %v17600_v50  ;;  %v1510_v50 = vpop.permute.xlu1 %1509  ;;  %v1648_v38 = vld [vmem:[%s20833_s8 + $0xc0] sm:$0xff] }
 0x5f7   :  { %v15905_v39 = vpop.f32.mrb[26].mxu1 }
 0x5f8   :  { %v1484_v41 = vmul.f32 %v15905_v39, %v1109_v57  ;;  %v1474_v42 = vpop.f32.mrb[27].mxu1  ;;  %v1641_v39 = vld [vmem:[%s20833_s8 + $0x88] sm:$0xff] }
 0x5f9   :  { %v1483_v44 = vmul.f32 %v1474_v42, %v17602_v53  ;;  %v13499_v42 = vcombine.low %v1640_v37, %v1648_v38 }
 0x5fa   :  { %v1486_v45 = vadd.f32 %v1484_v41, %v1399_v40  ;;  %v13500_v40 = vcombine.high %v1640_v37, %v1648_v38  ;;  %v1649_v41 = vld [vmem:[%s20833_s8 + $0xc8] sm:$0xff]  ;;  %v13494_v38 = vcombine.high %v1629_v25, %v1637_v46 }
 0x5fb   :  { %v1485_v54 = vadd.f32 %v1483_v44, %v1398_v43  ;;  %v13501_v43 = vcombine.low %v1641_v39, %v1649_v41  ;;  %v13502_v44 = vcombine.high %v1641_v39, %v1649_v41  ;;  %v1652_v41 = vld [vmem:[%s20833_s8 + $0xe0] sm:$0xff] }
 0x5fc   :  { %v1490_v55 = vrot.slane %v1486_v45, 4  ;;  %1910 = vmatprep.subr.bf16.mxu1 %v13500_v40  ;;  %v1626_v45 = vld [vmem:[%s20833_s8 + $0x10] sm:$0xff]  ;;  %v1644_v40 = vld [vmem:[%s20833_s8 + $0xa0] sm:$0xff] }
 0x5fd   :  { %v1489_v58 = vrot.slane %v1485_v54, 4  ;;  %1911 = vmatpush1.bf16.msra.mxu1 %v13499_v42  ;;  %v1634_v54 = vld [vmem:[%s20833_s8 + $0x50] sm:$0xff]  ;;  %v1645_v42 = vld [vmem:[%s20833_s8 + $0xa8] sm:$0xff] }
 0x5ff   :  { %v1491_v59 = vsel %vm818_vm0, %v1489_v58, %v1490_v55  ;;  %v1494_v60 = vsel %vm818_vm0, %v1115_v0, %v1489_v58  ;;  %v1627_v55 = vld [vmem:[%s20833_s8 + $0x18] sm:$0xff]  ;;  %v13488_v58 = vcombine.high %v1626_v45, %v1634_v54 }
 0x600   :  { %v1496_v61 = vpack.c.bf16 %v1491_v59, %v1491_v59  ;;  %v1495_v31 = vpack.c.bf16 %v1494_v60, %v17606_v3  ;;  %v1635_v59 = vld [vmem:[%s20833_s8 + $0x58] sm:$0xff]  ;;  %v13487_v60 = vcombine.low %v1626_v45, %v1634_v54  ;;  %v13493_v45 = vcombine.low %v1629_v25, %v1637_v46  ;;  %v1630_v54 = vld [vmem:[%s20833_s8 + $0x30] sm:$0xff]  ;;  %v16592_v46 = vld [vmem:[%s20834_s10 + $0x60] sm:$0xff]  }
 0x601   :  { %2010 = vmatprep.subr.bf16.mxu1 %v13488_v58  ;;  %v1631_v58 = vld [vmem:[%s20833_s8 + $0x38] sm:$0xff] }
 0x602   :  { %15910 = vmatprep.mubr.msk.bf16.mxu0 %vm20855_vm7, %v1495_v31  ;;  %v13490_v31 = vcombine.high %v1627_v55, %v1635_v59  ;;  %vm20880_vm7 = vmmov %vm20876_vm3  ;;  %v16591_v25 = vld [vmem:[%s20834_s10 + $0x98] sm:$0xff]  }
 0x603   :  { %15911 = vmatmul.mubr.msk.bf16.vlgmr.msra.gmra.mrb[24].mxu0 %vm20868_vm8, %v1496_v61  ;;  %v13489_v61 = vcombine.low %v1627_v55, %v1635_v59  ;;  %v1638_v55 = vld [vmem:[%s20833_s8 + $0x70] sm:$0xff]  ;;  %v1639_v59 = vld [vmem:[%s20833_s8 + $0x78] sm:$0xff]  ;;  %vm20881_vm8 = vmmov %vm20876_vm3 }
 0x604   :  { %1991 = vmatprep.mubr.bf16.mxu0 %v17224_v2  ;;  %1960 = vmatpush1.bf16.msra.mxu0 %v13485_v35 }
 0x605   :  { %1961 = vmatprep.subr.bf16.mxu0 %v13502_v44 }
 0x608   :  { %1962 = vmatpush1.bf16.msra.mxu0 %v13501_v43  ;;  %v1653_v43 = vld [vmem:[%s20833_s8 + $0xe8] sm:$0xff] }
 0x609   :  { %2061 = vmatprep.subr.bf16.mxu0 %v13490_v31  ;;  %v13507_v31 = vcombine.low %v1644_v40, %v1652_v41 }
 0x6d6   :  { %v15912_v56 = vpop.f32.mrb[24].mxu0 }
 0x6d7   :  { %v1552_v53 = vpop.f32.mrb[25].mxu0  ;;  %v1561_v57 = vadd.f32 %v15912_v56, %v1510_v50 }
 0x6d8   :  { %v1553_v62 = vadd.f32 %v1552_v53, %v1510_v50  ;;  %v15913_v63 = vpop.f32.mrb[26].mxu0 }
 0x6d9   :  { %v1555_v5 = vpop.f32.mrb[27].mxu0  ;;  %v1569_v8 = vadd.f32 %v1561_v57, %v17480_v17 }
 0x6da   :  { %v1556_v6 = vadd.f32 %v1555_v5, %v1510_v50  ;;  %v1567_v7 = vadd.f32 %v1553_v62, %v17473_v1 }
 0x6db   :  { %v1576_v10 = vsel %vm20871_vm11, %v1569_v8, 0.0  ;;  %vm20884_vm11 = vmmov %vm20876_vm3 }
 0x6dc   :  { %v1570_v0 = vsel %vm20869_vm9, %v1567_v7, 0.0  ;;  %v1568_v3 = vadd.f32 %v1556_v6, %v17475_v4  ;;  %vm20882_vm9 = vmmov %vm20876_vm3 }
 0x6dd   :  { %1571 = vadd.xlane.f32.xlu0 %v1570_v0  ;;  %v1566_v0 = vld [vmem:[%s20835_s11] sm:$0x1f] }
 0x6de   :  { %v1573_v9 = vsel %vm20870_vm10, %v1568_v3, 0.0  ;;  %vm20883_vm10 = vmmov %vm20876_vm3 }
 0x6df   :  { %1574 = vadd.xlane.f32.xlu1 %v1573_v9 }
 0x6e1   :  { %1577 = vadd.xlane.f32.xlu0 %v1576_v10 }
 0x76a   :  { %v1572_v11 = vpop.xlane.xlu0 %1571 }
 0x76b   :  { %v1580_v12 = vmul.f32 0.03125, %v1572_v11  ;;  %v1620_v11 = vrot.slane %v1566_v0, %v17448_v49 }
 0x76c   :  { %v1575_v13 = vpop.xlane.xlu1 %1574 }
 0x76d   :  { %v17637_v14 = vsub.f32 %v1567_v7, %v1580_v12  ;;  %v1581_v15 = vmul.f32 0.03125, %v1575_v13 }
 0x76e   :  { %v1578_v1 = vpop.xlane.xlu0 %1577 }
 0x76f   :  { %v17639_v16 = vsub.f32 %v1568_v3, %v1581_v15  ;;  %v1582_v18 = vmul.f32 0.03125, %v1578_v1  ;;  %v1586_v4 = vmul.f32 %v17637_v14, %v17637_v14  ;;  %v1613_v3 = vrot.slane %v1566_v0, %v17454_v51 }
 0x771   :  { %v17643_v17 = vsub.f32 %v1569_v8, %v1582_v18  ;;  %v1589_v19 = vsel %vm20872_vm12, %v1586_v4, 0.0  ;;  %v1587_v20 = vmul.f32 %v17639_v16, %v17639_v16  ;;  %v1642_v4 = vld [vmem:[%s20833_s8 + $0x90] sm:$0xff]  ;;  %vm20885_vm12 = vmmov %vm20876_vm3 }
 0x772   :  { %1590 = vadd.xlane.f32.xlu0 %v1589_v19  ;;  %v1650_v19 = vld [vmem:[%s20833_s8 + $0xd0] sm:$0xff] }
 0x773   :  { %v1592_v21 = vsel %vm20873_vm13, %v1587_v20, 0.0  ;;  %v1588_v22 = vmul.f32 %v17643_v17, %v17643_v17  ;;  %v13504_v32 = vcombine.high %v1642_v4, %v1650_v19  ;;  %v13503_v35 = vcombine.low %v1642_v4, %v1650_v19  ;;  %vm20886_vm13 = vmmov %vm20876_vm3  ;;  %v16583_v4 = vld [vmem:[%s20834_s10 + $0x88] sm:$0xff]   ;;  %v16584_v19 = vld [vmem:[%s20834_s10 + $0x50] sm:$0xff]  }
 0x774   :  { %1593 = vadd.xlane.f32.xlu1 %v1592_v21 }
 0x775   :  { %v1595_v23 = vsel %vm20874_vm14, %v1588_v22, 0.0  ;;  %vm20887_vm14 = vmmov %vm20876_vm3 }
 0x776   :  { %1596 = vadd.xlane.f32.xlu0 %v1595_v23  ;;  %v1628_v23 = vld [vmem:[%s20833_s8 + $0x20] sm:$0xff] }
 0x777   :  { %v13492_v37 = vcombine.high %v1628_v23, %v1636_v24  ;;  %v13491_v44 = vcombine.low %v1628_v23, %v1636_v24  ;;  %v16589_v23 = vld [vmem:[%s20834_s10 + $0xd8] sm:$0xff]  }
 0x778   :  { %v16590_v24 = vld [vmem:[%s20834_s10 + $0x18] sm:$0xff]  }
 0x7ff   :  { %v1591_v50 = vpop.xlane.xlu0 %1590 }
 0x800   :  { %v1598_v56 = vmul.f32 0.03125, %v1591_v50  ;;  %v13509_v50 = vcombine.low %v1645_v42, %v1653_v43 }
 0x801   :  { %v1594_v53 = vpop.xlane.xlu1 %1593 }
 0x802   :  { %v1601_v57 = vadd.f32 1e-05, %v1598_v56  ;;  %v1599_v62 = vmul.f32 0.03125, %v1594_v53  ;;  %v13496_v56 = vcombine.high %v1630_v54, %v1638_v55  ;;  %v13498_v53 = vcombine.high %v1631_v58, %v1639_v59 }
 0x803   :  { %v1597_v63 = vpop.xlane.xlu0 %1596 }
 0x804   :  { %17016 = vrsqrt.f32 %v1601_v57  ;;  %v1602_v5 = vadd.f32 1e-05, %v1599_v62  ;;  %v1600_v6 = vmul.f32 0.03125, %v1597_v63  ;;  %v1646_v57 = vld [vmem:[%s20833_s8 + $0xb0] sm:$0xff]  ;;  %v1647_v63 = vld [vmem:[%s20833_s8 + $0xb8] sm:$0xff] }
 0x805   :  { %v1654_v62 = vld [vmem:[%s20833_s8 + $0xf0] sm:$0xff] }
 0x806   :  { %17018 = vrsqrt.f32 %v1602_v5  ;;  %v1603_v7 = vadd.f32 1e-05, %v1600_v6  ;;  %v1655_v5 = vld [vmem:[%s20833_s8 + $0xf8] sm:$0xff]  ;;  %v13495_v6 = vcombine.low %v1630_v54, %v1638_v55  ;;  %v13512_v0 = vcombine.high %v1646_v57, %v1654_v62 }
 0x807   :  { %v16606_v54 = vld [vmem:[%s20834_s10 + $0x38] sm:$0xff]  }
 0x808   :  { %17020 = vrsqrt.f32 %v1603_v7  ;;  %v13497_v7 = vcombine.low %v1631_v58, %v1639_v59  ;;  %v16607_v55 = vld [vmem:[%s20834_s10 + $0xb8] sm:$0xff]   ;;  %v16608_v58 = vld [vmem:[%s20834_s10 + $0x140] sm:$0xff]  }
 0x809   :  { %v16609_v59 = vld [vmem:[%s20834_s10 + $0x1c0] sm:$0xff]  }
 0x80e   :  { %v17017_v8 = vpop.eup %17016 }
 0x80f   :  { %v1607_v9 = vmul.f32 %v17017_v8, %v17637_v14  ;;  %v1643_v14 = vld [vmem:[%s20833_s8 + $0x98] sm:$0xff]  ;;  %v16576_v8 = vld [vmem:[%s20834_s10 + $0x40] sm:$0xff]  }
 0x810   :  { %v17019_v10 = vpop.eup %17018 }
 0x811   :  { %v1614_v12 = vmul.f32 %v1613_v3, %v1607_v9  ;;  %v1608_v13 = vmul.f32 %v17019_v10, %v17639_v16  ;;  %v1651_v16 = vld [vmem:[%s20833_s8 + $0xd8] sm:$0xff]  ;;  %v16577_v9 = vld [vmem:[%s20834_s10 + $0xc0] sm:$0xff]   ;;  %v13511_v10 = vcombine.low %v1646_v57, %v1654_v62 }
 0x812   :  { %v17021_v15 = vpop.eup %17020  ;;  %v13506_v33 = vcombine.high %v1643_v14, %v1651_v16  ;;  %v13505_v36 = vcombine.low %v1643_v14, %v1651_v16  ;;  %v16585_v14 = vld [vmem:[%s20834_s10 + $0xd0] sm:$0xff]  }
 0x813   :  { %v1615_v1 = vmul.f32 %v1613_v3, %v1608_v13  ;;  %v1609_v18 = vmul.f32 %v17021_v15, %v17643_v17  ;;  %v17708_v20 = vadd.f32 %v1620_v11, %v1614_v12  ;;  %v16578_v12 = vld [vmem:[%s20834_s10] sm:$0xff]   ;;  %v16580_v15 = vld [vmem:[%s20834_s10 + $0x48] sm:$0xff]   ;;  %v16586_v16 = vld [vmem:[%s20834_s10 + $0x10] sm:$0xff]  }
 0x814   :  { %v16579_v13 = vld [vmem:[%s20834_s10 + $0x80] sm:$0xff]  }
 0x815   :  { %v17710_v21 = vadd.f32 %v1620_v11, %v1615_v1  ;;  %v1616_v22 = vmul.f32 %v1613_v3, %v1609_v18  ;;  %v13514_v3 = vcombine.high %v1647_v63, %v1655_v5  ;;  %v16581_v1 = vld [vmem:[%s20834_s10 + $0xc8] sm:$0xff]  }
 0x816   :  { %v16582_v18 = vld [vmem:[%s20834_s10 + $0x8] sm:$0xff]  }
 0x817   :  { %v17714_v17 = vpack.c.bf16 %v17710_v21, %v17708_v20  ;;  %v17734_v34 = vadd.f32 %v1620_v11, %v1616_v22  ;;  %v13513_v11 = vcombine.low %v1647_v63, %v1655_v5  ;;  %v16588_v22 = vld [vmem:[%s20834_s10 + $0x58] sm:$0xff]  }
 0x819   :  { %13515 = vmatmul.mubr.msk.bf16.vlgmr.msra.gmra.mrb[28].mxu1 %vm20875_vm15, %v17714_v17  ;;  %13517 = vmatmul.mubr.msk.bf16.vlgmr.msra.gmra.mrb[28].mxu0 %vm20876_vm3, %v17714_v17  ;;  %v17738_v39 = vpack.c.bf16 %v17734_v34, %v17734_v34  ;;  %vm20888_vm15 = vmmov %vm20876_vm3 }
 0x81a   :  { %1950 = vmatprep.mubr.bf16.mxu1 %v17224_v2  ;;  %2001 = vmatprep.mubr.bf16.mxu0 %v17224_v2 }
 0x81b   :  { %2011 = vmatpush1.bf16.msra.mxu1 %v13487_v60  ;;  %2062 = vmatpush1.bf16.msra.mxu0 %v13489_v61  ;;  %v13508_v60 = vcombine.high %v1644_v40, %v1652_v41  ;;  %v13510_v61 = vcombine.high %v1645_v42, %v1653_v43  ;;  %v16600_v40 = vld [vmem:[%s20834_s10 + $0x70] sm:$0xff]  }
 0x81c   :  { %2012 = vmatprep.subr.bf16.mxu1 %v13504_v32  ;;  %2063 = vmatprep.subr.bf16.mxu0 %v13506_v33  ;;  %v16593_v32 = vld [vmem:[%s20834_s10 + $0xe0] sm:$0xff]   ;;  %v16601_v41 = vld [vmem:[%s20834_s10 + $0xf0] sm:$0xff]  }
 0x81d   :  { %v16594_v33 = vld [vmem:[%s20834_s10 + $0x20] sm:$0xff]   ;;  %v16602_v42 = vld [vmem:[%s20834_s10 + $0x30] sm:$0xff]  }
 0x81e   :  { %v16603_v43 = vld [vmem:[%s20834_s10 + $0xb0] sm:$0xff]  }
 0x81f   :  { %2013 = vmatpush1.bf16.msra.mxu1 %v13503_v35  ;;  %2064 = vmatpush1.bf16.msra.mxu0 %v13505_v36  ;;  %v16595_v35 = vld [vmem:[%s20834_s10 + $0xa0] sm:$0xff]   ;;  %v16596_v36 = vld [vmem:[%s20834_s10 + $0x68] sm:$0xff]  }
 0x820   :  { %2112 = vmatprep.subr.bf16.mxu1 %v13492_v37  ;;  %2163 = vmatprep.subr.bf16.mxu0 %v13494_v38  ;;  %v16597_v37 = vld [vmem:[%s20834_s10 + $0xe8] sm:$0xff]  }
 0x821   :  { %13516 = vmatmul.mubr.msk.bf16.gmra.mrb[32].mxu1 %vm20877_vm4, %v17738_v39  ;;  %13518 = vmatmul.mubr.msk.bf16.gmra.mrb[32].mxu0 %vm20878_vm5, %v17738_v39  ;;  %vm20889_vm4 = vmmov %vm20876_vm3  ;;  %v16598_v38 = vld [vmem:[%s20834_s10 + $0x28] sm:$0xff]  }
 0x822   :  { %2042 = vmatprep.mubr.bf16.mxu1 %v17224_v2  ;;  %2093 = vmatprep.mubr.bf16.mxu0 %v17224_v2  ;;  %vm20890_vm5 = vmmov %vm20876_vm3 }
 0x829   :  { %13519 = vmatmul.mubr.msk.bf16.vlgmr.msra.gmra.mrb[36].mxu1 %vm20879_vm6, %v17714_v17  ;;  %13521 = vmatmul.mubr.msk.bf16.vlgmr.msra.gmra.mrb[36].mxu0 %vm20880_vm7, %v17714_v17  ;;  %vm20891_vm6 = vmmov %vm20876_vm3 }
 0x82a   :  { %2052 = vmatprep.mubr.bf16.mxu1 %v17224_v2  ;;  %2103 = vmatprep.mubr.bf16.mxu0 %v17224_v2  ;;  %vm20892_vm7 = vmmov %vm20876_vm3 }
 0x82b   :  { %2113 = vmatpush1.bf16.msra.mxu1 %v13491_v44  ;;  %2164 = vmatpush1.bf16.msra.mxu0 %v13493_v45  ;;  %v16604_v44 = vld [vmem:[%s20834_s10 + $0x78] sm:$0xff]  }
 0x82c   :  { %2114 = vmatprep.subr.bf16.mxu1 %v13508_v60  ;;  %2165 = vmatprep.subr.bf16.mxu0 %v13510_v61  ;;  %v16605_v45 = vld [vmem:[%s20834_s10 + $0xf8] sm:$0xff]   ;;  %v17919_v60 = vsub.s32 4, %v17442_v47  ;;  %v17922_v61 = vsub.s32 6, %v17442_v47 }
 0x82f   :  { %2115 = vmatpush1.bf16.msra.mxu1 %v13507_v31  ;;  %2166 = vmatpush1.bf16.msra.mxu0 %v13509_v50  ;;  %v17925_v31 = vsub.s32 5, %v17442_v47  ;;  %v17928_v50 = vsub.s32 7, %v17442_v47 }
 0x830   :  { %2214 = vmatprep.subr.bf16.mxu1 %v13496_v56  ;;  %2265 = vmatprep.subr.bf16.mxu0 %v13498_v53  ;;  %v17933_v56 = vld [vmem:[%s20836_s9] sm:$0xff] }
 0x831   :  { %13520 = vmatmul.mubr.msk.bf16.gmra.mrb[40].mxu1 %vm20881_vm8, %v17738_v39  ;;  %13522 = vmatmul.mubr.msk.bf16.gmra.mrb[40].mxu0 %vm20882_vm9, %v17738_v39  ;;  %v1665_v53 = vrot.slane %v17933_v56, %v17445_v48  ;;  %v1673_v57 = vrot.slane %v17933_v56, %v17448_v49  ;;  %v1669_v62 = vrot.slane %v17933_v56, %v17454_v51  ;;  %vm20893_vm8 = vmmov %vm20876_vm3 }
 0x832   :  { %2144 = vmatprep.mubr.bf16.mxu1 %v17224_v2  ;;  %2195 = vmatprep.mubr.bf16.mxu0 %v17224_v2  ;;  %v1677_v63 = vrot.slane %v17933_v56, %v17457_v52  ;;  %vm20894_vm9 = vmmov %vm20876_vm3 }
 0x839   :  { %13523 = vmatmul.mubr.msk.bf16.vlgmr.msra.gmra.mrb[44].mxu1 %vm20883_vm10, %v17714_v17  ;;  %13525 = vmatmul.mubr.msk.bf16.vlgmr.msra.gmra.mrb[44].mxu0 %vm20884_vm11, %v17714_v17  ;;  %vm20895_vm10 = vmmov %vm20876_vm3 }
 0x83a   :  { %2154 = vmatprep.mubr.bf16.mxu1 %v17224_v2  ;;  %2205 = vmatprep.mubr.bf16.mxu0 %v17224_v2  ;;  %vm20896_vm11 = vmmov %vm20876_vm3 }
 0x83b   :  { %2215 = vmatpush1.bf16.msra.mxu1 %v13495_v6  ;;  %2266 = vmatpush1.bf16.msra.mxu0 %v13497_v7 }
 0x83c   :  { %2216 = vmatprep.subr.bf16.mxu1 %v13512_v0  ;;  %2267 = vmatprep.subr.bf16.mxu0 %v13514_v3 }
 0x83f   :  { %2217 = vmatpush1.bf16.msra.mxu1 %v13511_v10  ;;  %2268 = vmatpush1.bf16.msra.mxu0 %v13513_v11 }
 0x840   :  { %14916 = vmatprep.subr.bf16.mxu1 %v16576_v8  ;;  %14944 = vmatprep.subr.bf16.mxu0 %v16577_v9 }
 0x841   :  { %13524 = vmatmul.mubr.msk.bf16.gmra.mrb[48].mxu1 %vm20885_vm12, %v17738_v39  ;;  %13526 = vmatmul.mubr.msk.bf16.gmra.mrb[48].mxu0 %vm20886_vm13, %v17738_v39  ;;  %vm20897_vm12 = vmmov %vm20876_vm3 }
 0x842   :  { %2246 = vmatprep.mubr.bf16.mxu1 %v17224_v2  ;;  %2297 = vmatprep.mubr.bf16.mxu0 %v17224_v2  ;;  %vm20898_vm13 = vmmov %vm20876_vm3 }
 0x849   :  { %13527 = vmatmul.mubr.msk.bf16.vlgmr.msra.gmra.mrb[52].mxu1 %vm20887_vm14, %v17714_v17  ;;  %13529 = vmatmul.mubr.msk.bf16.vlgmr.msra.gmra.mrb[52].mxu0 %vm20888_vm15, %v17714_v17  ;;  %v16587_v17 = vld [vmem:[%s20834_s10 + $0x90] sm:$0xff]   ;;  %vm20899_vm14 = vmmov %vm20876_vm3 }
 0x84a   :  { %2256 = vmatprep.mubr.bf16.mxu1 %v17224_v2  ;;  %2307 = vmatprep.mubr.bf16.mxu0 %v17224_v2  ;;  %vm20900_vm15 = vmmov %vm20876_vm3 }
 0x84b   :  { %14917 = vmatpush3.bf16.msra.mxu1 %v16578_v12  ;;  %14945 = vmatpush3.bf16.msra.mxu0 %v16579_v13 }
 0x84c   :  { %14918 = vmatprep.subr.bf16.mxu1 %v16580_v15  ;;  %14946 = vmatprep.subr.bf16.mxu0 %v16581_v1 }
 0x84f   :  { %14919 = vmatpush3.bf16.msra.mxu1 %v16582_v18  ;;  %14947 = vmatpush3.bf16.msra.mxu0 %v16583_v4 }
 0x850   :  { %14920 = vmatprep.subr.bf16.mxu1 %v16584_v19  ;;  %14948 = vmatprep.subr.bf16.mxu0 %v16585_v14 }
 0x851   :  { %13528 = vmatmul.mubr.msk.bf16.gmra.mrb[56].mxu1 %vm20876_vm3, %v17738_v39  ;;  %13530 = vmatmul.mubr.msk.bf16.gmra.mrb[56].mxu0 %vm20889_vm4, %v17738_v39  ;;  %v16599_v39 = vld [vmem:[%s20834_s10 + $0xa8] sm:$0xff]   ;;  %vm20901_vm4 = vcmask 31744  }
 0x853   :  { %14921 = vmatpush3.bf16.msra.mxu1 %v16586_v16  ;;  %14949 = vmatpush3.bf16.msra.mxu0 %v16587_v17 }
 0x854   :  { %14922 = vmatprep.subr.bf16.mxu1 %v16588_v22  ;;  %14950 = vmatprep.subr.bf16.mxu0 %v16589_v23 }
 0x857   :  { %14923 = vmatpush3.bf16.msra.mxu1 %v16590_v24  ;;  %14951 = vmatpush3.bf16.msra.mxu0 %v16591_v25 }
 0x858   :  { %14924 = vmatprep.subr.bf16.mxu1 %v16592_v46  ;;  %14952 = vmatprep.subr.bf16.mxu0 %v16593_v32  ;;  %v16610_v46 = vld [vmem:[%s20834_s10 + $0x100] sm:$0xff]  }
 0x859   :  { %v16611_v32 = vld [vmem:[%s20834_s10 + $0x180] sm:$0xff]  }
 0x85b   :  { %14925 = vmatpush3.bf16.msra.mxu1 %v16594_v33  ;;  %14953 = vmatpush3.bf16.msra.mxu0 %v16595_v35 }
 0x85c   :  { %14926 = vmatprep.subr.bf16.mxu1 %v16596_v36  ;;  %14954 = vmatprep.subr.bf16.mxu0 %v16597_v37  ;;  %v16612_v36 = vld [vmem:[%s20834_s10 + $0x148] sm:$0xff]  }
 0x85d   :  { %v16613_v37 = vld [vmem:[%s20834_s10 + $0x1c8] sm:$0xff]  }
 0x85f   :  { %14927 = vmatpush3.bf16.msra.mxu1 %v16598_v38  ;;  %14955 = vmatpush3.bf16.msra.mxu0 %v16599_v39 }
 0x860   :  { %14928 = vmatprep.subr.bf16.mxu1 %v16600_v40  ;;  %14956 = vmatprep.subr.bf16.mxu0 %v16601_v41 }
 0x863   :  { %14929 = vmatpush3.bf16.msra.mxu1 %v16602_v42  ;;  %14957 = vmatpush3.bf16.msra.mxu0 %v16603_v43 }
 0x864   :  { %14930 = vmatprep.subr.bf16.mxu1 %v16604_v44  ;;  %14958 = vmatprep.subr.bf16.mxu0 %v16605_v45 }
 0x867   :  { %14931 = vmatpush3.bf16.msra.mxu1 %v16606_v54  ;;  %14959 = vmatpush3.bf16.msra.mxu0 %v16607_v55 }
 0x868   :  { %14972 = vmatprep.subr.bf16.mxu1 %v16608_v58  ;;  %15000 = vmatprep.subr.bf16.mxu0 %v16609_v59 }
 0x8ec   :  { %v1942_v5 = vpop.f32.mrb[28].mxu1  ;;  %v1993_v47 = vpop.f32.mrb[28].mxu0 }
 0x8ed   :  { %v1943_v6 = vadd.f32 %v1942_v5, %v1665_v53  ;;  %v1994_v7 = vadd.f32 %v1993_v47, %v1673_v57  ;;  %v1944_v0 = vpop.f32.mrb[29].mxu1  ;;  %v1995_v3 = vpop.f32.mrb[29].mxu0  ;;  %v16614_v5 = vld [vmem:[%s20834_s10 + $0x108] sm:$0xff]  }
 0x8ee   :  { %v1945_v8 = vadd.f32 %v1944_v0, %v1669_v62  ;;  %v1996_v9 = vadd.f32 %v1995_v3, %v1677_v63  ;;  %v1946_v10 = vpop.f32.mrb[30].mxu1  ;;  %v1997_v11 = vpop.f32.mrb[30].mxu0  ;;  %v16615_v47 = vld [vmem:[%s20834_s10 + $0x188] sm:$0xff]   ;;  %v16616_v0 = vld [vmem:[%s20834_s10 + $0x150] sm:$0xff]  }
 0x8ef   :  { %v2316_v12 = vmax.f32 %v1943_v6, 0.0  ;;  %v2318_v13 = vmax.f32 %v1994_v7, 0.0  ;;  %v1947_v15 = vadd.f32 %v1946_v10, %v1665_v53  ;;  %v1998_v1 = vadd.f32 %v1997_v11, %v1673_v57  ;;  %v1948_v18 = vpop.f32.mrb[31].mxu1  ;;  %v1999_v4 = vpop.f32.mrb[31].mxu0  ;;  %v16617_v3 = vld [vmem:[%s20834_s10 + $0x1d0] sm:$0xff]  }
 0x8f0   :  { %v2317_v19 = vmax.f32 %v1945_v8, 0.0  ;;  %v2319_v14 = vmax.f32 %v1996_v9, 0.0  ;;  %v1949_v16 = vadd.f32 %v1948_v18, %v1669_v62  ;;  %v2000_v17 = vadd.f32 %v1999_v4, %v1677_v63  ;;  %v16620_v18 = vld [vmem:[%s20834_s10 + $0x158] sm:$0xff]  }
 0x8f1   :  { %v2332_v22 = vmax.f32 %v1947_v15, 0.0  ;;  %v2334_v23 = vmax.f32 %v1998_v1, 0.0  ;;  %v17969_v8 = vrot.slane %v17933_v56, %v17919_v60  ;;  %v17973_v9 = vrot.slane %v17933_v56, %v17922_v61  ;;  %v16618_v15 = vld [vmem:[%s20834_s10 + $0x110] sm:$0xff]   ;;  %v16621_v4 = vld [vmem:[%s20834_s10 + $0x1d8] sm:$0xff]  }
 0x8f2   :  { %v2333_v24 = vmax.f32 %v1949_v16, 0.0  ;;  %v2335_v25 = vmax.f32 %v2000_v17, 0.0  ;;  %v16619_v1 = vld [vmem:[%s20834_s10 + $0x190] sm:$0xff]  }
 0x8f3   :  { %v2620_v33 = vpack.c.bf16 %v2332_v22, %v2316_v12  ;;  %v2622_v35 = vpack.c.bf16 %v2334_v23, %v2318_v13  ;;  %v17977_v12 = vrot.slane %v17933_v56, %v17925_v31  ;;  %v17981_v13 = vrot.slane %v17933_v56, %v17928_v50 }
 0x8f4   :  { %v1952_v38 = vpop.f32.mrb[32].mxu1  ;;  %v2003_v39 = vpop.f32.mrb[32].mxu0  ;;  %v2621_v40 = vpack.c.bf16 %v2333_v24, %v2317_v19  ;;  %v2623_v41 = vpack.c.bf16 %v2335_v25, %v2319_v14 }
 0x8f5   :  { %v1953_v42 = vadd.f32 %v1952_v38, %v1665_v53  ;;  %v2004_v43 = vadd.f32 %v2003_v39, %v1673_v57  ;;  %v1954_v44 = vpop.f32.mrb[33].mxu1  ;;  %v2005_v45 = vpop.f32.mrb[33].mxu0 }
 0x8f6   :  { %v1955_v54 = vadd.f32 %v1954_v44, %v1669_v62  ;;  %v2006_v55 = vadd.f32 %v2005_v45, %v1677_v63  ;;  %v1956_v58 = vpop.f32.mrb[34].mxu1  ;;  %v2007_v59 = vpop.f32.mrb[34].mxu0  ;;  %3456 = vmatprep.mubr.bf16.mxu1 %v2621_v40  ;;  %3504 = vmatprep.mubr.bf16.mxu0 %v2623_v41  ;;  %v16625_v44 = vld [vmem:[%s20834_s10 + $0x1e0] sm:$0xff]  }
 0x8f7   :  { %v2348_v6 = vmax.f32 %v1953_v42, 0.0  ;;  %v2350_v7 = vmax.f32 %v2004_v43, 0.0  ;;  %v1957_v53 = vpop.f32.mrb[35].mxu1  ;;  %v2008_v57 = vpop.f32.mrb[35].mxu0  ;;  %3457 = vmatmul.mubr.bf16.vlgmr.msra.gmra.mrb[60].mxu1 %v2620_v33  ;;  %3505 = vmatmul.mubr.bf16.vlgmr.msra.gmra.mrb[60].mxu0 %v2622_v35  ;;  %v16622_v35 = vld [vmem:[%s20834_s10 + $0x118] sm:$0xff]   ;;  %v16624_v43 = vld [vmem:[%s20834_s10 + $0x160] sm:$0xff]  }
 0x8f8   :  { %v2349_v62 = vmax.f32 %v1955_v54, 0.0  ;;  %v2351_v63 = vmax.f32 %v2006_v55, 0.0  ;;  %14973 = vmatpush3.bf16.msra.mxu1 %v16610_v46  ;;  %15001 = vmatpush3.bf16.msra.mxu0 %v16611_v32  ;;  %v16627_v53 = vld [vmem:[%s20834_s10 + $0x1a0] sm:$0xff]  }
 0x8f9   :  { %14974 = vmatprep.subr.bf16.mxu1 %v16612_v36  ;;  %15002 = vmatprep.subr.bf16.mxu0 %v16613_v37  ;;  %v2636_v19 = vpack.c.bf16 %v2348_v6, %v2348_v6  ;;  %v2638_v16 = vpack.c.bf16 %v2350_v7, %v2350_v7  ;;  %v16623_v36 = vld [vmem:[%s20834_s10 + $0x198] sm:$0xff]   ;;  %v16626_v7 = vld [vmem:[%s20834_s10 + $0x120] sm:$0xff]  }
 0x8fa   :  { %v2637_v10 = vpack.c.bf16 %v2349_v62, %v2349_v62  ;;  %v2639_v11 = vpack.c.bf16 %v2351_v63, %v2351_v63  ;;  %v16628_v63 = vld [vmem:[%s20834_s10 + $0x168] sm:$0xff]  }
 0x8fc   :  { %14975 = vmatpush3.bf16.msra.mxu1 %v16614_v5  ;;  %15003 = vmatpush3.bf16.msra.mxu0 %v16615_v47  ;;  %v2044_v56 = vpop.f32.mrb[36].mxu1  ;;  %v2095_v14 = vpop.f32.mrb[36].mxu0 }
 0x8fd   :  { %v2045_v17 = vadd.f32 %v2044_v56, %v17969_v8  ;;  %v2096_v22 = vadd.f32 %v2095_v14, %v17973_v9  ;;  %3464 = vmatprep.mubr.bf16.mxu1 %v2637_v10  ;;  %3512 = vmatprep.mubr.bf16.mxu0 %v2639_v11  ;;  %v2046_v23 = vpop.f32.mrb[37].mxu1  ;;  %v2097_v24 = vpop.f32.mrb[37].mxu0 }
 0x8fe   :  { %v2047_v25 = vadd.f32 %v2046_v23, %v17977_v12  ;;  %v2098_v46 = vadd.f32 %v2097_v24, %v17981_v13  ;;  %v2048_v32 = vpop.f32.mrb[38].mxu1  ;;  %v2099_v33 = vpop.f32.mrb[38].mxu0  ;;  %14976 = vmatprep.subr.bf16.mxu1 %v16616_v0  ;;  %15004 = vmatprep.subr.bf16.mxu0 %v16617_v3  ;;  %v16629_v0 = vld [vmem:[%s20834_s10 + $0x1e8] sm:$0xff]  }
 0x8ff   :  { %v2320_v37 = vmax.f32 %v2045_v17, 0.0  ;;  %v2322_v38 = vmax.f32 %v2096_v22, 0.0  ;;  %v2049_v39 = vadd.f32 %v2048_v32, %v17969_v8  ;;  %v2100_v40 = vadd.f32 %v2099_v33, %v17973_v9  ;;  %v2050_v41 = vpop.f32.mrb[39].mxu1  ;;  %v2101_v42 = vpop.f32.mrb[39].mxu0  ;;  %3465 = vmatmul.mubr.bf16.gmra.mrb[64].mxu1 %v2636_v19  ;;  %3513 = vmatmul.mubr.bf16.gmra.mrb[64].mxu0 %v2638_v16  ;;  %v16630_v17 = vld [vmem:[%s20834_s10 + $0x128] sm:$0xff]  }
 0x900   :  { %v2321_v45 = vmax.f32 %v2047_v25, 0.0  ;;  %v2323_v54 = vmax.f32 %v2098_v46, 0.0  ;;  %v2051_v55 = vadd.f32 %v2050_v41, %v17977_v12  ;;  %v2102_v58 = vadd.f32 %v2101_v42, %v17981_v13  ;;  %14977 = vmatpush3.bf16.msra.mxu1 %v16618_v15  ;;  %15005 = vmatpush3.bf16.msra.mxu0 %v16619_v1  ;;  %v18038_v1 = vld [vmem:[%s20836_s9 + $0x8] sm:$0xff]  ;;  %v16632_v25 = vld [vmem:[%s20834_s10 + $0x170] sm:$0xff]  }
 0x901   :  { %v2336_v59 = vmax.f32 %v2049_v39, 0.0  ;;  %v2338_v5 = vmax.f32 %v2100_v40, 0.0  ;;  %14978 = vmatprep.subr.bf16.mxu1 %v16620_v18  ;;  %15006 = vmatprep.subr.bf16.mxu0 %v16621_v4  ;;  %v16631_v22 = vld [vmem:[%s20834_s10 + $0x1a8] sm:$0xff]   ;;  %v18048_v23 = vrot.slane %v18038_v1, %v17445_v48  ;;  %v18052_v24 = vrot.slane %v18038_v1, %v17448_v49  ;;  %v16633_v46 = vld [vmem:[%s20834_s10 + $0x1f0] sm:$0xff]  }
 0x902   :  { %v2337_v47 = vmax.f32 %v2051_v55, 0.0  ;;  %v2339_v6 = vmax.f32 %v2102_v58, 0.0  ;;  %v18062_v32 = vrot.slane %v18038_v1, %v17454_v51  ;;  %v18066_v33 = vrot.slane %v18038_v1, %v17457_v52  ;;  %v16634_v39 = vld [vmem:[%s20834_s10 + $0x130] sm:$0xff]  }
 0x903   :  { %v18021_v57 = vpack.c.bf16 %v2336_v59, %v2320_v37  ;;  %v18023_v62 = vpack.c.bf16 %v2338_v5, %v2322_v38  ;;  %v16635_v40 = vld [vmem:[%s20834_s10 + $0x1b0] sm:$0xff]  }
 0x904   :  { %v2625_v3 = vpack.c.bf16 %v2337_v47, %v2321_v45  ;;  %v2627_v10 = vpack.c.bf16 %v2339_v6, %v2323_v54  ;;  %14979 = vmatpush3.bf16.msra.mxu1 %v16622_v35  ;;  %15007 = vmatpush3.bf16.msra.mxu0 %v16623_v36  ;;  %v18031_v11 = vpop.f32.mrb[40].mxu1  ;;  %v18033_v15 = vpop.f32.mrb[40].mxu0 }
 0x905   :  { %v2056_v18 = vpop.f32.mrb[41].mxu1  ;;  %v2107_v4 = vpop.f32.mrb[41].mxu0  ;;  %14980 = vmatprep.subr.bf16.mxu1 %v16624_v43  ;;  %15008 = vmatprep.subr.bf16.mxu0 %v16625_v44  ;;  %v16637_v44 = vld [vmem:[%s20834_s10 + $0x1f8] sm:$0xff]  }
 0x906   :  { %v2058_v19 = vpop.f32.mrb[42].mxu1  ;;  %v2109_v56 = vpop.f32.mrb[42].mxu0  ;;  %3552 = vmatprep.mubr.bf16.mxu1 %v2625_v3  ;;  %3600 = vmatprep.mubr.bf16.mxu0 %v2627_v10  ;;  %v2057_v35 = vadd.f32 %v2056_v18, %v17977_v12  ;;  %v2108_v36 = vadd.f32 %v2107_v4, %v17981_v13  ;;  %v16636_v13 = vld [vmem:[%s20834_s10 + $0x178] sm:$0xff]  }
 0x907   :  { %v2059_v14 = vpop.f32.mrb[43].mxu1  ;;  %v2110_v16 = vpop.f32.mrb[43].mxu0  ;;  %v16638_v3 = vld [vmem:[%s20834_s10 + $0x138] sm:$0xff]  }
 0x908   :  { %14981 = vmatpush3.bf16.msra.mxu1 %v16626_v7  ;;  %15009 = vmatpush3.bf16.msra.mxu0 %v16627_v53  ;;  %v2353_v7 = vmax.f32 %v2057_v35, 0.0  ;;  %v2355_v53 = vmax.f32 %v2108_v36, 0.0  ;;  %v16639_v10 = vld [vmem:[%s20834_s10 + $0x1b8] sm:$0xff]   ;;  %v16640_v14 = vld [vmem:[%s20834_s10 + $0x240] sm:$0xff]  }
 0x909   :  { %14982 = vmatprep.subr.bf16.mxu1 %v16628_v63  ;;  %15010 = vmatprep.subr.bf16.mxu0 %v16629_v0  ;;  %v16641_v16 = vld [vmem:[%s20834_s10 + $0x2c0] sm:$0xff]  }
 0x90c   :  { %14983 = vmatpush3.bf16.msra.mxu1 %v16630_v17  ;;  %15011 = vmatpush3.bf16.msra.mxu0 %v16631_v22  ;;  %v2146_v37 = vpop.f32.mrb[44].mxu1  ;;  %v2197_v38 = vpop.f32.mrb[44].mxu0 }
 0x90d   :  { %v2147_v41 = vadd.f32 %v2146_v37, %v18048_v23  ;;  %v2198_v42 = vadd.f32 %v2197_v38, %v18052_v24  ;;  %v2148_v43 = vpop.f32.mrb[45].mxu1  ;;  %v2199_v12 = vpop.f32.mrb[45].mxu0  ;;  %14984 = vmatprep.subr.bf16.mxu1 %v16632_v25  ;;  %15012 = vmatprep.subr.bf16.mxu0 %v16633_v46  ;;  %v2055_v37 = vadd.f32 %v18031_v11, %v17969_v8  ;;  %v16642_v8 = vld [vmem:[%s20834_s10 + $0x200] sm:$0xff]  }
 0x90e   :  { %v2149_v45 = vadd.f32 %v2148_v43, %v18062_v32  ;;  %v2200_v54 = vadd.f32 %v2199_v12, %v18066_v33  ;;  %v2150_v55 = vpop.f32.mrb[46].mxu1  ;;  %v2201_v58 = vpop.f32.mrb[46].mxu0  ;;  %v16643_v11 = vld [vmem:[%s20834_s10 + $0x280] sm:$0xff]  }
 0x90f   :  { %v2151_v59 = vadd.f32 %v2150_v55, %v18048_v23  ;;  %v2202_v5 = vadd.f32 %v2201_v58, %v18052_v24  ;;  %v2152_v47 = vpop.f32.mrb[47].mxu1  ;;  %v2203_v6 = vpop.f32.mrb[47].mxu0  ;;  %v2324_v18 = vmax.f32 %v2147_v41, 0.0  ;;  %v2326_v4 = vmax.f32 %v2198_v42, 0.0 }
 0x910   :  { %v2153_v63 = vadd.f32 %v2152_v47, %v18062_v32  ;;  %v2204_v0 = vadd.f32 %v2203_v6, %v18066_v33  ;;  %14985 = vmatpush3.bf16.msra.mxu1 %v16634_v39  ;;  %15013 = vmatpush3.bf16.msra.mxu0 %v16635_v40  ;;  %v2325_v17 = vmax.f32 %v2149_v45, 0.0  ;;  %v2327_v22 = vmax.f32 %v2200_v54, 0.0  ;;  %v16646_v47 = vld [vmem:[%s20834_s10 + $0x208] sm:$0xff]  }
 0x911   :  { %v2340_v19 = vmax.f32 %v2151_v59, 0.0  ;;  %v2342_v56 = vmax.f32 %v2202_v5, 0.0  ;;  %14986 = vmatprep.subr.bf16.mxu1 %v16636_v13  ;;  %15014 = vmatprep.subr.bf16.mxu0 %v16637_v44  ;;  %v2106_v42 = vadd.f32 %v18033_v15, %v17973_v9  ;;  %v2641_v13 = vpack.c.bf16 %v2353_v7, %v2353_v7  ;;  %v16644_v9 = vld [vmem:[%s20834_s10 + $0x248] sm:$0xff]  }
 0x912   :  { %v2341_v25 = vmax.f32 %v2153_v63, 0.0  ;;  %v2343_v46 = vmax.f32 %v2204_v0, 0.0  ;;  %v2643_v44 = vpack.c.bf16 %v2355_v53, %v2355_v53  ;;  %v16645_v15 = vld [vmem:[%s20834_s10 + $0x2c8] sm:$0xff]   ;;  %v2352_v59 = vmax.f32 %v2055_v37, 0.0  ;;  %v16648_v63 = vld [vmem:[%s20834_s10 + $0x250] sm:$0xff]  }
 0x913   :  { %v18102_v35 = vpack.c.bf16 %v2340_v19, %v2324_v18  ;;  %v18104_v36 = vpack.c.bf16 %v2342_v56, %v2326_v4  ;;  %v2354_v5 = vmax.f32 %v2106_v42, 0.0  ;;  %v16647_v6 = vld [vmem:[%s20834_s10 + $0x288] sm:$0xff]   ;;  %v18152_v7 = vrot.slane %v18038_v1, %v17925_v31  ;;  %v16649_v0 = vld [vmem:[%s20834_s10 + $0x2d0] sm:$0xff]   ;;  %v16652_v42 = vld [vmem:[%s20834_s10 + $0x258] sm:$0xff]  }
 0x914   :  { %v18108_v38 = vpack.c.bf16 %v2341_v25, %v2325_v17  ;;  %v18110_v39 = vpack.c.bf16 %v2343_v46, %v2327_v22  ;;  %14987 = vmatpush3.bf16.msra.mxu1 %v16638_v3  ;;  %15015 = vmatpush3.bf16.msra.mxu0 %v16639_v10  ;;  %v18112_v40 = vpop.f32.mrb[48].mxu1  ;;  %v18114_v41 = vpop.f32.mrb[48].mxu0  ;;  %v18156_v53 = vrot.slane %v18038_v1, %v17928_v50  ;;  %v16651_v17 = vld [vmem:[%s20834_s10 + $0x290] sm:$0xff]  }
 0x915   :  { %v18118_v43 = vpop.f32.mrb[49].mxu1  ;;  %v18120_v12 = vpop.f32.mrb[49].mxu0  ;;  %15028 = vmatprep.subr.bf16.mxu1 %v16640_v14  ;;  %15056 = vmatprep.subr.bf16.mxu0 %v16641_v16  ;;  %v2640_v3 = vpack.c.bf16 %v2352_v59, %v2352_v59  ;;  %v2642_v4 = vpack.c.bf16 %v2354_v5, %v2354_v5  ;;  %v16650_v16 = vld [vmem:[%s20834_s10 + $0x210] sm:$0xff]   ;;  %v16654_v5 = vld [vmem:[%s20834_s10 + $0x218] sm:$0xff]  }
 0x916   :  { %v2160_v45 = vpop.f32.mrb[50].mxu1  ;;  %v2211_v54 = vpop.f32.mrb[50].mxu0 }
 0x917   :  { %3553 = vmatmul.mubr.bf16.vlgmr.msra.gmra.mrb[68].mxu1 %v18021_v57  ;;  %3601 = vmatmul.mubr.bf16.vlgmr.msra.gmra.mrb[68].mxu0 %v18023_v62  ;;  %v2161_v55 = vpop.f32.mrb[51].mxu1  ;;  %v2212_v58 = vpop.f32.mrb[51].mxu0  ;;  %v18144_v57 = vrot.slane %v18038_v1, %v17919_v60  ;;  %v18148_v62 = vrot.slane %v18038_v1, %v17922_v61 }
 0x918   :  { %3560 = vmatprep.mubr.bf16.mxu1 %v2641_v13  ;;  %3608 = vmatprep.mubr.bf16.mxu0 %v2643_v44 }
 0x919   :  { %15029 = vmatpush3.bf16.msra.mxu1 %v16642_v8  ;;  %15057 = vmatpush3.bf16.msra.mxu0 %v16643_v11  ;;  %v16653_v8 = vld [vmem:[%s20834_s10 + $0x2d8] sm:$0xff]  }
 0x91a   :  { %15030 = vmatprep.subr.bf16.mxu1 %v16644_v9  ;;  %15058 = vmatprep.subr.bf16.mxu0 %v16645_v15 }
 0x91c   :  { %v2248_v10 = vpop.f32.mrb[52].mxu1  ;;  %v2299_v18 = vpop.f32.mrb[52].mxu0 }
 0x91d   :  { %15031 = vmatpush3.bf16.msra.mxu1 %v16646_v47  ;;  %15059 = vmatpush3.bf16.msra.mxu0 %v16647_v6  ;;  %v2249_v19 = vadd.f32 %v2248_v10, %v18144_v57  ;;  %v2300_v56 = vadd.f32 %v2299_v18, %v18148_v62  ;;  %v2250_v1 = vpop.f32.mrb[53].mxu1  ;;  %v2301_v14 = vpop.f32.mrb[53].mxu0  ;;  %v16655_v47 = vld [vmem:[%s20834_s10 + $0x298] sm:$0xff]  }
 0x91e   :  { %v2251_v22 = vadd.f32 %v2250_v1, %v18152_v7  ;;  %v2302_v25 = vadd.f32 %v2301_v14, %v18156_v53  ;;  %v2252_v46 = vpop.f32.mrb[54].mxu1  ;;  %v2303_v37 = vpop.f32.mrb[54].mxu0  ;;  %15032 = vmatprep.subr.bf16.mxu1 %v16648_v63  ;;  %15060 = vmatprep.subr.bf16.mxu0 %v16649_v0 }
 0x91f   :  { %v2253_v11 = vadd.f32 %v2252_v46, %v18144_v57  ;;  %v2304_v13 = vadd.f32 %v2303_v37, %v18148_v62  ;;  %3561 = vmatmul.mubr.bf16.gmra.mrb[72].mxu1 %v2640_v3  ;;  %3609 = vmatmul.mubr.bf16.gmra.mrb[72].mxu0 %v2642_v4  ;;  %v2254_v44 = vpop.f32.mrb[55].mxu1  ;;  %v2305_v45 = vpop.f32.mrb[55].mxu0  ;;  %v2328_v15 = vmax.f32 %v2249_v19, 0.0  ;;  %v2330_v55 = vmax.f32 %v2300_v56, 0.0  ;;  %v16657_v3 = vld [vmem:[%s20834_s10 + $0x2e0] sm:$0xff]   ;;  %v16660_v37 = vld [vmem:[%s20834_s10 + $0x268] sm:$0xff]  }
 0x920   :  { %v2255_v54 = vadd.f32 %v2254_v44, %v18152_v7  ;;  %v2306_v9 = vadd.f32 %v2305_v45, %v18156_v53  ;;  %3648 = vmatprep.mubr.bf16.mxu1 %v18108_v38  ;;  %3696 = vmatprep.mubr.bf16.mxu0 %v18110_v39  ;;  %v2329_v6 = vmax.f32 %v2251_v22, 0.0  ;;  %v2331_v63 = vmax.f32 %v2302_v25, 0.0  ;;  %v16656_v39 = vld [vmem:[%s20834_s10 + $0x260] sm:$0xff]   ;;  %v16663_v44 = vld [vmem:[%s20834_s10 + $0x2a8] sm:$0xff]   ;;  %v16664_v45 = vld [vmem:[%s20834_s10 + $0x270] sm:$0xff]  }
 0x921   :  { %v2344_v58 = vmax.f32 %v2253_v11, 0.0  ;;  %v2346_v59 = vmax.f32 %v2304_v13, 0.0  ;;  %15033 = vmatpush3.bf16.msra.mxu1 %v16650_v16  ;;  %15061 = vmatpush3.bf16.msra.mxu0 %v16651_v17  ;;  %v16658_v17 = vld [vmem:[%s20834_s10 + $0x220] sm:$0xff]   ;;  %v16662_v13 = vld [vmem:[%s20834_s10 + $0x228] sm:$0xff]  }
 0x922   :  { %v2345_v0 = vmax.f32 %v2255_v54, 0.0  ;;  %v2347_v38 = vmax.f32 %v2306_v9, 0.0  ;;  %15034 = vmatprep.subr.bf16.mxu1 %v16652_v42  ;;  %15062 = vmatprep.subr.bf16.mxu0 %v16653_v8  ;;  %v16659_v22 = vld [vmem:[%s20834_s10 + $0x2a0] sm:$0xff]   ;;  %v16661_v42 = vld [vmem:[%s20834_s10 + $0x2e8] sm:$0xff]   ;;  %v16665_v54 = vld [vmem:[%s20834_s10 + $0x2f0] sm:$0xff]  }
 0x923   :  { %v18198_v10 = vpack.c.bf16 %v2344_v58, %v2328_v15  ;;  %v18200_v18 = vpack.c.bf16 %v2346_v59, %v2330_v55  ;;  %v16666_v9 = vld [vmem:[%s20834_s10 + $0x230] sm:$0xff]   ;;  %v16668_v55 = vld [vmem:[%s20834_s10 + $0x278] sm:$0xff]   ;;  %v2159_v59 = vadd.f32 %v18118_v43, %v18062_v32  ;;  %v16673_v32 = vld [vmem:[%s20834_s10 + $0x3c0] sm:$0xff]  }
 0x924   :  { %v18202_v4 = vpack.c.bf16 %v2345_v0, %v2329_v6  ;;  %v18204_v19 = vpack.c.bf16 %v2347_v38, %v2331_v63  ;;  %v18206_v56 = vpop.f32.mrb[56].mxu1  ;;  %v18208_v1 = vpop.f32.mrb[56].mxu0  ;;  %v16667_v15 = vld [vmem:[%s20834_s10 + $0x2b0] sm:$0xff]   ;;  %v16669_v58 = vld [vmem:[%s20834_s10 + $0x2f8] sm:$0xff]   ;;  %v16672_v63 = vld [vmem:[%s20834_s10 + $0x340] sm:$0xff]   ;;  %v2208_v0 = vadd.f32 %v18114_v41, %v18052_v24 }
 0x925   :  { %15035 = vmatpush3.bf16.msra.mxu1 %v16654_v5  ;;  %15063 = vmatpush3.bf16.msra.mxu0 %v16655_v47  ;;  %v18210_v14 = vpop.f32.mrb[57].mxu1  ;;  %v18212_v16 = vpop.f32.mrb[57].mxu0  ;;  %v2210_v5 = vadd.f32 %v18120_v12, %v18066_v33  ;;  %v16670_v47 = vld [vmem:[%s20834_s10 + $0x238] sm:$0xff]   ;;  %v2357_v33 = vmax.f32 %v2159_v59, 0.0  ;;  %v2157_v12 = vadd.f32 %v18112_v40, %v18048_v23  ;;  %v16674_v38 = vld [vmem:[%s20834_s10 + $0x300] sm:$0xff]   ;;  %v16677_v23 = vld [vmem:[%s20834_s10 + $0x3c8] sm:$0xff]  }
 0x926   :  { %v2262_v25 = vpop.f32.mrb[58].mxu1  ;;  %v2313_v46 = vpop.f32.mrb[58].mxu0  ;;  %15036 = vmatprep.subr.bf16.mxu1 %v16656_v39  ;;  %15064 = vmatprep.subr.bf16.mxu0 %v16657_v3  ;;  %v16671_v6 = vld [vmem:[%s20834_s10 + $0x2b8] sm:$0xff]   ;;  %v16675_v39 = vld [vmem:[%s20834_s10 + $0x380] sm:$0xff]   ;;  %v2358_v40 = vmax.f32 %v2208_v0, 0.0  ;;  %v16678_v41 = vld [vmem:[%s20834_s10 + $0x308] sm:$0xff]  }
 0x927   :  { %v2263_v8 = vpop.f32.mrb[59].mxu1  ;;  %v2314_v11 = vpop.f32.mrb[59].mxu0  ;;  %v2359_v43 = vmax.f32 %v2210_v5, 0.0  ;;  %v2645_v3 = vpack.c.bf16 %v2357_v33, %v2357_v33  ;;  %v2356_v24 = vmax.f32 %v2157_v12, 0.0  ;;  %v16679_v25 = vld [vmem:[%s20834_s10 + $0x388] sm:$0xff]   ;;  %v16696_v5 = vld [vmem:[%s20834_s10 + $0x370] sm:$0xff]   ;;  %v2312_v12 = vadd.f32 %v18212_v16, %v18156_v53 }
 0x928   :  { %v16683_v8 = vld [vmem:[%s20834_s10 + $0x390] sm:$0xff]   ;;  %v16684_v11 = vld [vmem:[%s20834_s10 + $0x358] sm:$0xff]   ;;  %v16695_v59 = vld [vmem:[%s20834_s10 + $0x3a8] sm:$0xff]   ;;  %v2310_v53 = vadd.f32 %v18208_v1, %v18148_v62 }
 0x929   :  { %15037 = vmatpush3.bf16.msra.mxu1 %v16658_v17  ;;  %15065 = vmatpush3.bf16.msra.mxu0 %v16659_v22  ;;  %v2647_v17 = vpack.c.bf16 %v2359_v43, %v2359_v43  ;;  %v16676_v22 = vld [vmem:[%s20834_s10 + $0x348] sm:$0xff]   ;;  %v2644_v46 = vpack.c.bf16 %v2356_v24, %v2356_v24  ;;  %v16701_v33 = vld [vmem:[%s20834_s10 + $0x3f8] sm:$0xff]   ;;  %v2261_v43 = vadd.f32 %v18210_v14, %v18152_v7 }
 0x92a   :  { %15038 = vmatprep.subr.bf16.mxu1 %v16660_v37  ;;  %15066 = vmatprep.subr.bf16.mxu0 %v16661_v42  ;;  %v2646_v37 = vpack.c.bf16 %v2358_v40, %v2358_v40  ;;  %v16682_v42 = vld [vmem:[%s20834_s10 + $0x310] sm:$0xff]   ;;  %v16702_v0 = vld [vmem:[%s20834_s10 + $0x338] sm:$0xff]   ;;  %v2259_v7 = vadd.f32 %v18206_v56, %v18144_v57  ;;  %v18391_v56 = vld [vmem:[%s20835_s11] sm:$0x1f] }
 0x92b   :  { %v2655_v1 = vrot.slane %v18391_v56, %v17445_v48 }
 0x92d   :  { %15039 = vmatpush3.bf16.msra.mxu1 %v16662_v13  ;;  %15067 = vmatpush3.bf16.msra.mxu0 %v16663_v44  ;;  %v16685_v13 = vld [vmem:[%s20834_s10 + $0x3d8] sm:$0xff]  }
 0x92e   :  { %15040 = vmatprep.subr.bf16.mxu1 %v16664_v45  ;;  %15068 = vmatprep.subr.bf16.mxu0 %v16665_v54  ;;  %v16686_v44 = vld [vmem:[%s20834_s10 + $0x318] sm:$0xff]   ;;  %v16688_v54 = vld [vmem:[%s20834_s10 + $0x360] sm:$0xff]  }
 0x92f   :  { %v16687_v45 = vld [vmem:[%s20834_s10 + $0x398] sm:$0xff]  }
 0x931   :  { %15041 = vmatpush3.bf16.msra.mxu1 %v16666_v9  ;;  %15069 = vmatpush3.bf16.msra.mxu0 %v16667_v15  ;;  %v16691_v9 = vld [vmem:[%s20834_s10 + $0x3a0] sm:$0xff]   ;;  %v16692_v15 = vld [vmem:[%s20834_s10 + $0x368] sm:$0xff]  }
 0x932   :  { %15042 = vmatprep.subr.bf16.mxu1 %v16668_v55  ;;  %15070 = vmatprep.subr.bf16.mxu0 %v16669_v58  ;;  %v16693_v55 = vld [vmem:[%s20834_s10 + $0x3e8] sm:$0xff]  }
 0x933   :  { %v16694_v58 = vld [vmem:[%s20834_s10 + $0x328] sm:$0xff]  }
 0x935   :  { %15043 = vmatpush3.bf16.msra.mxu1 %v16670_v47  ;;  %15071 = vmatpush3.bf16.msra.mxu0 %v16671_v6  ;;  %v16697_v47 = vld [vmem:[%s20834_s10 + $0x3f0] sm:$0xff]  }
 0x936   :  { %15084 = vmatprep.subr.bf16.mxu1 %v16672_v63  ;;  %15112 = vmatprep.subr.bf16.mxu0 %v16673_v32  ;;  %v16698_v6 = vld [vmem:[%s20834_s10 + $0x330] sm:$0xff]   ;;  %v16700_v32 = vld [vmem:[%s20834_s10 + $0x378] sm:$0xff]  }
 0x937   :  { %v16699_v63 = vld [vmem:[%s20834_s10 + $0x3b0] sm:$0xff]  }
 0x938   :  { %3649 = vmatmul.mubr.bf16.vlgmr.msra.gmra.mrb[76].mxu1 %v18102_v35  ;;  %3697 = vmatmul.mubr.bf16.vlgmr.msra.gmra.mrb[76].mxu0 %v18104_v36  ;;  %v16680_v35 = vld [vmem:[%s20834_s10 + $0x350] sm:$0xff]  }
 0x939   :  { %3656 = vmatprep.mubr.bf16.mxu1 %v2645_v3  ;;  %3704 = vmatprep.mubr.bf16.mxu0 %v2647_v17  ;;  %v16681_v36 = vld [vmem:[%s20834_s10 + $0x3d0] sm:$0xff]   ;;  %v2363_v3 = vmax.f32 %v2312_v12, 0.0  ;;  %v2360_v17 = vmax.f32 %v2259_v7, 0.0 }
 0x93a   :  { %15085 = vmatpush3.bf16.msra.mxu1 %v16674_v38  ;;  %15113 = vmatpush3.bf16.msra.mxu0 %v16675_v39  ;;  %v16703_v38 = vld [vmem:[%s20834_s10 + $0x3b8] sm:$0xff]   ;;  %v2361_v39 = vmax.f32 %v2261_v43, 0.0 }
 0x93b   :  { %15086 = vmatprep.subr.bf16.mxu1 %v16676_v22  ;;  %15114 = vmatprep.subr.bf16.mxu0 %v16677_v23  ;;  %v2651_v16 = vpack.c.bf16 %v2363_v3, %v2363_v3  ;;  %v2362_v22 = vmax.f32 %v2310_v53, 0.0  ;;  %v2648_v57 = vpack.c.bf16 %v2360_v17, %v2360_v17 }
 0x93c   :  { %v2649_v14 = vpack.c.bf16 %v2361_v39, %v2361_v39 }
 0x93d   :  { %v2650_v62 = vpack.c.bf16 %v2362_v22, %v2362_v22 }
 0x93e   :  { %15087 = vmatpush3.bf16.msra.mxu1 %v16678_v41  ;;  %15115 = vmatpush3.bf16.msra.mxu0 %v16679_v25 }
 0x93f   :  { %15088 = vmatprep.subr.bf16.mxu1 %v16680_v35  ;;  %15116 = vmatprep.subr.bf16.mxu0 %v16681_v36 }
 0x940   :  { %3657 = vmatmul.mubr.bf16.gmra.mrb[80].mxu1 %v2644_v46  ;;  %3705 = vmatmul.mubr.bf16.gmra.mrb[80].mxu0 %v2646_v37 }
 0x941   :  { %3744 = vmatprep.mubr.bf16.mxu1 %v18202_v4  ;;  %3792 = vmatprep.mubr.bf16.mxu0 %v18204_v19  ;;  %v16689_v4 = vld [vmem:[%s20834_s10 + $0x3e0] sm:$0xff]  }
 0x942   :  { %15089 = vmatpush3.bf16.msra.mxu1 %v16682_v42  ;;  %15117 = vmatpush3.bf16.msra.mxu0 %v16683_v8  ;;  %v16690_v19 = vld [vmem:[%s20834_s10 + $0x320] sm:$0xff]  }
 0x943   :  { %15090 = vmatprep.subr.bf16.mxu1 %v16684_v11  ;;  %15118 = vmatprep.subr.bf16.mxu0 %v16685_v13 }
 0x946   :  { %15091 = vmatpush3.bf16.msra.mxu1 %v16686_v44  ;;  %15119 = vmatpush3.bf16.msra.mxu0 %v16687_v45 }
 0x947   :  { %15092 = vmatprep.subr.bf16.mxu1 %v16688_v54  ;;  %15120 = vmatprep.subr.bf16.mxu0 %v16689_v4 }
 0x94a   :  { %15093 = vmatpush3.bf16.msra.mxu1 %v16690_v19  ;;  %15121 = vmatpush3.bf16.msra.mxu0 %v16691_v9 }
 0x94b   :  { %15094 = vmatprep.subr.bf16.mxu1 %v16692_v15  ;;  %15122 = vmatprep.subr.bf16.mxu0 %v16693_v55 }
 0x94e   :  { %15095 = vmatpush3.bf16.msra.mxu1 %v16694_v58  ;;  %15123 = vmatpush3.bf16.msra.mxu0 %v16695_v59 }
 0x94f   :  { %15096 = vmatprep.subr.bf16.mxu1 %v16696_v5  ;;  %15124 = vmatprep.subr.bf16.mxu0 %v16697_v47 }
 0x952   :  { %15097 = vmatpush3.bf16.msra.mxu1 %v16698_v6  ;;  %15125 = vmatpush3.bf16.msra.mxu0 %v16699_v63 }
 0x953   :  { %15098 = vmatprep.subr.bf16.mxu1 %v16700_v32  ;;  %15126 = vmatprep.subr.bf16.mxu0 %v16701_v33 }
 0x956   :  { %15099 = vmatpush3.bf16.msra.mxu1 %v16702_v0  ;;  %15127 = vmatpush3.bf16.msra.mxu0 %v16703_v38 }
 0x957   :  { %16368 = vmatprep.subr.msk.bf16.mxu0 %vm17492_vm1, %v17225_v28 }
 0x959   :  { %3745 = vmatmul.mubr.bf16.vlgmr.msra.gmra.mrb[84].mxu1 %v18198_v10  ;;  %3793 = vmatmul.mubr.bf16.vlgmr.msra.gmra.mrb[84].mxu0 %v18200_v18 }
 0x95a   :  { %3752 = vmatprep.mubr.bf16.mxu1 %v2649_v14  ;;  %3800 = vmatprep.mubr.bf16.mxu0 %v2651_v16 }
 0x95b   :  { %16370 = vmatpush3.bf16.msk.msra.mxu0 %vm17492_vm1, %v17225_v28 }
 0x95c   :  { %16372 = vmatprep.subr.msk.bf16.mxu0 %vm17496_vm2, %v17225_v28 }
 0x95f   :  { %16374 = vmatpush3.bf16.msk.msra.mxu0 %vm17496_vm2, %v17225_v28 }
 0x960   :  { %15944 = vmatprep.subr.msk.mxu0 %vm818_vm0, %v17519_v30 }
 0x961   :  { %3753 = vmatmul.mubr.bf16.gmra.mrb[88].mxu1 %v2648_v57  ;;  %3801 = vmatmul.mubr.bf16.gmra.mrb[88].mxu0 %v2650_v62 }
 0x9ca   :  { %v14932_v10 = vpop.f32.mrb[60].mxu1  ;;  %v14960_v18 = vpop.f32.mrb[60].mxu0 }
 0x9cb   :  { %v14933_v23 = vpop.f32.mrb[61].mxu1  ;;  %v14961_v24 = vpop.f32.mrb[61].mxu0 }
 0x9cc   :  { %v14934_v40 = vadd.f32 %v14933_v23, %v14932_v10  ;;  %v14962_v41 = vadd.f32 %v14961_v24, %v14960_v18  ;;  %v14935_v25 = vpop.f32.mrb[62].mxu1  ;;  %v14963_v35 = vpop.f32.mrb[62].mxu0 }
 0x9cd   :  { %v14936_v36 = vpop.f32.mrb[63].mxu1  ;;  %v14964_v46 = vpop.f32.mrb[63].mxu0 }
 0x9ce   :  { %v3459_v37 = vadd.f32 %v14934_v40, %v2655_v1  ;;  %v14937_v42 = vadd.f32 %v14936_v36, %v14935_v25  ;;  %v14965_v8 = vadd.f32 %v14964_v46, %v14963_v35 }
 0x9d0   :  { %v3507_v11 = vadd.f32 %v14962_v41, %v3459_v37  ;;  %v3462_v13 = vadd.f32 %v14937_v42, %v2655_v1 }
 0x9d2   :  { %v3510_v44 = vadd.f32 %v14965_v8, %v3462_v13  ;;  %v14938_v45 = vpop.f32.mrb[64].mxu1  ;;  %v14966_v54 = vpop.f32.mrb[64].mxu0 }
 0x9d3   :  { %v14939_v4 = vpop.f32.mrb[65].mxu1  ;;  %v14967_v19 = vpop.f32.mrb[65].mxu0 }
 0x9d4   :  { %v14940_v9 = vadd.f32 %v14939_v4, %v14938_v45  ;;  %v14968_v15 = vadd.f32 %v14967_v19, %v14966_v54  ;;  %v14941_v55 = vpop.f32.mrb[66].mxu1  ;;  %v14969_v58 = vpop.f32.mrb[66].mxu0 }
 0x9d5   :  { %v14942_v59 = vpop.f32.mrb[67].mxu1  ;;  %v14970_v5 = vpop.f32.mrb[67].mxu0 }
 0x9d6   :  { %v3467_v47 = vadd.f32 %v14940_v9, %v2655_v1 }
 0x9d8   :  { %v3515_v6 = vadd.f32 %v14968_v15, %v3467_v47 }
 0x9ea   :  { %v14988_v63 = vpop.f32.mrb[68].mxu1  ;;  %v15016_v32 = vpop.f32.mrb[68].mxu0 }
 0x9eb   :  { %v14989_v33 = vpop.f32.mrb[69].mxu1  ;;  %v15017_v43 = vpop.f32.mrb[69].mxu0 }
 0x9ec   :  { %v14990_v12 = vadd.f32 %v14989_v33, %v14988_v63  ;;  %v15018_v0 = vadd.f32 %v15017_v43, %v15016_v32  ;;  %v14991_v38 = vpop.f32.mrb[70].mxu1  ;;  %v15019_v39 = vpop.f32.mrb[70].mxu0 }
 0x9ed   :  { %v14992_v3 = vpop.f32.mrb[71].mxu1  ;;  %v15020_v7 = vpop.f32.mrb[71].mxu0 }
 0x9ee   :  { %v3555_v53 = vadd.f32 %v14990_v12, %v3507_v11  ;;  %v14993_v14 = vadd.f32 %v14992_v3, %v14991_v38  ;;  %v15021_v16 = vadd.f32 %v15020_v7, %v15019_v39 }
 0x9f0   :  { %v3603_v17 = vadd.f32 %v15018_v0, %v3555_v53  ;;  %v3558_v22 = vadd.f32 %v14993_v14, %v3510_v44 }
 0x9f2   :  { %v3606_v57 = vadd.f32 %v15021_v16, %v3558_v22  ;;  %v14994_v62 = vpop.f32.mrb[72].mxu1  ;;  %v15022_v10 = vpop.f32.mrb[72].mxu0 }
 0x9f3   :  { %v14995_v18 = vpop.f32.mrb[73].mxu1  ;;  %v15023_v1 = vpop.f32.mrb[73].mxu0 }
 0x9f4   :  { %v14996_v23 = vadd.f32 %v14995_v18, %v14994_v62  ;;  %v15024_v24 = vadd.f32 %v15023_v1, %v15022_v10  ;;  %v14997_v40 = vpop.f32.mrb[74].mxu1  ;;  %v15025_v41 = vpop.f32.mrb[74].mxu0 }
 0x9f5   :  { %v14998_v25 = vpop.f32.mrb[75].mxu1  ;;  %v15026_v35 = vpop.f32.mrb[75].mxu0 }
 0x9f6   :  { %v3563_v36 = vadd.f32 %v14996_v23, %v3515_v6 }
 0x9f8   :  { %v3611_v46 = vadd.f32 %v15024_v24, %v3563_v36 }
 0xa0b   :  { %v15044_v37 = vpop.f32.mrb[76].mxu1  ;;  %v15072_v42 = vpop.f32.mrb[76].mxu0 }
 0xa0c   :  { %v15045_v8 = vpop.f32.mrb[77].mxu1  ;;  %v15073_v11 = vpop.f32.mrb[77].mxu0 }
 0xa0d   :  { %v15046_v13 = vadd.f32 %v15045_v8, %v15044_v37  ;;  %v15074_v45 = vadd.f32 %v15073_v11, %v15072_v42  ;;  %v15047_v44 = vpop.f32.mrb[78].mxu1  ;;  %v15075_v54 = vpop.f32.mrb[78].mxu0 }
 0xa0e   :  { %v15048_v4 = vpop.f32.mrb[79].mxu1  ;;  %v15076_v19 = vpop.f32.mrb[79].mxu0 }
 0xa0f   :  { %v3651_v9 = vadd.f32 %v15046_v13, %v3603_v17  ;;  %v15049_v15 = vadd.f32 %v15048_v4, %v15047_v44  ;;  %v15077_v55 = vadd.f32 %v15076_v19, %v15075_v54 }
 0xa11   :  { %v3699_v58 = vadd.f32 %v15074_v45, %v3651_v9  ;;  %v3654_v59 = vadd.f32 %v15049_v15, %v3606_v57 }
 0xa13   :  { %v3702_v5 = vadd.f32 %v15077_v55, %v3654_v59  ;;  %v15050_v47 = vpop.f32.mrb[80].mxu1  ;;  %v15078_v63 = vpop.f32.mrb[80].mxu0 }
 0xa14   :  { %v15051_v6 = vpop.f32.mrb[81].mxu1  ;;  %v15079_v32 = vpop.f32.mrb[81].mxu0 }
 0xa15   :  { %v15052_v33 = vadd.f32 %v15051_v6, %v15050_v47  ;;  %v15080_v43 = vadd.f32 %v15079_v32, %v15078_v63  ;;  %v15053_v12 = vpop.f32.mrb[82].mxu1  ;;  %v15081_v0 = vpop.f32.mrb[82].mxu0 }
 0xa16   :  { %v15054_v38 = vpop.f32.mrb[83].mxu1  ;;  %v15082_v39 = vpop.f32.mrb[83].mxu0 }
 0xa17   :  { %v3659_v3 = vadd.f32 %v15052_v33, %v3611_v46 }
 0xa19   :  { %v3707_v7 = vadd.f32 %v15080_v43, %v3659_v3 }
 0xa2c   :  { %v15100_v53 = vpop.f32.mrb[84].mxu1  ;;  %v15128_v14 = vpop.f32.mrb[84].mxu0 }
 0xa2d   :  { %v15101_v16 = vpop.f32.mrb[85].mxu1  ;;  %v15129_v17 = vpop.f32.mrb[85].mxu0 }
 0xa2e   :  { %v15102_v22 = vadd.f32 %v15101_v16, %v15100_v53  ;;  %v15130_v62 = vadd.f32 %v15129_v17, %v15128_v14  ;;  %v15103_v57 = vpop.f32.mrb[86].mxu1  ;;  %v15131_v10 = vpop.f32.mrb[86].mxu0  ;;  %v16704_v53 = vld [vmem:[%s20829_s5 + $0x10] sm:$0xff]   ;;  %v16705_v14 = vld [vmem:[%s20829_s5 + $0x18] sm:$0xff]  }
 0xa2f   :  { %v15104_v18 = vpop.f32.mrb[87].mxu1  ;;  %v15132_v1 = vpop.f32.mrb[87].mxu0  ;;  %15914 = vmatprep.subr.bf16.mxu1 %v16704_v53 }
 0xa30   :  { %v3747_v23 = vadd.f32 %v15102_v22, %v3699_v58  ;;  %v15105_v24 = vadd.f32 %v15104_v18, %v15103_v57  ;;  %v15133_v40 = vadd.f32 %v15132_v1, %v15131_v10  ;;  %15915 = vmatpush3.bf16.msra.mxu1 %v16704_v53 }
 0xa31   :  { %15916 = vmatprep.subr.bf16.mxu1 %v16705_v14 }
 0xa32   :  { %v3795_v41 = vadd.f32 %v15130_v62, %v3747_v23  ;;  %v3750_v25 = vadd.f32 %v15105_v24, %v3702_v5  ;;  %v3853_v24 = vrot.slane %v18391_v56, %v17457_v52 }
 0xa34   :  { %v3798_v35 = vadd.f32 %v15133_v40, %v3750_v25  ;;  %v15106_v36 = vpop.f32.mrb[88].mxu1  ;;  %v15134_v37 = vpop.f32.mrb[88].mxu0  ;;  %v3808_v46 = vadd.f32 %v3795_v41, %v17708_v20  ;;  %15917 = vmatpush3.bf16.msra.mxu1 %v16705_v14 }
 0xa35   :  { %v15107_v42 = vpop.f32.mrb[89].mxu1  ;;  %v15135_v8 = vpop.f32.mrb[89].mxu0  ;;  %16376 = vmatprep.subr.msk.bf16.mxu1 %vm17492_vm1, %v17225_v28 }
 0xa36   :  { %v15108_v11 = vadd.f32 %v15107_v42, %v15106_v36  ;;  %v15136_v13 = vadd.f32 %v15135_v8, %v15134_v37  ;;  %v15109_v45 = vpop.f32.mrb[90].mxu1  ;;  %v15137_v44 = vpop.f32.mrb[90].mxu0  ;;  %v3811_v54 = vsel %vm20890_vm5, %v3808_v46, 0.0  ;;  %v3809_v4 = vadd.f32 %v3798_v35, %v17710_v21  ;;  %vm20902_vm5 = vmmov %vm20901_vm4 }
 0xa37   :  { %v15110_v19 = vpop.f32.mrb[91].mxu1  ;;  %v15138_v9 = vpop.f32.mrb[91].mxu0  ;;  %3812 = vadd.xlane.f32.xlu1 %v3811_v54  ;;  %v3860_v37 = vrot.slane %v18391_v56, %v17919_v60  ;;  %v13668_v56 = vld [vmem:[%s20831_s7 + $0x1] ss:$0 sm:$0xff] }
 0xa38   :  { %v3755_v15 = vadd.f32 %v15108_v11, %v3707_v7  ;;  %v3814_v55 = vsel %vm20891_vm6, %v3809_v4, 0.0  ;;  %vm20903_vm6 = vmmov %vm20901_vm4 }
 0xa39   :  { %3815 = vadd.xlane.f32.xlu0 %v3814_v55 }
 0xa3a   :  { %v3803_v58 = vadd.f32 %v15136_v13, %v3755_v15 }
 0xa3c   :  { %v3810_v20 = vadd.f32 %v3803_v58, %v17734_v34 }
 0xa3e   :  { %v3817_v59 = vsel %vm20892_vm7, %v3810_v20, 0.0  ;;  %vm20904_vm7 = vmmov %vm20901_vm4 }
 0xa3f   :  { %3818 = vadd.xlane.f32.xlu1 %v3817_v59 }
 0xac4   :  { %v3813_v5 = vpop.xlane.xlu1 %3812 }
 0xac5   :  { %v3820_v47 = vmul.f32 0.03125, %v3813_v5 }
 0xac6   :  { %v3816_v63 = vpop.xlane.xlu0 %3815 }
 0xac7   :  { %v3823_v6 = vsub.f32 %v3808_v46, %v3820_v47  ;;  %v3821_v32 = vmul.f32 0.03125, %v3816_v63 }
 0xac9   :  { %v3824_v33 = vsub.f32 %v3809_v4, %v3821_v32  ;;  %v3826_v21 = vmul.f32 %v3823_v6, %v3823_v6 }
 0xacb   :  { %v3829_v43 = vsel %vm20893_vm8, %v3826_v21, 0.0  ;;  %v3827_v12 = vmul.f32 %v3824_v33, %v3824_v33  ;;  %vm20905_vm8 = vmmov %vm20876_vm3 }
 0xacc   :  { %3830 = vadd.xlane.f32.xlu0 %v3829_v43  ;;  %v3819_v0 = vpop.xlane.xlu1 %3818 }
 0xacd   :  { %v3822_v38 = vmul.f32 0.03125, %v3819_v0  ;;  %v3832_v39 = vsel %vm20894_vm9, %v3827_v12, 0.0  ;;  %vm20906_vm9 = vmmov %vm20876_vm3 }
 0xace   :  { %3833 = vadd.xlane.f32.xlu1 %v3832_v39 }
 0xacf   :  { %v3825_v34 = vsub.f32 %v3810_v20, %v3822_v38 }
 0xad1   :  { %v3828_v3 = vmul.f32 %v3825_v34, %v3825_v34 }
 0xad3   :  { %v3835_v7 = vsel %vm20895_vm10, %v3828_v3, 0.0  ;;  %vm20907_vm10 = vmmov %vm20876_vm3 }
 0xad4   :  { %3836 = vadd.xlane.f32.xlu0 %v3835_v7 }
 0xb59   :  { %v3831_v16 = vpop.xlane.xlu0 %3830 }
 0xb5a   :  { %v3838_v17 = vmul.f32 0.03125, %v3831_v16 }
 0xb5b   :  { %v3834_v22 = vpop.xlane.xlu1 %3833 }
 0xb5c   :  { %v3841_v62 = vadd.f32 1e-05, %v3838_v17  ;;  %v3839_v57 = vmul.f32 0.03125, %v3834_v22 }
 0xb5e   :  { %17022 = vrsqrt.f32 %v3841_v62  ;;  %v3842_v10 = vadd.f32 1e-05, %v3839_v57 }
 0xb60   :  { %17024 = vrsqrt.f32 %v3842_v10 }
 0xb61   :  { %v3837_v18 = vpop.xlane.xlu0 %3836 }
 0xb62   :  { %v3840_v1 = vmul.f32 0.03125, %v3837_v18 }
 0xb64   :  { %v3843_v23 = vadd.f32 1e-05, %v3840_v1 }
 0xb66   :  { %17026 = vrsqrt.f32 %v3843_v23 }
 0xb68   :  { %v17023_v40 = vpop.eup %17022 }
 0xb69   :  { %v3847_v41 = vmul.f32 %v17023_v40, %v3823_v6 }
 0xb6a   :  { %v17025_v25 = vpop.eup %17024 }
 0xb6b   :  { %v3848_v35 = vmul.f32 %v17025_v25, %v3824_v33  ;;  %v3854_v36 = vmul.f32 %v3853_v24, %v3847_v41 }
 0xb6d   :  { %v3855_v46 = vmul.f32 %v3853_v24, %v3848_v35  ;;  %v18417_v42 = vadd.f32 %v3860_v37, %v3854_v36 }
 0xb6f   :  { %v18419_v8 = vadd.f32 %v3860_v37, %v3855_v46 }
 0xb70   :  { %v17027_v11 = vpop.eup %17026 }
 0xb71   :  { %v3849_v13 = vmul.f32 %v17027_v11, %v3825_v34  ;;  %v3876_v45 = vpack.c.bf16 %v18419_v8, %v18417_v42 }
 0xb73   :  { %v3856_v44 = vmul.f32 %v3853_v24, %v3849_v13  ;;  %15918 = vmatprep.mubr.msk.bf16.mxu1 %vm20896_vm11, %v3876_v45  ;;  %vm20908_vm11 = vmmov %vm20876_vm3 }
 0xb75   :  { %v18424_v54 = vadd.f32 %v3860_v37, %v3856_v44 }
 0xb77   :  { %v3877_v4 = vpack.c.bf16 %v18424_v54, %v18424_v54 }
 0xb79   :  { %15919 = vmatmul.mubr.msk.bf16.vlgmr.msra.gmra.mrb[92].mxu1 %vm20897_vm12, %v3877_v4  ;;  %vm20909_vm12 = vmmov %vm20901_vm4 }
 0xb7a   :  { %16378 = vmatpush3.bf16.msk.msra.mxu1 %vm17492_vm1, %v17225_v28 }
 0xb7b   :  { %16380 = vmatprep.subr.msk.bf16.mxu1 %vm17496_vm2, %v17225_v28 }
 0xb7e   :  { %16382 = vmatpush3.bf16.msk.msra.mxu1 %vm17496_vm2, %v17225_v28 }
 0xb7f   :  { %15949 = vmatprep.subr.msk.mxu1 %vm818_vm0, %v17519_v30 }
 0xc4c   :  { %v15920_v19 = vpop.f32.mrb[92].mxu1 }
 0xc4d   :  { %v3936_v9 = vpop.f32.mrb[93].mxu1  ;;  %v3945_v15 = vadd.f32 %v15920_v19, %v13668_v56 }
 0xc4e   :  { %v3937_v55 = vadd.f32 %v13668_v56, %v3936_v9  ;;  %v15921_v58 = vpop.f32.mrb[94].mxu1 }
 0xc4f   :  { %v3939_v20 = vpop.f32.mrb[95].mxu1  ;;  %v4046_v5 = vrot.slane %v3945_v15, 4  ;;  %v3952_v16 = vmul.f32 0.35355338, %v3945_v15 }
 0xc50   :  { %v3940_v59 = vadd.f32 %v13668_v56, %v3939_v20  ;;  %3955 = vrot.lane.b32.xlu1 %v3937_v55, %s17227_s0  ;;  %v4339_v63 = vrot.slane %v3937_v55, 4  ;;  %v3950_v33 = vmul.f32 0.35355338, %v3937_v55 }
 0xc52   :  { %v4045_v47 = vrot.slane %v3940_v59, 4  ;;  %v3951_v12 = vmul.f32 0.35355338, %v3940_v59 }
 0xc54   :  { %3957 = vrot.lane.b32.xlu1 %v3940_v59, %s17227_s0  ;;  %v4047_v6 = vsel %vm818_vm0, %v4045_v47, %v4046_v5  ;;  %v4340_v32 = vsel %vm818_vm0, %v4339_v63, %v4045_v47 }
 0xc55   :  { %4048 = vrot.lane.b32.xlu0 %v4047_v6, %s17227_s0 }
 0xc58   :  { %4050 = vrot.lane.b32.xlu1 %v4046_v5, %s17227_s0 }
 0xc59   :  { %4341 = vrot.lane.b32.xlu0 %v4339_v63, %s17227_s0 }
 0xc5c   :  { %4343 = vrot.lane.b32.xlu1 %v4340_v32, %s17227_s0 }
 0xc5d   :  { %4433 = vrot.lane.b32.xlu0 %v3945_v15, %s17227_s0 }
 0xc60   :  { %4238 = vrot.lane.b32.xlu1 %v3937_v55, %s17228_s17 }
 0xc61   :  { %4329 = vrot.lane.b32.xlu0 %v4047_v6, %s17228_s17 }
 0xc64   :  { %4240 = vrot.lane.b32.xlu1 %v3940_v59, %s17228_s17 }
 0xc65   :  { %4331 = vrot.lane.b32.xlu0 %v4046_v5, %s17228_s17 }
 0xc68   :  { %4732 = vrot.lane.b32.xlu1 %v13668_v56, %s17229_s22 }
 0xcc2   :  { %v3956_v21 = vpop.permute.xlu1 %3955 }
 0xcc3   :  { %v3961_v43 = vmul.f32 %v3956_v21, %v3950_v33 }
 0xcc5   :  { %15930 = vmatprep.mubr.msk.f32.mxu0 %vm20898_vm13, %v3961_v43  ;;  %vm20910_vm13 = vmmov %vm20901_vm4 }
 0xcc6   :  { %v3958_v0 = vpop.permute.xlu1 %3957 }
 0xcc7   :  { %v3962_v38 = vmul.f32 %v3958_v0, %v3951_v12  ;;  %v4049_v39 = vpop.permute.xlu0 %4048 }
 0xcc8   :  { %v4054_v34 = vmul.f32 %v4049_v39, %v3950_v33 }
 0xcc9   :  { %15931 = vmatmul.mubr.msk.f32.vlgmr.msra.gmra.mrb[92].mxu0 %vm20899_vm14, %v3962_v38  ;;  %v4438_v1 = vrot.slane %v3962_v38, 4  ;;  %vm20911_vm14 = vmmov %vm20901_vm4 }
 0xcca   :  { %v4051_v3 = vpop.permute.xlu1 %4050  ;;  %15941 = vmatprep.mubr.msk.f32.mxu1 %vm20900_vm15, %v4054_v34  ;;  %15945 = vmatpush3.msk.msra.mxu0 %vm818_vm0, %v17519_v30  ;;  %vm20912_vm15 = vmmov %vm20901_vm4 }
 0xccb   :  { %v4055_v7 = vmul.f32 %v4051_v3, %v3951_v12  ;;  %v4342_v53 = vpop.permute.xlu0 %4341  ;;  %16384 = vmatprep.subr.msk.bf16.mxu0 %vm17492_vm1, %v17225_v28 }
 0xccc   :  { %v4347_v14 = vmul.f32 %v4342_v53, %v3951_v12 }
 0xccd   :  { %15942 = vmatmul.mubr.msk.f32.vlgmr.msra.gmra.mrb[96].mxu1 %vm20876_vm3, %v4055_v7 }
 0xcce   :  { %v4344_v17 = vpop.permute.xlu1 %4343  ;;  %15950 = vmatpush3.msk.msra.mxu1 %vm818_vm0, %v17519_v30  ;;  %v4351_v10 = vrot.slane %v4347_v14, 4 }
 0xccf   :  { %v4348_v22 = vmul.f32 %v4344_v17, %v3952_v16  ;;  %v4434_v62 = vpop.permute.xlu0 %4433  ;;  %16392 = vmatprep.subr.msk.bf16.mxu1 %vm17492_vm1, %v17225_v28 }
 0xcd0   :  { %v4436_v57 = vmul.f32 %v4434_v62, %v3952_v16 }
 0xcd1   :  { %v4352_v18 = vrot.slane %v4348_v22, 4 }
 0xcd2   :  { %v4439_v23 = vrot.slane %v4436_v57, 4  ;;  %v18507_v43 = vpop.permute.xlu1 %4238 }
 0xcd3   :  { %v4353_v24 = vsel %vm818_vm0, %v4351_v10, %v4352_v18  ;;  %v18509_v12 = vpop.permute.xlu0 %4329 }
 0xcd4   :  { %v4440_v40 = vsel %vm818_vm0, %v4438_v1, %v4439_v23 }
 0xcd6   :  { %v4241_v0 = vpop.permute.xlu1 %4240 }
 0xcd7   :  { %v4332_v38 = vpop.permute.xlu0 %4331 }
 0xd9c   :  { %v15932_v41 = vpop.f32.mrb[92].mxu0 }
 0xd9d   :  { %v4035_v25 = vpop.f32.mrb[93].mxu0 }
 0xda0   :  { %v15943_v35 = vpop.f32.mrb[96].mxu1 }
 0xda1   :  { %v4138_v36 = vmax.f32 %v15932_v41, %v15943_v35  ;;  %v4128_v37 = vpop.f32.mrb[97].mxu1 }
 0xda2   :  { %v4137_v46 = vmax.f32 %v4035_v25, %v4128_v37 }
 0xda3   :  { %v4140_v11 = vsub.f32 %v15932_v41, %v4138_v36  ;;  %v4146_v13 = vsub.f32 %v15943_v35, %v4138_v36 }
 0xda4   :  { %v4139_v45 = vsub.f32 %v4035_v25, %v4137_v46  ;;  %v4145_v44 = vsub.f32 %v4128_v37, %v4137_v46 }
 0xda5   :  { %v4143_v4 = vmul.f32 1.442695, %v4140_v11  ;;  %v4149_v56 = vmul.f32 1.442695, %v4146_v13 }
 0xda6   :  { %v4141_v19 = vmul.f32 1.442695, %v4139_v45  ;;  %v4147_v9 = vmul.f32 1.442695, %v4145_v44 }
 0xda7   :  { %17028 = vpow2.f32 %v4143_v4 }
 0xda8   :  { %17030 = vpow2.f32 %v4149_v56 }
 0xda9   :  { %17032 = vpow2.f32 %v4141_v19 }
 0xdaa   :  { %17034 = vpow2.f32 %v4147_v9 }
 0xdb1   :  { %v17029_v15 = vpop.eup %17028 }
 0xdb2   :  { %v17031_v55 = vpop.eup %17030 }
 0xdb3   :  { %v17033_v58 = vpop.eup %17032  ;;  %v4152_v20 = vadd.f32 %v17031_v55, %v17029_v15 }
 0xdb4   :  { %v17035_v59 = vpop.eup %17034 }
 0xdb5   :  { %17036 = vrcp.f32 %v4152_v20  ;;  %v4151_v5 = vadd.f32 %v17035_v59, %v17033_v58 }
 0xdb7   :  { %17038 = vrcp.f32 %v4151_v5  ;;  %v16706_v5 = vld [vmem:[%s20832_s6 + $0x10] sm:$0xff]  }
 0xdbf   :  { %v17037_v47 = vpop.eup %17036 }
 0xdc0   :  { %v4156_v63 = vmul.f32 %v17037_v47, %v17029_v15  ;;  %v4247_v6 = vmul.f32 %v17037_v47, %v17031_v55  ;;  %v16707_v47 = vld [vmem:[%s20832_s6 + $0x18] sm:$0xff]  }
 0xdc1   :  { %v17039_v32 = vpop.eup %17038 }
 0xdc2   :  { %v4155_v33 = vmul.f32 %v17039_v32, %v17033_v58  ;;  %v4246_v21 = vmul.f32 %v17039_v32, %v17035_v59 }
 0xdc4   :  { %15946 = vmatprep.mubr.msk.f32.mxu0 %vm20901_vm4, %v4155_v33  ;;  %15951 = vmatprep.mubr.msk.f32.mxu1 %vm20902_vm5, %v4246_v21  ;;  %vm20913_vm4 = vmmov %vm20876_vm3 }
 0xdc5   :  { %15947 = vmatmul.mubr.msk.f32.vlgmr.msra.gmra.mrb[94].mxu0 %vm20903_vm6, %v4156_v63  ;;  %15952 = vmatmul.mubr.msk.f32.vlgmr.msra.gmra.mrb[98].mxu1 %vm20904_vm7, %v4247_v6  ;;  %vm20914_vm5 = vmmov %vm20876_vm3 }
 0xdc6   :  { %16386 = vmatpush3.bf16.msk.msra.mxu0 %vm17492_vm1, %v17225_v28  ;;  %16394 = vmatpush3.bf16.msk.msra.mxu1 %vm17492_vm1, %v17225_v28  ;;  %vm20915_vm6 = vmmov %vm20876_vm3 }
 0xdc7   :  { %15962 = vmatprep.mubr.msk.f32.mxu0 %vm20905_vm8, %v4353_v24  ;;  %15973 = vmatprep.mubr.msk.f32.mxu1 %vm20906_vm9, %v4440_v40  ;;  %vm20916_vm7 = vmmov %vm20876_vm3 }
 0xdc8   :  { %16388 = vmatprep.subr.msk.bf16.mxu0 %vm17496_vm2, %v17225_v28  ;;  %16396 = vmatprep.subr.msk.bf16.mxu1 %vm17496_vm2, %v17225_v28  ;;  %vm20917_vm8 = vmmov %vm20876_vm3 }
 0xdc9   :  { %vm20918_vm9 = vmmov %vm20876_vm3 }
 0xdca   :  { %16390 = vmatpush3.bf16.msk.msra.mxu0 %vm17496_vm2, %v17225_v28  ;;  %16398 = vmatpush3.bf16.msk.msra.mxu1 %vm17496_vm2, %v17225_v28 }
 0xdcb   :  { %15976 = vmatprep.subr.msk.mxu0 %vm818_vm0, %v17519_v30  ;;  %15981 = vmatprep.subr.msk.mxu1 %vm818_vm0, %v17519_v30 }
 0xdcd   :  { %15963 = vmatmul.mubr.msk.f32.vlgmr.msra.gmra.mrb[96].mxu0 %vm20907_vm10, %v4352_v18  ;;  %15974 = vmatmul.mubr.msk.f32.vlgmr.msra.gmra.mrb[100].mxu1 %vm20908_vm11, %v4439_v23  ;;  %vm20919_vm10 = vmmov %vm20876_vm3 }
 0xdce   :  { %15977 = vmatpush3.msk.msra.mxu0 %vm818_vm0, %v17519_v30  ;;  %15982 = vmatpush3.msk.msra.mxu1 %vm818_vm0, %v17519_v30  ;;  %vm20920_vm11 = vmmov %vm20876_vm3 }
 0xdcf   :  { %15986 = vmatprep.subr.bf16.mxu0 %v16706_v5 }
 0xe98   :  { %v15948_v39 = vpop.f32.mrb[94].mxu0  ;;  %v15953_v34 = vpop.f32.mrb[98].mxu1 }
 0xe99   :  { %v4245_v3 = vmul.f32 %v15948_v39, %v4241_v0  ;;  %v4336_v7 = vmul.f32 %v15953_v34, %v4332_v38  ;;  %v4229_v53 = vpop.f32.mrb[95].mxu0  ;;  %v4320_v14 = vpop.f32.mrb[99].mxu1 }
 0xe9a   :  { %v4244_v16 = vmul.f32 %v18507_v43, %v4229_v53  ;;  %v4335_v17 = vmul.f32 %v18509_v12, %v4320_v14 }
 0xe9b   :  { %v4338_v22 = vadd.f32 %v4336_v7, %v4245_v3 }
 0xe9c   :  { %v4337_v62 = vadd.f32 %v4335_v17, %v4244_v16 }
 0xea0   :  { %v15964_v57 = vpop.f32.mrb[96].mxu0  ;;  %v15975_v10 = vpop.f32.mrb[100].mxu1 }
 0xea1   :  { %v4521_v18 = vmax.f32 %v15964_v57, %v15975_v10  ;;  %v4424_v1 = vpop.f32.mrb[97].mxu0  ;;  %v4511_v23 = vpop.f32.mrb[101].mxu1 }
 0xea2   :  { %v4520_v24 = vmax.f32 %v4424_v1, %v4511_v23 }
 0xea3   :  { %v4523_v40 = vsub.f32 %v15964_v57, %v4521_v18  ;;  %v4529_v41 = vsub.f32 %v15975_v10, %v4521_v18 }
 0xea4   :  { %v4522_v25 = vsub.f32 %v4424_v1, %v4520_v24  ;;  %v4528_v35 = vsub.f32 %v4511_v23, %v4520_v24 }
 0xea5   :  { %v4526_v36 = vmul.f32 1.442695, %v4523_v40  ;;  %v4532_v37 = vmul.f32 1.442695, %v4529_v41 }
 0xea6   :  { %v4524_v46 = vmul.f32 1.442695, %v4522_v25  ;;  %v4530_v11 = vmul.f32 1.442695, %v4528_v35 }
 0xea7   :  { %17040 = vpow2.f32 %v4526_v36 }
 0xea8   :  { %17042 = vpow2.f32 %v4532_v37 }
 0xea9   :  { %17044 = vpow2.f32 %v4524_v46 }
 0xeaa   :  { %17046 = vpow2.f32 %v4530_v11 }
 0xeb1   :  { %v17041_v13 = vpop.eup %17040 }
 0xeb2   :  { %v17043_v45 = vpop.eup %17042 }
 0xeb3   :  { %v17045_v44 = vpop.eup %17044  ;;  %v4535_v4 = vadd.f32 %v17043_v45, %v17041_v13 }
 0xeb4   :  { %v17047_v56 = vpop.eup %17046 }
 0xeb5   :  { %17048 = vrcp.f32 %v4535_v4  ;;  %v4534_v19 = vadd.f32 %v17047_v56, %v17045_v44 }
 0xeb7   :  { %17050 = vrcp.f32 %v4534_v19 }
 0xebf   :  { %v17049_v9 = vpop.eup %17048 }
 0xec0   :  { %v4539_v15 = vmul.f32 %v17049_v9, %v17041_v13  ;;  %v4624_v55 = vmul.f32 %v17049_v9, %v17043_v45 }
 0xec1   :  { %v17051_v58 = vpop.eup %17050 }
 0xec2   :  { %v4538_v20 = vmul.f32 %v17051_v58, %v17045_v44  ;;  %v4623_v59 = vmul.f32 %v17051_v58, %v17047_v56  ;;  %v13714_v58 = vld [vmem:[%s20833_s8 + $0x100] sm:$0xff] }
 0xec4   :  { %15978 = vmatprep.mubr.msk.f32.mxu0 %vm20909_vm12, %v4538_v20  ;;  %15983 = vmatprep.mubr.msk.f32.mxu1 %vm20910_vm13, %v4623_v59  ;;  %v13722_v20 = vld [vmem:[%s20833_s8 + $0x140] sm:$0xff]  ;;  %v13715_v59 = vld [vmem:[%s20833_s8 + $0x108] sm:$0xff]  ;;  %vm20921_vm12 = vmmov %vm20876_vm3 }
 0xec5   :  { %15979 = vmatmul.mubr.msk.f32.vlgmr.msra.gmra.mrb[98].mxu0 %vm20911_vm14, %v4539_v15  ;;  %15984 = vmatmul.mubr.msk.f32.vlgmr.msra.gmra.mrb[102].mxu1 %vm20912_vm15, %v4624_v55  ;;  %vm20922_vm13 = vmmov %vm20876_vm3 }
 0xec6   :  { %5165 = vmatprep.mubr.bf16.mxu1 %v17224_v2  ;;  %15987 = vmatpush3.bf16.msra.mxu0 %v16706_v5  ;;  %v13749_v5 = vcombine.high %v13714_v58, %v13722_v20  ;;  %vm20923_vm14 = vmmov %vm20876_vm3 }
 0xec7   :  { %15988 = vmatprep.subr.bf16.mxu0 %v16707_v47  ;;  %vm20924_vm15 = vmmov %vm20876_vm3 }
 0xec8   :  { %5133 = vmatprep.subr.bf16.mxu1 %v13749_v5 }
 0xeca   :  { %15989 = vmatpush3.bf16.msra.mxu0 %v16707_v47  ;;  %v13723_v47 = vld [vmem:[%s20833_s8 + $0x148] sm:$0xff] }
 0xf98   :  { %v15980_v63 = vpop.f32.mrb[98].mxu0  ;;  %v15985_v6 = vpop.f32.mrb[102].mxu1 }
 0xf99   :  { %v4622_v32 = vmul.f32 %v15980_v63, %v4241_v0  ;;  %v4707_v33 = vmul.f32 %v15985_v6, %v4332_v38  ;;  %v4612_v21 = vpop.f32.mrb[99].mxu0  ;;  %v4697_v39 = vpop.f32.mrb[103].mxu1  ;;  %v13748_v63 = vcombine.low %v13714_v58, %v13722_v20  ;;  %v13750_v6 = vcombine.low %v13715_v59, %v13723_v47 }
 0xf9a   :  { %v4621_v34 = vmul.f32 %v4612_v21, %v18507_v43  ;;  %v4706_v3 = vmul.f32 %v4697_v39, %v18509_v12  ;;  %v4733_v0 = vpop.permute.xlu1 %4732  ;;  %v13738_v21 = vld [vmem:[%s20833_s8 + $0x1c0] sm:$0xff]  ;;  %v13731_v39 = vld [vmem:[%s20833_s8 + $0x188] sm:$0xff] }
 0xf9b   :  { %v4709_v7 = vadd.f32 %v4707_v33, %v4622_v32  ;;  %v13751_v32 = vcombine.high %v13715_v59, %v13723_v47  ;;  %5134 = vmatpush1.bf16.msra.mxu1 %v13748_v63  ;;  %v13730_v33 = vld [vmem:[%s20833_s8 + $0x180] sm:$0xff] }
 0xf9c   :  { %v4708_v53 = vadd.f32 %v4706_v3, %v4621_v34  ;;  %v13765_v34 = vcombine.high %v13730_v33, %v13738_v21  ;;  %v13739_v3 = vld [vmem:[%s20833_s8 + $0x1c8] sm:$0xff]  ;;  %v13718_v47 = vld [vmem:[%s20833_s8 + $0x120] sm:$0xff] }
 0xf9d   :  { %v4713_v14 = vrot.slane %v4709_v7, 4  ;;  %5184 = vmatprep.subr.bf16.mxu0 %v13751_v32  ;;  %v13764_v7 = vcombine.low %v13730_v33, %v13738_v21  ;;  %v13726_v63 = vld [vmem:[%s20833_s8 + $0x160] sm:$0xff]  ;;  %v13727_v32 = vld [vmem:[%s20833_s8 + $0x168] sm:$0xff] }
 0xf9e   :  { %v4712_v16 = vrot.slane %v4708_v53, 4  ;;  %v13766_v53 = vcombine.low %v13731_v39, %v13739_v3  ;;  %5135 = vmatprep.subr.bf16.mxu1 %v13765_v34  ;;  %v13757_v34 = vcombine.high %v13718_v47, %v13726_v63 }
 0xf9f   :  { %5136 = vmatpush1.bf16.msra.mxu1 %v13764_v7 }
 0xfa0   :  { %v4714_v17 = vsel %vm818_vm0, %v4712_v16, %v4713_v14  ;;  %v4717_v57 = vsel %vm818_vm0, %v4338_v22, %v4712_v16  ;;  %v13767_v14 = vcombine.high %v13731_v39, %v13739_v3  ;;  %v13716_v16 = vld [vmem:[%s20833_s8 + $0x110] sm:$0xff] }
 0xfa1   :  { %v4719_v10 = vpack.c.bf16 %v4714_v17, %v4714_v17  ;;  %v4718_v18 = vpack.c.bf16 %v4717_v57, %v4337_v62  ;;  %v13724_v17 = vld [vmem:[%s20833_s8 + $0x150] sm:$0xff]  ;;  %v13717_v57 = vld [vmem:[%s20833_s8 + $0x118] sm:$0xff] }
 0xfa3   :  { %15990 = vmatprep.mubr.msk.bf16.mxu0 %vm20876_vm3, %v4718_v18  ;;  %v13725_v18 = vld [vmem:[%s20833_s8 + $0x158] sm:$0xff] }
 0xfa4   :  { %15991 = vmatmul.mubr.msk.bf16.vlgmr.msra.gmra.mrb[100].mxu0 %vm20913_vm4, %v4719_v10  ;;  %v13753_v10 = vcombine.high %v13716_v16, %v13724_v17  ;;  %vm20925_vm4 = vmmov %vm20876_vm3 }
 0xfa5   :  { %5216 = vmatprep.mubr.bf16.mxu0 %v17224_v2  ;;  %5185 = vmatpush1.bf16.msra.mxu0 %v13750_v6  ;;  %v13719_v6 = vld [vmem:[%s20833_s8 + $0x128] sm:$0xff] }
 0xfa6   :  { %5186 = vmatprep.subr.bf16.mxu0 %v13767_v14  ;;  %5235 = vmatprep.subr.bf16.mxu1 %v13753_v10  ;;  %v13759_v3 = vcombine.high %v13719_v6, %v13727_v32  ;;  %v13742_v14 = vld [vmem:[%s20833_s8 + $0x1e0] sm:$0xff]  ;;  %v13758_v10 = vcombine.low %v13719_v6, %v13727_v32  ;;  %v16722_v6 = vld [vmem:[%s20834_s10 + $0x418] sm:$0xff]  }
 0xfa7   :  { %v16723_v32 = vld [vmem:[%s20834_s10 + $0x498] sm:$0xff]  }
 0xfa9   :  { %5187 = vmatpush1.bf16.msra.mxu0 %v13766_v53  ;;  %v13734_v53 = vld [vmem:[%s20833_s8 + $0x1a0] sm:$0xff] }
0x1077   :  { %v15992_v43 = vpop.f32.mrb[100].mxu0 }
0x1078   :  { %v4775_v38 = vpop.f32.mrb[101].mxu0  ;;  %v4784_v12 = vadd.f32 %v15992_v43, %v4733_v0  ;;  %v13754_v43 = vcombine.low %v13717_v57, %v13725_v18 }
0x1079   :  { %v4776_v1 = vadd.f32 %v4775_v38, %v4733_v0  ;;  %v15993_v23 = vpop.f32.mrb[102].mxu0  ;;  %v13755_v38 = vcombine.high %v13717_v57, %v13725_v18  ;;  %v13756_v57 = vcombine.low %v13718_v47, %v13726_v63  ;;  %v13773_v18 = vcombine.high %v13734_v53, %v13742_v14  ;;  %v16720_v47 = vld [vmem:[%s20834_s10 + $0x458] sm:$0xff]  }
0x107a   :  { %v4778_v24 = vpop.f32.mrb[103].mxu0  ;;  %v4793_v25 = vadd.f32 %v4784_v12, %v18424_v54  ;;  %v16721_v63 = vld [vmem:[%s20834_s10 + $0x4d8] sm:$0xff]  }
0x107b   :  { %v4779_v40 = vadd.f32 %v4778_v24, %v4733_v0  ;;  %v4791_v41 = vadd.f32 %v4776_v1, %v18417_v42  ;;  %v13752_v0 = vcombine.low %v13716_v16, %v13724_v17  ;;  %5286 = vmatprep.subr.bf16.mxu0 %v13755_v38  ;;  %v13735_v16 = vld [vmem:[%s20833_s8 + $0x1a8] sm:$0xff]  ;;  %v13728_v38 = vld [vmem:[%s20833_s8 + $0x170] sm:$0xff] }
0x107c   :  { %v4800_v36 = vsel %vm20916_vm7, %v4793_v25, 0.0  ;;  %v13743_v17 = vld [vmem:[%s20833_s8 + $0x1e8] sm:$0xff]  ;;  %vm20928_vm7 = vmmov %vm20876_vm3 }
0x107d   :  { %v4794_v22 = vsel %vm20914_vm5, %v4791_v41, 0.0  ;;  %v4792_v62 = vadd.f32 %v4779_v40, %v18419_v8  ;;  %vm20926_vm5 = vmmov %vm20876_vm3 }
0x107e   :  { %4795 = vadd.xlane.f32.xlu0 %v4794_v22 }
0x107f   :  { %v4797_v35 = vsel %vm20915_vm6, %v4792_v62, 0.0  ;;  %vm20927_vm6 = vmmov %vm20876_vm3 }
0x1080   :  { %4798 = vadd.xlane.f32.xlu1 %v4797_v35  ;;  %v13713_v35 = vld [vmem:[%s20835_s11 + $0x8] sm:$0x1f] }
0x1082   :  { %4801 = vadd.xlane.f32.xlu0 %v4800_v36  ;;  %v4836_v36 = vrot.slane %v13713_v35, %v17454_v51 }
0x110b   :  { %v4796_v37 = vpop.xlane.xlu0 %4795 }
0x110c   :  { %v4803_v46 = vmul.f32 0.03125, %v4796_v37 }
0x110d   :  { %v4799_v11 = vpop.xlane.xlu1 %4798 }
0x110e   :  { %v18537_v13 = vsub.f32 %v4791_v41, %v4803_v46  ;;  %v4804_v45 = vmul.f32 0.03125, %v4799_v11 }
0x110f   :  { %v4802_v42 = vpop.xlane.xlu0 %4801 }
0x1110   :  { %v18539_v44 = vsub.f32 %v4792_v62, %v4804_v45  ;;  %v4805_v4 = vmul.f32 0.03125, %v4802_v42  ;;  %v4809_v8 = vmul.f32 %v18537_v13, %v18537_v13  ;;  %v4843_v45 = vrot.slane %v13713_v35, %v17448_v49  ;;  %v13745_v35 = vld [vmem:[%s20833_s8 + $0x1f8] sm:$0xff] }
0x1112   :  { %v18543_v54 = vsub.f32 %v4793_v25, %v4805_v4  ;;  %v4812_v56 = vsel %vm20917_vm8, %v4809_v8, 0.0  ;;  %v4810_v19 = vmul.f32 %v18539_v44, %v18539_v44  ;;  %vm20929_vm8 = vmmov %vm20876_vm3 }
0x1113   :  { %4813 = vadd.xlane.f32.xlu0 %v4812_v56 }
0x1114   :  { %v4815_v9 = vsel %vm20918_vm9, %v4810_v19, 0.0  ;;  %v4811_v15 = vmul.f32 %v18543_v54, %v18543_v54  ;;  %vm20930_vm9 = vmmov %vm20876_vm3 }
0x1115   :  { %4816 = vadd.xlane.f32.xlu1 %v4815_v9  ;;  %v13732_v9 = vld [vmem:[%s20833_s8 + $0x190] sm:$0xff] }
0x1116   :  { %v4818_v55 = vsel %vm20919_vm10, %v4811_v15, 0.0  ;;  %vm20931_vm10 = vmmov %vm20876_vm3 }
0x1117   :  { %4819 = vadd.xlane.f32.xlu0 %v4818_v55 }
0x11a0   :  { %v4814_v12 = vpop.xlane.xlu0 %4813 }
0x11a1   :  { %v4821_v1 = vmul.f32 0.03125, %v4814_v12  ;;  %v13721_v12 = vld [vmem:[%s20833_s8 + $0x138] sm:$0xff] }
0x11a2   :  { %v4817_v23 = vpop.xlane.xlu1 %4816 }
0x11a3   :  { %v4824_v24 = vadd.f32 1e-05, %v4821_v1  ;;  %v4822_v40 = vmul.f32 0.03125, %v4817_v23  ;;  %v13729_v1 = vld [vmem:[%s20833_s8 + $0x178] sm:$0xff]  ;;  %v13772_v23 = vcombine.low %v13734_v53, %v13742_v14  ;;  %v16729_v53 = vld [vmem:[%s20834_s10 + $0x4e8] sm:$0xff]  }
0x11a4   :  { %v4820_v41 = vpop.xlane.xlu0 %4819  ;;  %v16730_v14 = vld [vmem:[%s20834_s10 + $0x428] sm:$0xff]  }
0x11a5   :  { %17052 = vrsqrt.f32 %v4824_v24  ;;  %v4825_v22 = vadd.f32 1e-05, %v4822_v40  ;;  %v4823_v62 = vmul.f32 0.03125, %v4820_v41  ;;  %v13774_v24 = vcombine.low %v13735_v16, %v13743_v17 }
0x11a6   :  { %v13763_v41 = vcombine.high %v13721_v12, %v13729_v1 }
0x11a7   :  { %17054 = vrsqrt.f32 %v4825_v22  ;;  %v4826_v25 = vadd.f32 1e-05, %v4823_v62  ;;  %v13736_v22 = vld [vmem:[%s20833_s8 + $0x1b0] sm:$0xff] }
0x11a8   :  { %v13744_v62 = vld [vmem:[%s20833_s8 + $0x1f0] sm:$0xff] }
0x11a9   :  { %17056 = vrsqrt.f32 %v4826_v25  ;;  %v13737_v25 = vld [vmem:[%s20833_s8 + $0x1b8] sm:$0xff] }
0x11af   :  { %v17053_v37 = vpop.eup %17052 }
0x11b0   :  { %v4830_v46 = vmul.f32 %v17053_v37, %v18537_v13  ;;  %v13740_v13 = vld [vmem:[%s20833_s8 + $0x1d0] sm:$0xff]  ;;  %v13762_v37 = vcombine.low %v13721_v12, %v13729_v1  ;;  %v16739_v12 = vld [vmem:[%s20834_s10 + $0x4b8] sm:$0xff]   ;;  %v16740_v1 = vld [vmem:[%s20834_s10 + $0x540] sm:$0xff]  }
0x11b1   :  { %v17055_v11 = vpop.eup %17054  ;;  %v13769_v59 = vcombine.high %v13732_v9, %v13740_v13  ;;  %v13768_v21 = vcombine.low %v13732_v9, %v13740_v13  ;;  %v16712_v9 = vld [vmem:[%s20834_s10 + $0x448] sm:$0xff]  }
0x11b2   :  { %v4837_v42 = vmul.f32 %v4836_v36, %v4830_v46  ;;  %v4831_v4 = vmul.f32 %v17055_v11, %v18539_v44  ;;  %v13733_v44 = vld [vmem:[%s20833_s8 + $0x198] sm:$0xff]  ;;  %v13777_v46 = vcombine.high %v13736_v22, %v13744_v62  ;;  %v13779_v11 = vcombine.high %v13737_v25, %v13745_v35  ;;  %v16713_v13 = vld [vmem:[%s20834_s10 + $0x4c8] sm:$0xff]  }
0x11b3   :  { %v17057_v8 = vpop.eup %17056 }
0x11b4   :  { %v4838_v56 = vmul.f32 %v4836_v36, %v4831_v4  ;;  %v4832_v19 = vmul.f32 %v17057_v8, %v18543_v54  ;;  %v18599_v15 = vadd.f32 %v4843_v45, %v4837_v42  ;;  %v13741_v54 = vld [vmem:[%s20833_s8 + $0x1d8] sm:$0xff]  ;;  %v13778_v42 = vcombine.low %v13737_v25, %v13745_v35  ;;  %v16708_v4 = vld [vmem:[%s20834_s10 + $0x440] sm:$0xff]  }
0x11b5   :  { %v13771_v5 = vcombine.high %v13733_v44, %v13741_v54  ;;  %v13770_v39 = vcombine.low %v13733_v44, %v13741_v54  ;;  %v16709_v8 = vld [vmem:[%s20834_s10 + $0x4c0] sm:$0xff]   ;;  %v16714_v44 = vld [vmem:[%s20834_s10 + $0x408] sm:$0xff]  }
0x11b6   :  { %v18601_v55 = vadd.f32 %v4843_v45, %v4838_v56  ;;  %v4839_v20 = vmul.f32 %v4836_v36, %v4832_v19  ;;  %v16710_v56 = vld [vmem:[%s20834_s10 + $0x400] sm:$0xff]   ;;  %v16715_v54 = vld [vmem:[%s20834_s10 + $0x488] sm:$0xff]  }
0x11b7   :  { %v16711_v19 = vld [vmem:[%s20834_s10 + $0x480] sm:$0xff]  }
0x11b8   :  { %v18614_v58 = vpack.c.bf16 %v18601_v55, %v18599_v15  ;;  %v18634_v33 = vadd.f32 %v4843_v45, %v4839_v20  ;;  %v13776_v45 = vcombine.low %v13736_v22, %v13744_v62  ;;  %v16717_v20 = vld [vmem:[%s20834_s10 + $0x4d0] sm:$0xff]  }
0x11ba   :  { %13780 = vmatmul.mubr.msk.bf16.vlgmr.msra.gmra.mrb[104].mxu1 %vm20920_vm11, %v18614_v58  ;;  %13782 = vmatmul.mubr.msk.bf16.vlgmr.msra.gmra.mrb[104].mxu0 %vm20921_vm12, %v18614_v58  ;;  %v18638_v7 = vpack.c.bf16 %v18634_v33, %v18634_v33  ;;  %vm20932_vm11 = vmmov %vm20876_vm3 }
0x11bb   :  { %5175 = vmatprep.mubr.bf16.mxu1 %v17224_v2  ;;  %5226 = vmatprep.mubr.bf16.mxu0 %v17224_v2  ;;  %vm20933_vm12 = vmmov %vm20876_vm3 }
0x11bc   :  { %5236 = vmatpush1.bf16.msra.mxu1 %v13752_v0  ;;  %5287 = vmatpush1.bf16.msra.mxu0 %v13754_v43  ;;  %v13775_v0 = vcombine.high %v13735_v16, %v13743_v17  ;;  %v13720_v43 = vld [vmem:[%s20833_s8 + $0x130] sm:$0xff]  ;;  %v16731_v16 = vld [vmem:[%s20834_s10 + $0x4a8] sm:$0xff]  }
0x11bd   :  { %5237 = vmatprep.subr.bf16.mxu1 %v13769_v59  ;;  %5288 = vmatprep.subr.bf16.mxu0 %v13771_v5  ;;  %v13761_v40 = vcombine.high %v13720_v43, %v13728_v38  ;;  %v13760_v36 = vcombine.low %v13720_v43, %v13728_v38  ;;  %v16718_v59 = vld [vmem:[%s20834_s10 + $0x410] sm:$0xff]   ;;  %v16737_v43 = vld [vmem:[%s20834_s10 + $0x4f8] sm:$0xff]  }
0x11be   :  { %v16719_v5 = vld [vmem:[%s20834_s10 + $0x490] sm:$0xff]   ;;  %v16738_v38 = vld [vmem:[%s20834_s10 + $0x438] sm:$0xff]  }
0x11bf   :  { %v16732_v17 = vld [vmem:[%s20834_s10 + $0x470] sm:$0xff]  }
0x11c0   :  { %5238 = vmatpush1.bf16.msra.mxu1 %v13768_v21  ;;  %5289 = vmatpush1.bf16.msra.mxu0 %v13770_v39  ;;  %v16724_v21 = vld [vmem:[%s20834_s10 + $0x460] sm:$0xff]  }
0x11c1   :  { %5337 = vmatprep.subr.bf16.mxu1 %v13757_v34  ;;  %5388 = vmatprep.subr.bf16.mxu0 %v13759_v3  ;;  %v16725_v39 = vld [vmem:[%s20834_s10 + $0x4e0] sm:$0xff]  }
0x11c2   :  { %13781 = vmatmul.mubr.msk.bf16.gmra.mrb[108].mxu1 %vm20922_vm13, %v18638_v7  ;;  %13783 = vmatmul.mubr.msk.bf16.gmra.mrb[108].mxu0 %vm20923_vm14, %v18638_v7  ;;  %vm20934_vm13 = vmmov %vm20876_vm3  ;;  %v16726_v34 = vld [vmem:[%s20834_s10 + $0x420] sm:$0xff]  }
0x11c3   :  { %5267 = vmatprep.mubr.bf16.mxu1 %v17224_v2  ;;  %5318 = vmatprep.mubr.bf16.mxu0 %v17224_v2  ;;  %v16727_v3 = vld [vmem:[%s20834_s10 + $0x4a0] sm:$0xff]   ;;  %vm20935_vm14 = vmmov %vm20876_vm3 }
0x11ca   :  { %13784 = vmatmul.mubr.msk.bf16.vlgmr.msra.gmra.mrb[112].mxu1 %vm20924_vm15, %v18614_v58  ;;  %13786 = vmatmul.mubr.msk.bf16.vlgmr.msra.gmra.mrb[112].mxu0 %vm20876_vm3, %v18614_v58  ;;  %vm20936_vm15 = vmmov %vm20876_vm3 }
0x11cb   :  { %5277 = vmatprep.mubr.bf16.mxu1 %v17224_v2  ;;  %5328 = vmatprep.mubr.bf16.mxu0 %v17224_v2 }
0x11cc   :  { %5338 = vmatpush1.bf16.msra.mxu1 %v13756_v57  ;;  %5389 = vmatpush1.bf16.msra.mxu0 %v13758_v10  ;;  %v16733_v57 = vld [vmem:[%s20834_s10 + $0x4f0] sm:$0xff]  }
0x11cd   :  { %5339 = vmatprep.subr.bf16.mxu1 %v13773_v18  ;;  %5390 = vmatprep.subr.bf16.mxu0 %v13775_v0  ;;  %v16734_v10 = vld [vmem:[%s20834_s10 + $0x430] sm:$0xff]   ;;  %v16736_v0 = vld [vmem:[%s20834_s10 + $0x478] sm:$0xff]  }
0x11ce   :  { %v16735_v18 = vld [vmem:[%s20834_s10 + $0x4b0] sm:$0xff]  }
0x11d0   :  { %5340 = vmatpush1.bf16.msra.mxu1 %v13772_v23  ;;  %5391 = vmatpush1.bf16.msra.mxu0 %v13774_v24  ;;  %v16741_v23 = vld [vmem:[%s20834_s10 + $0x5c0] sm:$0xff]   ;;  %v18821_v24 = vld [vmem:[%s20836_s9 + $0x10] sm:$0xff] }
0x11d1   :  { %5439 = vmatprep.subr.bf16.mxu1 %v13761_v40  ;;  %5490 = vmatprep.subr.bf16.mxu0 %v13763_v41  ;;  %v4890_v40 = vrot.slane %v18821_v24, %v17445_v48  ;;  %v4898_v41 = vrot.slane %v18821_v24, %v17448_v49  ;;  %v4894_v22 = vrot.slane %v18821_v24, %v17454_v51 }
0x11d2   :  { %13785 = vmatmul.mubr.msk.bf16.gmra.mrb[116].mxu1 %vm20925_vm4, %v18638_v7  ;;  %13787 = vmatmul.mubr.msk.bf16.gmra.mrb[116].mxu0 %vm20926_vm5, %v18638_v7  ;;  %v4902_v62 = vrot.slane %v18821_v24, %v17457_v52  ;;  %vm20937_vm4 = vmmov %vm20876_vm3 }
0x11d3   :  { %5369 = vmatprep.mubr.bf16.mxu1 %v17224_v2  ;;  %5420 = vmatprep.mubr.bf16.mxu0 %v17224_v2  ;;  %vm20938_vm5 = vmmov %vm20876_vm3 }
0x11da   :  { %13788 = vmatmul.mubr.msk.bf16.vlgmr.msra.gmra.mrb[120].mxu1 %vm20927_vm6, %v18614_v58  ;;  %13790 = vmatmul.mubr.msk.bf16.vlgmr.msra.gmra.mrb[120].mxu0 %vm20928_vm7, %v18614_v58  ;;  %vm20939_vm6 = vmmov %vm20876_vm3 }
0x11db   :  { %5379 = vmatprep.mubr.bf16.mxu1 %v17224_v2  ;;  %5430 = vmatprep.mubr.bf16.mxu0 %v17224_v2  ;;  %vm20940_vm7 = vmmov %vm20876_vm3 }
0x11dc   :  { %5440 = vmatpush1.bf16.msra.mxu1 %v13760_v36  ;;  %5491 = vmatpush1.bf16.msra.mxu0 %v13762_v37 }
0x11dd   :  { %5441 = vmatprep.subr.bf16.mxu1 %v13777_v46  ;;  %5492 = vmatprep.subr.bf16.mxu0 %v13779_v11 }
0x11e0   :  { %5442 = vmatpush1.bf16.msra.mxu1 %v13776_v45  ;;  %5493 = vmatpush1.bf16.msra.mxu0 %v13778_v42 }
0x11e1   :  { %15184 = vmatprep.subr.bf16.mxu1 %v16708_v4  ;;  %15212 = vmatprep.subr.bf16.mxu0 %v16709_v8 }
0x11e2   :  { %13789 = vmatmul.mubr.msk.bf16.gmra.mrb[124].mxu1 %vm20929_vm8, %v18638_v7  ;;  %13791 = vmatmul.mubr.msk.bf16.gmra.mrb[124].mxu0 %vm20930_vm9, %v18638_v7  ;;  %vm20941_vm8 = vmmov %vm20876_vm3 }
0x11e3   :  { %5471 = vmatprep.mubr.bf16.mxu1 %v17224_v2  ;;  %5522 = vmatprep.mubr.bf16.mxu0 %v17224_v2  ;;  %vm20942_vm9 = vmmov %vm20876_vm3 }
0x11ea   :  { %13792 = vmatmul.mubr.msk.bf16.vlgmr.msra.gmra.mrb[128].mxu1 %vm20931_vm10, %v18614_v58  ;;  %13794 = vmatmul.mubr.msk.bf16.vlgmr.msra.gmra.mrb[128].mxu0 %vm20932_vm11, %v18614_v58  ;;  %v16716_v58 = vld [vmem:[%s20834_s10 + $0x450] sm:$0xff]   ;;  %vm20943_vm10 = vmmov %vm20876_vm3 }
0x11eb   :  { %5481 = vmatprep.mubr.bf16.mxu1 %v17224_v2  ;;  %5532 = vmatprep.mubr.bf16.mxu0 %v17224_v2  ;;  %vm20944_vm11 = vmmov %vm20876_vm3 }
0x11ec   :  { %15185 = vmatpush3.bf16.msra.mxu1 %v16710_v56  ;;  %15213 = vmatpush3.bf16.msra.mxu0 %v16711_v19 }
0x11ed   :  { %15186 = vmatprep.subr.bf16.mxu1 %v16712_v9  ;;  %15214 = vmatprep.subr.bf16.mxu0 %v16713_v13 }
0x11f0   :  { %15187 = vmatpush3.bf16.msra.mxu1 %v16714_v44  ;;  %15215 = vmatpush3.bf16.msra.mxu0 %v16715_v54 }
0x11f1   :  { %15188 = vmatprep.subr.bf16.mxu1 %v16716_v58  ;;  %15216 = vmatprep.subr.bf16.mxu0 %v16717_v20 }
0x11f2   :  { %13793 = vmatmul.mubr.msk.bf16.gmra.mrb[132].mxu1 %vm20933_vm12, %v18638_v7  ;;  %13795 = vmatmul.mubr.msk.bf16.gmra.mrb[132].mxu0 %vm20934_vm13, %v18638_v7  ;;  %v16728_v7 = vld [vmem:[%s20834_s10 + $0x468] sm:$0xff]   ;;  %vm20945_vm12 = vmmov %vm20876_vm3  ;;  %vm20946_vm13 = vcmask 31744  }
0x11f4   :  { %15189 = vmatpush3.bf16.msra.mxu1 %v16718_v59  ;;  %15217 = vmatpush3.bf16.msra.mxu0 %v16719_v5 }
0x11f5   :  { %15190 = vmatprep.subr.bf16.mxu1 %v16720_v47  ;;  %15218 = vmatprep.subr.bf16.mxu0 %v16721_v63 }
0x11f8   :  { %15191 = vmatpush3.bf16.msra.mxu1 %v16722_v6  ;;  %15219 = vmatpush3.bf16.msra.mxu0 %v16723_v32 }
0x11f9   :  { %15192 = vmatprep.subr.bf16.mxu1 %v16724_v21  ;;  %15220 = vmatprep.subr.bf16.mxu0 %v16725_v39 }
0x11fc   :  { %15193 = vmatpush3.bf16.msra.mxu1 %v16726_v34  ;;  %15221 = vmatpush3.bf16.msra.mxu0 %v16727_v3 }
0x11fd   :  { %15194 = vmatprep.subr.bf16.mxu1 %v16728_v7  ;;  %15222 = vmatprep.subr.bf16.mxu0 %v16729_v53 }
0x1200   :  { %15195 = vmatpush3.bf16.msra.mxu1 %v16730_v14  ;;  %15223 = vmatpush3.bf16.msra.mxu0 %v16731_v16  ;;  %v16742_v14 = vld [vmem:[%s20834_s10 + $0x500] sm:$0xff]  }
0x1201   :  { %15196 = vmatprep.subr.bf16.mxu1 %v16732_v17  ;;  %15224 = vmatprep.subr.bf16.mxu0 %v16733_v57  ;;  %v16743_v16 = vld [vmem:[%s20834_s10 + $0x580] sm:$0xff]  }
0x1204   :  { %15197 = vmatpush3.bf16.msra.mxu1 %v16734_v10  ;;  %15225 = vmatpush3.bf16.msra.mxu0 %v16735_v18 }
0x1205   :  { %15198 = vmatprep.subr.bf16.mxu1 %v16736_v0  ;;  %15226 = vmatprep.subr.bf16.mxu0 %v16737_v43  ;;  %v16744_v0 = vld [vmem:[%s20834_s10 + $0x548] sm:$0xff]  }
0x1206   :  { %v16745_v43 = vld [vmem:[%s20834_s10 + $0x5c8] sm:$0xff]  }
0x1208   :  { %15199 = vmatpush3.bf16.msra.mxu1 %v16738_v38  ;;  %15227 = vmatpush3.bf16.msra.mxu0 %v16739_v12 }
0x1209   :  { %15240 = vmatprep.subr.bf16.mxu1 %v16740_v1  ;;  %15268 = vmatprep.subr.bf16.mxu0 %v16741_v23 }
0x128d   :  { %v5167_v25 = vpop.f32.mrb[104].mxu1  ;;  %v5218_v35 = vpop.f32.mrb[104].mxu0 }
0x128e   :  { %v5168_v36 = vadd.f32 %v5167_v25, %v4890_v40  ;;  %v5219_v37 = vadd.f32 %v5218_v35, %v4898_v41  ;;  %v5169_v46 = vpop.f32.mrb[105].mxu1  ;;  %v5220_v11 = vpop.f32.mrb[105].mxu0 }
0x128f   :  { %v5170_v45 = vadd.f32 %v5169_v46, %v4894_v22  ;;  %v5221_v42 = vadd.f32 %v5220_v11, %v4902_v62  ;;  %v5171_v4 = vpop.f32.mrb[106].mxu1  ;;  %v5222_v8 = vpop.f32.mrb[106].mxu0  ;;  %v18851_v46 = vrot.slane %v18821_v24, %v17919_v60  ;;  %v18855_v11 = vrot.slane %v18821_v24, %v17922_v61 }
0x1290   :  { %v5172_v56 = vadd.f32 %v5171_v4, %v4890_v40  ;;  %v5223_v19 = vadd.f32 %v5222_v8, %v4898_v41  ;;  %v5173_v9 = vpop.f32.mrb[107].mxu1  ;;  %v5224_v13 = vpop.f32.mrb[107].mxu0  ;;  %v5541_v58 = vmax.f32 %v5168_v36, 0.0  ;;  %v5543_v20 = vmax.f32 %v5219_v37, 0.0  ;;  %v16746_v37 = vld [vmem:[%s20834_s10 + $0x508] sm:$0xff]  }
0x1291   :  { %v5174_v44 = vadd.f32 %v5173_v9, %v4894_v22  ;;  %v5225_v54 = vadd.f32 %v5224_v13, %v4902_v62  ;;  %v5542_v47 = vmax.f32 %v5170_v45, 0.0  ;;  %v5544_v63 = vmax.f32 %v5221_v42, 0.0 }
0x1292   :  { %v5557_v59 = vmax.f32 %v5172_v56, 0.0  ;;  %v5559_v5 = vmax.f32 %v5223_v19, 0.0  ;;  %v18859_v4 = vrot.slane %v18821_v24, %v17925_v31  ;;  %v18863_v8 = vrot.slane %v18821_v24, %v17928_v50  ;;  %v16748_v56 = vld [vmem:[%s20834_s10 + $0x550] sm:$0xff]  }
0x1293   :  { %v5558_v6 = vmax.f32 %v5174_v44, 0.0  ;;  %v5560_v32 = vmax.f32 %v5225_v54, 0.0  ;;  %v16749_v19 = vld [vmem:[%s20834_s10 + $0x5d0] sm:$0xff]  }
0x1294   :  { %v5846_v21 = vpack.c.bf16 %v5557_v59, %v5541_v58  ;;  %v5848_v39 = vpack.c.bf16 %v5559_v5, %v5543_v20  ;;  %v16750_v54 = vld [vmem:[%s20834_s10 + $0x510] sm:$0xff]  }
0x1295   :  { %v5847_v34 = vpack.c.bf16 %v5558_v6, %v5542_v47  ;;  %v5849_v3 = vpack.c.bf16 %v5560_v32, %v5544_v63  ;;  %v5177_v7 = vpop.f32.mrb[108].mxu1  ;;  %v5228_v53 = vpop.f32.mrb[108].mxu0  ;;  %v16751_v24 = vld [vmem:[%s20834_s10 + $0x590] sm:$0xff]   ;;  %v16752_v63 = vld [vmem:[%s20834_s10 + $0x558] sm:$0xff]  }
0x1296   :  { %v5178_v17 = vadd.f32 %v5177_v7, %v4890_v40  ;;  %v5229_v57 = vadd.f32 %v5228_v53, %v4898_v41  ;;  %v5179_v10 = vpop.f32.mrb[109].mxu1  ;;  %v5230_v18 = vpop.f32.mrb[109].mxu0  ;;  %v16753_v6 = vld [vmem:[%s20834_s10 + $0x5d8] sm:$0xff]  }
0x1297   :  { %v5180_v38 = vadd.f32 %v5179_v10, %v4894_v22  ;;  %v5231_v12 = vadd.f32 %v5230_v18, %v4902_v62  ;;  %v5181_v1 = vpop.f32.mrb[110].mxu1  ;;  %v5232_v23 = vpop.f32.mrb[110].mxu0  ;;  %6682 = vmatprep.mubr.bf16.mxu1 %v5847_v34  ;;  %6730 = vmatprep.mubr.bf16.mxu0 %v5849_v3  ;;  %v16747_v22 = vld [vmem:[%s20834_s10 + $0x588] sm:$0xff]   ;;  %v16755_v10 = vld [vmem:[%s20834_s10 + $0x598] sm:$0xff]  }
0x1298   :  { %v5182_v25 = vpop.f32.mrb[111].mxu1  ;;  %v5233_v35 = vpop.f32.mrb[111].mxu0  ;;  %6683 = vmatmul.mubr.bf16.vlgmr.msra.gmra.mrb[136].mxu1 %v5846_v21  ;;  %6731 = vmatmul.mubr.bf16.vlgmr.msra.gmra.mrb[136].mxu0 %v5848_v39  ;;  %v5573_v40 = vmax.f32 %v5178_v17, 0.0  ;;  %v5575_v62 = vmax.f32 %v5229_v57, 0.0  ;;  %v16754_v57 = vld [vmem:[%s20834_s10 + $0x518] sm:$0xff]   ;;  %v16757_v1 = vld [vmem:[%s20834_s10 + $0x5e0] sm:$0xff]  }
0x1299   :  { %v5574_v41 = vmax.f32 %v5180_v38, 0.0  ;;  %v5576_v36 = vmax.f32 %v5231_v12, 0.0  ;;  %15241 = vmatpush3.bf16.msra.mxu1 %v16742_v14  ;;  %15269 = vmatpush3.bf16.msra.mxu0 %v16743_v16  ;;  %v16756_v12 = vld [vmem:[%s20834_s10 + $0x560] sm:$0xff]  }
0x129a   :  { %15242 = vmatprep.subr.bf16.mxu1 %v16744_v0  ;;  %15270 = vmatprep.subr.bf16.mxu0 %v16745_v43  ;;  %v5862_v9 = vpack.c.bf16 %v5573_v40, %v5573_v40  ;;  %v5864_v58 = vpack.c.bf16 %v5575_v62, %v5575_v62 }
0x129b   :  { %v5863_v45 = vpack.c.bf16 %v5574_v41, %v5574_v41  ;;  %v5865_v42 = vpack.c.bf16 %v5576_v36, %v5576_v36 }
0x129d   :  { %15243 = vmatpush3.bf16.msra.mxu1 %v16746_v37  ;;  %15271 = vmatpush3.bf16.msra.mxu0 %v16747_v22  ;;  %v5269_v13 = vpop.f32.mrb[112].mxu1  ;;  %v5320_v44 = vpop.f32.mrb[112].mxu0 }
0x129e   :  { %v5270_v20 = vadd.f32 %v5269_v13, %v18851_v46  ;;  %v5321_v59 = vadd.f32 %v5320_v44, %v18855_v11  ;;  %6690 = vmatprep.mubr.bf16.mxu1 %v5863_v45  ;;  %6738 = vmatprep.mubr.bf16.mxu0 %v5865_v42  ;;  %v5271_v5 = vpop.f32.mrb[113].mxu1  ;;  %v5322_v47 = vpop.f32.mrb[113].mxu0  ;;  %v16758_v42 = vld [vmem:[%s20834_s10 + $0x520] sm:$0xff]   ;;  %v16760_v13 = vld [vmem:[%s20834_s10 + $0x568] sm:$0xff]  }
0x129f   :  { %v5272_v32 = vadd.f32 %v5271_v5, %v18859_v4  ;;  %v5323_v21 = vadd.f32 %v5322_v47, %v18863_v8  ;;  %v5273_v39 = vpop.f32.mrb[114].mxu1  ;;  %v5324_v34 = vpop.f32.mrb[114].mxu0  ;;  %15244 = vmatprep.subr.bf16.mxu1 %v16748_v56  ;;  %15272 = vmatprep.subr.bf16.mxu0 %v16749_v19  ;;  %v16759_v56 = vld [vmem:[%s20834_s10 + $0x5a0] sm:$0xff]   ;;  %v16761_v44 = vld [vmem:[%s20834_s10 + $0x5e8] sm:$0xff]  }
0x12a0   :  { %v5274_v3 = vadd.f32 %v5273_v39, %v18851_v46  ;;  %v5325_v7 = vadd.f32 %v5324_v34, %v18855_v11  ;;  %v5275_v53 = vpop.f32.mrb[115].mxu1  ;;  %v5326_v14 = vpop.f32.mrb[115].mxu0  ;;  %6691 = vmatmul.mubr.bf16.gmra.mrb[140].mxu1 %v5862_v9  ;;  %6739 = vmatmul.mubr.bf16.gmra.mrb[140].mxu0 %v5864_v58  ;;  %v5545_v18 = vmax.f32 %v5270_v20, 0.0  ;;  %v5547_v0 = vmax.f32 %v5321_v59, 0.0  ;;  %v18926_v58 = vld [vmem:[%s20836_s9 + $0x18] sm:$0xff]  ;;  %v16762_v5 = vld [vmem:[%s20834_s10 + $0x528] sm:$0xff]  }
0x12a1   :  { %v5276_v16 = vadd.f32 %v5275_v53, %v18859_v4  ;;  %v5327_v17 = vadd.f32 %v5326_v14, %v18863_v8  ;;  %15245 = vmatpush3.bf16.msra.mxu1 %v16750_v54  ;;  %15273 = vmatpush3.bf16.msra.mxu0 %v16751_v24  ;;  %v5546_v23 = vmax.f32 %v5272_v32, 0.0  ;;  %v5548_v25 = vmax.f32 %v5323_v21, 0.0  ;;  %v16763_v47 = vld [vmem:[%s20834_s10 + $0x5a8] sm:$0xff]   ;;  %v16764_v32 = vld [vmem:[%s20834_s10 + $0x570] sm:$0xff]  }
0x12a2   :  { %v5561_v43 = vmax.f32 %v5274_v3, 0.0  ;;  %v5563_v38 = vmax.f32 %v5325_v7, 0.0  ;;  %15246 = vmatprep.subr.bf16.mxu1 %v16752_v63  ;;  %15274 = vmatprep.subr.bf16.mxu0 %v16753_v6  ;;  %v18936_v63 = vrot.slane %v18926_v58, %v17445_v48  ;;  %v18940_v6 = vrot.slane %v18926_v58, %v17448_v49  ;;  %v16765_v21 = vld [vmem:[%s20834_s10 + $0x5f0] sm:$0xff]  }
0x12a3   :  { %v5562_v35 = vmax.f32 %v5276_v16, 0.0  ;;  %v5564_v40 = vmax.f32 %v5327_v17, 0.0  ;;  %v18950_v39 = vrot.slane %v18926_v58, %v17454_v51  ;;  %v18954_v34 = vrot.slane %v18926_v58, %v17457_v52  ;;  %v16766_v16 = vld [vmem:[%s20834_s10 + $0x530] sm:$0xff]  }
0x12a4   :  { %v18903_v41 = vpack.c.bf16 %v5561_v43, %v5545_v18  ;;  %v18905_v36 = vpack.c.bf16 %v5563_v38, %v5547_v0  ;;  %v16767_v17 = vld [vmem:[%s20834_s10 + $0x5b0] sm:$0xff]   ;;  %v16769_v0 = vld [vmem:[%s20834_s10 + $0x5f8] sm:$0xff]  }
0x12a5   :  { %v5851_v37 = vpack.c.bf16 %v5562_v35, %v5546_v23  ;;  %v5853_v22 = vpack.c.bf16 %v5564_v40, %v5548_v25  ;;  %15247 = vmatpush3.bf16.msra.mxu1 %v16754_v57  ;;  %15275 = vmatpush3.bf16.msra.mxu0 %v16755_v10  ;;  %v18907_v62 = vpop.f32.mrb[116].mxu1  ;;  %v18909_v45 = vpop.f32.mrb[116].mxu0 }
0x12a6   :  { %v5281_v19 = vpop.f32.mrb[117].mxu1  ;;  %v5332_v9 = vpop.f32.mrb[117].mxu0  ;;  %15248 = vmatprep.subr.bf16.mxu1 %v16756_v12  ;;  %15276 = vmatprep.subr.bf16.mxu0 %v16757_v1 }
0x12a7   :  { %v5283_v54 = vpop.f32.mrb[118].mxu1  ;;  %v5334_v24 = vpop.f32.mrb[118].mxu0  ;;  %6778 = vmatprep.mubr.bf16.mxu1 %v5851_v37  ;;  %6826 = vmatprep.mubr.bf16.mxu0 %v5853_v22  ;;  %v5282_v3 = vadd.f32 %v5281_v19, %v18859_v4  ;;  %v5333_v7 = vadd.f32 %v5332_v9, %v18863_v8  ;;  %v16768_v8 = vld [vmem:[%s20834_s10 + $0x578] sm:$0xff]  }
0x12a8   :  { %v5284_v20 = vpop.f32.mrb[119].mxu1  ;;  %v5335_v59 = vpop.f32.mrb[119].mxu0  ;;  %v16770_v19 = vld [vmem:[%s20834_s10 + $0x538] sm:$0xff]  }
0x12a9   :  { %15249 = vmatpush3.bf16.msra.mxu1 %v16758_v42  ;;  %15277 = vmatpush3.bf16.msra.mxu0 %v16759_v56  ;;  %v5578_v37 = vmax.f32 %v5282_v3, 0.0  ;;  %v5580_v22 = vmax.f32 %v5333_v7, 0.0  ;;  %v16771_v9 = vld [vmem:[%s20834_s10 + $0x5b8] sm:$0xff]   ;;  %v16772_v20 = vld [vmem:[%s20834_s10 + $0x640] sm:$0xff]  }
0x12aa   :  { %15250 = vmatprep.subr.bf16.mxu1 %v16760_v13  ;;  %15278 = vmatprep.subr.bf16.mxu0 %v16761_v44  ;;  %v16773_v59 = vld [vmem:[%s20834_s10 + $0x6c0] sm:$0xff]  }
0x12ad   :  { %15251 = vmatpush3.bf16.msra.mxu1 %v16762_v5  ;;  %15279 = vmatpush3.bf16.msra.mxu0 %v16763_v47  ;;  %v5371_v53 = vpop.f32.mrb[120].mxu1  ;;  %v5422_v14 = vpop.f32.mrb[120].mxu0 }
0x12ae   :  { %v5372_v57 = vadd.f32 %v5371_v53, %v18936_v63  ;;  %v5423_v10 = vadd.f32 %v5422_v14, %v18940_v6  ;;  %v5373_v18 = vpop.f32.mrb[121].mxu1  ;;  %v5424_v4 = vpop.f32.mrb[121].mxu0  ;;  %15252 = vmatprep.subr.bf16.mxu1 %v16764_v32  ;;  %15280 = vmatprep.subr.bf16.mxu0 %v16765_v21  ;;  %v5280_v53 = vadd.f32 %v18907_v62, %v18851_v46  ;;  %v16774_v46 = vld [vmem:[%s20834_s10 + $0x600] sm:$0xff]  }
0x12af   :  { %v5374_v43 = vadd.f32 %v5373_v18, %v18950_v39  ;;  %v5425_v38 = vadd.f32 %v5424_v4, %v18954_v34  ;;  %v5375_v12 = vpop.f32.mrb[122].mxu1  ;;  %v5426_v1 = vpop.f32.mrb[122].mxu0  ;;  %v16775_v62 = vld [vmem:[%s20834_s10 + $0x680] sm:$0xff]  }
0x12b0   :  { %v5376_v23 = vadd.f32 %v5375_v12, %v18936_v63  ;;  %v5427_v25 = vadd.f32 %v5426_v1, %v18940_v6  ;;  %v5377_v35 = vpop.f32.mrb[123].mxu1  ;;  %v5428_v40 = vpop.f32.mrb[123].mxu0  ;;  %v5549_v13 = vmax.f32 %v5372_v57, 0.0  ;;  %v5551_v44 = vmax.f32 %v5423_v10, 0.0 }
0x12b1   :  { %v5378_v42 = vadd.f32 %v5377_v35, %v18950_v39  ;;  %v5429_v56 = vadd.f32 %v5428_v40, %v18954_v34  ;;  %15253 = vmatpush3.bf16.msra.mxu1 %v16766_v16  ;;  %15281 = vmatpush3.bf16.msra.mxu0 %v16767_v17  ;;  %v5550_v5 = vmax.f32 %v5374_v43, 0.0  ;;  %v5552_v47 = vmax.f32 %v5425_v38, 0.0  ;;  %v16778_v35 = vld [vmem:[%s20834_s10 + $0x608] sm:$0xff]  }
0x12b2   :  { %v5565_v54 = vmax.f32 %v5376_v23, 0.0  ;;  %v5567_v24 = vmax.f32 %v5427_v25, 0.0  ;;  %15254 = vmatprep.subr.bf16.mxu1 %v16768_v8  ;;  %15282 = vmatprep.subr.bf16.mxu0 %v16769_v0  ;;  %v5331_v10 = vadd.f32 %v18909_v45, %v18855_v11  ;;  %v5867_v8 = vpack.c.bf16 %v5578_v37, %v5578_v37  ;;  %v16776_v11 = vld [vmem:[%s20834_s10 + $0x648] sm:$0xff]  }
0x12b3   :  { %v5566_v32 = vmax.f32 %v5378_v42, 0.0  ;;  %v5568_v21 = vmax.f32 %v5429_v56, 0.0  ;;  %v5869_v0 = vpack.c.bf16 %v5580_v22, %v5580_v22  ;;  %v16777_v45 = vld [vmem:[%s20834_s10 + $0x6c8] sm:$0xff]   ;;  %v5577_v23 = vmax.f32 %v5280_v53, 0.0  ;;  %v16780_v42 = vld [vmem:[%s20834_s10 + $0x650] sm:$0xff]  }
0x12b4   :  { %v18990_v3 = vpack.c.bf16 %v5565_v54, %v5549_v13  ;;  %v18992_v7 = vpack.c.bf16 %v5567_v24, %v5551_v44  ;;  %v5579_v25 = vmax.f32 %v5331_v10, 0.0  ;;  %v16779_v40 = vld [vmem:[%s20834_s10 + $0x688] sm:$0xff]   ;;  %v19040_v37 = vrot.slane %v18926_v58, %v17925_v31  ;;  %v16781_v56 = vld [vmem:[%s20834_s10 + $0x6d0] sm:$0xff]   ;;  %v16784_v10 = vld [vmem:[%s20834_s10 + $0x658] sm:$0xff]  }
0x12b5   :  { %v18996_v14 = vpack.c.bf16 %v5566_v32, %v5550_v5  ;;  %v18998_v16 = vpack.c.bf16 %v5568_v21, %v5552_v47  ;;  %15255 = vmatpush3.bf16.msra.mxu1 %v16770_v19  ;;  %15283 = vmatpush3.bf16.msra.mxu0 %v16771_v9  ;;  %v19000_v17 = vpop.f32.mrb[124].mxu1  ;;  %v19002_v57 = vpop.f32.mrb[124].mxu0  ;;  %v19044_v22 = vrot.slane %v18926_v58, %v17928_v50  ;;  %v16783_v5 = vld [vmem:[%s20834_s10 + $0x690] sm:$0xff]  }
0x12b6   :  { %v19006_v18 = vpop.f32.mrb[125].mxu1  ;;  %v19008_v4 = vpop.f32.mrb[125].mxu0  ;;  %15296 = vmatprep.subr.bf16.mxu1 %v16772_v20  ;;  %15324 = vmatprep.subr.bf16.mxu0 %v16773_v59  ;;  %v5866_v19 = vpack.c.bf16 %v5577_v23, %v5577_v23  ;;  %v5868_v44 = vpack.c.bf16 %v5579_v25, %v5579_v25  ;;  %v16782_v59 = vld [vmem:[%s20834_s10 + $0x610] sm:$0xff]   ;;  %v16786_v25 = vld [vmem:[%s20834_s10 + $0x618] sm:$0xff]  }
0x12b7   :  { %v5385_v43 = vpop.f32.mrb[126].mxu1  ;;  %v5436_v38 = vpop.f32.mrb[126].mxu0 }
0x12b8   :  { %6779 = vmatmul.mubr.bf16.vlgmr.msra.gmra.mrb[144].mxu1 %v18903_v41  ;;  %6827 = vmatmul.mubr.bf16.vlgmr.msra.gmra.mrb[144].mxu0 %v18905_v36  ;;  %v5386_v12 = vpop.f32.mrb[127].mxu1  ;;  %v5437_v1 = vpop.f32.mrb[127].mxu0  ;;  %v19032_v41 = vrot.slane %v18926_v58, %v17919_v60  ;;  %v19036_v36 = vrot.slane %v18926_v58, %v17922_v61 }
0x12b9   :  { %6786 = vmatprep.mubr.bf16.mxu1 %v5867_v8  ;;  %6834 = vmatprep.mubr.bf16.mxu0 %v5869_v0 }
0x12ba   :  { %15297 = vmatpush3.bf16.msra.mxu1 %v16774_v46  ;;  %15325 = vmatpush3.bf16.msra.mxu0 %v16775_v62  ;;  %v16785_v46 = vld [vmem:[%s20834_s10 + $0x6d8] sm:$0xff]  }
0x12bb   :  { %15298 = vmatprep.subr.bf16.mxu1 %v16776_v11  ;;  %15326 = vmatprep.subr.bf16.mxu0 %v16777_v45 }
0x12bd   :  { %v5473_v9 = vpop.f32.mrb[128].mxu1  ;;  %v5524_v13 = vpop.f32.mrb[128].mxu0 }
0x12be   :  { %15299 = vmatpush3.bf16.msra.mxu1 %v16778_v35  ;;  %15327 = vmatpush3.bf16.msra.mxu0 %v16779_v40  ;;  %v5474_v54 = vadd.f32 %v5473_v9, %v19032_v41  ;;  %v5525_v24 = vadd.f32 %v5524_v13, %v19036_v36  ;;  %v5475_v58 = vpop.f32.mrb[129].mxu1  ;;  %v5526_v20 = vpop.f32.mrb[129].mxu0  ;;  %v16787_v35 = vld [vmem:[%s20834_s10 + $0x698] sm:$0xff]  }
0x12bf   :  { %v5476_v47 = vadd.f32 %v5475_v58, %v19040_v37  ;;  %v5527_v32 = vadd.f32 %v5526_v20, %v19044_v22  ;;  %v5477_v21 = vpop.f32.mrb[130].mxu1  ;;  %v5528_v53 = vpop.f32.mrb[130].mxu0  ;;  %15300 = vmatprep.subr.bf16.mxu1 %v16780_v42  ;;  %15328 = vmatprep.subr.bf16.mxu0 %v16781_v56 }
0x12c0   :  { %v5478_v62 = vadd.f32 %v5477_v21, %v19032_v41  ;;  %v5529_v8 = vadd.f32 %v5528_v53, %v19036_v36  ;;  %6787 = vmatmul.mubr.bf16.gmra.mrb[148].mxu1 %v5866_v19  ;;  %6835 = vmatmul.mubr.bf16.gmra.mrb[148].mxu0 %v5868_v44  ;;  %v5479_v0 = vpop.f32.mrb[131].mxu1  ;;  %v5530_v43 = vpop.f32.mrb[131].mxu0  ;;  %v5553_v45 = vmax.f32 %v5474_v54, 0.0  ;;  %v5555_v12 = vmax.f32 %v5525_v24, 0.0  ;;  %v16789_v19 = vld [vmem:[%s20834_s10 + $0x6e0] sm:$0xff]   ;;  %v16792_v53 = vld [vmem:[%s20834_s10 + $0x668] sm:$0xff]  }
0x12c1   :  { %v5480_v38 = vadd.f32 %v5479_v0, %v19040_v37  ;;  %v5531_v11 = vadd.f32 %v5530_v43, %v19044_v22  ;;  %6874 = vmatprep.mubr.bf16.mxu1 %v18996_v14  ;;  %6922 = vmatprep.mubr.bf16.mxu0 %v18998_v16  ;;  %v5554_v40 = vmax.f32 %v5476_v47, 0.0  ;;  %v5556_v42 = vmax.f32 %v5527_v32, 0.0  ;;  %v16788_v16 = vld [vmem:[%s20834_s10 + $0x660] sm:$0xff]   ;;  %v16795_v0 = vld [vmem:[%s20834_s10 + $0x6a8] sm:$0xff]   ;;  %v16796_v43 = vld [vmem:[%s20834_s10 + $0x670] sm:$0xff]  }
0x12c2   :  { %v5569_v1 = vmax.f32 %v5478_v62, 0.0  ;;  %v5571_v23 = vmax.f32 %v5529_v8, 0.0  ;;  %15301 = vmatpush3.bf16.msra.mxu1 %v16782_v59  ;;  %15329 = vmatpush3.bf16.msra.mxu0 %v16783_v5  ;;  %v16790_v5 = vld [vmem:[%s20834_s10 + $0x620] sm:$0xff]   ;;  %v16794_v8 = vld [vmem:[%s20834_s10 + $0x628] sm:$0xff]  }
0x12c3   :  { %v5570_v56 = vmax.f32 %v5480_v38, 0.0  ;;  %v5572_v14 = vmax.f32 %v5531_v11, 0.0  ;;  %15302 = vmatprep.subr.bf16.mxu1 %v16784_v10  ;;  %15330 = vmatprep.subr.bf16.mxu0 %v16785_v46  ;;  %v16791_v47 = vld [vmem:[%s20834_s10 + $0x6a0] sm:$0xff]   ;;  %v16793_v10 = vld [vmem:[%s20834_s10 + $0x6e8] sm:$0xff]   ;;  %v16797_v38 = vld [vmem:[%s20834_s10 + $0x6f0] sm:$0xff]  }
0x12c4   :  { %v19086_v9 = vpack.c.bf16 %v5569_v1, %v5553_v45  ;;  %v19088_v13 = vpack.c.bf16 %v5571_v23, %v5555_v12  ;;  %v16798_v11 = vld [vmem:[%s20834_s10 + $0x630] sm:$0xff]   ;;  %v16800_v12 = vld [vmem:[%s20834_s10 + $0x678] sm:$0xff]   ;;  %v5384_v23 = vadd.f32 %v19006_v18, %v18950_v39  ;;  %v16805_v39 = vld [vmem:[%s20834_s10 + $0x7c0] sm:$0xff]  }
0x12c5   :  { %v19090_v44 = vpack.c.bf16 %v5570_v56, %v5554_v40  ;;  %v19092_v54 = vpack.c.bf16 %v5572_v14, %v5556_v42  ;;  %v19094_v24 = vpop.f32.mrb[132].mxu1  ;;  %v19096_v58 = vpop.f32.mrb[132].mxu0  ;;  %v16799_v45 = vld [vmem:[%s20834_s10 + $0x6b0] sm:$0xff]   ;;  %v16801_v1 = vld [vmem:[%s20834_s10 + $0x6f8] sm:$0xff]   ;;  %v16804_v42 = vld [vmem:[%s20834_s10 + $0x740] sm:$0xff]   ;;  %v5433_v56 = vadd.f32 %v19002_v57, %v18940_v6 }
0x12c6   :  { %15303 = vmatpush3.bf16.msra.mxu1 %v16786_v25  ;;  %15331 = vmatpush3.bf16.msra.mxu0 %v16787_v35  ;;  %v19098_v20 = vpop.f32.mrb[133].mxu1  ;;  %v19100_v59 = vpop.f32.mrb[133].mxu0  ;;  %v5435_v25 = vadd.f32 %v19008_v4, %v18954_v34  ;;  %v16802_v35 = vld [vmem:[%s20834_s10 + $0x638] sm:$0xff]   ;;  %v5582_v34 = vmax.f32 %v5384_v23, 0.0  ;;  %v5382_v4 = vadd.f32 %v19000_v17, %v18936_v63  ;;  %v16806_v14 = vld [vmem:[%s20834_s10 + $0x700] sm:$0xff]   ;;  %v16809_v63 = vld [vmem:[%s20834_s10 + $0x7c8] sm:$0xff]  }
0x12c7   :  { %v5487_v32 = vpop.f32.mrb[134].mxu1  ;;  %v5538_v21 = vpop.f32.mrb[134].mxu0  ;;  %15304 = vmatprep.subr.bf16.mxu1 %v16788_v16  ;;  %15332 = vmatprep.subr.bf16.mxu0 %v16789_v19  ;;  %v16803_v40 = vld [vmem:[%s20834_s10 + $0x6b8] sm:$0xff]   ;;  %v16807_v16 = vld [vmem:[%s20834_s10 + $0x780] sm:$0xff]   ;;  %v5583_v17 = vmax.f32 %v5433_v56, 0.0  ;;  %v16810_v57 = vld [vmem:[%s20834_s10 + $0x708] sm:$0xff]  }
0x12c8   :  { %v5488_v46 = vpop.f32.mrb[135].mxu1  ;;  %v5539_v62 = vpop.f32.mrb[135].mxu0  ;;  %v5584_v18 = vmax.f32 %v5435_v25, 0.0  ;;  %v5871_v19 = vpack.c.bf16 %v5582_v34, %v5582_v34  ;;  %v5581_v6 = vmax.f32 %v5382_v4, 0.0  ;;  %v16811_v32 = vld [vmem:[%s20834_s10 + $0x788] sm:$0xff]   ;;  %v16828_v25 = vld [vmem:[%s20834_s10 + $0x770] sm:$0xff]   ;;  %v5537_v4 = vadd.f32 %v19100_v59, %v19044_v22 }
0x12c9   :  { %v16815_v46 = vld [vmem:[%s20834_s10 + $0x790] sm:$0xff]   ;;  %v16816_v62 = vld [vmem:[%s20834_s10 + $0x758] sm:$0xff]   ;;  %v16827_v23 = vld [vmem:[%s20834_s10 + $0x7a8] sm:$0xff]   ;;  %v5535_v22 = vadd.f32 %v19096_v58, %v19036_v36 }
0x12ca   :  { %15305 = vmatpush3.bf16.msra.mxu1 %v16790_v5  ;;  %15333 = vmatpush3.bf16.msra.mxu0 %v16791_v47  ;;  %v5873_v5 = vpack.c.bf16 %v5584_v18, %v5584_v18  ;;  %v16808_v47 = vld [vmem:[%s20834_s10 + $0x748] sm:$0xff]   ;;  %v5870_v21 = vpack.c.bf16 %v5581_v6, %v5581_v6  ;;  %v16833_v34 = vld [vmem:[%s20834_s10 + $0x7f8] sm:$0xff]   ;;  %v5486_v18 = vadd.f32 %v19098_v20, %v19040_v37 }
0x12cb   :  { %15306 = vmatprep.subr.bf16.mxu1 %v16792_v53  ;;  %15334 = vmatprep.subr.bf16.mxu0 %v16793_v10  ;;  %v5872_v53 = vpack.c.bf16 %v5583_v17, %v5583_v17  ;;  %v16814_v10 = vld [vmem:[%s20834_s10 + $0x710] sm:$0xff]   ;;  %v16834_v56 = vld [vmem:[%s20834_s10 + $0x738] sm:$0xff]   ;;  %v5484_v37 = vadd.f32 %v19094_v24, %v19032_v41  ;;  %v19279_v24 = vld [vmem:[%s20835_s11 + $0x8] sm:$0x1f] }
0x12cc   :  { %v5881_v58 = vrot.slane %v19279_v24, %v17445_v48 }
0x12ce   :  { %15307 = vmatpush3.bf16.msra.mxu1 %v16794_v8  ;;  %15335 = vmatpush3.bf16.msra.mxu0 %v16795_v0  ;;  %v16817_v8 = vld [vmem:[%s20834_s10 + $0x7d8] sm:$0xff]  }
0x12cf   :  { %15308 = vmatprep.subr.bf16.mxu1 %v16796_v43  ;;  %15336 = vmatprep.subr.bf16.mxu0 %v16797_v38  ;;  %v16818_v0 = vld [vmem:[%s20834_s10 + $0x718] sm:$0xff]   ;;  %v16820_v38 = vld [vmem:[%s20834_s10 + $0x760] sm:$0xff]  }
0x12d0   :  { %v16819_v43 = vld [vmem:[%s20834_s10 + $0x798] sm:$0xff]  }
0x12d2   :  { %15309 = vmatpush3.bf16.msra.mxu1 %v16798_v11  ;;  %15337 = vmatpush3.bf16.msra.mxu0 %v16799_v45  ;;  %v16823_v11 = vld [vmem:[%s20834_s10 + $0x7a0] sm:$0xff]   ;;  %v16824_v45 = vld [vmem:[%s20834_s10 + $0x768] sm:$0xff]  }
0x12d3   :  { %15310 = vmatprep.subr.bf16.mxu1 %v16800_v12  ;;  %15338 = vmatprep.subr.bf16.mxu0 %v16801_v1  ;;  %v16825_v12 = vld [vmem:[%s20834_s10 + $0x7e8] sm:$0xff]  }
0x12d4   :  { %v16826_v1 = vld [vmem:[%s20834_s10 + $0x728] sm:$0xff]  }
0x12d6   :  { %15311 = vmatpush3.bf16.msra.mxu1 %v16802_v35  ;;  %15339 = vmatpush3.bf16.msra.mxu0 %v16803_v40  ;;  %v16829_v35 = vld [vmem:[%s20834_s10 + $0x7f0] sm:$0xff]  }
0x12d7   :  { %15352 = vmatprep.subr.bf16.mxu1 %v16804_v42  ;;  %15380 = vmatprep.subr.bf16.mxu0 %v16805_v39  ;;  %v16830_v40 = vld [vmem:[%s20834_s10 + $0x730] sm:$0xff]   ;;  %v16832_v39 = vld [vmem:[%s20834_s10 + $0x778] sm:$0xff]  }
0x12d8   :  { %v16831_v42 = vld [vmem:[%s20834_s10 + $0x7b0] sm:$0xff]  }
0x12d9   :  { %6875 = vmatmul.mubr.bf16.vlgmr.msra.gmra.mrb[152].mxu1 %v18990_v3  ;;  %6923 = vmatmul.mubr.bf16.vlgmr.msra.gmra.mrb[152].mxu0 %v18992_v7  ;;  %v16812_v3 = vld [vmem:[%s20834_s10 + $0x750] sm:$0xff]  }
0x12da   :  { %6882 = vmatprep.mubr.bf16.mxu1 %v5871_v19  ;;  %6930 = vmatprep.mubr.bf16.mxu0 %v5873_v5  ;;  %v16813_v7 = vld [vmem:[%s20834_s10 + $0x7d0] sm:$0xff]   ;;  %v5588_v19 = vmax.f32 %v5537_v4, 0.0  ;;  %v5585_v5 = vmax.f32 %v5484_v37, 0.0 }
0x12db   :  { %15353 = vmatpush3.bf16.msra.mxu1 %v16806_v14  ;;  %15381 = vmatpush3.bf16.msra.mxu0 %v16807_v16  ;;  %v16835_v14 = vld [vmem:[%s20834_s10 + $0x7b8] sm:$0xff]   ;;  %v5586_v16 = vmax.f32 %v5486_v18, 0.0 }
0x12dc   :  { %15354 = vmatprep.subr.bf16.mxu1 %v16808_v47  ;;  %15382 = vmatprep.subr.bf16.mxu0 %v16809_v63  ;;  %v5877_v59 = vpack.c.bf16 %v5588_v19, %v5588_v19  ;;  %v5587_v47 = vmax.f32 %v5535_v22, 0.0  ;;  %v5874_v41 = vpack.c.bf16 %v5585_v5, %v5585_v5 }
0x12dd   :  { %v5875_v20 = vpack.c.bf16 %v5586_v16, %v5586_v16 }
0x12de   :  { %v5876_v36 = vpack.c.bf16 %v5587_v47, %v5587_v47 }
0x12df   :  { %15355 = vmatpush3.bf16.msra.mxu1 %v16810_v57  ;;  %15383 = vmatpush3.bf16.msra.mxu0 %v16811_v32 }
0x12e0   :  { %15356 = vmatprep.subr.bf16.mxu1 %v16812_v3  ;;  %15384 = vmatprep.subr.bf16.mxu0 %v16813_v7 }
0x12e1   :  { %6883 = vmatmul.mubr.bf16.gmra.mrb[156].mxu1 %v5870_v21  ;;  %6931 = vmatmul.mubr.bf16.gmra.mrb[156].mxu0 %v5872_v53 }
0x12e2   :  { %6970 = vmatprep.mubr.bf16.mxu1 %v19090_v44  ;;  %7018 = vmatprep.mubr.bf16.mxu0 %v19092_v54  ;;  %v16821_v44 = vld [vmem:[%s20834_s10 + $0x7e0] sm:$0xff]  }
0x12e3   :  { %15357 = vmatpush3.bf16.msra.mxu1 %v16814_v10  ;;  %15385 = vmatpush3.bf16.msra.mxu0 %v16815_v46  ;;  %v16822_v54 = vld [vmem:[%s20834_s10 + $0x720] sm:$0xff]  }
0x12e4   :  { %15358 = vmatprep.subr.bf16.mxu1 %v16816_v62  ;;  %15386 = vmatprep.subr.bf16.mxu0 %v16817_v8 }
0x12e7   :  { %15359 = vmatpush3.bf16.msra.mxu1 %v16818_v0  ;;  %15387 = vmatpush3.bf16.msra.mxu0 %v16819_v43 }
0x12e8   :  { %15360 = vmatprep.subr.bf16.mxu1 %v16820_v38  ;;  %15388 = vmatprep.subr.bf16.mxu0 %v16821_v44 }
0x12eb   :  { %15361 = vmatpush3.bf16.msra.mxu1 %v16822_v54  ;;  %15389 = vmatpush3.bf16.msra.mxu0 %v16823_v11 }
0x12ec   :  { %15362 = vmatprep.subr.bf16.mxu1 %v16824_v45  ;;  %15390 = vmatprep.subr.bf16.mxu0 %v16825_v12 }
0x12ef   :  { %15363 = vmatpush3.bf16.msra.mxu1 %v16826_v1  ;;  %15391 = vmatpush3.bf16.msra.mxu0 %v16827_v23 }
0x12f0   :  { %15364 = vmatprep.subr.bf16.mxu1 %v16828_v25  ;;  %15392 = vmatprep.subr.bf16.mxu0 %v16829_v35 }
0x12f3   :  { %15365 = vmatpush3.bf16.msra.mxu1 %v16830_v40  ;;  %15393 = vmatpush3.bf16.msra.mxu0 %v16831_v42 }
0x12f4   :  { %15366 = vmatprep.subr.bf16.mxu1 %v16832_v39  ;;  %15394 = vmatprep.subr.bf16.mxu0 %v16833_v34 }
0x12f7   :  { %15367 = vmatpush3.bf16.msra.mxu1 %v16834_v56  ;;  %15395 = vmatpush3.bf16.msra.mxu0 %v16835_v14 }
0x12f8   :  { %16400 = vmatprep.subr.msk.bf16.mxu0 %vm17492_vm1, %v17225_v28 }
0x12fa   :  { %6971 = vmatmul.mubr.bf16.vlgmr.msra.gmra.mrb[160].mxu1 %v19086_v9  ;;  %7019 = vmatmul.mubr.bf16.vlgmr.msra.gmra.mrb[160].mxu0 %v19088_v13 }
0x12fb   :  { %6978 = vmatprep.mubr.bf16.mxu1 %v5875_v20  ;;  %7026 = vmatprep.mubr.bf16.mxu0 %v5877_v59 }
0x12fc   :  { %16402 = vmatpush3.bf16.msk.msra.mxu0 %vm17492_vm1, %v17225_v28 }
0x12fd   :  { %16404 = vmatprep.subr.msk.bf16.mxu0 %vm17496_vm2, %v17225_v28 }
0x1300   :  { %16406 = vmatpush3.bf16.msk.msra.mxu0 %vm17496_vm2, %v17225_v28 }
0x1301   :  { %16024 = vmatprep.subr.msk.mxu0 %vm818_vm0, %v17519_v30 }
0x1302   :  { %6979 = vmatmul.mubr.bf16.gmra.mrb[164].mxu1 %v5874_v41  ;;  %7027 = vmatmul.mubr.bf16.gmra.mrb[164].mxu0 %v5876_v36 }
0x136b   :  { %v15200_v9 = vpop.f32.mrb[136].mxu1  ;;  %v15228_v13 = vpop.f32.mrb[136].mxu0 }
0x136c   :  { %v15201_v63 = vpop.f32.mrb[137].mxu1  ;;  %v15229_v6 = vpop.f32.mrb[137].mxu0 }
0x136d   :  { %v15202_v17 = vadd.f32 %v15201_v63, %v15200_v9  ;;  %v15230_v57 = vadd.f32 %v15229_v6, %v15228_v13  ;;  %v15203_v32 = vpop.f32.mrb[138].mxu1  ;;  %v15231_v3 = vpop.f32.mrb[138].mxu0 }
0x136e   :  { %v15204_v7 = vpop.f32.mrb[139].mxu1  ;;  %v15232_v21 = vpop.f32.mrb[139].mxu0 }
0x136f   :  { %v6685_v53 = vadd.f32 %v15202_v17, %v5881_v58  ;;  %v15205_v10 = vadd.f32 %v15204_v7, %v15203_v32  ;;  %v15233_v46 = vadd.f32 %v15232_v21, %v15231_v3 }
0x1371   :  { %v6733_v62 = vadd.f32 %v15230_v57, %v6685_v53  ;;  %v6688_v8 = vadd.f32 %v15205_v10, %v5881_v58 }
0x1373   :  { %v6736_v0 = vadd.f32 %v15233_v46, %v6688_v8  ;;  %v15206_v43 = vpop.f32.mrb[140].mxu1  ;;  %v15234_v38 = vpop.f32.mrb[140].mxu0 }
0x1374   :  { %v15207_v44 = vpop.f32.mrb[141].mxu1  ;;  %v15235_v54 = vpop.f32.mrb[141].mxu0 }
0x1375   :  { %v15208_v11 = vadd.f32 %v15207_v44, %v15206_v43  ;;  %v15236_v45 = vadd.f32 %v15235_v54, %v15234_v38  ;;  %v15209_v12 = vpop.f32.mrb[142].mxu1  ;;  %v15237_v1 = vpop.f32.mrb[142].mxu0 }
0x1376   :  { %v15210_v23 = vpop.f32.mrb[143].mxu1  ;;  %v15238_v25 = vpop.f32.mrb[143].mxu0 }
0x1377   :  { %v6693_v35 = vadd.f32 %v15208_v11, %v5881_v58 }
0x1379   :  { %v6741_v40 = vadd.f32 %v15236_v45, %v6693_v35 }
0x138b   :  { %v15256_v42 = vpop.f32.mrb[144].mxu1  ;;  %v15284_v39 = vpop.f32.mrb[144].mxu0 }
0x138c   :  { %v15257_v34 = vpop.f32.mrb[145].mxu1  ;;  %v15285_v18 = vpop.f32.mrb[145].mxu0 }
0x138d   :  { %v15258_v4 = vadd.f32 %v15257_v34, %v15256_v42  ;;  %v15286_v56 = vadd.f32 %v15285_v18, %v15284_v39  ;;  %v15259_v14 = vpop.f32.mrb[146].mxu1  ;;  %v15287_v16 = vpop.f32.mrb[146].mxu0 }
0x138e   :  { %v15260_v19 = vpop.f32.mrb[147].mxu1  ;;  %v15288_v37 = vpop.f32.mrb[147].mxu0 }
0x138f   :  { %v6781_v22 = vadd.f32 %v15258_v4, %v6733_v62  ;;  %v15261_v20 = vadd.f32 %v15260_v19, %v15259_v14  ;;  %v15289_v59 = vadd.f32 %v15288_v37, %v15287_v16 }
0x1391   :  { %v6829_v5 = vadd.f32 %v15286_v56, %v6781_v22  ;;  %v6784_v47 = vadd.f32 %v15261_v20, %v6736_v0 }
0x1393   :  { %v6832_v41 = vadd.f32 %v15289_v59, %v6784_v47  ;;  %v15262_v36 = vpop.f32.mrb[148].mxu1  ;;  %v15290_v9 = vpop.f32.mrb[148].mxu0 }
0x1394   :  { %v15263_v13 = vpop.f32.mrb[149].mxu1  ;;  %v15291_v58 = vpop.f32.mrb[149].mxu0 }
0x1395   :  { %v15264_v63 = vadd.f32 %v15263_v13, %v15262_v36  ;;  %v15292_v6 = vadd.f32 %v15291_v58, %v15290_v9  ;;  %v15265_v17 = vpop.f32.mrb[150].mxu1  ;;  %v15293_v57 = vpop.f32.mrb[150].mxu0 }
0x1396   :  { %v15266_v32 = vpop.f32.mrb[151].mxu1  ;;  %v15294_v3 = vpop.f32.mrb[151].mxu0 }
0x1397   :  { %v6789_v7 = vadd.f32 %v15264_v63, %v6741_v40 }
0x1399   :  { %v6837_v21 = vadd.f32 %v15292_v6, %v6789_v7 }
0x13ac   :  { %v15312_v53 = vpop.f32.mrb[152].mxu1  ;;  %v15340_v10 = vpop.f32.mrb[152].mxu0 }
0x13ad   :  { %v15313_v46 = vpop.f32.mrb[153].mxu1  ;;  %v15341_v62 = vpop.f32.mrb[153].mxu0 }
0x13ae   :  { %v15314_v8 = vadd.f32 %v15313_v46, %v15312_v53  ;;  %v15342_v43 = vadd.f32 %v15341_v62, %v15340_v10  ;;  %v15315_v0 = vpop.f32.mrb[154].mxu1  ;;  %v15343_v38 = vpop.f32.mrb[154].mxu0 }
0x13af   :  { %v15316_v44 = vpop.f32.mrb[155].mxu1  ;;  %v15344_v54 = vpop.f32.mrb[155].mxu0 }
0x13b0   :  { %v6877_v11 = vadd.f32 %v15314_v8, %v6829_v5  ;;  %v15317_v45 = vadd.f32 %v15316_v44, %v15315_v0  ;;  %v15345_v12 = vadd.f32 %v15344_v54, %v15343_v38 }
0x13b2   :  { %v6925_v1 = vadd.f32 %v15342_v43, %v6877_v11  ;;  %v6880_v23 = vadd.f32 %v15317_v45, %v6832_v41 }
0x13b4   :  { %v6928_v25 = vadd.f32 %v15345_v12, %v6880_v23  ;;  %v15318_v35 = vpop.f32.mrb[156].mxu1  ;;  %v15346_v42 = vpop.f32.mrb[156].mxu0 }
0x13b5   :  { %v15319_v40 = vpop.f32.mrb[157].mxu1  ;;  %v15347_v39 = vpop.f32.mrb[157].mxu0 }
0x13b6   :  { %v15320_v34 = vadd.f32 %v15319_v40, %v15318_v35  ;;  %v15348_v18 = vadd.f32 %v15347_v39, %v15346_v42  ;;  %v15321_v4 = vpop.f32.mrb[158].mxu1  ;;  %v15349_v56 = vpop.f32.mrb[158].mxu0 }
0x13b7   :  { %v15322_v14 = vpop.f32.mrb[159].mxu1  ;;  %v15350_v16 = vpop.f32.mrb[159].mxu0 }
0x13b8   :  { %v6885_v19 = vadd.f32 %v15320_v34, %v6837_v21 }
0x13ba   :  { %v6933_v37 = vadd.f32 %v15348_v18, %v6885_v19 }
0x13cd   :  { %v15368_v22 = vpop.f32.mrb[160].mxu1  ;;  %v15396_v20 = vpop.f32.mrb[160].mxu0 }
0x13ce   :  { %v15369_v59 = vpop.f32.mrb[161].mxu1  ;;  %v15397_v5 = vpop.f32.mrb[161].mxu0 }
0x13cf   :  { %v15370_v47 = vadd.f32 %v15369_v59, %v15368_v22  ;;  %v15398_v36 = vadd.f32 %v15397_v5, %v15396_v20  ;;  %v15371_v41 = vpop.f32.mrb[162].mxu1  ;;  %v15399_v9 = vpop.f32.mrb[162].mxu0  ;;  %v16836_v22 = vld [vmem:[%s20829_s5 + $0x20] sm:$0xff]   ;;  %v16837_v20 = vld [vmem:[%s20829_s5 + $0x28] sm:$0xff]  }
0x13d0   :  { %v15372_v13 = vpop.f32.mrb[163].mxu1  ;;  %v15400_v58 = vpop.f32.mrb[163].mxu0  ;;  %15994 = vmatprep.subr.bf16.mxu1 %v16836_v22 }
0x13d1   :  { %v6973_v63 = vadd.f32 %v15370_v47, %v6925_v1  ;;  %v15373_v6 = vadd.f32 %v15372_v13, %v15371_v41  ;;  %v15401_v17 = vadd.f32 %v15400_v58, %v15399_v9  ;;  %15995 = vmatpush3.bf16.msra.mxu1 %v16836_v22 }
0x13d2   :  { %15996 = vmatprep.subr.bf16.mxu1 %v16837_v20 }
0x13d3   :  { %v7021_v57 = vadd.f32 %v15398_v36, %v6973_v63  ;;  %v6976_v32 = vadd.f32 %v15373_v6, %v6928_v25  ;;  %v7079_v6 = vrot.slane %v19279_v24, %v17457_v52 }
0x13d5   :  { %v7024_v3 = vadd.f32 %v15401_v17, %v6976_v32  ;;  %v15374_v7 = vpop.f32.mrb[164].mxu1  ;;  %v15402_v53 = vpop.f32.mrb[164].mxu0  ;;  %v7034_v21 = vadd.f32 %v7021_v57, %v18599_v15  ;;  %15997 = vmatpush3.bf16.msra.mxu1 %v16837_v20 }
0x13d6   :  { %v15375_v10 = vpop.f32.mrb[165].mxu1  ;;  %v15403_v46 = vpop.f32.mrb[165].mxu0  ;;  %16408 = vmatprep.subr.msk.bf16.mxu1 %vm17492_vm1, %v17225_v28 }
0x13d7   :  { %v15376_v62 = vadd.f32 %v15375_v10, %v15374_v7  ;;  %v15404_v8 = vadd.f32 %v15403_v46, %v15402_v53  ;;  %v15377_v43 = vpop.f32.mrb[166].mxu1  ;;  %v15405_v0 = vpop.f32.mrb[166].mxu0  ;;  %v7037_v38 = vsel %vm20935_vm14, %v7034_v21, 0.0  ;;  %v7035_v44 = vadd.f32 %v7024_v3, %v18601_v55  ;;  %vm20947_vm14 = vmmov %vm20946_vm13 }
0x13d8   :  { %v15378_v54 = vpop.f32.mrb[167].mxu1  ;;  %v15406_v11 = vpop.f32.mrb[167].mxu0  ;;  %7038 = vadd.xlane.f32.xlu1 %v7037_v38  ;;  %v7086_v53 = vrot.slane %v19279_v24, %v17919_v60  ;;  %v14189_v24 = vld [vmem:[%s20831_s7 + $0x2] ss:$0 sm:$0xff] }
0x13d9   :  { %v6981_v45 = vadd.f32 %v15376_v62, %v6933_v37  ;;  %v7040_v12 = vsel %vm20936_vm15, %v7035_v44, 0.0  ;;  %vm20948_vm15 = vmmov %vm20946_vm13 }
0x13da   :  { %7041 = vadd.xlane.f32.xlu0 %v7040_v12 }
0x13db   :  { %v7029_v1 = vadd.f32 %v15404_v8, %v6981_v45 }
0x13dd   :  { %v7036_v15 = vadd.f32 %v7029_v1, %v18634_v33 }
0x13df   :  { %v7043_v23 = vsel %vm20876_vm3, %v7036_v15, 0.0  ;;  %vm20949_vm3 = vmmov %vm20946_vm13 }
0x13e0   :  { %7044 = vadd.xlane.f32.xlu1 %v7043_v23 }
0x1465   :  { %v7039_v25 = vpop.xlane.xlu1 %7038 }
0x1466   :  { %v7046_v35 = vmul.f32 0.03125, %v7039_v25 }
0x1467   :  { %v7042_v42 = vpop.xlane.xlu0 %7041 }
0x1468   :  { %v7049_v40 = vsub.f32 %v7034_v21, %v7046_v35  ;;  %v7047_v39 = vmul.f32 0.03125, %v7042_v42 }
0x146a   :  { %v7050_v34 = vsub.f32 %v7035_v44, %v7047_v39  ;;  %v7052_v55 = vmul.f32 %v7049_v40, %v7049_v40 }
0x146c   :  { %v7055_v18 = vsel %vm20937_vm4, %v7052_v55, 0.0  ;;  %v7053_v4 = vmul.f32 %v7050_v34, %v7050_v34 }
0x146d   :  { %7056 = vadd.xlane.f32.xlu0 %v7055_v18  ;;  %v7045_v56 = vpop.xlane.xlu1 %7044 }
0x146e   :  { %v7048_v14 = vmul.f32 0.03125, %v7045_v56  ;;  %v7058_v16 = vsel %vm20938_vm5, %v7053_v4, 0.0  ;;  %vm20950_vm5 = vmmov %vm20937_vm4 }
0x146f   :  { %7059 = vadd.xlane.f32.xlu1 %v7058_v16 }
0x1470   :  { %v7051_v33 = vsub.f32 %v7036_v15, %v7048_v14 }
0x1472   :  { %v7054_v19 = vmul.f32 %v7051_v33, %v7051_v33 }
0x1474   :  { %v7061_v37 = vsel %vm20939_vm6, %v7054_v19, 0.0  ;;  %vm20951_vm6 = vmmov %vm20937_vm4 }
0x1475   :  { %7062 = vadd.xlane.f32.xlu0 %v7061_v37 }
0x14fa   :  { %v7057_v59 = vpop.xlane.xlu0 %7056 }
0x14fb   :  { %v7064_v5 = vmul.f32 0.03125, %v7057_v59 }
0x14fc   :  { %v7060_v47 = vpop.xlane.xlu1 %7059 }
0x14fd   :  { %v7067_v36 = vadd.f32 1e-05, %v7064_v5  ;;  %v7065_v41 = vmul.f32 0.03125, %v7060_v47 }
0x14ff   :  { %17058 = vrsqrt.f32 %v7067_v36  ;;  %v7068_v9 = vadd.f32 1e-05, %v7065_v41 }
0x1501   :  { %17060 = vrsqrt.f32 %v7068_v9 }
0x1502   :  { %v7063_v13 = vpop.xlane.xlu0 %7062 }
0x1503   :  { %v7066_v58 = vmul.f32 0.03125, %v7063_v13 }
0x1505   :  { %v7069_v63 = vadd.f32 1e-05, %v7066_v58 }
0x1507   :  { %17062 = vrsqrt.f32 %v7069_v63 }
0x1509   :  { %v17059_v17 = vpop.eup %17058 }
0x150a   :  { %v7073_v57 = vmul.f32 %v17059_v17, %v7049_v40 }
0x150b   :  { %v17061_v32 = vpop.eup %17060 }
0x150c   :  { %v7074_v3 = vmul.f32 %v17061_v32, %v7050_v34  ;;  %v7080_v7 = vmul.f32 %v7079_v6, %v7073_v57 }
0x150e   :  { %v7081_v21 = vmul.f32 %v7079_v6, %v7074_v3  ;;  %v19305_v10 = vadd.f32 %v7086_v53, %v7080_v7 }
0x1510   :  { %v19307_v46 = vadd.f32 %v7086_v53, %v7081_v21 }
0x1511   :  { %v17063_v62 = vpop.eup %17062 }
0x1512   :  { %v7075_v8 = vmul.f32 %v17063_v62, %v7051_v33  ;;  %v7102_v43 = vpack.c.bf16 %v19307_v46, %v19305_v10 }
0x1514   :  { %v7082_v0 = vmul.f32 %v7079_v6, %v7075_v8  ;;  %15998 = vmatprep.mubr.msk.bf16.mxu1 %vm20940_vm7, %v7102_v43  ;;  %vm20952_vm7 = vmmov %vm20937_vm4 }
0x1516   :  { %v19312_v38 = vadd.f32 %v7086_v53, %v7082_v0 }
0x1518   :  { %v7103_v44 = vpack.c.bf16 %v19312_v38, %v19312_v38 }
0x151a   :  { %15999 = vmatmul.mubr.msk.bf16.vlgmr.msra.gmra.mrb[168].mxu1 %vm20941_vm8, %v7103_v44  ;;  %vm20953_vm8 = vmmov %vm20949_vm3 }
0x151b   :  { %16410 = vmatpush3.bf16.msk.msra.mxu1 %vm17492_vm1, %v17225_v28 }
0x151c   :  { %16412 = vmatprep.subr.msk.bf16.mxu1 %vm17496_vm2, %v17225_v28 }
0x151f   :  { %16414 = vmatpush3.bf16.msk.msra.mxu1 %vm17496_vm2, %v17225_v28 }
0x1520   :  { %16029 = vmatprep.subr.msk.mxu1 %vm818_vm0, %v17519_v30 }
0x15ed   :  { %v16000_v54 = vpop.f32.mrb[168].mxu1 }
0x15ee   :  { %v7162_v11 = vpop.f32.mrb[169].mxu1  ;;  %v7171_v45 = vadd.f32 %v16000_v54, %v14189_v24 }
0x15ef   :  { %v7163_v12 = vadd.f32 %v14189_v24, %v7162_v11  ;;  %v16001_v1 = vpop.f32.mrb[170].mxu1 }
0x15f0   :  { %v7165_v15 = vpop.f32.mrb[171].mxu1  ;;  %v7272_v25 = vrot.slane %v7171_v45, 4  ;;  %v7178_v59 = vmul.f32 0.35355338, %v7171_v45 }
0x15f1   :  { %v7166_v23 = vadd.f32 %v14189_v24, %v7165_v15  ;;  %7181 = vrot.lane.b32.xlu1 %v7163_v12, %s17227_s0  ;;  %v7565_v42 = vrot.slane %v7163_v12, 4  ;;  %v7176_v34 = vmul.f32 0.35355338, %v7163_v12 }
0x15f3   :  { %v7271_v35 = vrot.slane %v7166_v23, 4  ;;  %v7177_v4 = vmul.f32 0.35355338, %v7166_v23 }
0x15f5   :  { %7183 = vrot.lane.b32.xlu1 %v7166_v23, %s17227_s0  ;;  %v7273_v40 = vsel %vm818_vm0, %v7271_v35, %v7272_v25  ;;  %v7566_v39 = vsel %vm818_vm0, %v7565_v42, %v7271_v35 }
0x15f6   :  { %7274 = vrot.lane.b32.xlu0 %v7273_v40, %s17227_s0 }
0x15f9   :  { %7276 = vrot.lane.b32.xlu1 %v7272_v25, %s17227_s0 }
0x15fa   :  { %7567 = vrot.lane.b32.xlu0 %v7565_v42, %s17227_s0 }
0x15fd   :  { %7569 = vrot.lane.b32.xlu1 %v7566_v39, %s17227_s0 }
0x15fe   :  { %7659 = vrot.lane.b32.xlu0 %v7171_v45, %s17227_s0 }
0x1601   :  { %7464 = vrot.lane.b32.xlu1 %v7163_v12, %s17228_s17 }
0x1602   :  { %7555 = vrot.lane.b32.xlu0 %v7273_v40, %s17228_s17 }
0x1605   :  { %7466 = vrot.lane.b32.xlu1 %v7166_v23, %s17228_s17 }
0x1606   :  { %7557 = vrot.lane.b32.xlu0 %v7272_v25, %s17228_s17 }
0x1609   :  { %7958 = vrot.lane.b32.xlu1 %v14189_v24, %s17229_s22 }
0x1663   :  { %v7182_v55 = vpop.permute.xlu1 %7181 }
0x1664   :  { %v7187_v18 = vmul.f32 %v7182_v55, %v7176_v34 }
0x1666   :  { %16010 = vmatprep.mubr.msk.f32.mxu0 %vm20942_vm9, %v7187_v18  ;;  %vm20954_vm9 = vmmov %vm20949_vm3 }
0x1667   :  { %v7184_v56 = vpop.permute.xlu1 %7183 }
0x1668   :  { %v7188_v14 = vmul.f32 %v7184_v56, %v7177_v4  ;;  %v7275_v16 = vpop.permute.xlu0 %7274 }
0x1669   :  { %v7280_v33 = vmul.f32 %v7275_v16, %v7176_v34 }
0x166a   :  { %16011 = vmatmul.mubr.msk.f32.vlgmr.msra.gmra.mrb[168].mxu0 %vm20943_vm10, %v7188_v14  ;;  %v7664_v58 = vrot.slane %v7188_v14, 4  ;;  %vm20955_vm10 = vmmov %vm20949_vm3 }
0x166b   :  { %v7277_v19 = vpop.permute.xlu1 %7276  ;;  %16021 = vmatprep.mubr.msk.f32.mxu1 %vm20944_vm11, %v7280_v33  ;;  %16025 = vmatpush3.msk.msra.mxu0 %vm818_vm0, %v17519_v30  ;;  %vm20956_vm11 = vmmov %vm20949_vm3 }
0x166c   :  { %v7281_v37 = vmul.f32 %v7277_v19, %v7177_v4  ;;  %v7568_v22 = vpop.permute.xlu0 %7567  ;;  %16416 = vmatprep.subr.msk.bf16.mxu0 %vm17492_vm1, %v17225_v28 }
0x166d   :  { %v7573_v20 = vmul.f32 %v7568_v22, %v7177_v4 }
0x166e   :  { %16022 = vmatmul.mubr.msk.f32.vlgmr.msra.gmra.mrb[172].mxu1 %vm20945_vm12, %v7281_v37  ;;  %vm20957_vm12 = vmmov %vm20937_vm4 }
0x166f   :  { %v7570_v5 = vpop.permute.xlu1 %7569  ;;  %16030 = vmatpush3.msk.msra.mxu1 %vm818_vm0, %v17519_v30  ;;  %v7577_v9 = vrot.slane %v7573_v20, 4 }
0x1670   :  { %v7574_v47 = vmul.f32 %v7570_v5, %v7178_v59  ;;  %v7660_v36 = vpop.permute.xlu0 %7659  ;;  %16424 = vmatprep.subr.msk.bf16.mxu1 %vm17492_vm1, %v17225_v28 }
0x1671   :  { %v7662_v41 = vmul.f32 %v7660_v36, %v7178_v59 }
0x1672   :  { %v7578_v13 = vrot.slane %v7574_v47, 4 }
0x1673   :  { %v7665_v63 = vrot.slane %v7662_v41, 4  ;;  %v19395_v18 = vpop.permute.xlu1 %7464 }
0x1674   :  { %v7579_v6 = vsel %vm818_vm0, %v7577_v9, %v7578_v13  ;;  %v19397_v4 = vpop.permute.xlu0 %7555 }
0x1675   :  { %v7666_v17 = vsel %vm818_vm0, %v7664_v58, %v7665_v63 }
0x1677   :  { %v7467_v56 = vpop.permute.xlu1 %7466 }
0x1678   :  { %v7558_v14 = vpop.permute.xlu0 %7557 }
0x173d   :  { %v16012_v57 = vpop.f32.mrb[168].mxu0 }
0x173e   :  { %v7261_v32 = vpop.f32.mrb[169].mxu0 }
0x1741   :  { %v16023_v3 = vpop.f32.mrb[172].mxu1 }
0x1742   :  { %v7364_v7 = vmax.f32 %v16012_v57, %v16023_v3  ;;  %v7354_v53 = vpop.f32.mrb[173].mxu1 }
0x1743   :  { %v7363_v21 = vmax.f32 %v7261_v32, %v7354_v53 }
0x1744   :  { %v7366_v62 = vsub.f32 %v16012_v57, %v7364_v7  ;;  %v7372_v8 = vsub.f32 %v16023_v3, %v7364_v7 }
0x1745   :  { %v7365_v43 = vsub.f32 %v7261_v32, %v7363_v21  ;;  %v7371_v0 = vsub.f32 %v7354_v53, %v7363_v21 }
0x1746   :  { %v7369_v44 = vmul.f32 1.442695, %v7366_v62  ;;  %v7375_v24 = vmul.f32 1.442695, %v7372_v8 }
0x1747   :  { %v7367_v54 = vmul.f32 1.442695, %v7365_v43  ;;  %v7373_v11 = vmul.f32 1.442695, %v7371_v0 }
0x1748   :  { %17064 = vpow2.f32 %v7369_v44 }
0x1749   :  { %17066 = vpow2.f32 %v7375_v24 }
0x174a   :  { %17068 = vpow2.f32 %v7367_v54 }
0x174b   :  { %17070 = vpow2.f32 %v7373_v11 }
0x1752   :  { %v17065_v45 = vpop.eup %17064 }
0x1753   :  { %v17067_v12 = vpop.eup %17066 }
0x1754   :  { %v17069_v1 = vpop.eup %17068  ;;  %v7378_v15 = vadd.f32 %v17067_v12, %v17065_v45 }
0x1755   :  { %v17071_v23 = vpop.eup %17070 }
0x1756   :  { %17072 = vrcp.f32 %v7378_v15  ;;  %v7377_v25 = vadd.f32 %v17071_v23, %v17069_v1 }
0x1758   :  { %17074 = vrcp.f32 %v7377_v25  ;;  %v16838_v25 = vld [vmem:[%s20832_s6 + $0x20] sm:$0xff]  }
0x1760   :  { %v17073_v35 = vpop.eup %17072 }
0x1761   :  { %v7382_v42 = vmul.f32 %v17073_v35, %v17065_v45  ;;  %v7473_v40 = vmul.f32 %v17073_v35, %v17067_v12  ;;  %v16839_v35 = vld [vmem:[%s20832_s6 + $0x28] sm:$0xff]  }
0x1762   :  { %v17075_v39 = vpop.eup %17074 }
0x1763   :  { %v7381_v34 = vmul.f32 %v17075_v39, %v17069_v1  ;;  %v7472_v55 = vmul.f32 %v17075_v39, %v17071_v23 }
0x1765   :  { %16026 = vmatprep.mubr.msk.f32.mxu0 %vm20946_vm13, %v7381_v34  ;;  %16031 = vmatprep.mubr.msk.f32.mxu1 %vm20947_vm14, %v7472_v55  ;;  %vm20958_vm13 = vmmov %vm20937_vm4 }
0x1766   :  { %16027 = vmatmul.mubr.msk.f32.vlgmr.msra.gmra.mrb[170].mxu0 %vm20948_vm15, %v7382_v42  ;;  %16032 = vmatmul.mubr.msk.f32.vlgmr.msra.gmra.mrb[174].mxu1 %vm20949_vm3, %v7473_v40  ;;  %vm20959_vm14 = vmmov %vm20937_vm4 }
0x1767   :  { %16418 = vmatpush3.bf16.msk.msra.mxu0 %vm17492_vm1, %v17225_v28  ;;  %16426 = vmatpush3.bf16.msk.msra.mxu1 %vm17492_vm1, %v17225_v28  ;;  %vm20960_vm15 = vmmov %vm20937_vm4 }
0x1768   :  { %16042 = vmatprep.mubr.msk.f32.mxu0 %vm20937_vm4, %v7579_v6  ;;  %16053 = vmatprep.mubr.msk.f32.mxu1 %vm20950_vm5, %v7666_v17  ;;  %vm20961_vm3 = vmmov %vm20937_vm4 }
0x1769   :  { %16420 = vmatprep.subr.msk.bf16.mxu0 %vm17496_vm2, %v17225_v28  ;;  %16428 = vmatprep.subr.msk.bf16.mxu1 %vm17496_vm2, %v17225_v28  ;;  %vm20962_vm4 = vmmov %vm20961_vm3 }
0x176a   :  { %vm20963_vm5 = vmmov %vm20961_vm3 }
0x176b   :  { %16422 = vmatpush3.bf16.msk.msra.mxu0 %vm17496_vm2, %v17225_v28  ;;  %16430 = vmatpush3.bf16.msk.msra.mxu1 %vm17496_vm2, %v17225_v28 }
0x176c   :  { %16056 = vmatprep.subr.msk.mxu0 %vm818_vm0, %v17519_v30  ;;  %16061 = vmatprep.subr.msk.mxu1 %vm818_vm0, %v17519_v30 }
0x176e   :  { %16043 = vmatmul.mubr.msk.f32.vlgmr.msra.gmra.mrb[172].mxu0 %vm20951_vm6, %v7578_v13  ;;  %16054 = vmatmul.mubr.msk.f32.vlgmr.msra.gmra.mrb[176].mxu1 %vm20952_vm7, %v7665_v63  ;;  %vm20964_vm6 = vmmov %vm20961_vm3 }
0x176f   :  { %16057 = vmatpush3.msk.msra.mxu0 %vm818_vm0, %v17519_v30  ;;  %16062 = vmatpush3.msk.msra.mxu1 %vm818_vm0, %v17519_v30  ;;  %vm20965_vm7 = vmmov %vm20961_vm3 }
0x1770   :  { %16066 = vmatprep.subr.bf16.mxu0 %v16838_v25 }
0x1839   :  { %v16028_v16 = vpop.f32.mrb[170].mxu0  ;;  %v16033_v33 = vpop.f32.mrb[174].mxu1 }
0x183a   :  { %v7471_v19 = vmul.f32 %v16028_v16, %v7467_v56  ;;  %v7562_v37 = vmul.f32 %v16033_v33, %v7558_v14  ;;  %v7455_v22 = vpop.f32.mrb[171].mxu0  ;;  %v7546_v20 = vpop.f32.mrb[175].mxu1 }
0x183b   :  { %v7470_v59 = vmul.f32 %v19395_v18, %v7455_v22  ;;  %v7561_v5 = vmul.f32 %v19397_v4, %v7546_v20 }
0x183c   :  { %v7564_v47 = vadd.f32 %v7562_v37, %v7471_v19 }
0x183d   :  { %v7563_v36 = vadd.f32 %v7561_v5, %v7470_v59 }
0x1841   :  { %v16044_v41 = vpop.f32.mrb[172].mxu0  ;;  %v16055_v9 = vpop.f32.mrb[176].mxu1 }
0x1842   :  { %v7747_v13 = vmax.f32 %v16044_v41, %v16055_v9  ;;  %v7650_v58 = vpop.f32.mrb[173].mxu0  ;;  %v7737_v63 = vpop.f32.mrb[177].mxu1 }
0x1843   :  { %v7746_v6 = vmax.f32 %v7650_v58, %v7737_v63 }
0x1844   :  { %v7749_v17 = vsub.f32 %v16044_v41, %v7747_v13  ;;  %v7755_v57 = vsub.f32 %v16055_v9, %v7747_v13 }
0x1845   :  { %v7748_v32 = vsub.f32 %v7650_v58, %v7746_v6  ;;  %v7754_v3 = vsub.f32 %v7737_v63, %v7746_v6 }
0x1846   :  { %v7752_v7 = vmul.f32 1.442695, %v7749_v17  ;;  %v7758_v53 = vmul.f32 1.442695, %v7755_v57 }
0x1847   :  { %v7750_v21 = vmul.f32 1.442695, %v7748_v32  ;;  %v7756_v62 = vmul.f32 1.442695, %v7754_v3 }
0x1848   :  { %17076 = vpow2.f32 %v7752_v7 }
0x1849   :  { %17078 = vpow2.f32 %v7758_v53 }
0x184a   :  { %17080 = vpow2.f32 %v7750_v21 }
0x184b   :  { %17082 = vpow2.f32 %v7756_v62 }
0x1852   :  { %v17077_v8 = vpop.eup %17076 }
0x1853   :  { %v17079_v43 = vpop.eup %17078 }
0x1854   :  { %v17081_v0 = vpop.eup %17080  ;;  %v7761_v44 = vadd.f32 %v17079_v43, %v17077_v8 }
0x1855   :  { %v17083_v24 = vpop.eup %17082 }
0x1856   :  { %17084 = vrcp.f32 %v7761_v44  ;;  %v7760_v54 = vadd.f32 %v17083_v24, %v17081_v0 }
0x1858   :  { %17086 = vrcp.f32 %v7760_v54 }
0x1860   :  { %v17085_v11 = vpop.eup %17084 }
0x1861   :  { %v7765_v45 = vmul.f32 %v17085_v11, %v17077_v8  ;;  %v7850_v12 = vmul.f32 %v17085_v11, %v17079_v43 }
0x1862   :  { %v17087_v1 = vpop.eup %17086 }
0x1863   :  { %v7764_v15 = vmul.f32 %v17087_v1, %v17081_v0  ;;  %v7849_v23 = vmul.f32 %v17087_v1, %v17083_v24  ;;  %v14235_v1 = vld [vmem:[%s20833_s8 + $0x200] sm:$0xff] }
0x1865   :  { %16058 = vmatprep.mubr.msk.f32.mxu0 %vm20953_vm8, %v7764_v15  ;;  %16063 = vmatprep.mubr.msk.f32.mxu1 %vm20954_vm9, %v7849_v23  ;;  %v14243_v15 = vld [vmem:[%s20833_s8 + $0x240] sm:$0xff]  ;;  %v14236_v23 = vld [vmem:[%s20833_s8 + $0x208] sm:$0xff]  ;;  %vm20966_vm8 = vmmov %vm20961_vm3 }
0x1866   :  { %16059 = vmatmul.mubr.msk.f32.vlgmr.msra.gmra.mrb[174].mxu0 %vm20955_vm10, %v7765_v45  ;;  %16064 = vmatmul.mubr.msk.f32.vlgmr.msra.gmra.mrb[178].mxu1 %vm20956_vm11, %v7850_v12  ;;  %vm20967_vm9 = vmmov %vm20961_vm3 }
0x1867   :  { %8391 = vmatprep.mubr.bf16.mxu1 %v17224_v2  ;;  %16067 = vmatpush3.bf16.msra.mxu0 %v16838_v25  ;;  %v14270_v25 = vcombine.high %v14235_v1, %v14243_v15  ;;  %vm20968_vm10 = vmmov %vm20961_vm3 }
0x1868   :  { %16068 = vmatprep.subr.bf16.mxu0 %v16839_v35  ;;  %vm20969_vm11 = vmmov %vm20961_vm3 }
0x1869   :  { %8359 = vmatprep.subr.bf16.mxu1 %v14270_v25 }
0x186b   :  { %16069 = vmatpush3.bf16.msra.mxu0 %v16839_v35  ;;  %v14244_v35 = vld [vmem:[%s20833_s8 + $0x248] sm:$0xff] }
0x1939   :  { %v16060_v42 = vpop.f32.mrb[174].mxu0  ;;  %v16065_v40 = vpop.f32.mrb[178].mxu1 }
0x193a   :  { %v7848_v39 = vmul.f32 %v16060_v42, %v7467_v56  ;;  %v7933_v34 = vmul.f32 %v16065_v40, %v7558_v14  ;;  %v7838_v55 = vpop.f32.mrb[175].mxu0  ;;  %v7923_v16 = vpop.f32.mrb[179].mxu1  ;;  %v14269_v42 = vcombine.low %v14235_v1, %v14243_v15  ;;  %v14271_v40 = vcombine.low %v14236_v23, %v14244_v35 }
0x193b   :  { %v7847_v33 = vmul.f32 %v7838_v55, %v19395_v18  ;;  %v7932_v19 = vmul.f32 %v7923_v16, %v19397_v4  ;;  %v7959_v56 = vpop.permute.xlu1 %7958  ;;  %v14259_v55 = vld [vmem:[%s20833_s8 + $0x2c0] sm:$0xff]  ;;  %v14252_v16 = vld [vmem:[%s20833_s8 + $0x288] sm:$0xff] }
0x193c   :  { %v7935_v37 = vadd.f32 %v7933_v34, %v7848_v39  ;;  %v14272_v39 = vcombine.high %v14236_v23, %v14244_v35  ;;  %8360 = vmatpush1.bf16.msra.mxu1 %v14269_v42  ;;  %v14251_v34 = vld [vmem:[%s20833_s8 + $0x280] sm:$0xff] }
0x193d   :  { %v7934_v22 = vadd.f32 %v7932_v19, %v7847_v33  ;;  %v14286_v33 = vcombine.high %v14251_v34, %v14259_v55  ;;  %v14260_v19 = vld [vmem:[%s20833_s8 + $0x2c8] sm:$0xff]  ;;  %v14239_v35 = vld [vmem:[%s20833_s8 + $0x220] sm:$0xff] }
0x193e   :  { %v7939_v20 = vrot.slane %v7935_v37, 4  ;;  %8410 = vmatprep.subr.bf16.mxu0 %v14272_v39  ;;  %v14285_v37 = vcombine.low %v14251_v34, %v14259_v55  ;;  %v14247_v42 = vld [vmem:[%s20833_s8 + $0x260] sm:$0xff]  ;;  %v14248_v39 = vld [vmem:[%s20833_s8 + $0x268] sm:$0xff] }
0x193f   :  { %v7938_v59 = vrot.slane %v7934_v22, 4  ;;  %v14287_v22 = vcombine.low %v14252_v16, %v14260_v19  ;;  %8361 = vmatprep.subr.bf16.mxu1 %v14286_v33  ;;  %v14278_v33 = vcombine.high %v14239_v35, %v14247_v42 }
0x1940   :  { %8362 = vmatpush1.bf16.msra.mxu1 %v14285_v37 }
0x1941   :  { %v7940_v5 = vsel %vm818_vm0, %v7938_v59, %v7939_v20  ;;  %v7943_v41 = vsel %vm818_vm0, %v7564_v47, %v7938_v59  ;;  %v14288_v20 = vcombine.high %v14252_v16, %v14260_v19  ;;  %v14237_v59 = vld [vmem:[%s20833_s8 + $0x210] sm:$0xff] }
0x1942   :  { %v7945_v9 = vpack.c.bf16 %v7940_v5, %v7940_v5  ;;  %v7944_v13 = vpack.c.bf16 %v7943_v41, %v7563_v36  ;;  %v14245_v5 = vld [vmem:[%s20833_s8 + $0x250] sm:$0xff]  ;;  %v14238_v41 = vld [vmem:[%s20833_s8 + $0x218] sm:$0xff] }
0x1944   :  { %16070 = vmatprep.mubr.msk.bf16.mxu0 %vm20957_vm12, %v7944_v13  ;;  %v14246_v13 = vld [vmem:[%s20833_s8 + $0x258] sm:$0xff]  ;;  %vm20970_vm12 = vmmov %vm20961_vm3 }
0x1945   :  { %16071 = vmatmul.mubr.msk.bf16.vlgmr.msra.gmra.mrb[176].mxu0 %vm20958_vm13, %v7945_v9  ;;  %v14274_v9 = vcombine.high %v14237_v59, %v14245_v5  ;;  %vm20971_vm13 = vmmov %vm20961_vm3 }
0x1946   :  { %8442 = vmatprep.mubr.bf16.mxu0 %v17224_v2  ;;  %8411 = vmatpush1.bf16.msra.mxu0 %v14271_v40  ;;  %v14240_v40 = vld [vmem:[%s20833_s8 + $0x228] sm:$0xff] }
0x1947   :  { %8412 = vmatprep.subr.bf16.mxu0 %v14288_v20  ;;  %8461 = vmatprep.subr.bf16.mxu1 %v14274_v9  ;;  %v14280_v19 = vcombine.high %v14240_v40, %v14248_v39  ;;  %v14263_v20 = vld [vmem:[%s20833_s8 + $0x2e0] sm:$0xff]  ;;  %v14279_v9 = vcombine.low %v14240_v40, %v14248_v39  ;;  %v16854_v40 = vld [vmem:[%s20834_s10 + $0x818] sm:$0xff]  }
0x1948   :  { %v16855_v39 = vld [vmem:[%s20834_s10 + $0x898] sm:$0xff]  }
0x194a   :  { %8413 = vmatpush1.bf16.msra.mxu0 %v14287_v22  ;;  %v14255_v22 = vld [vmem:[%s20833_s8 + $0x2a0] sm:$0xff] }
0x1a18   :  { %v16072_v18 = vpop.f32.mrb[176].mxu0 }
0x1a19   :  { %v8001_v14 = vpop.f32.mrb[177].mxu0  ;;  %v8010_v4 = vadd.f32 %v16072_v18, %v7959_v56  ;;  %v14275_v18 = vcombine.low %v14238_v41, %v14246_v13 }
0x1a1a   :  { %v8002_v58 = vadd.f32 %v8001_v14, %v7959_v56  ;;  %v16073_v63 = vpop.f32.mrb[178].mxu0  ;;  %v14276_v14 = vcombine.high %v14238_v41, %v14246_v13  ;;  %v14277_v41 = vcombine.low %v14239_v35, %v14247_v42  ;;  %v14294_v13 = vcombine.high %v14255_v22, %v14263_v20  ;;  %v16852_v35 = vld [vmem:[%s20834_s10 + $0x858] sm:$0xff]  }
0x1a1b   :  { %v8004_v6 = vpop.f32.mrb[179].mxu0  ;;  %v8019_v32 = vadd.f32 %v8010_v4, %v19312_v38  ;;  %v16853_v42 = vld [vmem:[%s20834_s10 + $0x8d8] sm:$0xff]  }
0x1a1c   :  { %v8005_v17 = vadd.f32 %v8004_v6, %v7959_v56  ;;  %v8017_v57 = vadd.f32 %v8002_v58, %v19305_v10  ;;  %v14273_v56 = vcombine.low %v14237_v59, %v14245_v5  ;;  %8512 = vmatprep.subr.bf16.mxu0 %v14276_v14  ;;  %v14256_v59 = vld [vmem:[%s20833_s8 + $0x2a8] sm:$0xff]  ;;  %v14249_v14 = vld [vmem:[%s20833_s8 + $0x270] sm:$0xff] }
0x1a1d   :  { %v8026_v7 = vsel %vm20961_vm3, %v8019_v32, 0.0  ;;  %v14264_v5 = vld [vmem:[%s20833_s8 + $0x2e8] sm:$0xff] }
0x1a1e   :  { %v8020_v47 = vsel %vm20959_vm14, %v8017_v57, 0.0  ;;  %v8018_v36 = vadd.f32 %v8005_v17, %v19307_v46  ;;  %vm20972_vm14 = vmmov %vm20961_vm3 }
0x1a1f   :  { %8021 = vadd.xlane.f32.xlu0 %v8020_v47 }
0x1a20   :  { %v8023_v3 = vsel %vm20960_vm15, %v8018_v36, 0.0  ;;  %vm20973_vm15 = vmmov %vm20961_vm3 }
0x1a21   :  { %8024 = vadd.xlane.f32.xlu1 %v8023_v3  ;;  %v14234_v3 = vld [vmem:[%s20835_s11 + $0x10] sm:$0x1f] }
0x1a23   :  { %8027 = vadd.xlane.f32.xlu0 %v8026_v7  ;;  %v8062_v7 = vrot.slane %v14234_v3, %v17454_v51 }
0x1aac   :  { %v8022_v53 = vpop.xlane.xlu0 %8021 }
0x1aad   :  { %v8029_v21 = vmul.f32 0.03125, %v8022_v53 }
0x1aae   :  { %v8025_v62 = vpop.xlane.xlu1 %8024 }
0x1aaf   :  { %v19425_v8 = vsub.f32 %v8017_v57, %v8029_v21  ;;  %v8030_v43 = vmul.f32 0.03125, %v8025_v62 }
0x1ab0   :  { %v8028_v10 = vpop.xlane.xlu0 %8027 }
0x1ab1   :  { %v19427_v0 = vsub.f32 %v8018_v36, %v8030_v43  ;;  %v8031_v44 = vmul.f32 0.03125, %v8028_v10  ;;  %v8035_v46 = vmul.f32 %v19425_v8, %v19425_v8  ;;  %v8069_v43 = vrot.slane %v14234_v3, %v17448_v49  ;;  %v14266_v3 = vld [vmem:[%s20833_s8 + $0x2f8] sm:$0xff] }
0x1ab3   :  { %v19431_v38 = vsub.f32 %v8019_v32, %v8031_v44  ;;  %v8038_v24 = vsel %vm20962_vm4, %v8035_v46, 0.0  ;;  %v8036_v54 = vmul.f32 %v19427_v0, %v19427_v0  ;;  %vm20974_vm4 = vmmov %vm20961_vm3 }
0x1ab4   :  { %8039 = vadd.xlane.f32.xlu0 %v8038_v24 }
0x1ab5   :  { %v8041_v11 = vsel %vm20963_vm5, %v8036_v54, 0.0  ;;  %v8037_v45 = vmul.f32 %v19431_v38, %v19431_v38  ;;  %vm20975_vm5 = vmmov %vm20961_vm3 }
0x1ab6   :  { %8042 = vadd.xlane.f32.xlu1 %v8041_v11  ;;  %v14253_v11 = vld [vmem:[%s20833_s8 + $0x290] sm:$0xff] }
0x1ab7   :  { %v8044_v12 = vsel %vm20964_vm6, %v8037_v45, 0.0  ;;  %vm20976_vm6 = vmmov %vm20961_vm3 }
0x1ab8   :  { %8045 = vadd.xlane.f32.xlu0 %v8044_v12 }
0x1b41   :  { %v8040_v4 = vpop.xlane.xlu0 %8039 }
0x1b42   :  { %v8047_v58 = vmul.f32 0.03125, %v8040_v4  ;;  %v14242_v4 = vld [vmem:[%s20833_s8 + $0x238] sm:$0xff] }
0x1b43   :  { %v8043_v63 = vpop.xlane.xlu1 %8042 }
0x1b44   :  { %v8050_v6 = vadd.f32 1e-05, %v8047_v58  ;;  %v8048_v17 = vmul.f32 0.03125, %v8043_v63  ;;  %v14250_v58 = vld [vmem:[%s20833_s8 + $0x278] sm:$0xff]  ;;  %v14293_v63 = vcombine.low %v14255_v22, %v14263_v20  ;;  %v16861_v22 = vld [vmem:[%s20834_s10 + $0x8e8] sm:$0xff]  }
0x1b45   :  { %v8046_v57 = vpop.xlane.xlu0 %8045  ;;  %v16862_v20 = vld [vmem:[%s20834_s10 + $0x828] sm:$0xff]  }
0x1b46   :  { %17088 = vrsqrt.f32 %v8050_v6  ;;  %v8051_v47 = vadd.f32 1e-05, %v8048_v17  ;;  %v8049_v36 = vmul.f32 0.03125, %v8046_v57  ;;  %v14295_v6 = vcombine.low %v14256_v59, %v14264_v5 }
0x1b47   :  { %v14284_v57 = vcombine.high %v14242_v4, %v14250_v58 }
0x1b48   :  { %17090 = vrsqrt.f32 %v8051_v47  ;;  %v8052_v32 = vadd.f32 1e-05, %v8049_v36  ;;  %v14257_v47 = vld [vmem:[%s20833_s8 + $0x2b0] sm:$0xff] }
0x1b49   :  { %v14265_v36 = vld [vmem:[%s20833_s8 + $0x2f0] sm:$0xff] }
0x1b4a   :  { %17092 = vrsqrt.f32 %v8052_v32  ;;  %v14258_v32 = vld [vmem:[%s20833_s8 + $0x2b8] sm:$0xff] }
0x1b50   :  { %v17089_v53 = vpop.eup %17088 }
0x1b51   :  { %v8056_v21 = vmul.f32 %v17089_v53, %v19425_v8  ;;  %v14261_v8 = vld [vmem:[%s20833_s8 + $0x2d0] sm:$0xff]  ;;  %v14283_v53 = vcombine.low %v14242_v4, %v14250_v58  ;;  %v16871_v4 = vld [vmem:[%s20834_s10 + $0x8b8] sm:$0xff]   ;;  %v16872_v58 = vld [vmem:[%s20834_s10 + $0x940] sm:$0xff]  }
0x1b52   :  { %v17091_v62 = vpop.eup %17090  ;;  %v14290_v23 = vcombine.high %v14253_v11, %v14261_v8  ;;  %v14289_v55 = vcombine.low %v14253_v11, %v14261_v8  ;;  %v16844_v11 = vld [vmem:[%s20834_s10 + $0x848] sm:$0xff]  }
0x1b53   :  { %v8063_v10 = vmul.f32 %v8062_v7, %v8056_v21  ;;  %v8057_v44 = vmul.f32 %v17091_v62, %v19427_v0  ;;  %v14254_v0 = vld [vmem:[%s20833_s8 + $0x298] sm:$0xff]  ;;  %v14298_v21 = vcombine.high %v14257_v47, %v14265_v36  ;;  %v14300_v62 = vcombine.high %v14258_v32, %v14266_v3  ;;  %v16845_v8 = vld [vmem:[%s20834_s10 + $0x8c8] sm:$0xff]  }
0x1b54   :  { %v17093_v46 = vpop.eup %17092 }
0x1b55   :  { %v8064_v24 = vmul.f32 %v8062_v7, %v8057_v44  ;;  %v8058_v54 = vmul.f32 %v17093_v46, %v19431_v38  ;;  %v19487_v45 = vadd.f32 %v8069_v43, %v8063_v10  ;;  %v14262_v38 = vld [vmem:[%s20833_s8 + $0x2d8] sm:$0xff]  ;;  %v14299_v10 = vcombine.low %v14258_v32, %v14266_v3  ;;  %v16840_v44 = vld [vmem:[%s20834_s10 + $0x840] sm:$0xff]  }
0x1b56   :  { %v14292_v25 = vcombine.high %v14254_v0, %v14262_v38  ;;  %v14291_v16 = vcombine.low %v14254_v0, %v14262_v38  ;;  %v16841_v46 = vld [vmem:[%s20834_s10 + $0x8c0] sm:$0xff]   ;;  %v16846_v0 = vld [vmem:[%s20834_s10 + $0x808] sm:$0xff]  }
0x1b57   :  { %v19489_v12 = vadd.f32 %v8069_v43, %v8064_v24  ;;  %v8065_v15 = vmul.f32 %v8062_v7, %v8058_v54  ;;  %v16842_v24 = vld [vmem:[%s20834_s10 + $0x800] sm:$0xff]   ;;  %v16847_v38 = vld [vmem:[%s20834_s10 + $0x888] sm:$0xff]  }
0x1b58   :  { %v16843_v54 = vld [vmem:[%s20834_s10 + $0x880] sm:$0xff]  }
0x1b59   :  { %v19502_v1 = vpack.c.bf16 %v19489_v12, %v19487_v45  ;;  %v19522_v34 = vadd.f32 %v8069_v43, %v8065_v15  ;;  %v14297_v43 = vcombine.low %v14257_v47, %v14265_v36  ;;  %v16849_v15 = vld [vmem:[%s20834_s10 + $0x8d0] sm:$0xff]  }
0x1b5b   :  { %14301 = vmatmul.mubr.msk.bf16.vlgmr.msra.gmra.mrb[180].mxu1 %vm20965_vm7, %v19502_v1  ;;  %14303 = vmatmul.mubr.msk.bf16.vlgmr.msra.gmra.mrb[180].mxu0 %vm20966_vm8, %v19502_v1  ;;  %v19526_v37 = vpack.c.bf16 %v19522_v34, %v19522_v34  ;;  %vm20977_vm7 = vmmov %vm20961_vm3 }
0x1b5c   :  { %8401 = vmatprep.mubr.bf16.mxu1 %v17224_v2  ;;  %8452 = vmatprep.mubr.bf16.mxu0 %v17224_v2  ;;  %vm20978_vm8 = vmmov %vm20961_vm3 }
0x1b5d   :  { %8462 = vmatpush1.bf16.msra.mxu1 %v14273_v56  ;;  %8513 = vmatpush1.bf16.msra.mxu0 %v14275_v18  ;;  %v14296_v56 = vcombine.high %v14256_v59, %v14264_v5  ;;  %v14241_v18 = vld [vmem:[%s20833_s8 + $0x230] sm:$0xff]  ;;  %v16863_v59 = vld [vmem:[%s20834_s10 + $0x8a8] sm:$0xff]  }
0x1b5e   :  { %8463 = vmatprep.subr.bf16.mxu1 %v14290_v23  ;;  %8514 = vmatprep.subr.bf16.mxu0 %v14292_v25  ;;  %v14282_v17 = vcombine.high %v14241_v18, %v14249_v14  ;;  %v14281_v7 = vcombine.low %v14241_v18, %v14249_v14  ;;  %v16850_v23 = vld [vmem:[%s20834_s10 + $0x810] sm:$0xff]   ;;  %v16869_v18 = vld [vmem:[%s20834_s10 + $0x8f8] sm:$0xff]  }
0x1b5f   :  { %v16851_v25 = vld [vmem:[%s20834_s10 + $0x890] sm:$0xff]   ;;  %v16870_v14 = vld [vmem:[%s20834_s10 + $0x838] sm:$0xff]  }
0x1b60   :  { %v16864_v5 = vld [vmem:[%s20834_s10 + $0x870] sm:$0xff]  }
0x1b61   :  { %8464 = vmatpush1.bf16.msra.mxu1 %v14289_v55  ;;  %8515 = vmatpush1.bf16.msra.mxu0 %v14291_v16  ;;  %v16856_v55 = vld [vmem:[%s20834_s10 + $0x860] sm:$0xff]  }
0x1b62   :  { %8563 = vmatprep.subr.bf16.mxu1 %v14278_v33  ;;  %8614 = vmatprep.subr.bf16.mxu0 %v14280_v19  ;;  %v16857_v16 = vld [vmem:[%s20834_s10 + $0x8e0] sm:$0xff]  }
0x1b63   :  { %14302 = vmatmul.mubr.msk.bf16.gmra.mrb[184].mxu1 %vm20967_vm9, %v19526_v37  ;;  %14304 = vmatmul.mubr.msk.bf16.gmra.mrb[184].mxu0 %vm20968_vm10, %v19526_v37  ;;  %vm20979_vm9 = vmmov %vm20961_vm3  ;;  %v16858_v33 = vld [vmem:[%s20834_s10 + $0x820] sm:$0xff]   ;;  %vm20980_vm10 = vcmask 1041408  }
0x1b64   :  { %8493 = vmatprep.mubr.bf16.mxu1 %v17224_v2  ;;  %8544 = vmatprep.mubr.bf16.mxu0 %v17224_v2  ;;  %v16859_v19 = vld [vmem:[%s20834_s10 + $0x8a0] sm:$0xff]  }
0x1b6b   :  { %14305 = vmatmul.mubr.msk.bf16.vlgmr.msra.gmra.mrb[188].mxu1 %vm20969_vm11, %v19502_v1  ;;  %14307 = vmatmul.mubr.msk.bf16.vlgmr.msra.gmra.mrb[188].mxu0 %vm20970_vm12, %v19502_v1  ;;  %vm20981_vm11 = vmmov %vm20980_vm10  ;;  %vm10334_vm12 = vcmask 15360  }
0x1b6c   :  { %8503 = vmatprep.mubr.bf16.mxu1 %v17224_v2  ;;  %8554 = vmatprep.mubr.bf16.mxu0 %v17224_v2 }
0x1b6d   :  { %8564 = vmatpush1.bf16.msra.mxu1 %v14277_v41  ;;  %8615 = vmatpush1.bf16.msra.mxu0 %v14279_v9  ;;  %v16865_v41 = vld [vmem:[%s20834_s10 + $0x8f0] sm:$0xff]  }
0x1b6e   :  { %8565 = vmatprep.subr.bf16.mxu1 %v14294_v13  ;;  %8616 = vmatprep.subr.bf16.mxu0 %v14296_v56  ;;  %v16866_v9 = vld [vmem:[%s20834_s10 + $0x830] sm:$0xff]   ;;  %v16868_v56 = vld [vmem:[%s20834_s10 + $0x878] sm:$0xff]  }
0x1b6f   :  { %v16867_v13 = vld [vmem:[%s20834_s10 + $0x8b0] sm:$0xff]  }
0x1b71   :  { %8566 = vmatpush1.bf16.msra.mxu1 %v14293_v63  ;;  %8617 = vmatpush1.bf16.msra.mxu0 %v14295_v6  ;;  %v16873_v63 = vld [vmem:[%s20834_s10 + $0x9c0] sm:$0xff]  }
0x1b72   :  { %8665 = vmatprep.subr.bf16.mxu1 %v14282_v17  ;;  %8716 = vmatprep.subr.bf16.mxu0 %v14284_v57  ;;  %v19709_v6 = vld [vmem:[%s20836_s9 + $0x20] sm:$0xff] }
0x1b73   :  { %14306 = vmatmul.mubr.msk.bf16.gmra.mrb[192].mxu1 %vm20971_vm13, %v19526_v37  ;;  %14308 = vmatmul.mubr.msk.bf16.gmra.mrb[192].mxu0 %vm20972_vm14, %v19526_v37  ;;  %v8116_v17 = vrot.slane %v19709_v6, %v17445_v48  ;;  %v8124_v57 = vrot.slane %v19709_v6, %v17448_v49  ;;  %v8120_v47 = vrot.slane %v19709_v6, %v17454_v51  ;;  %vm17231_vm13 = vmmov 0   ;;  %vm20982_vm14 = vmmov %vm20961_vm3 }
0x1b74   :  { %8595 = vmatprep.mubr.bf16.mxu1 %v17224_v2  ;;  %8646 = vmatprep.mubr.bf16.mxu0 %v17224_v2  ;;  %v8128_v36 = vrot.slane %v19709_v6, %v17457_v52 }
0x1b7b   :  { %14309 = vmatmul.mubr.msk.bf16.vlgmr.msra.gmra.mrb[196].mxu1 %vm20973_vm15, %v19502_v1  ;;  %14311 = vmatmul.mubr.msk.bf16.vlgmr.msra.gmra.mrb[196].mxu0 %vm20961_vm3, %v19502_v1  ;;  %vm20983_vm15 = vmmov %vm20961_vm3 }
0x1b7c   :  { %8605 = vmatprep.mubr.bf16.mxu1 %v17224_v2  ;;  %8656 = vmatprep.mubr.bf16.mxu0 %v17224_v2 }
0x1b7d   :  { %8666 = vmatpush1.bf16.msra.mxu1 %v14281_v7  ;;  %8717 = vmatpush1.bf16.msra.mxu0 %v14283_v53 }
0x1b7e   :  { %8667 = vmatprep.subr.bf16.mxu1 %v14298_v21  ;;  %8718 = vmatprep.subr.bf16.mxu0 %v14300_v62 }
0x1b81   :  { %8668 = vmatpush1.bf16.msra.mxu1 %v14297_v43  ;;  %8719 = vmatpush1.bf16.msra.mxu0 %v14299_v10 }
0x1b82   :  { %15452 = vmatprep.subr.bf16.mxu1 %v16840_v44  ;;  %15480 = vmatprep.subr.bf16.mxu0 %v16841_v46 }
0x1b83   :  { %14310 = vmatmul.mubr.msk.bf16.gmra.mrb[200].mxu1 %vm20974_vm4, %v19526_v37  ;;  %14312 = vmatmul.mubr.msk.bf16.gmra.mrb[200].mxu0 %vm20975_vm5, %v19526_v37  ;;  %vm11287_vm4 = vcmask 1040384   ;;  %vm20984_vm5 = vmmov %vm20980_vm10 }
0x1b84   :  { %8697 = vmatprep.mubr.bf16.mxu1 %v17224_v2  ;;  %8748 = vmatprep.mubr.bf16.mxu0 %v17224_v2 }
0x1b8b   :  { %14313 = vmatmul.mubr.msk.bf16.vlgmr.msra.gmra.mrb[204].mxu1 %vm20976_vm6, %v19502_v1  ;;  %14315 = vmatmul.mubr.msk.bf16.vlgmr.msra.gmra.mrb[204].mxu0 %vm20977_vm7, %v19502_v1  ;;  %v16848_v1 = vld [vmem:[%s20834_s10 + $0x850] sm:$0xff]   ;;  %vm20985_vm6 = vmmov %vm20984_vm5 }
0x1b8c   :  { %8707 = vmatprep.mubr.bf16.mxu1 %v17224_v2  ;;  %8758 = vmatprep.mubr.bf16.mxu0 %v17224_v2  ;;  %vm20986_vm7 = vmmov %vm20961_vm3 }
0x1b8d   :  { %15453 = vmatpush3.bf16.msra.mxu1 %v16842_v24  ;;  %15481 = vmatpush3.bf16.msra.mxu0 %v16843_v54 }
0x1b8e   :  { %15454 = vmatprep.subr.bf16.mxu1 %v16844_v11  ;;  %15482 = vmatprep.subr.bf16.mxu0 %v16845_v8 }
0x1b91   :  { %15455 = vmatpush3.bf16.msra.mxu1 %v16846_v0  ;;  %15483 = vmatpush3.bf16.msra.mxu0 %v16847_v38 }
0x1b92   :  { %15456 = vmatprep.subr.bf16.mxu1 %v16848_v1  ;;  %15484 = vmatprep.subr.bf16.mxu0 %v16849_v15 }
0x1b93   :  { %14314 = vmatmul.mubr.msk.bf16.gmra.mrb[208].mxu1 %vm20978_vm8, %v19526_v37  ;;  %14316 = vmatmul.mubr.msk.bf16.gmra.mrb[208].mxu0 %vm20979_vm9, %v19526_v37  ;;  %v16860_v37 = vld [vmem:[%s20834_s10 + $0x868] sm:$0xff]   ;;  %vm11290_vm8 = vcmask 1042432   ;;  %vm20987_vm9 = vmmov %vm20961_vm3 }
0x1b95   :  { %15457 = vmatpush3.bf16.msra.mxu1 %v16850_v23  ;;  %15485 = vmatpush3.bf16.msra.mxu0 %v16851_v25 }
0x1b96   :  { %15458 = vmatprep.subr.bf16.mxu1 %v16852_v35  ;;  %15486 = vmatprep.subr.bf16.mxu0 %v16853_v42 }
0x1b99   :  { %15459 = vmatpush3.bf16.msra.mxu1 %v16854_v40  ;;  %15487 = vmatpush3.bf16.msra.mxu0 %v16855_v39 }
0x1b9a   :  { %15460 = vmatprep.subr.bf16.mxu1 %v16856_v55  ;;  %15488 = vmatprep.subr.bf16.mxu0 %v16857_v16 }
0x1b9d   :  { %15461 = vmatpush3.bf16.msra.mxu1 %v16858_v33  ;;  %15489 = vmatpush3.bf16.msra.mxu0 %v16859_v19 }
0x1b9e   :  { %15462 = vmatprep.subr.bf16.mxu1 %v16860_v37  ;;  %15490 = vmatprep.subr.bf16.mxu0 %v16861_v22 }
0x1ba1   :  { %15463 = vmatpush3.bf16.msra.mxu1 %v16862_v20  ;;  %15491 = vmatpush3.bf16.msra.mxu0 %v16863_v59  ;;  %v16874_v20 = vld [vmem:[%s20834_s10 + $0x900] sm:$0xff]  }
0x1ba2   :  { %15464 = vmatprep.subr.bf16.mxu1 %v16864_v5  ;;  %15492 = vmatprep.subr.bf16.mxu0 %v16865_v41  ;;  %v16875_v59 = vld [vmem:[%s20834_s10 + $0x980] sm:$0xff]  }
0x1ba5   :  { %15465 = vmatpush3.bf16.msra.mxu1 %v16866_v9  ;;  %15493 = vmatpush3.bf16.msra.mxu0 %v16867_v13 }
0x1ba6   :  { %15466 = vmatprep.subr.bf16.mxu1 %v16868_v56  ;;  %15494 = vmatprep.subr.bf16.mxu0 %v16869_v18  ;;  %v16876_v56 = vld [vmem:[%s20834_s10 + $0x948] sm:$0xff]  }
0x1ba7   :  { %v16877_v18 = vld [vmem:[%s20834_s10 + $0x9c8] sm:$0xff]  }
0x1ba9   :  { %15467 = vmatpush3.bf16.msra.mxu1 %v16870_v14  ;;  %15495 = vmatpush3.bf16.msra.mxu0 %v16871_v4 }
0x1baa   :  { %15508 = vmatprep.subr.bf16.mxu1 %v16872_v58  ;;  %15536 = vmatprep.subr.bf16.mxu0 %v16873_v63 }
0x1c2e   :  { %v8393_v32 = vpop.f32.mrb[180].mxu1  ;;  %v8444_v3 = vpop.f32.mrb[180].mxu0 }
0x1c2f   :  { %v8394_v7 = vadd.f32 %v8393_v32, %v8116_v17  ;;  %v8445_v53 = vadd.f32 %v8444_v3, %v8124_v57  ;;  %v8395_v21 = vpop.f32.mrb[181].mxu1  ;;  %v8446_v62 = vpop.f32.mrb[181].mxu0 }
0x1c30   :  { %v8396_v43 = vadd.f32 %v8395_v21, %v8120_v47  ;;  %v8447_v10 = vadd.f32 %v8446_v62, %v8128_v36  ;;  %v8397_v44 = vpop.f32.mrb[182].mxu1  ;;  %v8448_v46 = vpop.f32.mrb[182].mxu0  ;;  %v19739_v21 = vrot.slane %v19709_v6, %v17919_v60  ;;  %v19743_v62 = vrot.slane %v19709_v6, %v17922_v61 }
0x1c31   :  { %v8398_v24 = vadd.f32 %v8397_v44, %v8116_v17  ;;  %v8449_v54 = vadd.f32 %v8448_v46, %v8124_v57  ;;  %v8399_v11 = vpop.f32.mrb[183].mxu1  ;;  %v8450_v8 = vpop.f32.mrb[183].mxu0  ;;  %v8767_v1 = vmax.f32 %v8394_v7, 0.0  ;;  %v8769_v15 = vmax.f32 %v8445_v53, 0.0  ;;  %v16878_v53 = vld [vmem:[%s20834_s10 + $0x908] sm:$0xff]  }
0x1c32   :  { %v8400_v0 = vadd.f32 %v8399_v11, %v8120_v47  ;;  %v8451_v38 = vadd.f32 %v8450_v8, %v8128_v36  ;;  %v8768_v35 = vmax.f32 %v8396_v43, 0.0  ;;  %v8770_v42 = vmax.f32 %v8447_v10, 0.0 }
0x1c33   :  { %v8783_v23 = vmax.f32 %v8398_v24, 0.0  ;;  %v8785_v25 = vmax.f32 %v8449_v54, 0.0  ;;  %v19747_v44 = vrot.slane %v19709_v6, %v17925_v31  ;;  %v19751_v46 = vrot.slane %v19709_v6, %v17928_v50  ;;  %v16880_v24 = vld [vmem:[%s20834_s10 + $0x950] sm:$0xff]  }
0x1c34   :  { %v8784_v40 = vmax.f32 %v8400_v0, 0.0  ;;  %v8786_v39 = vmax.f32 %v8451_v38, 0.0  ;;  %v16881_v54 = vld [vmem:[%s20834_s10 + $0x9d0] sm:$0xff]  }
0x1c35   :  { %v9072_v55 = vpack.c.bf16 %v8783_v23, %v8767_v1  ;;  %v9074_v16 = vpack.c.bf16 %v8785_v25, %v8769_v15  ;;  %v16882_v38 = vld [vmem:[%s20834_s10 + $0x910] sm:$0xff]  }
0x1c36   :  { %v9073_v33 = vpack.c.bf16 %v8784_v40, %v8768_v35  ;;  %v9075_v19 = vpack.c.bf16 %v8786_v39, %v8770_v42  ;;  %v8403_v37 = vpop.f32.mrb[184].mxu1  ;;  %v8454_v22 = vpop.f32.mrb[184].mxu0  ;;  %v16883_v6 = vld [vmem:[%s20834_s10 + $0x990] sm:$0xff]   ;;  %v16884_v42 = vld [vmem:[%s20834_s10 + $0x958] sm:$0xff]  }
0x1c37   :  { %v8404_v5 = vadd.f32 %v8403_v37, %v8116_v17  ;;  %v8455_v41 = vadd.f32 %v8454_v22, %v8124_v57  ;;  %v8405_v9 = vpop.f32.mrb[185].mxu1  ;;  %v8456_v13 = vpop.f32.mrb[185].mxu0  ;;  %v16885_v40 = vld [vmem:[%s20834_s10 + $0x9d8] sm:$0xff]  }
0x1c38   :  { %v8406_v14 = vadd.f32 %v8405_v9, %v8120_v47  ;;  %v8457_v4 = vadd.f32 %v8456_v13, %v8128_v36  ;;  %v8407_v58 = vpop.f32.mrb[186].mxu1  ;;  %v8458_v63 = vpop.f32.mrb[186].mxu0  ;;  %9908 = vmatprep.mubr.bf16.mxu1 %v9073_v33  ;;  %9956 = vmatprep.mubr.bf16.mxu0 %v9075_v19  ;;  %v16879_v47 = vld [vmem:[%s20834_s10 + $0x988] sm:$0xff]   ;;  %v16887_v9 = vld [vmem:[%s20834_s10 + $0x998] sm:$0xff]  }
0x1c39   :  { %v8408_v32 = vpop.f32.mrb[187].mxu1  ;;  %v8459_v3 = vpop.f32.mrb[187].mxu0  ;;  %9909 = vmatmul.mubr.bf16.vlgmr.msra.gmra.mrb[212].mxu1 %v9072_v55  ;;  %9957 = vmatmul.mubr.bf16.vlgmr.msra.gmra.mrb[212].mxu0 %v9074_v16  ;;  %v8799_v17 = vmax.f32 %v8404_v5, 0.0  ;;  %v8801_v36 = vmax.f32 %v8455_v41, 0.0  ;;  %v16886_v41 = vld [vmem:[%s20834_s10 + $0x918] sm:$0xff]   ;;  %v16889_v58 = vld [vmem:[%s20834_s10 + $0x9e0] sm:$0xff]  }
0x1c3a   :  { %v8800_v57 = vmax.f32 %v8406_v14, 0.0  ;;  %v8802_v7 = vmax.f32 %v8457_v4, 0.0  ;;  %15509 = vmatpush3.bf16.msra.mxu1 %v16874_v20  ;;  %15537 = vmatpush3.bf16.msra.mxu0 %v16875_v59  ;;  %v16888_v4 = vld [vmem:[%s20834_s10 + $0x960] sm:$0xff]  }
0x1c3b   :  { %15510 = vmatprep.subr.bf16.mxu1 %v16876_v56  ;;  %15538 = vmatprep.subr.bf16.mxu0 %v16877_v18  ;;  %v9088_v11 = vpack.c.bf16 %v8799_v17, %v8799_v17  ;;  %v9090_v1 = vpack.c.bf16 %v8801_v36, %v8801_v36 }
0x1c3c   :  { %v9089_v43 = vpack.c.bf16 %v8800_v57, %v8800_v57  ;;  %v9091_v10 = vpack.c.bf16 %v8802_v7, %v8802_v7 }
0x1c3e   :  { %15511 = vmatpush3.bf16.msra.mxu1 %v16878_v53  ;;  %15539 = vmatpush3.bf16.msra.mxu0 %v16879_v47  ;;  %v8495_v8 = vpop.f32.mrb[188].mxu1  ;;  %v8546_v0 = vpop.f32.mrb[188].mxu0 }
0x1c3f   :  { %v8496_v15 = vadd.f32 %v8495_v8, %v19739_v21  ;;  %v8547_v23 = vadd.f32 %v8546_v0, %v19743_v62  ;;  %9916 = vmatprep.mubr.bf16.mxu1 %v9089_v43  ;;  %9964 = vmatprep.mubr.bf16.mxu0 %v9091_v10  ;;  %v8497_v25 = vpop.f32.mrb[189].mxu1  ;;  %v8548_v35 = vpop.f32.mrb[189].mxu0  ;;  %v16890_v10 = vld [vmem:[%s20834_s10 + $0x920] sm:$0xff]   ;;  %v16892_v8 = vld [vmem:[%s20834_s10 + $0x968] sm:$0xff]  }
0x1c40   :  { %v8498_v39 = vadd.f32 %v8497_v25, %v19747_v44  ;;  %v8549_v55 = vadd.f32 %v8548_v35, %v19751_v46  ;;  %v8499_v16 = vpop.f32.mrb[190].mxu1  ;;  %v8550_v33 = vpop.f32.mrb[190].mxu0  ;;  %15512 = vmatprep.subr.bf16.mxu1 %v16880_v24  ;;  %15540 = vmatprep.subr.bf16.mxu0 %v16881_v54  ;;  %v16891_v24 = vld [vmem:[%s20834_s10 + $0x9a0] sm:$0xff]   ;;  %v16893_v0 = vld [vmem:[%s20834_s10 + $0x9e8] sm:$0xff]  }
0x1c41   :  { %v8500_v19 = vadd.f32 %v8499_v16, %v19739_v21  ;;  %v8551_v37 = vadd.f32 %v8550_v33, %v19743_v62  ;;  %v8501_v22 = vpop.f32.mrb[191].mxu1  ;;  %v8552_v20 = vpop.f32.mrb[191].mxu0  ;;  %9917 = vmatmul.mubr.bf16.gmra.mrb[216].mxu1 %v9088_v11  ;;  %9965 = vmatmul.mubr.bf16.gmra.mrb[216].mxu0 %v9090_v1  ;;  %v8771_v13 = vmax.f32 %v8496_v15, 0.0  ;;  %v8773_v56 = vmax.f32 %v8547_v23, 0.0  ;;  %v19814_v1 = vld [vmem:[%s20836_s9 + $0x28] sm:$0xff] }
0x1c42   :  { %v8502_v59 = vadd.f32 %v8501_v22, %v19747_v44  ;;  %v8553_v5 = vadd.f32 %v8552_v20, %v19751_v46  ;;  %15513 = vmatpush3.bf16.msra.mxu1 %v16882_v38  ;;  %15541 = vmatpush3.bf16.msra.mxu0 %v16883_v6  ;;  %v8772_v63 = vmax.f32 %v8498_v39, 0.0  ;;  %v8774_v32 = vmax.f32 %v8549_v55, 0.0  ;;  %v16894_v25 = vld [vmem:[%s20834_s10 + $0x928] sm:$0xff]   ;;  %v16896_v39 = vld [vmem:[%s20834_s10 + $0x970] sm:$0xff]  }
0x1c43   :  { %v8787_v18 = vmax.f32 %v8500_v19, 0.0  ;;  %v8789_v14 = vmax.f32 %v8551_v37, 0.0  ;;  %15514 = vmatprep.subr.bf16.mxu1 %v16884_v42  ;;  %15542 = vmatprep.subr.bf16.mxu0 %v16885_v40  ;;  %v16895_v35 = vld [vmem:[%s20834_s10 + $0x9a8] sm:$0xff]   ;;  %v19824_v42 = vrot.slane %v19814_v1, %v17445_v48  ;;  %v19828_v40 = vrot.slane %v19814_v1, %v17448_v49  ;;  %v16897_v55 = vld [vmem:[%s20834_s10 + $0x9f0] sm:$0xff]  }
0x1c44   :  { %v8788_v3 = vmax.f32 %v8502_v59, 0.0  ;;  %v8790_v17 = vmax.f32 %v8553_v5, 0.0  ;;  %v19838_v16 = vrot.slane %v19814_v1, %v17454_v51  ;;  %v19842_v33 = vrot.slane %v19814_v1, %v17457_v52  ;;  %v16898_v59 = vld [vmem:[%s20834_s10 + $0x930] sm:$0xff]  }
0x1c45   :  { %v19791_v57 = vpack.c.bf16 %v8787_v18, %v8771_v13  ;;  %v19793_v7 = vpack.c.bf16 %v8789_v14, %v8773_v56  ;;  %v16899_v5 = vld [vmem:[%s20834_s10 + $0x9b0] sm:$0xff]   ;;  %v16901_v56 = vld [vmem:[%s20834_s10 + $0x9f8] sm:$0xff]  }
0x1c46   :  { %v9077_v53 = vpack.c.bf16 %v8788_v3, %v8772_v63  ;;  %v9079_v47 = vpack.c.bf16 %v8790_v17, %v8774_v32  ;;  %15515 = vmatpush3.bf16.msra.mxu1 %v16886_v41  ;;  %15543 = vmatpush3.bf16.msra.mxu0 %v16887_v9  ;;  %v19795_v36 = vpop.f32.mrb[192].mxu1  ;;  %v19797_v43 = vpop.f32.mrb[192].mxu0 }
0x1c47   :  { %v8507_v54 = vpop.f32.mrb[193].mxu1  ;;  %v8558_v11 = vpop.f32.mrb[193].mxu0  ;;  %15516 = vmatprep.subr.bf16.mxu1 %v16888_v4  ;;  %15544 = vmatprep.subr.bf16.mxu0 %v16889_v58 }
0x1c48   :  { %v8509_v38 = vpop.f32.mrb[194].mxu1  ;;  %v8560_v6 = vpop.f32.mrb[194].mxu0  ;;  %10004 = vmatprep.mubr.bf16.mxu1 %v9077_v53  ;;  %10052 = vmatprep.mubr.bf16.mxu0 %v9079_v47  ;;  %v8508_v19 = vadd.f32 %v8507_v54, %v19747_v44  ;;  %v8559_v37 = vadd.f32 %v8558_v11, %v19751_v46  ;;  %v16900_v46 = vld [vmem:[%s20834_s10 + $0x978] sm:$0xff]  }
0x1c49   :  { %v8510_v15 = vpop.f32.mrb[195].mxu1  ;;  %v8561_v23 = vpop.f32.mrb[195].mxu0  ;;  %v16902_v54 = vld [vmem:[%s20834_s10 + $0x938] sm:$0xff]  }
0x1c4a   :  { %15517 = vmatpush3.bf16.msra.mxu1 %v16890_v10  ;;  %15545 = vmatpush3.bf16.msra.mxu0 %v16891_v24  ;;  %v8804_v53 = vmax.f32 %v8508_v19, 0.0  ;;  %v8806_v47 = vmax.f32 %v8559_v37, 0.0  ;;  %v16903_v11 = vld [vmem:[%s20834_s10 + $0x9b8] sm:$0xff]   ;;  %v16904_v15 = vld [vmem:[%s20834_s10 + $0xa40] sm:$0xff]  }
0x1c4b   :  { %15518 = vmatprep.subr.bf16.mxu1 %v16892_v8  ;;  %15546 = vmatprep.subr.bf16.mxu0 %v16893_v0  ;;  %v16905_v23 = vld [vmem:[%s20834_s10 + $0xac0] sm:$0xff]  }
0x1c4e   :  { %15519 = vmatpush3.bf16.msra.mxu1 %v16894_v25  ;;  %15547 = vmatpush3.bf16.msra.mxu0 %v16895_v35  ;;  %v8597_v22 = vpop.f32.mrb[196].mxu1  ;;  %v8648_v20 = vpop.f32.mrb[196].mxu0 }
0x1c4f   :  { %v8598_v41 = vadd.f32 %v8597_v22, %v19824_v42  ;;  %v8649_v9 = vadd.f32 %v8648_v20, %v19828_v40  ;;  %v8599_v13 = vpop.f32.mrb[197].mxu1  ;;  %v8650_v44 = vpop.f32.mrb[197].mxu0  ;;  %15520 = vmatprep.subr.bf16.mxu1 %v16896_v39  ;;  %15548 = vmatprep.subr.bf16.mxu0 %v16897_v55  ;;  %v8506_v22 = vadd.f32 %v19795_v36, %v19739_v21  ;;  %v16906_v21 = vld [vmem:[%s20834_s10 + $0xa00] sm:$0xff]  }
0x1c50   :  { %v8600_v18 = vadd.f32 %v8599_v13, %v19838_v16  ;;  %v8651_v14 = vadd.f32 %v8650_v44, %v19842_v33  ;;  %v8601_v4 = vpop.f32.mrb[198].mxu1  ;;  %v8652_v58 = vpop.f32.mrb[198].mxu0  ;;  %v16907_v36 = vld [vmem:[%s20834_s10 + $0xa80] sm:$0xff]  }
0x1c51   :  { %v8602_v63 = vadd.f32 %v8601_v4, %v19824_v42  ;;  %v8653_v32 = vadd.f32 %v8652_v58, %v19828_v40  ;;  %v8603_v3 = vpop.f32.mrb[199].mxu1  ;;  %v8654_v17 = vpop.f32.mrb[199].mxu0  ;;  %v8775_v8 = vmax.f32 %v8598_v41, 0.0  ;;  %v8777_v0 = vmax.f32 %v8649_v9, 0.0 }
0x1c52   :  { %v8604_v10 = vadd.f32 %v8603_v3, %v19838_v16  ;;  %v8655_v24 = vadd.f32 %v8654_v17, %v19842_v33  ;;  %15521 = vmatpush3.bf16.msra.mxu1 %v16898_v59  ;;  %15549 = vmatpush3.bf16.msra.mxu0 %v16899_v5  ;;  %v8776_v25 = vmax.f32 %v8600_v18, 0.0  ;;  %v8778_v35 = vmax.f32 %v8651_v14, 0.0  ;;  %v16910_v3 = vld [vmem:[%s20834_s10 + $0xa08] sm:$0xff]  }
0x1c53   :  { %v8791_v38 = vmax.f32 %v8602_v63, 0.0  ;;  %v8793_v6 = vmax.f32 %v8653_v32, 0.0  ;;  %15522 = vmatprep.subr.bf16.mxu1 %v16900_v46  ;;  %15550 = vmatprep.subr.bf16.mxu0 %v16901_v56  ;;  %v8557_v9 = vadd.f32 %v19797_v43, %v19743_v62  ;;  %v9093_v46 = vpack.c.bf16 %v8804_v53, %v8804_v53  ;;  %v16908_v62 = vld [vmem:[%s20834_s10 + $0xa48] sm:$0xff]  }
0x1c54   :  { %v8792_v39 = vmax.f32 %v8604_v10, 0.0  ;;  %v8794_v55 = vmax.f32 %v8655_v24, 0.0  ;;  %v9095_v56 = vpack.c.bf16 %v8806_v47, %v8806_v47  ;;  %v16909_v43 = vld [vmem:[%s20834_s10 + $0xac8] sm:$0xff]   ;;  %v8803_v63 = vmax.f32 %v8506_v22, 0.0  ;;  %v16912_v10 = vld [vmem:[%s20834_s10 + $0xa50] sm:$0xff]  }
0x1c55   :  { %v19878_v19 = vpack.c.bf16 %v8791_v38, %v8775_v8  ;;  %v19880_v37 = vpack.c.bf16 %v8793_v6, %v8777_v0  ;;  %v8805_v32 = vmax.f32 %v8557_v9, 0.0  ;;  %v16911_v17 = vld [vmem:[%s20834_s10 + $0xa88] sm:$0xff]   ;;  %v19928_v53 = vrot.slane %v19814_v1, %v17925_v31  ;;  %v16913_v24 = vld [vmem:[%s20834_s10 + $0xad0] sm:$0xff]  }
0x1c56   :  { %v19884_v20 = vpack.c.bf16 %v8792_v39, %v8776_v25  ;;  %v19886_v59 = vpack.c.bf16 %v8794_v55, %v8778_v35  ;;  %15523 = vmatpush3.bf16.msra.mxu1 %v16902_v54  ;;  %15551 = vmatpush3.bf16.msra.mxu0 %v16903_v11  ;;  %v19888_v5 = vpop.f32.mrb[200].mxu1  ;;  %v19890_v41 = vpop.f32.mrb[200].mxu0  ;;  %v19932_v47 = vrot.slane %v19814_v1, %v17928_v50  ;;  %v16914_v38 = vld [vmem:[%s20834_s10 + $0xa10] sm:$0xff]   ;;  %v16916_v39 = vld [vmem:[%s20834_s10 + $0xa58] sm:$0xff]  }
0x1c57   :  { %v19894_v13 = vpop.f32.mrb[201].mxu1  ;;  %v19896_v44 = vpop.f32.mrb[201].mxu0  ;;  %15564 = vmatprep.subr.bf16.mxu1 %v16904_v15  ;;  %15592 = vmatprep.subr.bf16.mxu0 %v16905_v23  ;;  %v9094_v8 = vpack.c.bf16 %v8805_v32, %v8805_v32  ;;  %v16915_v6 = vld [vmem:[%s20834_s10 + $0xa90] sm:$0xff]   ;;  %v16917_v55 = vld [vmem:[%s20834_s10 + $0xad8] sm:$0xff]  }
0x1c58   :  { %v8611_v18 = vpop.f32.mrb[202].mxu1  ;;  %v8662_v14 = vpop.f32.mrb[202].mxu0 }
0x1c59   :  { %10005 = vmatmul.mubr.bf16.vlgmr.msra.gmra.mrb[220].mxu1 %v19791_v57  ;;  %10053 = vmatmul.mubr.bf16.vlgmr.msra.gmra.mrb[220].mxu0 %v19793_v7  ;;  %v8612_v4 = vpop.f32.mrb[203].mxu1  ;;  %v8663_v58 = vpop.f32.mrb[203].mxu0  ;;  %v19920_v57 = vrot.slane %v19814_v1, %v17919_v60  ;;  %v19924_v7 = vrot.slane %v19814_v1, %v17922_v61  ;;  %v9092_v61 = vpack.c.bf16 %v8803_v63, %v8803_v63 }
0x1c5a   :  { %10012 = vmatprep.mubr.bf16.mxu1 %v9093_v46  ;;  %10060 = vmatprep.mubr.bf16.mxu0 %v9095_v56  ;;  %v16918_v4 = vld [vmem:[%s20834_s10 + $0xa18] sm:$0xff]  }
0x1c5b   :  { %15565 = vmatpush3.bf16.msra.mxu1 %v16906_v21  ;;  %15593 = vmatpush3.bf16.msra.mxu0 %v16907_v36  ;;  %v16919_v58 = vld [vmem:[%s20834_s10 + $0xa98] sm:$0xff]  }
0x1c5c   :  { %15566 = vmatprep.subr.bf16.mxu1 %v16908_v62  ;;  %15594 = vmatprep.subr.bf16.mxu0 %v16909_v43 }
0x1c5e   :  { %v8699_v54 = vpop.f32.mrb[204].mxu1  ;;  %v8750_v11 = vpop.f32.mrb[204].mxu0 }
0x1c5f   :  { %15567 = vmatpush3.bf16.msra.mxu1 %v16910_v3  ;;  %15595 = vmatpush3.bf16.msra.mxu0 %v16911_v17  ;;  %v8700_v31 = vadd.f32 %v8699_v54, %v19920_v57  ;;  %v8751_v0 = vadd.f32 %v8750_v11, %v19924_v7  ;;  %v8701_v50 = vpop.f32.mrb[205].mxu1  ;;  %v8752_v1 = vpop.f32.mrb[205].mxu0  ;;  %v16921_v17 = vld [vmem:[%s20834_s10 + $0xae0] sm:$0xff]  }
0x1c60   :  { %v8702_v15 = vadd.f32 %v8701_v50, %v19928_v53  ;;  %v8753_v23 = vadd.f32 %v8752_v1, %v19932_v47  ;;  %v8703_v25 = vpop.f32.mrb[206].mxu1  ;;  %v8754_v35 = vpop.f32.mrb[206].mxu0  ;;  %15568 = vmatprep.subr.bf16.mxu1 %v16912_v10  ;;  %15596 = vmatprep.subr.bf16.mxu0 %v16913_v24  ;;  %v16922_v50 = vld [vmem:[%s20834_s10 + $0xa20] sm:$0xff]  }
0x1c61   :  { %v8704_v22 = vadd.f32 %v8703_v25, %v19920_v57  ;;  %v8755_v9 = vadd.f32 %v8754_v35, %v19924_v7  ;;  %10013 = vmatmul.mubr.bf16.gmra.mrb[224].mxu1 %v9092_v61  ;;  %10061 = vmatmul.mubr.bf16.gmra.mrb[224].mxu0 %v9094_v8  ;;  %v8705_v21 = vpop.f32.mrb[207].mxu1  ;;  %v8756_v36 = vpop.f32.mrb[207].mxu0  ;;  %v8779_v18 = vmax.f32 %v8700_v31, 0.0  ;;  %v8781_v14 = vmax.f32 %v8751_v0, 0.0  ;;  %v16923_v1 = vld [vmem:[%s20834_s10 + $0xaa0] sm:$0xff]  }
0x1c62   :  { %v8706_v46 = vadd.f32 %v8705_v21, %v19928_v53  ;;  %v8757_v56 = vadd.f32 %v8756_v36, %v19932_v47  ;;  %10100 = vmatprep.mubr.bf16.mxu1 %v19884_v20  ;;  %10148 = vmatprep.mubr.bf16.mxu0 %v19886_v59  ;;  %v8780_v63 = vmax.f32 %v8702_v15, 0.0  ;;  %v8782_v32 = vmax.f32 %v8753_v23, 0.0  ;;  %v16920_v59 = vld [vmem:[%s20834_s10 + $0xa60] sm:$0xff]   ;;  %v16924_v15 = vld [vmem:[%s20834_s10 + $0xa68] sm:$0xff]   ;;  %v16930_v21 = vld [vmem:[%s20834_s10 + $0xa30] sm:$0xff]  }
0x1c63   :  { %v8795_v62 = vmax.f32 %v8704_v22, 0.0  ;;  %v8797_v43 = vmax.f32 %v8755_v9, 0.0  ;;  %15569 = vmatpush3.bf16.msra.mxu1 %v16914_v38  ;;  %15597 = vmatpush3.bf16.msra.mxu0 %v16915_v6  ;;  %v16925_v23 = vld [vmem:[%s20834_s10 + $0xae8] sm:$0xff]   ;;  %v16928_v22 = vld [vmem:[%s20834_s10 + $0xa70] sm:$0xff]  }
0x1c64   :  { %v8796_v3 = vmax.f32 %v8706_v46, 0.0  ;;  %v8798_v20 = vmax.f32 %v8757_v56, 0.0  ;;  %15570 = vmatprep.subr.bf16.mxu1 %v16916_v39  ;;  %15598 = vmatprep.subr.bf16.mxu0 %v16917_v55  ;;  %v16926_v39 = vld [vmem:[%s20834_s10 + $0xa28] sm:$0xff]   ;;  %v16929_v9 = vld [vmem:[%s20834_s10 + $0xaf0] sm:$0xff]   ;;  %v16932_v46 = vld [vmem:[%s20834_s10 + $0xa78] sm:$0xff]  }
0x1c65   :  { %v19974_v10 = vpack.c.bf16 %v8795_v62, %v8779_v18  ;;  %v19976_v24 = vpack.c.bf16 %v8797_v43, %v8781_v14  ;;  %v16927_v55 = vld [vmem:[%s20834_s10 + $0xaa8] sm:$0xff]   ;;  %v16931_v36 = vld [vmem:[%s20834_s10 + $0xab0] sm:$0xff]   ;;  %v16933_v56 = vld [vmem:[%s20834_s10 + $0xaf8] sm:$0xff]   ;;  %v8610_v18 = vadd.f32 %v19894_v13, %v19838_v16  ;;  %v8661_v14 = vadd.f32 %v19896_v44, %v19842_v33 }
0x1c66   :  { %v19978_v61 = vpack.c.bf16 %v8796_v3, %v8780_v63  ;;  %v19980_v54 = vpack.c.bf16 %v8798_v20, %v8782_v32  ;;  %v19982_v11 = vpop.f32.mrb[208].mxu1  ;;  %v19984_v8 = vpop.f32.mrb[208].mxu0  ;;  %v16934_v62 = vld [vmem:[%s20834_s10 + $0xa38] sm:$0xff]   ;;  %v16937_v16 = vld [vmem:[%s20834_s10 + $0xbc0] sm:$0xff]   ;;  %v8608_v44 = vadd.f32 %v19888_v5, %v19824_v42  ;;  %v16941_v42 = vld [vmem:[%s20834_s10 + $0xbc8] sm:$0xff]  }
0x1c67   :  { %15571 = vmatpush3.bf16.msra.mxu1 %v16918_v4  ;;  %15599 = vmatpush3.bf16.msra.mxu0 %v16919_v58  ;;  %v19986_v31 = vpop.f32.mrb[209].mxu1  ;;  %v19988_v0 = vpop.f32.mrb[209].mxu0  ;;  %v16935_v43 = vld [vmem:[%s20834_s10 + $0xab8] sm:$0xff]   ;;  %v16936_v4 = vld [vmem:[%s20834_s10 + $0xb40] sm:$0xff]   ;;  %v8808_v33 = vmax.f32 %v8610_v18, 0.0  ;;  %v8810_v13 = vmax.f32 %v8661_v14, 0.0  ;;  %v8659_v58 = vadd.f32 %v19890_v41, %v19828_v40 }
0x1c68   :  { %v8713_v38 = vpop.f32.mrb[210].mxu1  ;;  %v8764_v6 = vpop.f32.mrb[210].mxu0  ;;  %15572 = vmatprep.subr.bf16.mxu1 %v16920_v59  ;;  %15600 = vmatprep.subr.bf16.mxu0 %v16921_v17  ;;  %v16938_v63 = vld [vmem:[%s20834_s10 + $0xb00] sm:$0xff]   ;;  %v16940_v59 = vld [vmem:[%s20834_s10 + $0xb48] sm:$0xff]   ;;  %v8807_v40 = vmax.f32 %v8608_v44, 0.0  ;;  %v16962_v18 = vld [vmem:[%s20834_s10 + $0xb30] sm:$0xff]  }
0x1c69   :  { %v8714_v25 = vpop.f32.mrb[211].mxu1  ;;  %v8765_v35 = vpop.f32.mrb[211].mxu0  ;;  %v16939_v32 = vld [vmem:[%s20834_s10 + $0xb80] sm:$0xff]   ;;  %v9097_v3 = vpack.c.bf16 %v8808_v33, %v8808_v33  ;;  %v9099_v20 = vpack.c.bf16 %v8810_v13, %v8810_v13  ;;  %v8809_v5 = vmax.f32 %v8659_v58, 0.0  ;;  %v16942_v41 = vld [vmem:[%s20834_s10 + $0xb08] sm:$0xff]   ;;  %v16946_v38 = vld [vmem:[%s20834_s10 + $0xb10] sm:$0xff]   ;;  %v8710_v58 = vadd.f32 %v19982_v11, %v19920_v57 }
0x1c6a   :  { %v16943_v17 = vld [vmem:[%s20834_s10 + $0xb88] sm:$0xff]   ;;  %v16947_v6 = vld [vmem:[%s20834_s10 + $0xb90] sm:$0xff]   ;;  %v16950_v25 = vld [vmem:[%s20834_s10 + $0xb18] sm:$0xff]  }
0x1c6b   :  { %15573 = vmatpush3.bf16.msra.mxu1 %v16922_v50  ;;  %15601 = vmatpush3.bf16.msra.mxu0 %v16923_v1  ;;  %v9096_v50 = vpack.c.bf16 %v8807_v40, %v8807_v40  ;;  %v9098_v1 = vpack.c.bf16 %v8809_v5, %v8809_v5  ;;  %v16951_v35 = vld [vmem:[%s20834_s10 + $0xb98] sm:$0xff]   ;;  %v16963_v14 = vld [vmem:[%s20834_s10 + $0xbb0] sm:$0xff]   ;;  %v10322_v44 = vld [vmem:[%s20837_s4] sm:$0x3]  ;;  %v8811_v11 = vmax.f32 %v8710_v58, 0.0 }
0x1c6c   :  { %15574 = vmatprep.subr.bf16.mxu1 %v16924_v15  ;;  %15602 = vmatprep.subr.bf16.mxu0 %v16925_v23  ;;  %v16948_v15 = vld [vmem:[%s20834_s10 + $0xb58] sm:$0xff]   ;;  %v10328_v5 = vld [vmem:[%s20839_s1] sm:$0xff] }
0x1c6d   :  { %v16949_v23 = vld [vmem:[%s20834_s10 + $0xbd8] sm:$0xff]  }
0x1c6e   :  { %v16966_v33 = vld [vmem:[%s20834_s10 + $0xb38] sm:$0xff]  }
0x1c6f   :  { %15575 = vmatpush3.bf16.msra.mxu1 %v16926_v39  ;;  %15603 = vmatpush3.bf16.msra.mxu0 %v16927_v55  ;;  %v16952_v39 = vld [vmem:[%s20834_s10 + $0xb60] sm:$0xff]   ;;  %v16967_v13 = vld [vmem:[%s20834_s10 + $0xbb8] sm:$0xff]  }
0x1c70   :  { %15576 = vmatprep.subr.bf16.mxu1 %v16928_v22  ;;  %15604 = vmatprep.subr.bf16.mxu0 %v16929_v9  ;;  %v16955_v55 = vld [vmem:[%s20834_s10 + $0xba0] sm:$0xff]   ;;  %v16956_v22 = vld [vmem:[%s20834_s10 + $0xb68] sm:$0xff]  }
0x1c71   :  { %v16957_v9 = vld [vmem:[%s20834_s10 + $0xbe8] sm:$0xff]   ;;  %v10326_v57 = vld [vmem:[%s20837_s4 + $0x1a] sm:$0xff] }
0x1c73   :  { %15577 = vmatpush3.bf16.msra.mxu1 %v16930_v21  ;;  %15605 = vmatpush3.bf16.msra.mxu0 %v16931_v36  ;;  %v16958_v21 = vld [vmem:[%s20834_s10 + $0xb28] sm:$0xff]  }
0x1c74   :  { %15578 = vmatprep.subr.bf16.mxu1 %v16932_v46  ;;  %15606 = vmatprep.subr.bf16.mxu0 %v16933_v56  ;;  %v16959_v36 = vld [vmem:[%s20834_s10 + $0xba8] sm:$0xff]   ;;  %v16960_v46 = vld [vmem:[%s20834_s10 + $0xb70] sm:$0xff]  }
0x1c75   :  { %v16961_v56 = vld [vmem:[%s20834_s10 + $0xbf0] sm:$0xff]  }
0x1c77   :  { %15579 = vmatpush3.bf16.msra.mxu1 %v16934_v62  ;;  %15607 = vmatpush3.bf16.msra.mxu0 %v16935_v43  ;;  %v16964_v62 = vld [vmem:[%s20834_s10 + $0xb78] sm:$0xff]  }
0x1c78   :  { %15620 = vmatprep.subr.bf16.mxu1 %v16936_v4  ;;  %15648 = vmatprep.subr.bf16.mxu0 %v16937_v16  ;;  %v16965_v43 = vld [vmem:[%s20834_s10 + $0xbf8] sm:$0xff]   ;;  %v8712_v4 = vadd.f32 %v19986_v31, %v19928_v53  ;;  %v8763_v16 = vadd.f32 %v19988_v0, %v19932_v47  ;;  %v10323_v47 = vld [vmem:[%s20837_s4 + $0x2] sm:$0xff]  ;;  %v10324_v0 = vld [vmem:[%s20837_s4 + $0xa] sm:$0xff] }
0x1c7a   :  { %10101 = vmatmul.mubr.bf16.vlgmr.msra.gmra.mrb[228].mxu1 %v19878_v19  ;;  %10149 = vmatmul.mubr.bf16.vlgmr.msra.gmra.mrb[228].mxu0 %v19880_v37  ;;  %v16944_v19 = vld [vmem:[%s20834_s10 + $0xb50] sm:$0xff]   ;;  %v8812_v53 = vmax.f32 %v8712_v4, 0.0  ;;  %v8814_v31 = vmax.f32 %v8763_v16, 0.0 }
0x1c7b   :  { %10108 = vmatprep.mubr.bf16.mxu1 %v9097_v3  ;;  %10156 = vmatprep.mubr.bf16.mxu0 %v9099_v20  ;;  %v16945_v37 = vld [vmem:[%s20834_s10 + $0xbd0] sm:$0xff]   ;;  %v17230_v3 = vmov 0.0|0.0  }
0x1c7c   :  { %15621 = vmatpush3.bf16.msra.mxu1 %v16938_v63  ;;  %15649 = vmatpush3.bf16.msra.mxu0 %v16939_v32  ;;  %v8761_v63 = vadd.f32 %v19984_v8, %v19924_v7  ;;  %v20158_v32 = vpack.c.bf16 %v10324_v0, %v10323_v47  ;;  %v9101_v20 = vpack.c.bf16 %v8812_v53, %v8812_v53  ;;  %v10420_v7 = vld [vmem:[%s20838_s2 + $0x2] sm:$0x3] }
0x1c7d   :  { %15622 = vmatprep.subr.bf16.mxu1 %v16940_v59  ;;  %15650 = vmatprep.subr.bf16.mxu0 %v16941_v42  ;;  %v9103_v59 = vpack.c.bf16 %v8814_v31, %v8814_v31  ;;  %v10325_v42 = vld [vmem:[%s20837_s4 + $0x12] sm:$0xff] }
0x1c7e   :  { %v8813_v8 = vmax.f32 %v8761_v63, 0.0  ;;  %v20172_v40 = vpack.c.bf16 %v10326_v57, %v10325_v42  ;;  %10502 = vrot.lane.b32.xlu0 %v10420_v7, %s17229_s22 }
0x1c80   :  { %15623 = vmatpush3.bf16.msra.mxu1 %v16942_v41  ;;  %15651 = vmatpush3.bf16.msra.mxu0 %v16943_v17  ;;  %v10329_v41 = vld [vmem:[%s20839_s1 + $0x8] sm:$0xff]  ;;  %v10419_v17 = vld [vmem:[%s20838_s2] sm:$0x3] }
0x1c81   :  { %15624 = vmatprep.subr.bf16.mxu1 %v16944_v19  ;;  %15652 = vmatprep.subr.bf16.mxu0 %v16945_v37 }
0x1c82   :  { %10109 = vmatmul.mubr.bf16.gmra.mrb[232].mxu1 %v9096_v50  ;;  %10157 = vmatmul.mubr.bf16.gmra.mrb[232].mxu0 %v9098_v1  ;;  %v20208_v50 = vld [vmem:[%s20835_s11 + $0x10] sm:$0x1f] }
0x1c83   :  { %10196 = vmatprep.mubr.bf16.mxu1 %v19978_v61  ;;  %10244 = vmatprep.mubr.bf16.mxu0 %v19980_v54  ;;  %v16953_v61 = vld [vmem:[%s20834_s10 + $0xbe0] sm:$0xff]   ;;  %v9107_v1 = vrot.slane %v20208_v50, %v17445_v48 }
0x1c84   :  { %15625 = vmatpush3.bf16.msra.mxu1 %v16946_v38  ;;  %15653 = vmatpush3.bf16.msra.mxu0 %v16947_v6  ;;  %v16954_v54 = vld [vmem:[%s20834_s10 + $0xb20] sm:$0xff]  }
0x1c85   :  { %15626 = vmatprep.subr.bf16.mxu1 %v16948_v15  ;;  %15654 = vmatprep.subr.bf16.mxu0 %v16949_v23 }
0x1c88   :  { %15627 = vmatpush3.bf16.msra.mxu1 %v16950_v25  ;;  %15655 = vmatpush3.bf16.msra.mxu0 %v16951_v35 }
0x1c89   :  { %15628 = vmatprep.subr.bf16.mxu1 %v16952_v39  ;;  %15656 = vmatprep.subr.bf16.mxu0 %v16953_v61 }
0x1c8c   :  { %15629 = vmatpush3.bf16.msra.mxu1 %v16954_v54  ;;  %15657 = vmatpush3.bf16.msra.mxu0 %v16955_v55 }
0x1c8d   :  { %15630 = vmatprep.subr.bf16.mxu1 %v16956_v22  ;;  %15658 = vmatprep.subr.bf16.mxu0 %v16957_v9 }
0x1c90   :  { %15631 = vmatpush3.bf16.msra.mxu1 %v16958_v21  ;;  %15659 = vmatpush3.bf16.msra.mxu0 %v16959_v36 }
0x1c91   :  { %15632 = vmatprep.subr.bf16.mxu1 %v16960_v46  ;;  %15660 = vmatprep.subr.bf16.mxu0 %v16961_v56 }
0x1c94   :  { %15633 = vmatpush3.bf16.msra.mxu1 %v16962_v18  ;;  %15661 = vmatpush3.bf16.msra.mxu0 %v16963_v14 }
0x1c95   :  { %15634 = vmatprep.subr.bf16.mxu1 %v16964_v62  ;;  %15662 = vmatprep.subr.bf16.mxu0 %v16965_v43 }
0x1c98   :  { %15635 = vmatpush3.bf16.msra.mxu1 %v16966_v33  ;;  %15663 = vmatpush3.bf16.msra.mxu0 %v16967_v13 }
0x1c99   :  { %16074 = vmatprep.subr.msk.mxu1 %vm20980_vm10, %v10322_v44  ;;  %16431 = vmatprep.subr.bf16.mxu0 %v17230_v3  ;;  %vm20988_vm10 = vmmov %vm20961_vm3 }
0x1c9b   :  { %10197 = vmatmul.mubr.bf16.vlgmr.msra.gmra.mrb[236].mxu1 %v19974_v10  ;;  %10245 = vmatmul.mubr.bf16.vlgmr.msra.gmra.mrb[236].mxu0 %v19976_v24  ;;  %v9100_v10 = vpack.c.bf16 %v8811_v11, %v8811_v11  ;;  %v9102_v24 = vpack.c.bf16 %v8813_v8, %v8813_v8 }
0x1c9c   :  { %10204 = vmatprep.mubr.bf16.mxu1 %v9101_v20  ;;  %10252 = vmatprep.mubr.bf16.mxu0 %v9103_v59 }
0x1c9d   :  { %16075 = vmatpush3.msk.msra.mxu1 %vm20981_vm11, %v10322_v44  ;;  %16433 = vmatpush3.bf16.msra.mxu0 %v20158_v32  ;;  %vm11293_vm11 = vcmask 1044480  }
0x1c9e   :  { %16434 = vmatprep.subr.bf16.mxu0 %v17230_v3  ;;  %16437 = vmatprep.subr.bf16.mxu1 %v17230_v3 }
0x1ca1   :  { %16436 = vmatpush3.bf16.msra.mxu0 %v20172_v40 }
0x1ca2   :  { %16443 = vmatprep.subr.bf16.mxu0 %v17230_v3 }
0x1ca3   :  { %10205 = vmatmul.mubr.bf16.gmra.mrb[240].mxu1 %v9100_v10  ;;  %10253 = vmatmul.mubr.bf16.gmra.mrb[240].mxu0 %v9102_v24 }
0x1ca4   :  { %16076 = vmatprep.mubr.msk.f32.mxu1 %vm10334_vm12, %v10328_v5  ;;  %16087 = vmatprep.mubr.msk.f32.mxu0 %vm17231_vm13, %v17226_v29 }
0x1cab   :  { %16077 = vmatmul.mubr.msk.f32.vlgmr.msra.gmra.mrb[244].mxu1 %vm10334_vm12, %v10329_v41  ;;  %16088 = vmatmul.mubr.msk.f32.vlgmr.msra.gmra.mrb[244].mxu0 %vm20982_vm14, %v10419_v17  ;;  %vm20989_vm12 = vmmov %vm20961_vm3  ;;  %vm11295_vm14 = vcmask 1045504  }
0x1cac   :  { %16439 = vmatpush3.bf16.msra.mxu1 %v20158_v32  ;;  %16098 = vmatprep.mubr.msk.f32.mxu1 %vm17231_vm13, %v17226_v29 }
0x1cad   :  { %16440 = vmatprep.subr.bf16.mxu1 %v17230_v3  ;;  %16445 = vmatpush3.bf16.msra.mxu0 %v20158_v32 }
0x1cae   :  { %16446 = vmatprep.subr.bf16.mxu0 %v17230_v3  ;;  %16109 = vmatprep.mubr.msk.f32.mxu0 %vm17231_vm13, %v17226_v29 }
0x1cb0   :  { %16442 = vmatpush3.bf16.msra.mxu1 %v20172_v40 }
0x1cb1   :  { %16448 = vmatpush3.bf16.msra.mxu0 %v20172_v40  ;;  %16449 = vmatprep.subr.bf16.mxu1 %v17230_v3 }
0x1cb2   :  { %16455 = vmatprep.subr.bf16.mxu0 %v17230_v3 }
0x1d0c   :  { %v15468_v19 = vpop.f32.mrb[212].mxu1  ;;  %v15496_v37 = vpop.f32.mrb[212].mxu0 }
0x1d0d   :  { %v15469_v38 = vpop.f32.mrb[213].mxu1  ;;  %v15497_v6 = vpop.f32.mrb[213].mxu0 }
0x1d0e   :  { %v15470_v15 = vadd.f32 %v15469_v38, %v15468_v19  ;;  %v15498_v23 = vadd.f32 %v15497_v6, %v15496_v37  ;;  %v15471_v25 = vpop.f32.mrb[214].mxu1  ;;  %v15499_v35 = vpop.f32.mrb[214].mxu0 }
0x1d0f   :  { %v15472_v39 = vpop.f32.mrb[215].mxu1  ;;  %v15500_v61 = vpop.f32.mrb[215].mxu0 }
0x1d10   :  { %v9911_v54 = vadd.f32 %v15470_v15, %v9107_v1  ;;  %v15473_v55 = vadd.f32 %v15472_v39, %v15471_v25  ;;  %v15501_v22 = vadd.f32 %v15500_v61, %v15499_v35 }
0x1d12   :  { %v9959_v9 = vadd.f32 %v15498_v23, %v9911_v54  ;;  %v9914_v21 = vadd.f32 %v15473_v55, %v9107_v1 }
0x1d14   :  { %v9962_v36 = vadd.f32 %v15501_v22, %v9914_v21  ;;  %v15474_v46 = vpop.f32.mrb[216].mxu1  ;;  %v15502_v56 = vpop.f32.mrb[216].mxu0 }
0x1d15   :  { %v15475_v18 = vpop.f32.mrb[217].mxu1  ;;  %v15503_v14 = vpop.f32.mrb[217].mxu0 }
0x1d16   :  { %v15476_v62 = vadd.f32 %v15475_v18, %v15474_v46  ;;  %v15504_v43 = vadd.f32 %v15503_v14, %v15502_v56  ;;  %v15477_v4 = vpop.f32.mrb[218].mxu1  ;;  %v15505_v16 = vpop.f32.mrb[218].mxu0 }
0x1d17   :  { %v15478_v33 = vpop.f32.mrb[219].mxu1  ;;  %v15506_v13 = vpop.f32.mrb[219].mxu0 }
0x1d18   :  { %v9919_v44 = vadd.f32 %v15476_v62, %v9107_v1 }
0x1d1a   :  { %v9967_v53 = vadd.f32 %v15504_v43, %v9919_v44 }
0x1d2c   :  { %v15524_v31 = vpop.f32.mrb[220].mxu1  ;;  %v15552_v47 = vpop.f32.mrb[220].mxu0 }
0x1d2d   :  { %v15525_v0 = vpop.f32.mrb[221].mxu1  ;;  %v15553_v58 = vpop.f32.mrb[221].mxu0 }
0x1d2e   :  { %v15526_v63 = vadd.f32 %v15525_v0, %v15524_v31  ;;  %v15554_v20 = vadd.f32 %v15553_v58, %v15552_v47  ;;  %v15527_v59 = vpop.f32.mrb[222].mxu1  ;;  %v15555_v42 = vpop.f32.mrb[222].mxu0 }
0x1d2f   :  { %v15528_v57 = vpop.f32.mrb[223].mxu1  ;;  %v15556_v7 = vpop.f32.mrb[223].mxu0 }
0x1d30   :  { %v10007_v11 = vadd.f32 %v15526_v63, %v9959_v9  ;;  %v15529_v8 = vadd.f32 %v15528_v57, %v15527_v59  ;;  %v15557_v10 = vadd.f32 %v15556_v7, %v15555_v42 }
0x1d32   :  { %v10055_v24 = vadd.f32 %v15554_v20, %v10007_v11  ;;  %v10010_v5 = vadd.f32 %v15529_v8, %v9962_v36 }
0x1d34   :  { %v10058_v41 = vadd.f32 %v15557_v10, %v10010_v5  ;;  %v15530_v17 = vpop.f32.mrb[224].mxu1  ;;  %v15558_v19 = vpop.f32.mrb[224].mxu0 }
0x1d35   :  { %v15531_v37 = vpop.f32.mrb[225].mxu1  ;;  %v15559_v1 = vpop.f32.mrb[225].mxu0 }
0x1d36   :  { %v15532_v38 = vadd.f32 %v15531_v37, %v15530_v17  ;;  %v15560_v6 = vadd.f32 %v15559_v1, %v15558_v19  ;;  %v15533_v15 = vpop.f32.mrb[226].mxu1  ;;  %v15561_v23 = vpop.f32.mrb[226].mxu0 }
0x1d37   :  { %v15534_v25 = vpop.f32.mrb[227].mxu1  ;;  %v15562_v35 = vpop.f32.mrb[227].mxu0 }
0x1d38   :  { %v10015_v39 = vadd.f32 %v15532_v38, %v9967_v53 }
0x1d3a   :  { %v10063_v61 = vadd.f32 %v15560_v6, %v10015_v39 }
0x1d4d   :  { %v15580_v54 = vpop.f32.mrb[228].mxu1  ;;  %v15608_v55 = vpop.f32.mrb[228].mxu0 }
0x1d4e   :  { %v15581_v22 = vpop.f32.mrb[229].mxu1  ;;  %v15609_v9 = vpop.f32.mrb[229].mxu0 }
0x1d4f   :  { %v15582_v21 = vadd.f32 %v15581_v22, %v15580_v54  ;;  %v15610_v46 = vadd.f32 %v15609_v9, %v15608_v55  ;;  %v15583_v36 = vpop.f32.mrb[230].mxu1  ;;  %v15611_v56 = vpop.f32.mrb[230].mxu0 }
0x1d50   :  { %v15584_v18 = vpop.f32.mrb[231].mxu1  ;;  %v15612_v14 = vpop.f32.mrb[231].mxu0 }
0x1d51   :  { %v10103_v62 = vadd.f32 %v15582_v21, %v10055_v24  ;;  %v15585_v43 = vadd.f32 %v15584_v18, %v15583_v36  ;;  %v15613_v4 = vadd.f32 %v15612_v14, %v15611_v56 }
0x1d53   :  { %v10151_v16 = vadd.f32 %v15610_v46, %v10103_v62  ;;  %v10106_v33 = vadd.f32 %v15585_v43, %v10058_v41  ;;  %v14701_v62 = vld [vmem:[%s20837_s4 + $0x22] ss:$0 sm:$0xff] }
0x1d55   :  { %v10154_v13 = vadd.f32 %v15613_v4, %v10106_v33  ;;  %v15586_v44 = vpop.f32.mrb[232].mxu1  ;;  %v15614_v31 = vpop.f32.mrb[232].mxu0 }
0x1d56   :  { %v15587_v53 = vpop.f32.mrb[233].mxu1  ;;  %v15615_v47 = vpop.f32.mrb[233].mxu0 }
0x1d57   :  { %v15588_v0 = vadd.f32 %v15587_v53, %v15586_v44  ;;  %v15616_v58 = vadd.f32 %v15615_v47, %v15614_v31  ;;  %v15589_v63 = vpop.f32.mrb[234].mxu1  ;;  %v15617_v20 = vpop.f32.mrb[234].mxu0 }
0x1d58   :  { %v15590_v59 = vpop.f32.mrb[235].mxu1  ;;  %v15618_v42 = vpop.f32.mrb[235].mxu0 }
0x1d59   :  { %v10111_v57 = vadd.f32 %v15588_v0, %v10063_v61 }
0x1d5b   :  { %v10159_v7 = vadd.f32 %v15616_v58, %v10111_v57  ;;  %v10503_v57 = vpop.permute.xlu0 %10502 }
0x1d6e   :  { %v15636_v11 = vpop.f32.mrb[236].mxu1  ;;  %v15664_v8 = vpop.f32.mrb[236].mxu0 }
0x1d6f   :  { %v15637_v10 = vpop.f32.mrb[237].mxu1  ;;  %v15665_v24 = vpop.f32.mrb[237].mxu0 }
0x1d70   :  { %v15638_v5 = vadd.f32 %v15637_v10, %v15636_v11  ;;  %v15666_v17 = vadd.f32 %v15665_v24, %v15664_v8  ;;  %v15639_v41 = vpop.f32.mrb[238].mxu1  ;;  %v15667_v19 = vpop.f32.mrb[238].mxu0 }
0x1d71   :  { %v15640_v37 = vpop.f32.mrb[239].mxu1  ;;  %v15668_v1 = vpop.f32.mrb[239].mxu0 }
0x1d72   :  { %v10199_v38 = vadd.f32 %v15638_v5, %v10151_v16  ;;  %v15641_v6 = vadd.f32 %v15640_v37, %v15639_v41  ;;  %v15669_v15 = vadd.f32 %v15668_v1, %v15667_v19 }
0x1d74   :  { %v20212_v23 = vadd.f32 %v15666_v17, %v10199_v38  ;;  %v10202_v25 = vadd.f32 %v15641_v6, %v10154_v13 }
0x1d76   :  { %v20214_v35 = vadd.f32 %v15669_v15, %v10202_v25  ;;  %v15642_v39 = vpop.f32.mrb[240].mxu1  ;;  %v15670_v61 = vpop.f32.mrb[240].mxu0 }
0x1d77   :  { %v15643_v54 = vpop.f32.mrb[241].mxu1  ;;  %v15671_v55 = vpop.f32.mrb[241].mxu0 }
0x1d78   :  { %v15644_v22 = vadd.f32 %v15643_v54, %v15642_v39  ;;  %v15672_v9 = vadd.f32 %v15671_v55, %v15670_v61  ;;  %v15645_v21 = vpop.f32.mrb[242].mxu1  ;;  %v15673_v46 = vpop.f32.mrb[242].mxu0 }
0x1d79   :  { %v15646_v36 = vpop.f32.mrb[243].mxu1  ;;  %v15674_v56 = vpop.f32.mrb[243].mxu0 }
0x1d7a   :  { %v10207_v18 = vadd.f32 %v15644_v22, %v10159_v7 }
0x1d7c   :  { %v20216_v14 = vadd.f32 %v15672_v9, %v10207_v18 }
0x1d7e   :  { %v16078_v43 = vpop.f32.mrb[244].mxu1  ;;  %v10490_v4 = vpop.f32.mrb[244].mxu0 }
0x1d7f   :  { %v20221_v16 = vadd.f32 %v16078_v43, %v14701_v62  ;;  %v10410_v33 = vpop.f32.mrb[245].mxu1  ;;  %v16089_v13 = vpop.f32.mrb[245].mxu0 }
0x1d80   :  { %v20223_v44 = vadd.f32 %v14701_v62, %v10410_v33 }
0x1d82   :  { %v10494_v31 = vadd.f32 %v10490_v4, %v20223_v44 }
0x1d84   :  { %17094 = vtanh.f32 %v10494_v31  ;;  %v10495_v47 = vsub.f32 0.0, %v10494_v31 }
0x1d86   :  { %v10496_v0 = vmul.f32 1.442695, %v10495_v47 }
0x1d88   :  { %17096 = vpow2.f32 %v10496_v0 }
0x1d8e   :  { %v17095_v53 = vpop.eup %17094 }
0x1d8f   :  { %10507 = vrot.lane.b32.xlu1 %v17095_v53, %s17228_s17 }
0x1d92   :  { %v17097_v58 = vpop.eup %17096 }
0x1d93   :  { %v10498_v63 = vadd.f32 1.0, %v17097_v58 }
0x1d95   :  { %17098 = vrcp.f32 %v10498_v63 }
0x1d9f   :  { %v17099_v20 = vpop.eup %17098 }
0x1da0   :  { %v10505_v7 = vmul.f32 %v17099_v20, %v10503_v57 }
0x1e01   :  { %v10508_v59 = vpop.permute.xlu1 %10507 }
0x1e02   :  { %v10510_v42 = vmul.f32 %v17099_v20, %v10508_v59 }
0x1e04   :  { %10512 = vrot.lane.b32.xlu1 %v10510_v42, %s17229_s22 }
0x1e76   :  { %v10513_v11 = vpop.permute.xlu1 %10512 }
0x1e77   :  { %v10515_v8 = vadd.f32 %v10513_v11, %v10505_v7 }
0x1e79   :  { %17100 = vtanh.f32 %v10515_v8  ;;  %v10608_v22 = vrot.slane %v10515_v8, 6 }
0x1e83   :  { %v17101_v10 = vpop.eup %17100 }
0x1e84   :  { %10518 = vrot.lane.b32.xlu1 %v17101_v10, %s17228_s17 }
0x1ef6   :  { %v10519_v24 = vpop.permute.xlu1 %10518 }
0x1ef7   :  { %v20229_v5 = vmul.f32 %v17099_v20, %v10519_v24 }
0x1ef9   :  { %10523 = vrot.lane.b32.xlu0 %v20229_v5, %s17229_s22 }
0x1f6b   :  { %v10524_v17 = vpop.permute.xlu0 %10523 }
0x1f6c   :  { %16099 = vmatmul.mubr.msk.f32.vlgmr.msra.gmra.mrb[246].mxu1 %vm20983_vm15, %v10524_v17  ;;  %vm20990_vm15 = vmmov %vm20961_vm3 }
0x1f6d   :  { %16451 = vmatpush3.bf16.msra.mxu1 %v20158_v32  ;;  %16120 = vmatprep.mubr.msk.f32.mxu1 %vm17231_vm13, %v17226_v29 }
0x1f6e   :  { %16452 = vmatprep.subr.bf16.mxu1 %v17230_v3 }
0x1f71   :  { %16454 = vmatpush3.bf16.msra.mxu1 %v20172_v40 }
0x1f72   :  { %16461 = vmatprep.subr.bf16.mxu1 %v17230_v3 }
0x203f   :  { %v10593_v41 = vpop.f32.mrb[246].mxu1 }
0x2040   :  { %v10598_v19 = vrot.slane %v10593_v41, 6  ;;  %v16100_v37 = vpop.f32.mrb[247].mxu1 }
0x2042   :  { %v10600_v1 = vadd.f32 %v10598_v19, %v20223_v44  ;;  %v11274_v19 = vrot.slane %v20229_v5, 1 }
0x2044   :  { %17102 = vtanh.f32 %v10600_v1  ;;  %v10601_v6 = vsub.f32 0.0, %v10600_v1 }
0x2046   :  { %v10602_v15 = vmul.f32 1.442695, %v10601_v6 }
0x2048   :  { %17104 = vpow2.f32 %v10602_v15 }
0x204e   :  { %v17103_v38 = vpop.eup %17102 }
0x204f   :  { %10612 = vrot.lane.b32.xlu1 %v17103_v38, %s17228_s17 }
0x2052   :  { %v17105_v25 = vpop.eup %17104 }
0x2053   :  { %v10604_v39 = vadd.f32 1.0, %v17105_v25 }
0x2055   :  { %17106 = vrcp.f32 %v10604_v39 }
0x205f   :  { %v17107_v61 = vpop.eup %17106 }
0x2060   :  { %v10610_v9 = vmul.f32 %v17107_v61, %v10608_v22 }
0x20c1   :  { %v10613_v54 = vpop.permute.xlu1 %10612 }
0x20c2   :  { %v10615_v55 = vmul.f32 %v17107_v61, %v10613_v54 }
0x20c4   :  { %10617 = vrot.lane.b32.xlu0 %v10615_v55, %s17229_s22 }
0x2136   :  { %v10618_v21 = vpop.permute.xlu0 %10617 }
0x2137   :  { %v10620_v46 = vadd.f32 %v10618_v21, %v10610_v9 }
0x2139   :  { %17108 = vtanh.f32 %v10620_v46  ;;  %v10714_v57 = vrot.slane %v10620_v46, 6 }
0x2143   :  { %v17109_v36 = vpop.eup %17108 }
0x2144   :  { %10623 = vrot.lane.b32.xlu1 %v17109_v36, %s17228_s17 }
0x21b6   :  { %v10624_v56 = vpop.permute.xlu1 %10623 }
0x21b7   :  { %v10626_v18 = vmul.f32 %v17107_v61, %v10624_v56 }
0x21b9   :  { %v10628_v62 = vrot.slane %v10626_v18, 2  ;;  %v11259_v24 = vrot.slane %v10626_v18, 1 }
0x21bb   :  { %10629 = vrot.lane.b32.xlu0 %v10628_v62, %s17229_s22  ;;  %v11288_v6 = vsel %vm11287_vm4, %v20229_v5, %v11259_v24  ;;  %v11299_v15 = vsel %vm11287_vm4, %v11274_v19, %v10628_v62  ;;  %vm20991_vm4 = vmmov %vm20961_vm3 }
0x222d   :  { %v10630_v43 = vpop.permute.xlu0 %10629 }
0x222e   :  { %16110 = vmatmul.mubr.msk.f32.vlgmr.msra.gmra.mrb[246].mxu0 %vm20961_vm3, %v10630_v43 }
0x222f   :  { %16457 = vmatpush3.bf16.msra.mxu0 %v20158_v32  ;;  %16131 = vmatprep.mubr.msk.f32.mxu0 %vm17231_vm13, %v17226_v29 }
0x2230   :  { %16458 = vmatprep.subr.bf16.mxu0 %v17230_v3 }
0x2233   :  { %16460 = vmatpush3.bf16.msra.mxu0 %v20172_v40 }
0x2234   :  { %16467 = vmatprep.subr.bf16.mxu0 %v17230_v3 }
0x2301   :  { %v10699_v4 = vpop.f32.mrb[246].mxu0 }
0x2302   :  { %v10704_v33 = vrot.slane %v10699_v4, 4  ;;  %v16111_v13 = vpop.f32.mrb[247].mxu0 }
0x2304   :  { %v10706_v31 = vadd.f32 %v10704_v33, %v20223_v44 }
0x2306   :  { %17110 = vtanh.f32 %v10706_v31  ;;  %v10707_v47 = vsub.f32 0.0, %v10706_v31 }
0x2308   :  { %v10708_v0 = vmul.f32 1.442695, %v10707_v47 }
0x230a   :  { %17112 = vpow2.f32 %v10708_v0 }
0x2310   :  { %v17111_v53 = vpop.eup %17110 }
0x2311   :  { %10718 = vrot.lane.b32.xlu1 %v17111_v53, %s17228_s17 }
0x2314   :  { %v17113_v58 = vpop.eup %17112 }
0x2315   :  { %v10710_v63 = vadd.f32 1.0, %v17113_v58 }
0x2317   :  { %17114 = vrcp.f32 %v10710_v63 }
0x2321   :  { %v17115_v20 = vpop.eup %17114 }
0x2322   :  { %v10716_v7 = vmul.f32 %v17115_v20, %v10714_v57 }
0x2383   :  { %v10719_v59 = vpop.permute.xlu1 %10718 }
0x2384   :  { %v10721_v42 = vmul.f32 %v17115_v20, %v10719_v59 }
0x2386   :  { %10723 = vrot.lane.b32.xlu0 %v10721_v42, %s17229_s22 }
0x23f8   :  { %v10724_v11 = vpop.permute.xlu0 %10723 }
0x23f9   :  { %v10726_v8 = vadd.f32 %v10724_v11, %v10716_v7 }
0x23fb   :  { %17116 = vtanh.f32 %v10726_v8  ;;  %v10820_v4 = vrot.slane %v10726_v8, 6 }
0x2405   :  { %v17117_v10 = vpop.eup %17116 }
0x2406   :  { %10729 = vrot.lane.b32.xlu1 %v17117_v10, %s17228_s17 }
0x2478   :  { %v10730_v17 = vpop.permute.xlu1 %10729 }
0x2479   :  { %v10732_v41 = vmul.f32 %v17115_v20, %v10730_v17 }
0x247b   :  { %v11261_v37 = vrot.slane %v10732_v41, 2  ;;  %v11277_v1 = vrot.slane %v10732_v41, 3  ;;  %v10734_v38 = vrot.slane %v10732_v41, 4 }
0x247d   :  { %v11289_v25 = vsel %vm20984_vm5, %v11288_v6, %v11261_v37  ;;  %v11300_v39 = vsel %vm20985_vm6, %v11299_v15, %v11277_v1  ;;  %10735 = vrot.lane.b32.xlu0 %v10734_v38, %s17229_s22  ;;  %vm20992_vm5 = vmmov %vm20961_vm3 }
0x247e   :  { %vm20993_vm6 = vmmov %vm20961_vm3 }
0x24ef   :  { %v10736_v61 = vpop.permute.xlu0 %10735 }
0x24f0   :  { %16121 = vmatmul.mubr.msk.f32.vlgmr.msra.gmra.mrb[248].mxu1 %vm20986_vm7, %v10736_v61  ;;  %vm20994_vm7 = vmmov %vm20961_vm3 }
0x24f1   :  { %16463 = vmatpush3.bf16.msra.mxu1 %v20158_v32  ;;  %16142 = vmatprep.mubr.msk.f32.mxu1 %vm17231_vm13, %v17226_v29 }
0x24f2   :  { %16464 = vmatprep.subr.bf16.mxu1 %v17230_v3 }
0x24f5   :  { %16466 = vmatpush3.bf16.msra.mxu1 %v20172_v40 }
0x24f6   :  { %16473 = vmatprep.subr.bf16.mxu1 %v17230_v3 }
0x25c3   :  { %v10805_v5 = vpop.f32.mrb[248].mxu1 }
0x25c4   :  { %v10810_v54 = vrot.slane %v10805_v5, 2  ;;  %v16122_v55 = vpop.f32.mrb[249].mxu1 }
0x25c6   :  { %v10812_v22 = vadd.f32 %v10810_v54, %v20223_v44 }
0x25c8   :  { %17118 = vtanh.f32 %v10812_v22  ;;  %v10813_v21 = vsub.f32 0.0, %v10812_v22 }
0x25ca   :  { %v10814_v46 = vmul.f32 1.442695, %v10813_v21 }
0x25cc   :  { %17120 = vpow2.f32 %v10814_v46 }
0x25d2   :  { %v17119_v9 = vpop.eup %17118 }
0x25d3   :  { %10824 = vrot.lane.b32.xlu1 %v17119_v9, %s17228_s17 }
0x25d6   :  { %v17121_v36 = vpop.eup %17120 }
0x25d7   :  { %v10816_v56 = vadd.f32 1.0, %v17121_v36 }
0x25d9   :  { %17122 = vrcp.f32 %v10816_v56 }
0x25e3   :  { %v17123_v18 = vpop.eup %17122 }
0x25e4   :  { %v10822_v33 = vmul.f32 %v17123_v18, %v10820_v4 }
0x2645   :  { %v10825_v62 = vpop.permute.xlu1 %10824 }
0x2646   :  { %v10827_v43 = vmul.f32 %v17123_v18, %v10825_v62 }
0x2648   :  { %10829 = vrot.lane.b32.xlu0 %v10827_v43, %s17229_s22 }
0x26ba   :  { %v10830_v13 = vpop.permute.xlu0 %10829 }
0x26bb   :  { %v10832_v31 = vadd.f32 %v10830_v13, %v10822_v33 }
0x26bd   :  { %17124 = vtanh.f32 %v10832_v31  ;;  %v10923_v38 = vrot.slane %v10832_v31, 6 }
0x26c7   :  { %v17125_v44 = vpop.eup %17124 }
0x26c8   :  { %10835 = vrot.lane.b32.xlu1 %v17125_v44, %s17228_s17 }
0x273a   :  { %v10836_v53 = vpop.permute.xlu1 %10835 }
0x273b   :  { %v10838_v47 = vmul.f32 %v17123_v18, %v10836_v53 }
0x273d   :  { %v11263_v0 = vrot.slane %v10838_v47, 3  ;;  %v11279_v58 = vrot.slane %v10838_v47, 4  ;;  %v10840_v63 = vrot.slane %v10838_v47, 6 }
0x273f   :  { %v11291_v20 = vsel %vm11290_vm8, %v11289_v25, %v11263_v0  ;;  %v11301_v59 = vsel %vm11290_vm8, %v11300_v39, %v11279_v58  ;;  %10841 = vrot.lane.b32.xlu0 %v10840_v63, %s17229_s22  ;;  %vm20995_vm8 = vmmov %vm20961_vm3 }
0x27b1   :  { %v10842_v42 = vpop.permute.xlu0 %10841 }
0x27b2   :  { %16132 = vmatmul.mubr.msk.f32.vlgmr.msra.gmra.mrb[248].mxu0 %vm20987_vm9, %v10842_v42  ;;  %vm11297_vm9 = vcmask 1046528  }
0x27b3   :  { %16469 = vmatpush3.bf16.msra.mxu0 %v20158_v32  ;;  %16153 = vmatprep.mubr.msk.f32.mxu0 %vm17231_vm13, %v17226_v29 }
0x27b4   :  { %16470 = vmatprep.subr.bf16.mxu0 %v17230_v3 }
0x27b7   :  { %16472 = vmatpush3.bf16.msra.mxu0 %v20172_v40 }
0x27b8   :  { %16167 = vmatprep.subr.bf16.mxu0 %v17226_v29 }
0x2885   :  { %v10911_v57 = vpop.f32.mrb[248].mxu0 }
0x2886   :  { %v10915_v7 = vadd.f32 %v10911_v57, %v20221_v16  ;;  %v16133_v11 = vpop.f32.mrb[249].mxu0 }
0x2888   :  { %17126 = vtanh.f32 %v10915_v7  ;;  %v10916_v10 = vsub.f32 0.0, %v10915_v7 }
0x288a   :  { %v10917_v24 = vmul.f32 1.442695, %v10916_v10 }
0x288c   :  { %17128 = vpow2.f32 %v10917_v24 }
0x2892   :  { %v17127_v8 = vpop.eup %17126 }
0x2893   :  { %10927 = vrot.lane.b32.xlu1 %v17127_v8, %s17228_s17 }
0x2896   :  { %v17129_v17 = vpop.eup %17128 }
0x2897   :  { %v10919_v41 = vadd.f32 1.0, %v17129_v17 }
0x2899   :  { %17130 = vrcp.f32 %v10919_v41 }
0x28a3   :  { %v17131_v19 = vpop.eup %17130 }
0x28a4   :  { %v10925_v6 = vmul.f32 %v17131_v19, %v10923_v38 }
0x2905   :  { %v10928_v37 = vpop.permute.xlu1 %10927 }
0x2906   :  { %v10930_v1 = vmul.f32 %v17131_v19, %v10928_v37 }
0x2908   :  { %10932 = vrot.lane.b32.xlu0 %v10930_v1, %s17229_s22 }
0x297a   :  { %v10933_v15 = vpop.permute.xlu0 %10932 }
0x297b   :  { %v10935_v25 = vadd.f32 %v10933_v15, %v10925_v6 }
0x297d   :  { %17132 = vtanh.f32 %v10935_v25  ;;  %v11028_v44 = vrot.slane %v10935_v25, 6 }
0x2987   :  { %v17133_v39 = vpop.eup %17132 }
0x2988   :  { %10938 = vrot.lane.b32.xlu1 %v17133_v39, %s17228_s17 }
0x29fa   :  { %v10939_v61 = vpop.permute.xlu1 %10938 }
0x29fb   :  { %v10941_v5 = vmul.f32 %v17131_v19, %v10939_v61 }
0x29fd   :  { %v11265_v54 = vrot.slane %v10941_v5, 4  ;;  %v11281_v55 = vrot.slane %v10941_v5, 5  ;;  %10943 = vrot.lane.b32.xlu0 %v10941_v5, %s17229_s22 }
0x29ff   :  { %v11292_v22 = vsel %vm818_vm0, %v11291_v20, %v11265_v54  ;;  %v11302_v9 = vsel %vm818_vm0, %v11301_v59, %v11281_v55 }
0x2a6f   :  { %v10944_v21 = vpop.permute.xlu0 %10943 }
0x2a70   :  { %16143 = vmatmul.mubr.msk.f32.vlgmr.msra.gmra.mrb[250].mxu1 %vm20988_vm10, %v10944_v21  ;;  %vm20996_vm10 = vmmov %vm20961_vm3 }
0x2a71   :  { %16475 = vmatpush3.bf16.msra.mxu1 %v20158_v32  ;;  %16164 = vmatprep.mubr.msk.f32.mxu1 %vm17231_vm13, %v17226_v29 }
0x2a72   :  { %16476 = vmatprep.subr.bf16.mxu1 %v17230_v3 }
0x2a75   :  { %16478 = vmatpush3.bf16.msra.mxu1 %v20172_v40 }
0x2a76   :  { %16175 = vmatprep.subr.bf16.mxu1 %v17226_v29 }
0x2b43   :  { %v11013_v46 = vpop.f32.mrb[250].mxu1 }
0x2b44   :  { %v11018_v36 = vrot.slane %v11013_v46, 6  ;;  %v16144_v56 = vpop.f32.mrb[251].mxu1 }
0x2b46   :  { %v11020_v18 = vadd.f32 %v11018_v36, %v20221_v16 }
0x2b48   :  { %17134 = vtanh.f32 %v11020_v18  ;;  %v11021_v43 = vsub.f32 0.0, %v11020_v18 }
0x2b4a   :  { %v11022_v32 = vmul.f32 1.442695, %v11021_v43  ;;  %v10261_v43 = vadd.f32 %v20214_v35, %v19489_v12  ;;  %v10260_v12 = vadd.f32 %v20212_v23, %v19487_v45 }
0x2b4c   :  { %17136 = vpow2.f32 %v11022_v32  ;;  %v10266_v32 = vsel %vm20990_vm15, %v10261_v43, 0.0  ;;  %v10263_v35 = vsel %vm20991_vm4, %v10260_v12, 0.0  ;;  %vm20999_vm15 = vmmov %vm20961_vm3 }
0x2b52   :  { %v17135_v62 = vpop.eup %17134 }
0x2b53   :  { %11032 = vrot.lane.b32.xlu1 %v17135_v62, %s17228_s17 }
0x2b56   :  { %v17137_v4 = vpop.eup %17136 }
0x2b57   :  { %v11024_v33 = vadd.f32 1.0, %v17137_v4 }
0x2b59   :  { %17138 = vrcp.f32 %v11024_v33 }
0x2b63   :  { %v17139_v13 = vpop.eup %17138 }
0x2b64   :  { %v11030_v53 = vmul.f32 %v17139_v13, %v11028_v44 }
0x2bc5   :  { %v11033_v31 = vpop.permute.xlu1 %11032 }
0x2bc6   :  { %v11035_v40 = vmul.f32 %v17139_v13, %v11033_v31 }
0x2bc8   :  { %11037 = vrot.lane.b32.xlu0 %v11035_v40, %s17229_s22 }
0x2c3a   :  { %v11038_v47 = vpop.permute.xlu0 %11037 }
0x2c3b   :  { %v11040_v0 = vadd.f32 %v11038_v47, %v11030_v53 }
0x2c3d   :  { %17140 = vtanh.f32 %v11040_v0  ;;  %v11134_v61 = vrot.slane %v11040_v0, 6 }
0x2c47   :  { %v17141_v58 = vpop.eup %17140 }
0x2c48   :  { %11043 = vrot.lane.b32.xlu1 %v17141_v58, %s17228_s17 }
0x2cba   :  { %v11044_v63 = vpop.permute.xlu1 %11043 }
0x2cbb   :  { %v11046_v20 = vmul.f32 %v17139_v13, %v11044_v63 }
0x2cbd   :  { %v11267_v59 = vrot.slane %v11046_v20, 5  ;;  %v11283_v42 = vrot.slane %v11046_v20, 6  ;;  %v11048_v57 = vrot.slane %v11046_v20, 2 }
0x2cbf   :  { %v11294_v7 = vsel %vm11293_vm11, %v11292_v22, %v11267_v59  ;;  %11049 = vrot.lane.b32.xlu0 %v11048_v57, %s17229_s22  ;;  %v11303_v11 = vsel %vm11293_vm11, %v11302_v9, %v11283_v42  ;;  %vm20997_vm11 = vmmov %vm20961_vm3 }
0x2d31   :  { %v11050_v8 = vpop.permute.xlu0 %11049 }
0x2d32   :  { %16154 = vmatmul.mubr.msk.f32.vlgmr.msra.gmra.mrb[250].mxu0 %vm20989_vm12, %v11050_v8  ;;  %vm20998_vm12 = vmmov %vm20961_vm3 }
0x2d33   :  { %16171 = vmatprep.mubr.msk.bf16.mxu0 %vm17231_vm13, %v17226_v29 }
0x2e05   :  { %v11119_v10 = vpop.f32.mrb[250].mxu0 }
0x2e06   :  { %v11124_v24 = vrot.slane %v11119_v10, 4  ;;  %v16155_v17 = vpop.f32.mrb[251].mxu0 }
0x2e08   :  { %v11126_v41 = vadd.f32 %v11124_v24, %v20221_v16 }
0x2e0a   :  { %17142 = vtanh.f32 %v11126_v41  ;;  %v11127_v37 = vsub.f32 0.0, %v11126_v41 }
0x2e0c   :  { %v11128_v1 = vmul.f32 1.442695, %v11127_v37 }
0x2e0e   :  { %17144 = vpow2.f32 %v11128_v1 }
0x2e14   :  { %v17143_v19 = vpop.eup %17142 }
0x2e15   :  { %11138 = vrot.lane.b32.xlu1 %v17143_v19, %s17228_s17 }
0x2e18   :  { %v17145_v38 = vpop.eup %17144 }
0x2e19   :  { %v11130_v6 = vadd.f32 1.0, %v17145_v38 }
0x2e1b   :  { %17146 = vrcp.f32 %v11130_v6 }
0x2e25   :  { %v17147_v15 = vpop.eup %17146 }
0x2e26   :  { %v11136_v5 = vmul.f32 %v17147_v15, %v11134_v61 }
0x2e87   :  { %v11139_v25 = vpop.permute.xlu1 %11138 }
0x2e88   :  { %v11141_v39 = vmul.f32 %v17147_v15, %v11139_v25 }
0x2e8a   :  { %11143 = vrot.lane.b32.xlu0 %v11141_v39, %s17229_s22 }
0x2efc   :  { %v11144_v54 = vpop.permute.xlu0 %11143 }
0x2efd   :  { %v11146_v55 = vadd.f32 %v11144_v54, %v11136_v5  ;;  %v20345_v54 = vld [vmem:[%s20831_s7 + $0x3] ss:$0 sm:$0xff] }
0x2eff   :  { %17148 = vtanh.f32 %v11146_v55  ;;  %v11240_v19 = vrot.slane %v11146_v55, 6 }
0x2f09   :  { %v17149_v22 = vpop.eup %17148 }
0x2f0a   :  { %11149 = vrot.lane.b32.xlu1 %v17149_v22, %s17228_s17 }
0x2f7c   :  { %v11150_v9 = vpop.permute.xlu1 %11149 }
0x2f7d   :  { %v11152_v21 = vmul.f32 %v17147_v15, %v11150_v9 }
0x2f7f   :  { %v11269_v46 = vrot.slane %v11152_v21, 6  ;;  %v11285_v36 = vrot.slane %v11152_v21, 7  ;;  %v11154_v56 = vrot.slane %v11152_v21, 4 }
0x2f81   :  { %11155 = vrot.lane.b32.xlu0 %v11154_v56, %s17229_s22  ;;  %v20308_v18 = vsel %vm11295_vm14, %v11294_v7, %v11269_v46  ;;  %v20311_v62 = vsel %vm11295_vm14, %v11303_v11, %v11285_v36 }
0x2fa0   :  { %10267 = vadd.xlane.f32.xlu0 %v10266_v32 }
0x2ff3   :  { %v11156_v4 = vpop.permute.xlu0 %11155 }
0x2ff4   :  { %16165 = vmatmul.mubr.msk.f32.vlgmr.msra.gmra.mrb[252].mxu1 %vm20961_vm3, %v11156_v4  ;;  %vm21000_vm3 = vcmask 31744  }
0x2ff5   :  { %16179 = vmatprep.mubr.msk.bf16.mxu1 %vm17231_vm13, %v17226_v29  ;;  %vm21001_vm4 = vmmov %vm21000_vm3 }
0x302d   :  { %v10268_v45 = vpop.xlane.xlu0 %10267 }
0x302e   :  { %v10273_v23 = vmul.f32 0.03125, %v10268_v45 }
0x3030   :  { %v10276_v11 = vsub.f32 %v10261_v43, %v10273_v23 }
0x3032   :  { %v10279_v17 = vmul.f32 %v10276_v11, %v10276_v11 }
0x3034   :  { %v10284_v41 = vsel %vm20994_vm7, %v10279_v17, 0.0  ;;  %vm21003_vm7 = vmmov %vm21000_vm3 }
0x30c7   :  { %v11225_v33 = vpop.f32.mrb[252].mxu1 }
0x30c8   :  { %v11230_v13 = vrot.slane %v11225_v33, 2  ;;  %v16166_v31 = vpop.f32.mrb[253].mxu1 }
0x30ca   :  { %v11232_v40 = vadd.f32 %v11230_v13, %v20221_v16  ;;  %v10262_v16 = vadd.f32 %v20216_v14, %v19522_v34  ;;  %v16968_v34 = vld [vmem:[%s20829_s5 + $0x30] sm:$0xff]   ;;  %v16969_v14 = vld [vmem:[%s20829_s5 + $0x38] sm:$0xff]  }
0x30cb   :  { %16168 = vmatpush3.bf16.msra.mxu0 %v16968_v34 }
0x30cc   :  { %17150 = vtanh.f32 %v11232_v40  ;;  %v11233_v53 = vsub.f32 0.0, %v11232_v40  ;;  %v10269_v42 = vsel %vm20992_vm5, %v10262_v16, 0.0  ;;  %16169 = vmatprep.subr.bf16.mxu0 %v17226_v29 }
0x30ce   :  { %v11234_v47 = vmul.f32 1.442695, %v11233_v53 }
0x30cf   :  { %16170 = vmatpush3.bf16.msra.mxu0 %v16969_v14 }
0x30d0   :  { %17152 = vpow2.f32 %v11234_v47  ;;  %16479 = vmatprep.subr.bf16.mxu0 %v17230_v3  ;;  %v10305_v47 = vrot.slane %v20208_v50, %v17457_v52 }
0x30d6   :  { %v17151_v44 = vpop.eup %17150 }
0x30d7   :  { %11244 = vrot.lane.b32.xlu1 %v17151_v44, %s17228_s17 }
0x30da   :  { %v17153_v0 = vpop.eup %17152 }
0x30db   :  { %v11236_v58 = vadd.f32 1.0, %v17153_v0 }
0x30dd   :  { %17154 = vrcp.f32 %v11236_v58 }
0x30e7   :  { %v17155_v63 = vpop.eup %17154 }
0x30e8   :  { %v11242_v37 = vmul.f32 %v17155_v63, %v11240_v19 }
0x30fb   :  { %10264 = vadd.xlane.f32.xlu1 %v10263_v35 }
0x3149   :  { %v11245_v20 = vpop.permute.xlu1 %11244 }
0x314a   :  { %v11247_v59 = vmul.f32 %v17155_v63, %v11245_v20 }
0x314c   :  { %11249 = vrot.lane.b32.xlu0 %v11247_v59, %s17229_s22 }
0x316b   :  { %10270 = vadd.xlane.f32.xlu0 %v10269_v42 }
0x3188   :  { %v10265_v57 = vpop.xlane.xlu1 %10264 }
0x3189   :  { %v10272_v7 = vmul.f32 0.03125, %v10265_v57 }
0x318b   :  { %v10275_v8 = vsub.f32 %v10260_v12, %v10272_v7 }
0x318d   :  { %v10278_v10 = vmul.f32 %v10275_v8, %v10275_v8 }
0x318f   :  { %v10281_v24 = vsel %vm20993_vm6, %v10278_v10, 0.0  ;;  %vm21002_vm6 = vmmov %vm20992_vm5 }
0x3190   :  { %10282 = vadd.xlane.f32.xlu0 %v10281_v24 }
0x3194   :  { %10285 = vadd.xlane.f32.xlu0 %v10284_v41 }
0x31be   :  { %v11250_v1 = vpop.permute.xlu0 %11249 }
0x31bf   :  { %v11252_v38 = vadd.f32 %v11250_v1, %v11242_v37 }
0x31c1   :  { %17156 = vtanh.f32 %v11252_v38 }
0x31cb   :  { %v17157_v6 = vpop.eup %17156 }
0x31cc   :  { %11255 = vrot.lane.b32.xlu1 %v17157_v6, %s17228_s17 }
0x31d0   :  { %11389 = vrot.lane.b32.xlu1 %v16969_v14, %s17227_s0 }
0x31f8   :  { %v10271_v15 = vpop.xlane.xlu0 %10270 }
0x31f9   :  { %v10274_v25 = vmul.f32 0.03125, %v10271_v15 }
0x31fb   :  { %v10277_v39 = vsub.f32 %v10262_v16, %v10274_v25 }
0x31fd   :  { %v10280_v61 = vmul.f32 %v10277_v39, %v10277_v39 }
0x31ff   :  { %v10287_v5 = vsel %vm20995_vm8, %v10280_v61, 0.0  ;;  %vm21004_vm8 = vmmov %vm21000_vm3 }
0x3200   :  { %10288 = vadd.xlane.f32.xlu0 %v10287_v5 }
0x3216   :  { %11387 = vrot.lane.b32.xlu0 %v16968_v34, %s17227_s0 }
0x321a   :  { %12077 = vrot.lane.b32.xlu0 %v20345_v54, %s17229_s22 }
0x321d   :  { %v10283_v56 = vpop.xlane.xlu0 %10282 }
0x321e   :  { %v10290_v4 = vmul.f32 0.03125, %v10283_v56 }
0x3220   :  { %v10293_v13 = vadd.f32 1e-05, %v10290_v4 }
0x3221   :  { %v10286_v43 = vpop.xlane.xlu0 %10285 }
0x3222   :  { %v10291_v32 = vmul.f32 0.03125, %v10286_v43 }
0x3224   :  { %v10294_v33 = vadd.f32 1e-05, %v10291_v32 }
0x3226   :  { %17158 = vrsqrt.f32 %v10294_v33 }
0x3227   :  { %17160 = vrsqrt.f32 %v10293_v13 }
0x323e   :  { %v11256_v55 = vpop.permute.xlu1 %11255 }
0x323f   :  { %v11258_v22 = vmul.f32 %v17155_v63, %v11256_v55  ;;  %v10312_v63 = vrot.slane %v20208_v50, %v17919_v60 }
0x3241   :  { %v11272_v9 = vrot.slane %v11258_v22, 7  ;;  %v20353_v46 = vsel %vm11297_vm9, %v20311_v62, %v11258_v22  ;;  %v17159_v62 = vpop.eup %17158 }
0x3242   :  { %v17161_v44 = vpop.eup %17160  ;;  %v10300_v35 = vmul.f32 %v17159_v62, %v10276_v11  ;;  %v11390_v53 = vpop.permute.xlu1 %11389 }
0x3243   :  { %v20350_v21 = vsel %vm11297_vm9, %v20308_v18, %v11272_v9  ;;  %v10299_v0 = vmul.f32 %v17161_v44, %v10275_v8  ;;  %vm21005_vm9 = vmmov %vm20992_vm5 }
0x3244   :  { %v11318_v36 = vpack.c.bf16 %v20353_v46, %v20350_v21  ;;  %v10307_v58 = vmul.f32 %v10305_v47, %v10300_v35 }
0x3245   :  { %v10306_v20 = vmul.f32 %v10305_v47, %v10299_v0 }
0x3246   :  { %11326 = vrot.lane.b32.xlu1 %v11318_v36, %s17229_s22  ;;  %v10314_v59 = vadd.f32 %v10312_v63, %v10307_v58 }
0x3247   :  { %v10313_v42 = vadd.f32 %v10312_v63, %v10306_v20 }
0x3248   :  { %v10319_v23 = vrot.slane %v10314_v59, 4 }
0x3249   :  { %v10318_v7 = vrot.slane %v10313_v42, 4 }
0x324a   :  { %11393 = vrot.lane.b32.xlu1 %v20345_v54, %s17227_s0 }
0x324b   :  { %v10320_v10 = vsel %vm818_vm0, %v10318_v7, %v10319_v23 }
0x328d   :  { %v10289_v18 = vpop.xlane.xlu0 %10288 }
0x328e   :  { %v10292_v31 = vmul.f32 0.03125, %v10289_v18 }
0x3290   :  { %v10295_v40 = vadd.f32 1e-05, %v10292_v31 }
0x3291   :  { %v11388_v12 = vpop.permute.xlu0 %11387 }
0x3292   :  { %17162 = vrsqrt.f32 %v10295_v40  ;;  %16176 = vmatpush3.bf16.msra.mxu1 %v11388_v12 }
0x3293   :  { %16177 = vmatprep.subr.bf16.mxu1 %v17226_v29 }
0x3296   :  { %16178 = vmatpush3.bf16.msra.mxu1 %v11390_v53 }
0x3297   :  { %16485 = vmatprep.subr.bf16.mxu1 %v17230_v3 }
0x329c   :  { %v17163_v16 = vpop.eup %17162 }
0x329d   :  { %v10301_v45 = vmul.f32 %v17163_v16, %v10277_v39 }
0x329f   :  { %v10308_v57 = vmul.f32 %v10305_v47, %v10301_v45 }
0x32a1   :  { %v10315_v11 = vadd.f32 %v10312_v63, %v10308_v57 }
0x32a3   :  { %v11386_v24 = vpack.c.bf16 %v10315_v11, %v10320_v10 }
0x32a5   :  { %16180 = vmatmul.mubr.msk.bf16.vlgmr.msra.gmra.mrb[0].mxu1 %vm20996_vm10, %v11386_v24  ;;  %vm21006_vm10 = vmmov %vm20992_vm5 }
0x32a6   :  { %16487 = vmatpush3.bf16.msk.msra.mxu1 %vm17492_vm1, %v17225_v28  ;;  %16202 = vmatprep.mubr.msk.f32.mxu1 %vm17231_vm13, %v17226_v29 }
0x32a7   :  { %16488 = vmatprep.subr.bf16.mxu1 %v17230_v3 }
0x32aa   :  { %16490 = vmatpush3.bf16.msk.msra.mxu1 %vm17496_vm2, %v17225_v28 }
0x32ab   :  { %16210 = vmatprep.subr.mxu1 %v17226_v29 }
0x32b8   :  { %v11327_v50 = vpop.permute.xlu1 %11326 }
0x32b9   :  { %16172 = vmatmul.mubr.msk.bf16.vlgmr.msra.gmra.mrb[252].mxu0 %vm20997_vm11, %v11327_v50  ;;  %vm21007_vm11 = vmmov %vm20992_vm5 }
0x32ba   :  { %16481 = vmatpush3.bf16.msk.msra.mxu0 %vm17492_vm1, %v17225_v28  ;;  %16191 = vmatprep.mubr.msk.f32.mxu0 %vm17231_vm13, %v17226_v29 }
0x32bb   :  { %16482 = vmatprep.subr.bf16.mxu0 %v17230_v3 }
0x32bc   :  { %v11394_v8 = vpop.permute.xlu1 %11393 }
0x32be   :  { %16484 = vmatpush3.bf16.msk.msra.mxu0 %vm17496_vm2, %v17225_v28 }
0x32bf   :  { %16205 = vmatprep.subr.mxu0 %v17226_v29 }
0x3378   :  { %v11433_v17 = vpop.f32.mrb[0].mxu1 }
0x3379   :  { %v11434_v41 = vadd.f32 %v11433_v17, %v11394_v8  ;;  %v16181_v34 = vpop.f32.mrb[1].mxu1 }
0x337a   :  { %v11436_v14 = vpop.f32.mrb[2].mxu1 }
0x337b   :  { %v16182_v19 = vpop.f32.mrb[3].mxu1  ;;  %11672 = vrot.lane.b32.xlu1 %v11434_v41, %s17227_s0  ;;  %v11437_v37 = vadd.f32 %v11436_v14, %v11394_v8 }
0x337f   :  { %11751 = vrot.lane.b32.xlu1 %v11437_v37, %s17227_s0 }
0x338c   :  { %v11377_v1 = vpop.f32.mrb[252].mxu0 }
0x338d   :  { %v11378_v38 = vadd.f32 %v20345_v54, %v11377_v1  ;;  %v16173_v6 = vpop.f32.mrb[253].mxu0 }
0x338e   :  { %v11380_v15 = vpop.f32.mrb[254].mxu0  ;;  %v16971_v6 = vld [vmem:[%s20832_s6 + $0x38] sm:$0xff]  }
0x338f   :  { %v11384_v25 = vmul.f32 0.35355338, %v11378_v38  ;;  %v11381_v39 = vadd.f32 %v20345_v54, %v11380_v15  ;;  %v16174_v61 = vpop.f32.mrb[255].mxu0  ;;  %v16970_v38 = vld [vmem:[%s20832_s6 + $0x30] sm:$0xff]   ;;  %v20456_v15 = vld [vmem:[%s20840_s3] sm:$0xff] }
0x3390   :  { %12136 = vrot.lane.b32.xlu1 %v20456_v15, %s17227_s0 }
0x3391   :  { %v11440_v5 = vmul.f32 %v11434_v41, %v11384_v25  ;;  %v11514_v55 = vmul.f32 %v11437_v37, %v11384_v25  ;;  %v11385_v22 = vmul.f32 0.35355338, %v11381_v39 }
0x3393   :  { %v11756_v9 = vmul.f32 %v11434_v41, %v11385_v22  ;;  %v11830_v36 = vmul.f32 %v11437_v37, %v11385_v22  ;;  %16192 = vmatmul.mubr.msk.f32.vlgmr.msra.gmra.mrb[0].mxu0 %vm20998_vm12, %v11440_v5  ;;  %16203 = vmatmul.mubr.msk.f32.vlgmr.msra.gmra.mrb[254].mxu1 %vm20999_vm15, %v11514_v55  ;;  %vm21008_vm12 = vmmov %vm20992_vm5 }
0x3394   :  { %16206 = vmatpush3.msk.msra.mxu0 %vm818_vm0, %v17519_v30  ;;  %16211 = vmatpush3.msk.msra.mxu1 %vm818_vm0, %v17519_v30  ;;  %vm21009_vm15 = vmmov %vm21000_vm3 }
0x3395   :  { %16207 = vmatprep.mubr.msk.f32.mxu0 %vm17231_vm13, %v17226_v29  ;;  %16212 = vmatprep.mubr.msk.f32.mxu1 %vm17231_vm13, %v17226_v29 }
0x3396   :  { %16491 = vmatprep.subr.bf16.mxu0 %v17230_v3  ;;  %16497 = vmatprep.subr.bf16.mxu1 %v17230_v3 }
0x33ed   :  { %v11673_v47 = vpop.permute.xlu1 %11672 }
0x33f1   :  { %v11752_v0 = vpop.permute.xlu1 %11751 }
0x3466   :  { %v11510_v54 = vpop.f32.mrb[0].mxu0  ;;  %v11584_v56 = vpop.f32.mrb[254].mxu1 }
0x3467   :  { %v11588_v43 = vmax.f32 %v11510_v54, %v11584_v56  ;;  %v16193_v32 = vpop.f32.mrb[1].mxu0  ;;  %v16204_v4 = vpop.f32.mrb[255].mxu1 }
0x3468   :  { %v16972_v32 = vld [vmem:[%s20829_s5 + $0x40] sm:$0xff]  }
0x3469   :  { %v11589_v33 = vsub.f32 %v11510_v54, %v11588_v43  ;;  %v11592_v13 = vsub.f32 %v11584_v56, %v11588_v43  ;;  %v20474_v54 = vld [vmem:[%s20840_s3 + $0x8] sm:$0xff]  ;;  %v12078_v56 = vpop.permute.xlu0 %12077 }
0x346a   :  { %12138 = vrot.lane.b32.xlu0 %v20474_v54, %s17227_s0 }
0x346b   :  { %v11590_v18 = vmul.f32 1.442695, %v11589_v33  ;;  %v11593_v31 = vmul.f32 1.442695, %v11592_v13 }
0x346d   :  { %17164 = vpow2.f32 %v11590_v18  ;;  %v16973_v18 = vld [vmem:[%s20829_s5 + $0x48] sm:$0xff]  }
0x346e   :  { %17166 = vpow2.f32 %v11593_v31 }
0x3477   :  { %v17165_v62 = vpop.eup %17164 }
0x3478   :  { %v17167_v40 = vpop.eup %17166 }
0x3479   :  { %v11595_v44 = vadd.f32 %v17167_v40, %v17165_v62 }
0x347b   :  { %17168 = vrcp.f32 %v11595_v44  ;;  %v20495_v44 = vld [vmem:[%s20840_s3 + $0x18] sm:$0xff] }
0x3485   :  { %v17169_v12 = vpop.eup %17168 }
0x3486   :  { %v11597_v35 = vmul.f32 %v17169_v12, %v17165_v62  ;;  %v11676_v53 = vmul.f32 %v17169_v12, %v17167_v40  ;;  %v20489_v40 = vld [vmem:[%s20840_s3 + $0x10] sm:$0xff]  ;;  %v20502_v12 = vpop.permute.xlu1 %12136 }
0x3488   :  { %16208 = vmatmul.mubr.msk.f32.vlgmr.msra.gmra.mrb[2].mxu0 %vm21000_vm3, %v11597_v35  ;;  %16213 = vmatmul.mubr.msk.f32.vlgmr.msra.gmra.mrb[4].mxu1 %vm21001_vm4, %v11676_v53 }
0x3489   :  { %16493 = vmatpush3.bf16.msk.msra.mxu0 %vm17492_vm1, %v17225_v28  ;;  %16499 = vmatpush3.bf16.msk.msra.mxu1 %vm17492_vm1, %v17225_v28 }
0x348a   :  { %16494 = vmatprep.subr.bf16.mxu0 %v17230_v3  ;;  %16500 = vmatprep.subr.bf16.mxu1 %v17230_v3 }
0x348b   :  { %16223 = vmatprep.mubr.msk.f32.mxu0 %vm17231_vm13, %v17226_v29  ;;  %16234 = vmatprep.mubr.msk.f32.mxu1 %vm17231_vm13, %v17226_v29 }
0x348d   :  { %16496 = vmatpush3.bf16.msk.msra.mxu0 %vm17496_vm2, %v17225_v28  ;;  %16502 = vmatpush3.bf16.msk.msra.mxu1 %vm17496_vm2, %v17225_v28 }
0x348e   :  { %16237 = vmatprep.subr.mxu0 %v17226_v29  ;;  %16242 = vmatprep.subr.mxu1 %v17226_v29 }
0x3490   :  { %16224 = vmatmul.mubr.msk.f32.vlgmr.msra.gmra.mrb[4].mxu0 %vm20992_vm5, %v11756_v9  ;;  %16235 = vmatmul.mubr.msk.f32.vlgmr.msra.gmra.mrb[6].mxu1 %vm21002_vm6, %v11830_v36 }
0x3491   :  { %16238 = vmatpush3.msk.msra.mxu0 %vm818_vm0, %v17519_v30  ;;  %16243 = vmatpush3.msk.msra.mxu1 %vm818_vm0, %v17519_v30 }
0x3492   :  { %16239 = vmatprep.mubr.msk.f32.mxu0 %vm17231_vm13, %v17226_v29  ;;  %16244 = vmatprep.mubr.msk.f32.mxu1 %vm17231_vm13, %v17226_v29 }
0x3493   :  { %16247 = vmatprep.subr.bf16.mxu0 %v17226_v29  ;;  %16255 = vmatprep.subr.bf16.mxu1 %v17226_v29 }
0x34dc   :  { %v20504_v35 = vpop.permute.xlu0 %12138 }
0x355b   :  { %v11667_v58 = vpop.f32.mrb[2].mxu0  ;;  %v11746_v63 = vpop.f32.mrb[4].mxu1 }
0x355c   :  { %v11675_v20 = vmul.f32 %v11673_v47, %v11667_v58  ;;  %v11754_v59 = vmul.f32 %v11752_v0, %v11746_v63  ;;  %v16209_v16 = vpop.f32.mrb[3].mxu0  ;;  %v16214_v42 = vpop.f32.mrb[5].mxu1 }
0x355e   :  { %v11755_v45 = vadd.f32 %v11754_v59, %v11675_v20 }
0x3563   :  { %v11826_v23 = vpop.f32.mrb[4].mxu0  ;;  %v11900_v57 = vpop.f32.mrb[6].mxu1 }
0x3564   :  { %v11904_v7 = vmax.f32 %v11826_v23, %v11900_v57  ;;  %v16225_v11 = vpop.f32.mrb[5].mxu0  ;;  %v16236_v10 = vpop.f32.mrb[7].mxu1 }
0x3566   :  { %v11905_v24 = vsub.f32 %v11826_v23, %v11904_v7  ;;  %v11908_v50 = vsub.f32 %v11900_v57, %v11904_v7  ;;  %v14767_v7 = vld [vmem:[%s20831_s7 + $0x4] ss:$0 sm:$0xff] }
0x3568   :  { %v11906_v8 = vmul.f32 1.442695, %v11905_v24  ;;  %v11909_v17 = vmul.f32 1.442695, %v11908_v50 }
0x356a   :  { %17170 = vpow2.f32 %v11906_v8 }
0x356b   :  { %17172 = vpow2.f32 %v11909_v17 }
0x3574   :  { %v17171_v41 = vpop.eup %17170 }
0x3575   :  { %v17173_v34 = vpop.eup %17172 }
0x3576   :  { %v11911_v14 = vadd.f32 %v17173_v34, %v17171_v41 }
0x3578   :  { %17174 = vrcp.f32 %v11911_v14 }
0x3582   :  { %v17175_v19 = vpop.eup %17174 }
0x3583   :  { %v11913_v37 = vmul.f32 %v17175_v19, %v17171_v41  ;;  %v11988_v1 = vmul.f32 %v17175_v19, %v17173_v34 }
0x3585   :  { %16240 = vmatmul.mubr.msk.f32.vlgmr.msra.gmra.mrb[6].mxu0 %vm21003_vm7, %v11913_v37  ;;  %16245 = vmatmul.mubr.msk.f32.vlgmr.msra.gmra.mrb[8].mxu1 %vm21004_vm8, %v11988_v1 }
0x3586   :  { %16251 = vmatprep.mubr.msk.bf16.mxu0 %vm17231_vm13, %v17226_v29  ;;  %16259 = vmatprep.mubr.msk.bf16.mxu1 %vm17231_vm13, %v17226_v29 }
0x3587   :  { %16248 = vmatpush3.bf16.msra.mxu0 %v16970_v38  ;;  %16256 = vmatpush3.bf16.msra.mxu1 %v16972_v32 }
0x3588   :  { %16249 = vmatprep.subr.bf16.mxu0 %v17226_v29  ;;  %16257 = vmatprep.subr.bf16.mxu1 %v17226_v29 }
0x358b   :  { %16250 = vmatpush3.bf16.msra.mxu0 %v16971_v6  ;;  %16258 = vmatpush3.bf16.msra.mxu1 %v16973_v18 }
0x358c   :  { %16503 = vmatprep.subr.bf16.mxu0 %v17230_v3  ;;  %16509 = vmatprep.subr.bf16.mxu1 %v17230_v3 }
0x3658   :  { %v11983_v25 = vpop.f32.mrb[6].mxu0  ;;  %v12058_v39 = vpop.f32.mrb[8].mxu1 }
0x3659   :  { %v11987_v61 = vmul.f32 %v11983_v25, %v11673_v47  ;;  %v12062_v5 = vmul.f32 %v12058_v39, %v11752_v0  ;;  %v16241_v55 = vpop.f32.mrb[7].mxu0  ;;  %v16246_v22 = vpop.f32.mrb[9].mxu1 }
0x365b   :  { %v12063_v9 = vadd.f32 %v12062_v5, %v11987_v61 }
0x365d   :  { %v12064_v36 = vpack.c.bf16 %v12063_v9, %v11755_v45 }
0x365f   :  { %16252 = vmatmul.mubr.msk.bf16.vlgmr.msra.gmra.mrb[8].mxu0 %vm21005_vm9, %v12064_v36 }
0x3660   :  { %16505 = vmatpush3.bf16.msk.msra.mxu0 %vm17492_vm1, %v17225_v28  ;;  %16271 = vmatprep.mubr.msk.f32.mxu0 %vm17231_vm13, %v17226_v29 }
0x3661   :  { %16506 = vmatprep.subr.bf16.mxu0 %v17230_v3 }
0x3664   :  { %16508 = vmatpush3.bf16.msk.msra.mxu0 %vm17496_vm2, %v17225_v28 }
0x3665   :  { %16285 = vmatprep.subr.mxu0 %v17226_v29 }
0x3732   :  { %v12117_v43 = vpop.f32.mrb[8].mxu0 }
0x3733   :  { %v12118_v4 = vadd.f32 %v12117_v43, %v12078_v56  ;;  %v16253_v33 = vpop.f32.mrb[9].mxu0 }
0x3734   :  { %v12120_v13 = vpop.f32.mrb[10].mxu0 }
0x3735   :  { %v12121_v31 = vadd.f32 %v12120_v13, %v12078_v56  ;;  %12126 = vrot.lane.b32.xlu1 %v12118_v4, %s17227_s0  ;;  %v16254_v62 = vpop.f32.mrb[11].mxu0 }
0x3737   :  { %12128 = vrot.lane.b32.xlu0 %v12121_v31, %s17227_s0 }
0x3739   :  { %12146 = vrot.lane.b32.xlu1 %v20489_v40, %s17227_s0 }
0x373b   :  { %12148 = vrot.lane.b32.xlu0 %v20495_v44, %s17227_s0 }
0x37a7   :  { %v12127_v53 = vpop.permute.xlu1 %12126 }
0x37a8   :  { %v12132_v47 = vadd.f32 %v12127_v53, %v20350_v21 }
0x37a9   :  { %v12129_v0 = vpop.permute.xlu0 %12128 }
0x37aa   :  { %v12142_v58 = vmul.f32 %v20502_v12, %v12132_v47  ;;  %v12133_v63 = vadd.f32 %v12129_v0, %v20353_v46 }
0x37ab   :  { %v20509_v20 = vpop.permute.xlu1 %12146 }
0x37ac   :  { %v12143_v59 = vmul.f32 %v20504_v35, %v12133_v63  ;;  %v20515_v42 = vadd.f32 %v20509_v20, %v12142_v58 }
0x37ad   :  { %v20512_v16 = vpop.permute.xlu0 %12148 }
0x37ae   :  { %v20518_v45 = vadd.f32 %v20512_v16, %v12143_v59 }
0x37b0   :  { %v12166_v23 = vpack.c.bf16 %v20518_v45, %v20515_v42 }
0x37b2   :  { %12174 = vrot.lane.b32.xlu1 %v12166_v23, %s17229_s22 }
0x3824   :  { %v12175_v57 = vpop.permute.xlu1 %12174 }
0x3825   :  { %16260 = vmatmul.mubr.msk.bf16.vlgmr.msra.gmra.mrb[12].mxu1 %vm21006_vm10, %v12175_v57  ;;  %vm13385_vm10 = vcmask 7168  }
0x3826   :  { %16511 = vmatpush3.bf16.msk.msra.mxu1 %vm17492_vm1, %v17225_v28  ;;  %16282 = vmatprep.mubr.msk.f32.mxu1 %vm17231_vm13, %v17226_v29 }
0x3827   :  { %16512 = vmatprep.subr.bf16.mxu1 %v17230_v3 }
0x382a   :  { %16514 = vmatpush3.bf16.msk.msra.mxu1 %vm17496_vm2, %v17225_v28 }
0x382b   :  { %16290 = vmatprep.subr.mxu1 %v17226_v29 }
0x38f8   :  { %v12225_v11 = vpop.f32.mrb[12].mxu1 }
0x38f9   :  { %v12226_v10 = vadd.f32 %v14767_v7, %v12225_v11  ;;  %v16261_v24 = vpop.f32.mrb[13].mxu1 }
0x38fa   :  { %v12228_v50 = vpop.f32.mrb[14].mxu1 }
0x38fb   :  { %v12229_v8 = vadd.f32 %v14767_v7, %v12228_v50  ;;  %12235 = vrot.lane.b32.xlu0 %v12226_v10, %s17227_s0  ;;  %v16262_v17 = vpop.f32.mrb[15].mxu1  ;;  %v12232_v41 = vmul.f32 0.35355338, %v12226_v10 }
0x38fd   :  { %12313 = vrot.lane.b32.xlu1 %v12229_v8, %s17227_s0  ;;  %v12233_v34 = vmul.f32 0.35355338, %v12229_v8 }
0x38ff   :  { %12473 = vrot.lane.b32.xlu0 %v12226_v10, %s17228_s17 }
0x3901   :  { %12551 = vrot.lane.b32.xlu1 %v12229_v8, %s17228_s17 }
0x3903   :  { %12877 = vrot.lane.b32.xlu0 %v14767_v7, %s17229_s22 }
0x396d   :  { %v12236_v14 = vpop.permute.xlu0 %12235 }
0x396e   :  { %v12238_v19 = vmul.f32 %v12236_v14, %v12232_v41  ;;  %v12556_v37 = vmul.f32 %v12236_v14, %v12233_v34  ;;  %v16974_v14 = vld [vmem:[%s20832_s6 + $0x40] sm:$0xff]  }
0x396f   :  { %v12314_v1 = vpop.permute.xlu1 %12313 }
0x3970   :  { %v12316_v38 = vmul.f32 %v12314_v1, %v12232_v41  ;;  %v12630_v6 = vmul.f32 %v12314_v1, %v12233_v34  ;;  %16272 = vmatmul.mubr.msk.f32.vlgmr.msra.gmra.mrb[12].mxu0 %vm21007_vm11, %v12238_v19  ;;  %v16975_v19 = vld [vmem:[%s20832_s6 + $0x48] sm:$0xff]   ;;  %vm13388_vm11 = vcmask 15368  }
0x3971   :  { %16286 = vmatpush3.msk.msra.mxu0 %vm818_vm0, %v17519_v30  ;;  %16287 = vmatprep.mubr.msk.f32.mxu0 %vm17231_vm13, %v17226_v29  ;;  %v12474_v26 = vpop.permute.xlu0 %12473 }
0x3972   :  { %16283 = vmatmul.mubr.msk.f32.vlgmr.msra.gmra.mrb[10].mxu1 %vm21008_vm12, %v12316_v38  ;;  %16515 = vmatprep.subr.bf16.mxu0 %v17230_v3 }
0x3973   :  { %16291 = vmatpush3.msk.msra.mxu1 %vm818_vm0, %v17519_v30  ;;  %16292 = vmatprep.mubr.msk.f32.mxu1 %vm17231_vm13, %v17226_v29  ;;  %v12552_v27 = vpop.permute.xlu1 %12551 }
0x3974   :  { %16521 = vmatprep.subr.bf16.mxu1 %v17230_v3 }
0x3a43   :  { %v12308_v25 = vpop.f32.mrb[12].mxu0 }
0x3a44   :  { %v16273_v39 = vpop.f32.mrb[13].mxu0 }
0x3a45   :  { %v12386_v61 = vpop.f32.mrb[10].mxu1 }
0x3a46   :  { %v12390_v5 = vmax.f32 %v12308_v25, %v12386_v61  ;;  %v16284_v55 = vpop.f32.mrb[11].mxu1 }
0x3a47   :  { %v12878_v55 = vpop.permute.xlu0 %12877 }
0x3a48   :  { %v12391_v22 = vsub.f32 %v12308_v25, %v12390_v5  ;;  %v12394_v9 = vsub.f32 %v12386_v61, %v12390_v5 }
0x3a4a   :  { %v12392_v36 = vmul.f32 1.442695, %v12391_v22  ;;  %v12395_v56 = vmul.f32 1.442695, %v12394_v9 }
0x3a4c   :  { %17176 = vpow2.f32 %v12392_v36 }
0x3a4d   :  { %17178 = vpow2.f32 %v12395_v56 }
0x3a56   :  { %v17177_v43 = vpop.eup %17176 }
0x3a57   :  { %v17179_v32 = vpop.eup %17178 }
0x3a58   :  { %v12397_v4 = vadd.f32 %v17179_v32, %v17177_v43 }
0x3a5a   :  { %17180 = vrcp.f32 %v12397_v4  ;;  %v17193_v4 = vld [vmem:[%s20827_s13 + $0x48] sm:$0xff]  }
0x3a64   :  { %v17181_v33 = vpop.eup %17180 }
0x3a65   :  { %v12399_v13 = vmul.f32 %v17181_v33, %v17177_v43  ;;  %v12477_v18 = vmul.f32 %v17181_v33, %v17179_v32  ;;  %v17191_v32 = vld [vmem:[%s20827_s13 + $0x40] sm:$0xff]   ;;  %v17194_v33 = vld [vmem:[%s20827_s13 + $0xc8] sm:$0xff]  }
0x3a67   :  { %16288 = vmatmul.mubr.msk.f32.vlgmr.msra.gmra.mrb[14].mxu0 %vm21009_vm15, %v12399_v13  ;;  %16293 = vmatmul.mubr.msk.f32.vlgmr.msra.gmra.mrb[16].mxu1 %vm21000_vm3, %v12477_v18  ;;  %v17195_v13 = vld [vmem:[%s20827_s13 + $0x50] sm:$0xff]  }
0x3a68   :  { %16517 = vmatpush3.bf16.msk.msra.mxu0 %vm17492_vm1, %v17225_v28  ;;  %16523 = vmatpush3.bf16.msk.msra.mxu1 %vm17492_vm1, %v17225_v28  ;;  %vm21010_vm1 = vmmov %vm20992_vm5  ;;  %v17196_v18 = vld [vmem:[%s20827_s13 + $0xd0] sm:$0xff]  }
0x3a69   :  { %16518 = vmatprep.subr.bf16.mxu0 %v17230_v3  ;;  %16524 = vmatprep.subr.bf16.mxu1 %v17230_v3  ;;  %vm21011_vm4 = vmmov %vm21010_vm1 }
0x3a6a   :  { %16303 = vmatprep.mubr.msk.f32.mxu0 %vm17231_vm13, %v17226_v29  ;;  %16314 = vmatprep.mubr.msk.f32.mxu1 %vm17231_vm13, %v17226_v29  ;;  %vm21016_vm5 = vmmov %vm21010_vm1 }
0x3a6b   :  { %vm21017_vm6 = vmmov %vm21010_vm1 }
0x3a6c   :  { %16520 = vmatpush3.bf16.msk.msra.mxu0 %vm17496_vm2, %v17225_v28  ;;  %16526 = vmatpush3.bf16.msk.msra.mxu1 %vm17496_vm2, %v17225_v28  ;;  %vm21012_vm2 = vmmov %vm21000_vm3 }
0x3a6d   :  { %16317 = vmatprep.subr.mxu0 %v17226_v29  ;;  %16322 = vmatprep.subr.mxu1 %v17226_v29  ;;  %vm21018_vm7 = vmmov %vm21010_vm1 }
0x3a6e   :  { %vm21019_vm8 = vmmov %vm21010_vm1 }
0x3a6f   :  { %16304 = vmatmul.mubr.msk.f32.vlgmr.msra.gmra.mrb[16].mxu0 %vm21010_vm1, %v12556_v37  ;;  %16315 = vmatmul.mubr.msk.f32.vlgmr.msra.gmra.mrb[18].mxu1 %vm21011_vm4, %v12630_v6  ;;  %vm21020_vm9 = vmmov %vm21010_vm1 }
0x3a70   :  { %16318 = vmatpush3.msk.msra.mxu0 %vm818_vm0, %v17519_v30  ;;  %16323 = vmatpush3.msk.msra.mxu1 %vm818_vm0, %v17519_v30  ;;  %vm21013_vm0 = vmmov %vm21012_vm2 }
0x3a71   :  { %16319 = vmatprep.mubr.msk.f32.mxu0 %vm17231_vm13, %v17226_v29  ;;  %16324 = vmatprep.mubr.msk.f32.mxu1 %vm17231_vm13, %v17226_v29 }
0x3a72   :  { %16327 = vmatprep.subr.bf16.mxu0 %v17226_v29 }
0x3b3a   :  { %v12469_v28 = vpop.f32.mrb[14].mxu0  ;;  %v12547_v3 = vpop.f32.mrb[16].mxu1 }
0x3b3b   :  { %v12476_v31 = vmul.f32 %v12474_v26, %v12469_v28  ;;  %v12554_v62 = vmul.f32 %v12552_v27, %v12547_v3  ;;  %v16289_v53 = vpop.f32.mrb[15].mxu0  ;;  %v16294_v47 = vpop.f32.mrb[17].mxu1  ;;  %v17199_v28 = vld [vmem:[%s20827_s13 + $0x60] sm:$0xff]  }
0x3b3c   :  { %v17200_v3 = vld [vmem:[%s20827_s13 + $0xe0] sm:$0xff]   ;;  %v17203_v53 = vld [vmem:[%s20827_s13 + $0x70] sm:$0xff]  }
0x3b3d   :  { %v12555_v0 = vadd.f32 %v12554_v62, %v12476_v31  ;;  %v17201_v31 = vld [vmem:[%s20827_s13 + $0x68] sm:$0xff]   ;;  %v17204_v47 = vld [vmem:[%s20827_s13 + $0xf0] sm:$0xff]  }
0x3b3e   :  { %v17202_v62 = vld [vmem:[%s20827_s13 + $0xe8] sm:$0xff]  }
0x3b42   :  { %v12626_v58 = vpop.f32.mrb[16].mxu0  ;;  %v12700_v63 = vpop.f32.mrb[18].mxu1 }
0x3b43   :  { %v12704_v30 = vmax.f32 %v12626_v58, %v12700_v63  ;;  %v16305_v59 = vpop.f32.mrb[17].mxu0  ;;  %v16316_v23 = vpop.f32.mrb[19].mxu1 }
0x3b44   :  { %v16976_v59 = vld [vmem:[%s20847_s23 + $0x4] ss:$16 sps:$4 sm:$0xfc]  }
0x3b45   :  { %v12705_v57 = vsub.f32 %v12626_v58, %v12704_v30  ;;  %v12708_v7 = vsub.f32 %v12700_v63, %v12704_v30  ;;  %v17206_v58 = vld [vmem:[%s20827_s13 + $0xf8] sm:$0xff]   ;;  %v20670_v63 = vld [vmem:[%s20830_s15] sm:$0x1f] }
0x3b46   :  { %v13352_v30 = vrot.slane %v20670_v63, %v17457_v52  ;;  %v16978_v23 = vld [vmem:[%s20847_s23 + $0x24] ss:$16 sps:$4 sm:$0xff]  }
0x3b47   :  { %v12706_v11 = vmul.f32 1.442695, %v12705_v57  ;;  %v12709_v10 = vmul.f32 1.442695, %v12708_v7  ;;  %v16982_v7 = vld [vmem:[%s20847_s23 + $0x2c] ss:$16 sps:$4 sm:$0xff]  }
0x3b48   :  { %v16980_v57 = vld [vmem:[%s20847_s23 + $0xc] ss:$16 sps:$4 sm:$0xfc]  }
0x3b49   :  { %17182 = vpow2.f32 %v12706_v11  ;;  %v13009_v11 = vrot.slane %v16976_v59, 2  ;;  %v17211_v59 = vld [vmem:[%s20827_s13 + $0x88] sm:$0xff]  }
0x3b4a   :  { %17184 = vpow2.f32 %v12709_v10  ;;  %v13010_v10 = vrot.slane %v16978_v23, 2 }
0x3b53   :  { %v17183_v24 = vpop.eup %17182 }
0x3b54   :  { %v17185_v50 = vpop.eup %17184 }
0x3b55   :  { %v12711_v8 = vadd.f32 %v17185_v50, %v17183_v24 }
0x3b57   :  { %17186 = vrcp.f32 %v12711_v8  ;;  %v13016_v8 = vrot.slane %v16982_v7, 2 }
0x3b61   :  { %v17187_v17 = vpop.eup %17186 }
0x3b62   :  { %v12713_v41 = vmul.f32 %v17187_v17, %v17183_v24  ;;  %v12788_v34 = vmul.f32 %v17187_v17, %v17185_v50  ;;  %v16984_v24 = vld [vmem:[%s20847_s23] ss:$16 sps:$4 sm:$0xfc]   ;;  %v13015_v50 = vrot.slane %v16980_v57, 2 }
0x3b63   :  { %v16985_v17 = vld [vmem:[%s20847_s23 + $0x20] ss:$16 sps:$4 sm:$0xff]  }
0x3b64   :  { %16320 = vmatmul.mubr.msk.f32.vlgmr.msra.gmra.mrb[18].mxu0 %vm21012_vm2, %v12713_v41  ;;  %16325 = vmatmul.mubr.msk.f32.vlgmr.msra.gmra.mrb[20].mxu1 %vm21013_vm0, %v12788_v34  ;;  %v16987_v41 = vld [vmem:[%s20847_s23 + $0x28] ss:$16 sps:$4 sm:$0xff]   ;;  %v13011_v34 = vsel %vm11295_vm14, %v13009_v11, %v13010_v10  ;;  %v17212_v57 = vld [vmem:[%s20827_s13 + $0x10] sm:$0xff]  }
0x3b65   :  { %16331 = vmatprep.mubr.msk.bf16.mxu0 %vm17231_vm13, %v17226_v29  ;;  %13069 = vmatprep.mubr.bf16.mxu1 %v17224_v2  ;;  %vm21014_vm13 = vmmov %vm21010_vm1  ;;  %v17213_v11 = vld [vmem:[%s20827_s13 + $0x90] sm:$0xff]  }
0x3b66   :  { %16328 = vmatpush3.bf16.msra.mxu0 %v16974_v14  ;;  %v13006_v14 = vrot.slane %v16984_v24, 2  ;;  %13037 = vmatprep.subr.bf16.mxu1 %v13011_v34  ;;  %v17214_v24 = vld [vmem:[%s20827_s13 + $0x18] sm:$0xff]  }
0x3b67   :  { %16329 = vmatprep.subr.bf16.mxu0 %v17226_v29 }
0x3b6a   :  { %16330 = vmatpush3.bf16.msra.mxu0 %v16975_v19  ;;  %v16986_v19 = vld [vmem:[%s20847_s23 + $0x8] ss:$16 sps:$4 sm:$0xfc]  }
0x3c37   :  { %v12783_v37 = vpop.f32.mrb[18].mxu0  ;;  %v12858_v1 = vpop.f32.mrb[20].mxu1 }
0x3c38   :  { %v12787_v38 = vmul.f32 %v12783_v37, %v12474_v26  ;;  %v12862_v6 = vmul.f32 %v12858_v1, %v12552_v27  ;;  %v16321_v25 = vpop.f32.mrb[19].mxu0  ;;  %v16326_v39 = vpop.f32.mrb[21].mxu1  ;;  %v17197_v26 = vld [vmem:[%s20827_s13 + $0x58] sm:$0xff]   ;;  %v100_v37 = vld [vmem:[%s20847_s23 + $0x40] sm:$0x33]  ;;  %v13017_v1 = vsel %vm11295_vm14, %v13015_v50, %v13016_v8 }
0x3c39   :  { %v17198_v27 = vld [vmem:[%s20827_s13 + $0xd8] sm:$0xff]   ;;  %v14811_v25 = vcombine.high %v100_v37, %v100_v37  ;;  %v101_v39 = vld [vmem:[%s20847_s23 + $0x48] sm:$0x33]  ;;  %13080 = vmatprep.subr.bf16.mxu0 %v13017_v1 }
0x3c3a   :  { %v12863_v61 = vadd.f32 %v12862_v6, %v12787_v38  ;;  %v13007_v38 = vrot.slane %v16985_v17, 2  ;;  %v13013_v6 = vrot.slane %v16987_v41, 2  ;;  %v17216_v41 = vld [vmem:[%s20827_s13 + $0x20] sm:$0xff]  }
0x3c3c   :  { %v12864_v5 = vpack.c.bf16 %v12863_v61, %v12555_v0  ;;  %v17205_v0 = vld [vmem:[%s20827_s13 + $0x78] sm:$0xff]   ;;  %v13012_v61 = vrot.slane %v16986_v19, 2 }
0x3c3e   :  { %16332 = vmatmul.mubr.msk.bf16.vlgmr.msra.gmra.mrb[20].mxu0 %vm21014_vm13, %v12864_v5  ;;  %v14813_v5 = vcombine.high %v101_v39, %v101_v39 }
0x3c3f   :  { %13112 = vmatprep.mubr.bf16.mxu0 %v17224_v2  ;;  %v17192_v2 = vld [vmem:[%s20827_s13 + $0xc0] sm:$0xff]  }
0x3d11   :  { %v12917_v22 = vpop.f32.mrb[20].mxu0 }
0x3d12   :  { %v12918_v29 = vadd.f32 %v12917_v22, %v12878_v55  ;;  %v16333_v9 = vpop.f32.mrb[21].mxu0  ;;  %v14812_v22 = vcombine.low %v101_v39, %v101_v39 }
0x3d13   :  { %v12920_v36 = vpop.f32.mrb[22].mxu0  ;;  %v13020_v9 = vrot.slane %v14811_v25, 2  ;;  %v17220_v25 = vld [vmem:[%s20827_s13 + $0x30] sm:$0xff]  }
0x3d14   :  { %v12921_v56 = vadd.f32 %v12920_v36, %v12878_v55  ;;  %12926 = vrot.lane.b32.xlu1 %v12918_v29, %s17227_s0  ;;  %v16334_v43 = vpop.f32.mrb[23].mxu0  ;;  %v14810_v55 = vcombine.low %v100_v37, %v100_v37  ;;  %v13008_v29 = vsel %vm11295_vm14, %v13006_v14, %v13007_v38  ;;  %v13014_v36 = vsel %vm11295_vm14, %v13012_v61, %v13013_v6  ;;  %v17217_v14 = vld [vmem:[%s20827_s13 + $0xa0] sm:$0xff]   ;;  %v17218_v37 = vld [vmem:[%s20827_s13 + $0x28] sm:$0xff]   ;;  %v17221_v61 = vld [vmem:[%s20827_s13 + $0xb0] sm:$0xff]  }
0x3d15   :  { %13038 = vmatpush1.bf16.msra.mxu1 %v13008_v29  ;;  %13081 = vmatpush1.bf16.msra.mxu0 %v13014_v36  ;;  %v17223_v29 = vld [vmem:[%s20827_s13 + $0xb8] sm:$0xff]  }
0x3d16   :  { %12928 = vrot.lane.b32.xlu0 %v12921_v56, %s17227_s0  ;;  %v13024_v56 = vrot.slane %v14813_v5, 2  ;;  %v13018_v43 = vrot.slane %v14810_v55, 2 }
0x3d1a   :  { %13155 = vrot.lane.b32.xlu0 %v17191_v32, %s17227_s0  ;;  %v13022_v32 = vrot.slane %v14812_v22, 2  ;;  %v17222_v22 = vld [vmem:[%s20827_s13 + $0x38] sm:$0xff]  }
0x3d1e   :  { %13187 = vrot.lane.b32.xlu0 %v17192_v2, %s17227_s0  ;;  %v13021_v2 = vsel %vm11295_vm14, %v13010_v10, %v13020_v9 }
0x3d1f   :  { %13039 = vmatprep.subr.bf16.mxu1 %v13021_v2 }
0x3d22   :  { %13157 = vrot.lane.b32.xlu0 %v17193_v4, %s17227_s0  ;;  %v13025_v4 = vsel %vm11295_vm14, %v13016_v8, %v13024_v56  ;;  %v17215_v8 = vld [vmem:[%s20827_s13 + $0x98] sm:$0xff]  }
0x3d23   :  { %13082 = vmatprep.subr.bf16.mxu0 %v13025_v4 }
0x3d26   :  { %13189 = vrot.lane.b32.xlu0 %v17194_v33, %s17227_s0  ;;  %v13019_v33 = vsel %vm11295_vm14, %v13007_v38, %v13018_v43  ;;  %v17219_v38 = vld [vmem:[%s20827_s13 + $0xa8] sm:$0xff]  }
0x3d27   :  { %13040 = vmatpush1.bf16.msra.mxu1 %v13019_v33 }
0x3d2a   :  { %13159 = vrot.lane.b32.xlu0 %v17195_v13, %s17227_s0  ;;  %v13023_v13 = vsel %vm11295_vm14, %v13013_v6, %v13022_v32  ;;  %vm21015_vm14 = vmmov %vm21010_vm1 }
0x3d2b   :  { %13083 = vmatpush1.bf16.msra.mxu0 %v13023_v13 }
0x3d2e   :  { %13191 = vrot.lane.b32.xlu0 %v17196_v18, %s17227_s0 }
0x3d32   :  { %13161 = vrot.lane.b32.xlu0 %v17197_v26, %s17227_s0 }
0x3d36   :  { %13193 = vrot.lane.b32.xlu0 %v17198_v27, %s17227_s0 }
0x3d3a   :  { %13163 = vrot.lane.b32.xlu0 %v17199_v28, %s17227_s0 }
0x3d3e   :  { %13195 = vrot.lane.b32.xlu0 %v17200_v3, %s17227_s0 }
0x3d42   :  { %13165 = vrot.lane.b32.xlu0 %v17201_v31, %s17227_s0 }
0x3d46   :  { %13197 = vrot.lane.b32.xlu0 %v17202_v62, %s17227_s0 }
0x3d4a   :  { %13167 = vrot.lane.b32.xlu0 %v17203_v53, %s17227_s0 }
0x3d4e   :  { %13199 = vrot.lane.b32.xlu0 %v17204_v47, %s17227_s0 }
0x3d52   :  { %13169 = vrot.lane.b32.xlu0 %v17205_v0, %s17227_s0 }
0x3d56   :  { %13201 = vrot.lane.b32.xlu0 %v17206_v58, %s17227_s0 }
0x3d5a   :  { %13354 = vrot.lane.b32.xlu0 %v13352_v30, %s17227_s0 }
0x3d86   :  { %v12927_v18 = vpop.permute.xlu1 %12926 }
0x3d87   :  { %v12932_v26 = vadd.f32 %v12927_v18, %v20515_v42 }
0x3d88   :  { %v12929_v27 = vpop.permute.xlu0 %12928 }
0x3d89   :  { %v12934_v28 = vmul.f32 %v12932_v26, %v20502_v12  ;;  %v12933_v3 = vadd.f32 %v12929_v27, %v20518_v45  ;;  %v17208_v12 = vld [vmem:[%s20827_s13] sm:$0xff]  }
0x3d8b   :  { %v12935_v31 = vmul.f32 %v12933_v3, %v20504_v35  ;;  %v12936_v53 = vadd.f32 %v12934_v28, %v20509_v20  ;;  %v17209_v35 = vld [vmem:[%s20827_s13 + $0x80] sm:$0xff]  }
0x3d8c   :  { %v13156_v62 = vpop.permute.xlu0 %13155 }
0x3d8d   :  { %v12937_v47 = vadd.f32 %v12935_v31, %v20512_v16  ;;  %15790 = vmatprep.subr.bf16.mxu1 %v13156_v62  ;;  %v17210_v16 = vld [vmem:[%s20827_s13 + $0x8] sm:$0xff]  }
0x3d8f   :  { %v12938_v0 = vpack.c.bf16 %v12937_v47, %v12936_v53 }
0x3d90   :  { %v13188_v58 = vpop.permute.xlu0 %13187 }
0x3d91   :  { %12961 = vrot.lane.b32.xlu1 %v12938_v0, %s17229_s22  ;;  %15812 = vmatprep.subr.bf16.mxu0 %v13188_v58 }
0x3d94   :  { %v13158_v30 = vpop.permute.xlu0 %13157 }
0x3d95   :  { %13139 = vrot.lane.b32.xlu1 %v17208_v12, %s17227_s0 }
0x3d98   :  { %v13190_v42 = vpop.permute.xlu0 %13189 }
0x3d99   :  { %13171 = vrot.lane.b32.xlu1 %v17209_v35, %s17227_s0 }
0x3d9c   :  { %v13160_v20 = vpop.permute.xlu0 %13159 }
0x3d9d   :  { %13141 = vrot.lane.b32.xlu1 %v17210_v16, %s17227_s0 }
0x3da0   :  { %v13192_v45 = vpop.permute.xlu0 %13191 }
0x3da1   :  { %13173 = vrot.lane.b32.xlu1 %v17211_v59, %s17227_s0 }
0x3da4   :  { %v13162_v23 = vpop.permute.xlu0 %13161 }
0x3da5   :  { %13143 = vrot.lane.b32.xlu1 %v17212_v57, %s17227_s0 }
0x3da8   :  { %v13194_v7 = vpop.permute.xlu0 %13193 }
0x3da9   :  { %13175 = vrot.lane.b32.xlu1 %v17213_v11, %s17227_s0 }
0x3dac   :  { %v13164_v10 = vpop.permute.xlu0 %13163 }
0x3dad   :  { %13145 = vrot.lane.b32.xlu1 %v17214_v24, %s17227_s0 }
0x3db0   :  { %v13196_v50 = vpop.permute.xlu0 %13195 }
0x3db1   :  { %13177 = vrot.lane.b32.xlu1 %v17215_v8, %s17227_s0 }
0x3db4   :  { %v13166_v17 = vpop.permute.xlu0 %13165 }
0x3db5   :  { %13147 = vrot.lane.b32.xlu1 %v17216_v41, %s17227_s0 }
0x3db8   :  { %v13198_v34 = vpop.permute.xlu0 %13197 }
0x3db9   :  { %13179 = vrot.lane.b32.xlu1 %v17217_v14, %s17227_s0 }
0x3dbc   :  { %v13168_v19 = vpop.permute.xlu0 %13167 }
0x3dbd   :  { %13149 = vrot.lane.b32.xlu1 %v17218_v37, %s17227_s0 }
0x3dc0   :  { %v13200_v1 = vpop.permute.xlu0 %13199 }
0x3dc1   :  { %13181 = vrot.lane.b32.xlu1 %v17219_v38, %s17227_s0 }
0x3dc4   :  { %v13170_v6 = vpop.permute.xlu0 %13169 }
0x3dc5   :  { %13151 = vrot.lane.b32.xlu1 %v17220_v25, %s17227_s0 }
0x3dc8   :  { %v13202_v39 = vpop.permute.xlu0 %13201 }
0x3dc9   :  { %13183 = vrot.lane.b32.xlu1 %v17221_v61, %s17227_s0 }
0x3dcc   :  { %v13355_v5 = vpop.permute.xlu0 %13354 }
0x3dcd   :  { %v13358_v55 = vmul.f32 %v13355_v5, %v20353_v46  ;;  %13153 = vrot.lane.b32.xlu1 %v17222_v22, %s17227_s0  ;;  %v13357_v9 = vmul.f32 %v13355_v5, %v20350_v21 }
0x3dcf   :  { %13363 = vrot.lane.b32.xlu0 %v13358_v55, %s17229_s22 }
0x3dd1   :  { %13185 = vrot.lane.b32.xlu1 %v17223_v29, %s17227_s0 }
0x3dd3   :  { %13321 = vrot.lane.b32.xlu0 %v12937_v47, %s17229_s22 }
0x3dd5   :  { %13361 = vrot.lane.b32.xlu1 %v13357_v9, %s17229_s22 }
0x3dd9   :  { %13319 = vrot.lane.b32.xlu1 %v12936_v53, %s17229_s22 }
0x3e03   :  { %v12962_v46 = vpop.permute.xlu1 %12961 }
0x3e04   :  { %14814 = vmatmul.mubr.msk.bf16.vlgmr.msra.gmra.mrb[24].mxu1 %vm21015_vm14, %v12962_v46  ;;  %14815 = vmatmul.mubr.msk.bf16.vlgmr.msra.gmra.mrb[24].mxu0 %vm21016_vm5, %v12962_v46  ;;  %v13138_v46 = vrot.slane %v20670_v63, %v17454_v51 }
0x3e07   :  { %v13140_v36 = vpop.permute.xlu1 %13139 }
0x3e08   :  { %15791 = vmatpush3.bf16.msra.mxu1 %v13140_v36 }
0x3e09   :  { %15792 = vmatprep.subr.bf16.mxu1 %v13158_v30  ;;  %v13395_v30 = vld [vmem:[%s20828_s14 + $0x1] ss:$2 sm:$0xf]  ;;  %s17232_s14 = smov 127  }
0x3e0a   :  { %v12943_v12 = vrot.slane %v13395_v30, %v17445_v48  ;;  %v12947_v35 = vrot.slane %v13395_v30, %v17454_v51 }
0x3e0b   :  { %v13172_v56 = vpop.permute.xlu1 %13171 }
0x3e0c   :  { %15813 = vmatpush3.bf16.msra.mxu0 %v13172_v56 }
0x3e0d   :  { %15814 = vmatprep.subr.bf16.mxu0 %v13190_v42  ;;  %v12951_v42 = vrot.slane %v13395_v30, %v17448_v49 }
0x3e0f   :  { %v13142_v43 = vpop.permute.xlu1 %13141 }
0x3e10   :  { %15793 = vmatpush3.bf16.msra.mxu1 %v13142_v43 }
0x3e11   :  { %15794 = vmatprep.subr.bf16.mxu1 %v13160_v20  ;;  %v12955_v20 = vrot.slane %v13395_v30, %v17457_v52 }
0x3e13   :  { %v13174_v21 = vpop.permute.xlu1 %13173 }
0x3e14   :  { %15815 = vmatpush3.bf16.msra.mxu0 %v13174_v21 }
0x3e15   :  { %15816 = vmatprep.subr.bf16.mxu0 %v13192_v45 }
0x3e17   :  { %v13144_v32 = vpop.permute.xlu1 %13143 }
0x3e18   :  { %15795 = vmatpush3.bf16.msra.mxu1 %v13144_v32 }
0x3e19   :  { %15796 = vmatprep.subr.bf16.mxu1 %v13162_v23 }
0x3e1b   :  { %v13176_v2 = vpop.permute.xlu1 %13175 }
0x3e1c   :  { %15817 = vmatpush3.bf16.msra.mxu0 %v13176_v2 }
0x3e1d   :  { %15818 = vmatprep.subr.bf16.mxu0 %v13194_v7 }
0x3e1f   :  { %v13146_v4 = vpop.permute.xlu1 %13145 }
0x3e20   :  { %15797 = vmatpush3.bf16.msra.mxu1 %v13146_v4 }
0x3e21   :  { %15798 = vmatprep.subr.bf16.mxu1 %v13164_v10 }
0x3e23   :  { %v13178_v33 = vpop.permute.xlu1 %13177 }
0x3e24   :  { %15819 = vmatpush3.bf16.msra.mxu0 %v13178_v33 }
0x3e25   :  { %15820 = vmatprep.subr.bf16.mxu0 %v13196_v50 }
0x3e27   :  { %v13148_v13 = vpop.permute.xlu1 %13147 }
0x3e28   :  { %15799 = vmatpush3.bf16.msra.mxu1 %v13148_v13 }
0x3e29   :  { %15800 = vmatprep.subr.bf16.mxu1 %v13166_v17 }
0x3e2b   :  { %v13180_v18 = vpop.permute.xlu1 %13179 }
0x3e2c   :  { %15821 = vmatpush3.bf16.msra.mxu0 %v13180_v18 }
0x3e2d   :  { %15822 = vmatprep.subr.bf16.mxu0 %v13198_v34 }
0x3e2f   :  { %v13150_v26 = vpop.permute.xlu1 %13149 }
0x3e30   :  { %15801 = vmatpush3.bf16.msra.mxu1 %v13150_v26 }
0x3e31   :  { %15802 = vmatprep.subr.bf16.mxu1 %v13168_v19 }
0x3e33   :  { %v13182_v27 = vpop.permute.xlu1 %13181 }
0x3e34   :  { %15823 = vmatpush3.bf16.msra.mxu0 %v13182_v27 }
0x3e35   :  { %15824 = vmatprep.subr.bf16.mxu0 %v13200_v1 }
0x3e37   :  { %v13152_v28 = vpop.permute.xlu1 %13151 }
0x3e38   :  { %15803 = vmatpush3.bf16.msra.mxu1 %v13152_v28 }
0x3e39   :  { %15804 = vmatprep.subr.bf16.mxu1 %v13170_v6 }
0x3e3b   :  { %v13184_v3 = vpop.permute.xlu1 %13183 }
0x3e3c   :  { %15825 = vmatpush3.bf16.msra.mxu0 %v13184_v3 }
0x3e3d   :  { %15826 = vmatprep.subr.bf16.mxu0 %v13202_v39 }
0x3e3f   :  { %v13154_v31 = vpop.permute.xlu1 %13153 }
0x3e40   :  { %15805 = vmatpush3.bf16.msra.mxu1 %v13154_v31 }
0x3e41   :  { %v13364_v62 = vpop.permute.xlu0 %13363 }
0x3e42   :  { %v13370_v53 = vsel %vm21017_vm6, %v13364_v62, 0.0 }
0x3e43   :  { %v13186_v47 = vpop.permute.xlu1 %13185  ;;  %13371 = vadd.xlane.f32.xlu0 %v13370_v53 }
0x3e44   :  { %15827 = vmatpush3.bf16.msra.mxu0 %v13186_v47 }
0x3e45   :  { %v13322_v53 = vpop.permute.xlu0 %13321 }
0x3e47   :  { %v13362_v0 = vpop.permute.xlu1 %13361 }
0x3e48   :  { %v13367_v58 = vsel %vm21018_vm7, %v13362_v0, 0.0  ;;  %v13334_v0 = vrot.slane %v20670_v63, %v17448_v49 }
0x3e49   :  { %13368 = vadd.xlane.f32.xlu1 %v13367_v58 }
0x3e4b   :  { %v13320_v3 = vpop.permute.xlu1 %13319 }
0x3ed6   :  { %v13369_v49 = vpop.xlane.xlu1 %13368 }
0x3ed7   :  { %v13071_v16 = vpop.f32.mrb[24].mxu1  ;;  %v13114_v45 = vpop.f32.mrb[24].mxu0 }
0x3ed8   :  { %v13072_v59 = vadd.f32 %v13071_v16, %v12943_v12  ;;  %v13115_v23 = vadd.f32 %v13114_v45, %v12951_v42  ;;  %v13073_v57 = vpop.f32.mrb[25].mxu1  ;;  %v13116_v7 = vpop.f32.mrb[25].mxu0 }
0x3ed9   :  { %v13074_v11 = vadd.f32 %v13073_v57, %v12947_v35  ;;  %v13117_v10 = vadd.f32 %v13116_v7, %v12955_v20  ;;  %v13075_v24 = vpop.f32.mrb[26].mxu1  ;;  %v13118_v50 = vpop.f32.mrb[26].mxu0 }
0x3eda   :  { %v13076_v8 = vadd.f32 %v13075_v24, %v12943_v12  ;;  %v13119_v17 = vadd.f32 %v13118_v50, %v12951_v42  ;;  %v13077_v41 = vpop.f32.mrb[27].mxu1  ;;  %v13120_v48 = vpop.f32.mrb[27].mxu0  ;;  %v13123_v19 = vmax.f32 %v13072_v59, 0.0  ;;  %v13125_v37 = vmax.f32 %v13115_v23, 0.0 }
0x3edb   :  { %v13078_v34 = vadd.f32 %v13077_v41, %v12947_v35  ;;  %v13121_v14 = vadd.f32 %v13120_v48, %v12955_v20  ;;  %v13124_v38 = vmax.f32 %v13074_v11, 0.0  ;;  %v13126_v6 = vmax.f32 %v13117_v10, 0.0  ;;  %v13372_v45 = vpop.xlane.xlu0 %13371 }
0x3edc   :  { %v13127_v1 = vmax.f32 %v13076_v8, 0.0  ;;  %v13129_v52 = vmax.f32 %v13119_v17, 0.0 }
0x3edd   :  { %v13128_v25 = vmax.f32 %v13078_v34, 0.0  ;;  %v13130_v39 = vmax.f32 %v13121_v14, 0.0 }
0x3ede   :  { %v13131_v61 = vpack.c.bf16 %v13127_v1, %v13123_v19  ;;  %v13133_v5 = vpack.c.bf16 %v13129_v52, %v13125_v37 }
0x3edf   :  { %v13132_v55 = vpack.c.bf16 %v13128_v25, %v13124_v38  ;;  %v13134_v22 = vpack.c.bf16 %v13130_v39, %v13126_v6 }
0x3ee1   :  { %13267 = vmatprep.mubr.bf16.mxu1 %v13132_v55  ;;  %13308 = vmatprep.mubr.bf16.mxu0 %v13134_v22 }
0x3ee2   :  { %13268 = vmatmul.mubr.bf16.vlgmr.msra.gmra.mrb[28].mxu1 %v13131_v61  ;;  %13309 = vmatmul.mubr.bf16.vlgmr.msra.gmra.mrb[28].mxu0 %v13133_v5 }
0x3fb5   :  { %v15806_v29 = vpop.f32.mrb[28].mxu1  ;;  %v15828_v9 = vpop.f32.mrb[28].mxu0 }
0x3fb6   :  { %v15807_v36 = vpop.f32.mrb[29].mxu1  ;;  %v15829_v56 = vpop.f32.mrb[29].mxu0 }
0x3fb7   :  { %v15808_v43 = vadd.f32 %v15807_v36, %v15806_v29  ;;  %v15830_v21 = vadd.f32 %v15829_v56, %v15828_v9  ;;  %v15809_v32 = vpop.f32.mrb[30].mxu1  ;;  %v15831_v2 = vpop.f32.mrb[30].mxu0 }
0x3fb8   :  { %v15810_v4 = vpop.f32.mrb[31].mxu1  ;;  %v15832_v33 = vpop.f32.mrb[31].mxu0 }
0x3fb9   :  { %v13270_v13 = vadd.f32 %v15808_v43, %v13138_v46  ;;  %v15811_v18 = vadd.f32 %v15810_v4, %v15809_v32  ;;  %v15833_v26 = vadd.f32 %v15832_v33, %v15831_v2 }
0x3fbb   :  { %v13311_v27 = vadd.f32 %v15830_v21, %v13270_v13  ;;  %v13273_v28 = vadd.f32 %v15811_v18, %v13138_v46 }
0x3fbd   :  { %v13325_v31 = vadd.f32 %v13320_v3, %v13311_v27  ;;  %v13314_v62 = vadd.f32 %v15833_v26, %v13273_v28 }
0x3fbf   :  { %v13327_v47 = vmul.f32 %v13325_v31, %v20456_v15  ;;  %v13326_v51 = vadd.f32 %v13322_v53, %v13314_v62  ;;  %v13346_v15 = vrot.slane %v20670_v63, %v17919_v60 }
0x3fc1   :  { %v13328_v58 = vmul.f32 %v13326_v51, %v20474_v54  ;;  %v13329_v30 = vadd.f32 %v13327_v47, %v20489_v40  ;;  %v13374_v59 = vadd.f32 %v13372_v45, %v13346_v15  ;;  %v13373_v54 = vadd.f32 %v13369_v49, %v13346_v15 }
0x3fc3   :  { %v13335_v12 = vmul.f32 %v13334_v0, %v13329_v30  ;;  %v13330_v42 = vadd.f32 %v13328_v58, %v20495_v44 }
0x3fc5   :  { %v13337_v35 = vsel %vm21019_vm8, %v13335_v12, 0.0  ;;  %v13336_v20 = vmul.f32 %v13334_v0, %v13330_v42 }
0x3fc6   :  { %13338 = vadd.xlane.f32.xlu0 %v13337_v35 }
0x3fc7   :  { %v13340_v16 = vsel %vm21020_vm9, %v13336_v20, 0.0 }
0x3fc8   :  { %13341 = vadd.xlane.f32.xlu1 %v13340_v16 }
0x3fd9   :  { %13379 = vrot.lane.b32.xlu1 %v13374_v59, %s17232_s14 }
0x3fdc   :  { %13377 = vrot.lane.b32.xlu0 %v13373_v54, %s17232_s14 }
0x4053   :  { %v13339_v40 = vpop.xlane.xlu0 %13338 }
0x4054   :  { %v13347_v44 = vadd.f32 %v13346_v15, %v13339_v40 }
0x4055   :  { %v13342_v23 = vpop.xlane.xlu1 %13341 }
0x4056   :  { %v13348_v7 = vadd.f32 %v13346_v15, %v13342_v23 }
0x4057   :  { %v13378_v57 = vpop.permute.xlu0 %13377 }
0x4058   :  { %v13383_v11 = vadd.f32 %v13378_v57, %v13347_v44 }
0x4059   :  { %v13380_v10 = vpop.permute.xlu1 %13379 }
0x405a   :  { %13386 = vst.msk [vmem:[%s20841_s16] sm:$0xff] %vm13385_vm10, %v13383_v11  ;;  %v13384_v60 = vadd.f32 %v13380_v10, %v13348_v7 }
0x405b   :  { %13389 = vst.msk [vmem:[%s20841_s16] sm:$0xff] %vm13388_vm11, %v13373_v54 }
0x405c   :  { %13387 = vst.msk [vmem:[%s20841_s16 + $0x8] sm:$0xff] %vm13385_vm10, %v13384_v60 }
0x405d   :  { %13390 = vst.msk [vmem:[%s20841_s16 + $0x8] sm:$0xff] %vm13388_vm11, %v13374_v59 }

</bundles_post_ra>
